<compile_context>
chip_gen: v6e
topology: v6e:2x2x1
jax: 0.10.0
libtpu: 0.0.40
codegen_flags: <defaults>
</compile_context>

<pallas_src>
import functools

import jax
import jax.numpy as jnp
from jax.experimental import pallas as pl
from jax.experimental.pallas import tpu as pltpu


_VMEM_LIMIT = 48 * 1024 * 1024   # safe on v7x (64 MiB); v5e/v6e could go ~96 MiB


def _round_up(x, m):
    return (x + m - 1) // m * m


# ----------------------------------------------------------------------------
# Fused Conv2d(k=4, s=2, p=1, bias=False) kernel  (+ optional BN sum/sumsq)
# ----------------------------------------------------------------------------
def _conv_down_kernel(z_ref, w_ref, *out_refs, m, wv, wo, want_stats):
    """One image per grid step.

    z_ref : (1, (Ho+1)*Wv, 8*Cin) bf16 -- W-direction taps folded into channels
    w_ref : (2, 8*Cin, Cout)      bf16 -- one matrix per H-direction tap
    out   : (1, M=Ho*Wv, Cout)         -- raw conv output (bf16)
    stats : (1, 2, Cout) f32           -- per-image (sum, sum-of-squares)
    """
    o_ref = out_refs[0]
    acc = jnp.dot(z_ref[0, pl.ds(0, m), :], w_ref[0],
                  preferred_element_type=jnp.float32)
    acc = acc + jnp.dot(z_ref[0, pl.ds(wv, m), :], w_ref[1],
                        preferred_element_type=jnp.float32)
    o_ref[0] = acc.astype(o_ref.dtype)

    if want_stats:
        stats_ref = out_refs[1]
        if wv != wo:   # mask virtual (lane-padding) output columns out of stats
            col = jax.lax.broadcasted_iota(jnp.int32, (m, 1), 0) % wv
            acc = jnp.where(col < wo, acc, 0.0)
        stats_ref[0, 0:1, :] = jnp.sum(acc, axis=0, keepdims=True)
        stats_ref[0, 1:2, :] = jnp.sum(acc * acc, axis=0, keepdims=True)


def conv_down(x, w_taps, *, want_stats, out_dtype=jnp.bfloat16):
    """Conv2d(k=4, s=2, p=1, bias=False).  x: (N,H,W,Cin) -> (N,Ho,Wo,Cout)."""
    N, H, W, C = x.shape
    assert H % 2 == 0 and W % 2 == 0
    Ho, Wo = H // 2, W // 2
    Co = w_taps.shape[-1]
    Wv = _round_up(Wo, 8)            # virtual width (sublane-aligned slices)
    M = Ho * Wv
    R = (Ho + 1) * Wv

    # Prep: pad, then fold the 8 W-direction taps (row parity a, kw) into the
    # channel dim.  One fused XLA copy (~2x the activation), no 16x im2col.
    xpad = jnp.pad(x.astype(jnp.bfloat16),
                   ((0, 0), (1, 1), (1, 2 * Wv + 1 - W), (0, 0)))
    cols = [xpad[:, :, kw:kw + 2 * Wv:2, :] for kw in range(4)]
    z = jnp.stack(cols, axis=3)                              # (N, H+2, Wv, 4, C)
    z = (z.reshape(N, Ho + 1, 2, Wv, 4, C)
          .transpose(0, 1, 3, 2, 4, 5)                       # (N, p, q, a, kw, C)
          .reshape(N, R, 8 * C))

    out_shape = [jax.ShapeDtypeStruct((N, M, Co), out_dtype)]
    out_specs = [pl.BlockSpec((1, M, Co), lambda n: (n, 0, 0))]
    if want_stats:
        out_shape.append(jax.ShapeDtypeStruct((N, 2, Co), jnp.float32))
        out_specs.append(pl.BlockSpec((1, 2, Co), lambda n: (n, 0, 0)))

    res = pl.pallas_call(
        functools.partial(_conv_down_kernel, m=M, wv=Wv, wo=Wo,
                          want_stats=want_stats),
        grid=(N,),
        in_specs=[pl.BlockSpec((1, R, 8 * C), lambda n: (n, 0, 0)),
                  pl.BlockSpec((2, 8 * C, Co), lambda n: (0, 0, 0))],
        out_specs=tuple(out_specs) if want_stats else out_specs[0],
        out_shape=tuple(out_shape) if want_stats else out_shape[0],
        compiler_params=pltpu.CompilerParams(
            dimension_semantics=("parallel",),
            vmem_limit_bytes=_VMEM_LIMIT),
        cost_estimate=pl.CostEstimate(
            flops=int(2 * N * M * 16 * C * Co),
            transcendentals=0,
            bytes_accessed=int(N * (R * 8 * C + M * Co) * 2 + 16 * C * Co * 2)),
    )(z, w_taps)

    y = res[0] if want_stats else res
    y = y.reshape(N, Ho, Wv, Co)[:, :, :Wo, :]
    return (y, res[1]) if want_stats else y


# ----------------------------------------------------------------------------
# Fused ConvTranspose2d(k=4, s=2, p=1) kernel: 4 phases per call
# (+ optional fused bias + tanh, + optional BN sum/sumsq)
# ----------------------------------------------------------------------------
def _conv_up_kernel(*refs, m, wv, w_real, cout, has_bias, fuse_tanh, want_stats):
    """One image per grid step; all 4 output-parity phases computed in-kernel.

    x_ref : (1, (H+2)*Wv, 3*Cin) bf16 -- W-direction offsets folded into channels
    w_ref : (4, 2, 3*Cin, Cout)  bf16 -- per (phase, H-tap)
    bias  : (1, Cout) f32 (outermost only)
    out   : (1, 4, M=H*Wv, Cout)
    stats : (1, 2, Cout) f32
    """
    x_ref, w_ref = refs[0], refs[1]
    i = 2
    bias_ref = None
    if has_bias:
        bias_ref = refs[i]
        i += 1
    o_ref = refs[i]
    i += 1
    stats_ref = refs[i] if want_stats else None

    if want_stats:
        s0 = jnp.zeros((1, cout), jnp.float32)
        s1 = jnp.zeros((1, cout), jnp.float32)
        if wv != w_real:
            col = jax.lax.broadcasted_iota(jnp.int32, (m, 1), 0) % wv
            valid = col < w_real

    for p in range(4):                       # phase = (row parity, col parity)
        ph = p // 2
        acc = jnp.zeros((m, cout), jnp.float32)
        for th in range(2):                  # H-direction taps
            start = (ph + 1 - th) * wv       # static, sublane-aligned
            acc = acc + jnp.dot(x_ref[0, pl.ds(start, m), :], w_ref[p, th],
                                preferred_element_type=jnp.float32)
        if has_bias:
            acc = acc + bias_ref[...]
        if fuse_tanh:
            acc = jnp.tanh(acc)
        o_ref[0, p] = acc.astype(o_ref.dtype)
        if want_stats:
            a = jnp.where(valid, acc, 0.0) if wv != w_real else acc
            s0 = s0 + jnp.sum(a, axis=0, keepdims=True)
            s1 = s1 + jnp.sum(a * a, axis=0, keepdims=True)

    if want_stats:
        stats_ref[0, 0:1, :] = s0
        stats_ref[0, 1:2, :] = s1


def conv_transpose_up(x, w_ptaps, *, bias=None, fuse_tanh=False,
                      want_stats=False, out_dtype=jnp.bfloat16):
    """ConvTranspose2d(k=4, s=2, p=1).  x: (N,H,W,Cin) -> (N,2H,2W,Cout)."""
    N, H, W, C = x.shape
    Co = w_ptaps.shape[-1]
    Wv = _round_up(W, 8)
    M = H * Wv
    R = (H + 2) * Wv

    xpad = jnp.pad(x.astype(jnp.bfloat16),
                   ((0, 0), (1, 1), (1, Wv + 1 - W), (0, 0)))   # (N, H+2, Wv+2, C)
    cols = [xpad[:, :, s:s + Wv, :] for s in range(3)]
    z = jnp.stack(cols, axis=3).reshape(N, R, 3 * C)

    args = [z, w_ptaps]
    in_specs = [pl.BlockSpec((1, R, 3 * C), lambda n: (n, 0, 0)),
                pl.BlockSpec((4, 2, 3 * C, Co), lambda n: (0, 0, 0, 0))]
    if bias is not None:
        args.append(bias.reshape(1, Co).astype(jnp.float32))
        in_specs.append(pl.BlockSpec((1, Co), lambda n: (0, 0)))

    out_shape = [jax.ShapeDtypeStruct((N, 4, M, Co), out_dtype)]
    out_specs = [pl.BlockSpec((1, 4, M, Co), lambda n: (n, 0, 0, 0))]
    if want_stats:
        out_shape.append(jax.ShapeDtypeStruct((N, 2, Co), jnp.float32))
        out_specs.append(pl.BlockSpec((1, 2, Co), lambda n: (n, 0, 0)))

    res = pl.pallas_call(
        functools.partial(_conv_up_kernel, m=M, wv=Wv, w_real=W, cout=Co,
                          has_bias=bias is not None, fuse_tanh=fuse_tanh,
                          want_stats=want_stats),
        grid=(N,),
        in_specs=in_specs,
        out_specs=tuple(out_specs) if want_stats else out_specs[0],
        out_shape=tuple(out_shape) if want_stats else out_shape[0],
        compiler_params=pltpu.CompilerParams(
            dimension_semantics=("parallel",),
            vmem_limit_bytes=_VMEM_LIMIT),
        cost_estimate=pl.CostEstimate(
            flops=int(2 * N * 4 * M * 6 * C * Co),
            transcendentals=int(N * 4 * M * Co) if fuse_tanh else 0,
            bytes_accessed=int(N * (R * 3 * C + 4 * M * Co) * 2)),
    )(*args)

    y = res[0] if want_stats else res
    # One lane-dense interleave (transpose) instead of 4 strided scatters.
    y = y.reshape(N, 2, 2, H, Wv, Co)[:, :, :, :, :W, :]
    y = y.transpose(0, 3, 1, 4, 2, 5).reshape(N, 2 * H, 2 * W, Co)
    return (y, res[1]) if want_stats else y


# ----------------------------------------------------------------------------
# BatchNorm finalize (stats come from the conv kernels' epilogues)
# ----------------------------------------------------------------------------
def _bn_scale_shift(stats, count, gamma, beta, eps=1e-5):
    # TODO(synk): E[x^2]-mean^2 in f32 can cancel for very large-mean activations.
    s = jnp.sum(stats, axis=0)                              # (2, C)
    mean = s[0] / count
    var = jnp.maximum(s[1] / count - mean * mean, 0.0)      # biased, like PyTorch
    scale = gamma * jax.lax.rsqrt(var + eps)
    shift = beta - mean * scale
    return scale, shift


# ----------------------------------------------------------------------------
# Parameter construction (deterministic, mirrors UnetBlock.__init__)
# ----------------------------------------------------------------------------
def _conv_weight(key, cin, cout):
    # (kh, kw, Cin, Cout) layout, self-generated init.
    # TODO(synk): real PyTorch ConvTranspose weights are (Cin, Cout, kH, kW);
    #             loading them would need a layout transpose first.
    return (jax.random.normal(key, (4, 4, cin, cout), jnp.float32)
            * (1.0 / jnp.sqrt(16.0 * cin)))


def _down_weight_taps(w):
    """(kh,kw,Cin,Cout) -> (2 [H-tap dh], 8*Cin [(a,kw,c)], Cout) bf16."""
    _, _, c, co = w.shape
    return (w.reshape(2, 2, 4, c, co)        # (dh, a, kw, c, co)
             .reshape(2, 8 * c, co)
             .astype(jnp.bfloat16))


def _up_weight_phase_taps(w):
    """(kh,kw,Cin,Cout) -> (4 [phase], 2 [H-tap th], 3*Cin [(shift s, c)], Cout)."""
    _, _, c, co = w.shape
    out = jnp.zeros((4, 2, 3 * c, co), jnp.float32)
    for ph in range(2):
        for pw in range(2):
            pidx = ph * 2 + pw
            for th in range(2):
                kh = 2 * th + 1 - ph
                for tw in range(2):
                    kw = 2 * tw + 1 - pw
                    s = pw + 1 - tw
                    out = out.at[pidx, th, s * c:(s + 1) * c, :].set(w[kh, kw])
    return out.astype(jnp.bfloat16)


def init_block(key, nf, ni, submodule=None, input_c=None, dropout=False,
               innermost=False, outermost=False):
    if input_c is None:
        input_c = nf
    k1, k2, k3, k4 = jax.random.split(key, 4)
    down_wt = _conv_weight(k1, input_c, ni)                 # Conv2d weight
    up_cin = ni if innermost else 2 * ni
    up_wt = _conv_weight(k2, up_cin, nf)                    # ConvTranspose weight

    p = {
        "outermost": outermost, "innermost": innermost, "dropout": dropout,
        "sub": submodule,
        "down_w": _down_weight_taps(down_wt),
        "up_w": _up_weight_phase_taps(up_wt),
    }
    if (not outermost) and (not innermost):       # downnorm = BatchNorm2d(ni)
        p["down_gamma"] = jnp.ones((ni,), jnp.float32)
        p["down_beta"] = jnp.zeros((ni,), jnp.float32)
    if outermost:                                 # outermost ConvT has bias
        p["up_bias"] = jax.random.normal(k3, (nf,), jnp.float32) * 0.01
    else:                                         # upnorm = BatchNorm2d(nf)
        p["up_gamma"] = jnp.ones((nf,), jnp.float32)
        p["up_beta"] = jnp.zeros((nf,), jnp.float32)
    if dropout:
        p["drop_key"] = k4
    return p


def build_unet_params(key, input_c=1, output_c=2, n_down=8, num_filters=64):
    keys = iter(jax.random.split(key, n_down))
    block = init_block(next(keys), num_filters * 8, num_filters * 8,
                       innermost=True)
    for _ in range(n_down - 5):
        block = init_block(next(keys), num_filters * 8, num_filters * 8,
                           submodule=block, dropout=True)
    out_filters = num_filters * 8
    for _ in range(3):
        block = init_block(next(keys), out_filters // 2, out_filters,
                           submodule=block)
        out_filters //= 2
    return init_block(next(keys), output_c, out_filters, input_c=input_c,
                      submodule=block, outermost=True)


# ----------------------------------------------------------------------------
# Forward pass (UnetBlock recursion)
# ----------------------------------------------------------------------------
def block_forward(p, x):
    """x: (N,H,W,Cin) NHWC (bf16 except the outermost f32 input)."""
    outermost, innermost = p["outermost"], p["innermost"]

    # down: [LeakyReLU(0.2)] -> Conv2d(4,2,1,bias=False) -> [BatchNorm]
    h_in = x if outermost else jnp.where(x >= 0, x, 0.2 * x)   # fuses into prep
    if (not outermost) and (not innermost):
        y, stats = conv_down(h_in, p["down_w"], want_stats=True)
        n, ho, wo, _ = y.shape
        scale, shift = _bn_scale_shift(stats, n * ho * wo,
                                       p["down_gamma"], p["down_beta"])
        # BN apply + bf16 cast fuse with the child's LeakyReLU / fold prep.
        h = (y.astype(jnp.float32) * scale + shift).astype(jnp.bfloat16)
    else:
        h = conv_down(h_in, p["down_w"], want_stats=False)

    g = block_forward(p["sub"], h) if p["sub"] is not None else h

    # up: ReLU -> ConvTranspose2d(4,2,1) -> Tanh | BatchNorm [-> Dropout]
    g = jnp.maximum(g, 0.0)                                    # fuses into prep
    if outermost:
        return conv_transpose_up(g, p["up_w"], bias=p["up_bias"],
                                 fuse_tanh=True, out_dtype=jnp.float32)

    y, stats = conv_transpose_up(g, p["up_w"], want_stats=True,
                                 out_dtype=jnp.bfloat16)
    n, hu, wu, _ = y.shape
    scale, shift = _bn_scale_shift(stats, n * hu * wu,
                                   p["up_gamma"], p["up_beta"])
    u = y.astype(jnp.float32) * scale + shift
    if p["dropout"]:
        # TODO(synk): PyTorch's dropout RNG stream cannot be reproduced;
        #             deterministic JAX key, training-mode scaling.
        keep = jax.random.bernoulli(p["drop_key"], 0.5, u.shape)
        u = jnp.where(keep, u * 2.0, 0.0)
    return jnp.concatenate([x.astype(jnp.bfloat16),
                            u.astype(jnp.bfloat16)], axis=-1)   # skip connection


def unet_forward(params, x_nchw):
    """x_nchw: (N, C, H, W) float32 -> (N, output_c, H, W) float32."""
    # TODO(synk): BatchNorm running statistics are not tracked (training-mode
    #             batch statistics only, matching module.train()).
    x = jnp.transpose(x_nchw, (0, 2, 3, 1))   # NCHW -> NHWC
    y = block_forward(params, x)
    return jnp.transpose(y, (0, 3, 1, 2))     # NHWC -> NCHW


# ----------------------------------------------------------------------------
if __name__ == "__main__":
    key = jax.random.PRNGKey(0)
    k_param, k_input = jax.random.split(key)

    # Small-but-faithful config: n_down=5, num_filters=8, 32x32 input -> the
    # innermost block reaches 1x1 spatial exactly like the reference recursion.
    N, C_IN, C_OUT, H, W = 2, 1, 2, 32, 32
    params = build_unet_params(k_param, input_c=C_IN, output_c=C_OUT,
                               n_down=5, num_filters=8)
    x = jax.random.normal(k_input, (N, C_IN, H, W), jnp.float32)

    fwd = jax.jit(lambda inp: unet_forward(params, inp))
    out = jax.block_until_ready(fwd(x))

    assert out.shape == (N, C_OUT, H, W), out.shape
    assert jnp.all(jnp.isfinite(out))
    assert jnp.all(jnp.abs(out) <= 1.0 + 1e-6)   # final Tanh range check
    print("KERNEL_OK")
</pallas_src>

<mosaic_0001>
module attributes {stable_mosaic.version = 11 : i64} {
  func.func @_conv_down_kernel(%arg0: i32, %arg1: memref<1x272x8xbf16, #tpu.memory_space<vmem>>, %arg2: memref<2x8x8xbf16, #tpu.memory_space<vmem>>, %arg3: memref<1x256x8xbf16, #tpu.memory_space<vmem>>) attributes {dimension_semantics = [#tpu.dimension_semantics<parallel>], iteration_bounds = array<i64: 2>, scalar_prefetch = 0 : i64, scratch_operands = 0 : i64, tpu.core_type = #tpu.core_type<tc>, window_params = [{transform_indices = @transform_0, window_bounds = array<i64: 1, 272, 8>}, {pipeline_mode = #tpu.pipeline_mode<synchronous>, transform_indices = @transform_1, window_bounds = array<i64: 2, 8, 8>}, {transform_indices = @transform_2, window_bounds = array<i64: 1, 256, 8>}]} {
    %c0 = arith.constant 0 : index
    %c0_0 = arith.constant 0 : index
    %c0_1 = arith.constant 0 : index
    %0 = vector.load %arg1[%c0, %c0_0, %c0_1] : memref<1x272x8xbf16, #tpu.memory_space<vmem>>, vector<1x256x8xbf16>
    %1 = vector.shape_cast %0 : vector<1x256x8xbf16> to vector<256x8xbf16>
    %c0_2 = arith.constant 0 : index
    %c0_3 = arith.constant 0 : index
    %c0_4 = arith.constant 0 : index
    %2 = vector.load %arg2[%c0_2, %c0_3, %c0_4] : memref<2x8x8xbf16, #tpu.memory_space<vmem>>, vector<1x8x8xbf16>
    %3 = vector.shape_cast %2 : vector<1x8x8xbf16> to vector<8x8xbf16>
    %cst = arith.constant dense<0.000000e+00> : vector<256x8xf32>
    %4 = tpu.matmul %1, %3, %cst {dimension_numbers = #tpu.dot_dimension_numbers<[1], [0], [0], [1], [0, 0, 1, 1], [], []>} : vector<256x8xbf16>, vector<8x8xbf16>, vector<256x8xf32> -> vector<256x8xf32>
    %c0_5 = arith.constant 0 : index
    %c16 = arith.constant 16 : index
    %c0_6 = arith.constant 0 : index
    %5 = vector.load %arg1[%c0_5, %c16, %c0_6] : memref<1x272x8xbf16, #tpu.memory_space<vmem>>, vector<1x256x8xbf16>
    %6 = vector.shape_cast %5 : vector<1x256x8xbf16> to vector<256x8xbf16>
    %c1 = arith.constant 1 : index
    %c0_7 = arith.constant 0 : index
    %c0_8 = arith.constant 0 : index
    %7 = vector.load %arg2[%c1, %c0_7, %c0_8] : memref<2x8x8xbf16, #tpu.memory_space<vmem>>, vector<1x8x8xbf16>
    %8 = vector.shape_cast %7 : vector<1x8x8xbf16> to vector<8x8xbf16>
    %cst_9 = arith.constant dense<0.000000e+00> : vector<256x8xf32>
    %9 = tpu.matmul %6, %8, %cst_9 {dimension_numbers = #tpu.dot_dimension_numbers<[1], [0], [0], [1], [0, 0, 1, 1], [], []>} : vector<256x8xbf16>, vector<8x8xbf16>, vector<256x8xf32> -> vector<256x8xf32>
    %10 = arith.addf %4, %9 : vector<256x8xf32>
    %11 = arith.truncf %10 : vector<256x8xf32> to vector<256x8xbf16>
    %c0_10 = arith.constant 0 : index
    %c0_11 = arith.constant 0 : index
    %c0_12 = arith.constant 0 : index
    %12 = vector.load %arg3[%c0_10, %c0_11, %c0_12] : memref<1x256x8xbf16, #tpu.memory_space<vmem>>, vector<1x256x8xbf16>
    %13 = vector.shape_cast %12 : vector<1x256x8xbf16> to vector<256x8xbf16>
    %14 = vector.shape_cast %11 : vector<256x8xbf16> to vector<1x256x8xbf16>
    tpu.vector_store %arg3[%c0_10, %c0_11, %c0_12], %14 {strides = array<i32>} : memref<1x256x8xbf16, #tpu.memory_space<vmem>>, vector<1x256x8xbf16>,
    return
  }
  func.func @transform_0(%arg0: i32) -> (i32, i32, i32) {
    %c0_i32 = arith.constant 0 : i32
    %c0_i32_0 = arith.constant 0 : i32
    %c0_i32_1 = arith.constant 0 : i32
    return %arg0, %c0_i32, %c0_i32_0 : i32, i32, i32
  }
  func.func @transform_1(%arg0: i32) -> (i32, i32, i32) {
    %c0_i32 = arith.constant 0 : i32
    %c0_i32_0 = arith.constant 0 : i32
    %c0_i32_1 = arith.constant 0 : i32
    %c0_i32_2 = arith.constant 0 : i32
    return %c0_i32, %c0_i32_0, %c0_i32_1 : i32, i32, i32
  }
  func.func @transform_2(%arg0: i32) -> (i32, i32, i32) {
    %c0_i32 = arith.constant 0 : i32
    %c0_i32_0 = arith.constant 0 : i32
    %c0_i32_1 = arith.constant 0 : i32
    return %arg0, %c0_i32, %c0_i32_0 : i32, i32, i32
  }
}

module attributes {stable_mosaic.version = 11 : i64} {
  func.func @_conv_down_kernel(%arg0: i32, %arg1: memref<1x72x64xbf16, #tpu.memory_space<vmem>>, %arg2: memref<2x64x16xbf16, #tpu.memory_space<vmem>>, %arg3: memref<1x64x16xbf16, #tpu.memory_space<vmem>>, %arg4: memref<1x2x16xf32, #tpu.memory_space<vmem>>) attributes {dimension_semantics = [#tpu.dimension_semantics<parallel>], iteration_bounds = array<i64: 2>, scalar_prefetch = 0 : i64, scratch_operands = 0 : i64, tpu.core_type = #tpu.core_type<tc>, window_params = [{transform_indices = @transform_0, window_bounds = array<i64: 1, 72, 64>}, {pipeline_mode = #tpu.pipeline_mode<synchronous>, transform_indices = @transform_1, window_bounds = array<i64: 2, 64, 16>}, {transform_indices = @transform_2, window_bounds = array<i64: 1, 64, 16>}, {transform_indices = @transform_3, window_bounds = array<i64: 1, 2, 16>}]} {
    %c0 = arith.constant 0 : index
    %c0_0 = arith.constant 0 : index
    %c0_1 = arith.constant 0 : index
    %0 = vector.load %arg1[%c0, %c0_0, %c0_1] : memref<1x72x64xbf16, #tpu.memory_space<vmem>>, vector<1x64x64xbf16>
    %1 = vector.shape_cast %0 : vector<1x64x64xbf16> to vector<64x64xbf16>
    %c0_2 = arith.constant 0 : index
    %c0_3 = arith.constant 0 : index
    %c0_4 = arith.constant 0 : index
    %2 = vector.load %arg2[%c0_2, %c0_3, %c0_4] : memref<2x64x16xbf16, #tpu.memory_space<vmem>>, vector<1x64x16xbf16>
    %3 = vector.shape_cast %2 : vector<1x64x16xbf16> to vector<64x16xbf16>
    %cst = arith.constant dense<0.000000e+00> : vector<64x16xf32>
    %4 = tpu.matmul %1, %3, %cst {dimension_numbers = #tpu.dot_dimension_numbers<[1], [0], [0], [1], [0, 0, 1, 1], [], []>} : vector<64x64xbf16>, vector<64x16xbf16>, vector<64x16xf32> -> vector<64x16xf32>
    %c0_5 = arith.constant 0 : index
    %c8 = arith.constant 8 : index
    %c0_6 = arith.constant 0 : index
    %5 = vector.load %arg1[%c0_5, %c8, %c0_6] : memref<1x72x64xbf16, #tpu.memory_space<vmem>>, vector<1x64x64xbf16>
    %6 = vector.shape_cast %5 : vector<1x64x64xbf16> to vector<64x64xbf16>
    %c1 = arith.constant 1 : index
    %c0_7 = arith.constant 0 : index
    %c0_8 = arith.constant 0 : index
    %7 = vector.load %arg2[%c1, %c0_7, %c0_8] : memref<2x64x16xbf16, #tpu.memory_space<vmem>>, vector<1x64x16xbf16>
    %8 = vector.shape_cast %7 : vector<1x64x16xbf16> to vector<64x16xbf16>
    %cst_9 = arith.constant dense<0.000000e+00> : vector<64x16xf32>
    %9 = tpu.matmul %6, %8, %cst_9 {dimension_numbers = #tpu.dot_dimension_numbers<[1], [0], [0], [1], [0, 0, 1, 1], [], []>} : vector<64x64xbf16>, vector<64x16xbf16>, vector<64x16xf32> -> vector<64x16xf32>
    %10 = arith.addf %4, %9 : vector<64x16xf32>
    %11 = arith.truncf %10 : vector<64x16xf32> to vector<64x16xbf16>
    %c0_10 = arith.constant 0 : index
    %c0_11 = arith.constant 0 : index
    %c0_12 = arith.constant 0 : index
    %12 = vector.load %arg3[%c0_10, %c0_11, %c0_12] : memref<1x64x16xbf16, #tpu.memory_space<vmem>>, vector<1x64x16xbf16>
    %13 = vector.shape_cast %12 : vector<1x64x16xbf16> to vector<64x16xbf16>
    %14 = vector.shape_cast %11 : vector<64x16xbf16> to vector<1x64x16xbf16>
    tpu.vector_store %arg3[%c0_10, %c0_11, %c0_12], %14 {strides = array<i32>} : memref<1x64x16xbf16, #tpu.memory_space<vmem>>, vector<1x64x16xbf16>,
    %cst_13 = arith.constant dense<0.000000e+00> : vector<16xf32>
    %15 = vector.multi_reduction <add>, %10, %cst_13 [0] : vector<64x16xf32> to vector<16xf32>
    %16 = vector.shape_cast %15 : vector<16xf32> to vector<1x16xf32>
    %c0_14 = arith.constant 0 : index
    %c0_15 = arith.constant 0 : index
    %c0_16 = arith.constant 0 : index
    %17 = vector.load %arg4[%c0_14, %c0_15, %c0_16] : memref<1x2x16xf32, #tpu.memory_space<vmem>>, vector<1x1x16xf32>
    %18 = vector.shape_cast %17 : vector<1x1x16xf32> to vector<1x16xf32>
    %19 = vector.shape_cast %16 : vector<1x16xf32> to vector<1x1x16xf32>
    tpu.vector_store %arg4[%c0_14, %c0_15, %c0_16], %19 {strides = array<i32>} : memref<1x2x16xf32, #tpu.memory_space<vmem>>, vector<1x1x16xf32>,
    %20 = arith.mulf %10, %10 : vector<64x16xf32>
    %cst_17 = arith.constant dense<0.000000e+00> : vector<16xf32>
    %21 = vector.multi_reduction <add>, %20, %cst_17 [0] : vector<64x16xf32> to vector<16xf32>
    %22 = vector.shape_cast %21 : vector<16xf32> to vector<1x16xf32>
    %c0_18 = arith.constant 0 : index
    %c1_19 = arith.constant 1 : index
    %c0_20 = arith.constant 0 : index
    %23 = vector.load %arg4[%c0_18, %c1_19, %c0_20] : memref<1x2x16xf32, #tpu.memory_space<vmem>>, vector<1x1x16xf32>
    %24 = vector.shape_cast %23 : vector<1x1x16xf32> to vector<1x16xf32>
    %25 = vector.shape_cast %22 : vector<1x16xf32> to vector<1x1x16xf32>
    tpu.vector_store %arg4[%c0_18, %c1_19, %c0_20], %25 {strides = array<i32>} : memref<1x2x16xf32, #tpu.memory_space<vmem>>, vector<1x1x16xf32>,
    return
  }
  func.func @transform_0(%arg0: i32) -> (i32, i32, i32) {
    %c0_i32 = arith.constant 0 : i32
    %c0_i32_0 = arith.constant 0 : i32
    %c0_i32_1 = arith.constant 0 : i32
    return %arg0, %c0_i32, %c0_i32_0 : i32, i32, i32
  }
  func.func @transform_1(%arg0: i32) -> (i32, i32, i32) {
    %c0_i32 = arith.constant 0 : i32
    %c0_i32_0 = arith.constant 0 : i32
    %c0_i32_1 = arith.constant 0 : i32
    %c0_i32_2 = arith.constant 0 : i32
    return %c0_i32, %c0_i32_0, %c0_i32_1 : i32, i32, i32
  }
  func.func @transform_2(%arg0: i32) -> (i32, i32, i32) {
    %c0_i32 = arith.constant 0 : i32
    %c0_i32_0 = arith.constant 0 : i32
    %c0_i32_1 = arith.constant 0 : i32
    return %arg0, %c0_i32, %c0_i32_0 : i32, i32, i32
  }
  func.func @transform_3(%arg0: i32) -> (i32, i32, i32) {
    %c0_i32 = arith.constant 0 : i32
    %c0_i32_0 = arith.constant 0 : i32
    %c0_i32_1 = arith.constant 0 : i32
    return %arg0, %c0_i32, %c0_i32_0 : i32, i32, i32
  }
}

module attributes {stable_mosaic.version = 11 : i64} {
  func.func @_conv_down_kernel(%arg0: i32, %arg1: memref<1x40x128xbf16, #tpu.memory_space<vmem>>, %arg2: memref<2x128x32xbf16, #tpu.memory_space<vmem>>, %arg3: memref<1x32x32xbf16, #tpu.memory_space<vmem>>, %arg4: memref<1x2x32xf32, #tpu.memory_space<vmem>>) attributes {dimension_semantics = [#tpu.dimension_semantics<parallel>], iteration_bounds = array<i64: 2>, scalar_prefetch = 0 : i64, scratch_operands = 0 : i64, tpu.core_type = #tpu.core_type<tc>, window_params = [{transform_indices = @transform_0, window_bounds = array<i64: 1, 40, 128>}, {pipeline_mode = #tpu.pipeline_mode<synchronous>, transform_indices = @transform_1, window_bounds = array<i64: 2, 128, 32>}, {transform_indices = @transform_2, window_bounds = array<i64: 1, 32, 32>}, {transform_indices = @transform_3, window_bounds = array<i64: 1, 2, 32>}]} {
    %c0 = arith.constant 0 : index
    %c0_0 = arith.constant 0 : index
    %c0_1 = arith.constant 0 : index
    %0 = vector.load %arg1[%c0, %c0_0, %c0_1] : memref<1x40x128xbf16, #tpu.memory_space<vmem>>, vector<1x32x128xbf16>
    %1 = vector.shape_cast %0 : vector<1x32x128xbf16> to vector<32x128xbf16>
    %c0_2 = arith.constant 0 : index
    %c0_3 = arith.constant 0 : index
    %c0_4 = arith.constant 0 : index
    %2 = vector.load %arg2[%c0_2, %c0_3, %c0_4] : memref<2x128x32xbf16, #tpu.memory_space<vmem>>, vector<1x128x32xbf16>
    %3 = vector.shape_cast %2 : vector<1x128x32xbf16> to vector<128x32xbf16>
    %cst = arith.constant dense<0.000000e+00> : vector<32x32xf32>
    %4 = tpu.matmul %1, %3, %cst {dimension_numbers = #tpu.dot_dimension_numbers<[1], [0], [0], [1], [0, 0, 1, 1], [], []>} : vector<32x128xbf16>, vector<128x32xbf16>, vector<32x32xf32> -> vector<32x32xf32>
    %c0_5 = arith.constant 0 : index
    %c8 = arith.constant 8 : index
    %c0_6 = arith.constant 0 : index
    %5 = vector.load %arg1[%c0_5, %c8, %c0_6] : memref<1x40x128xbf16, #tpu.memory_space<vmem>>, vector<1x32x128xbf16>
    %6 = vector.shape_cast %5 : vector<1x32x128xbf16> to vector<32x128xbf16>
    %c1 = arith.constant 1 : index
    %c0_7 = arith.constant 0 : index
    %c0_8 = arith.constant 0 : index
    %7 = vector.load %arg2[%c1, %c0_7, %c0_8] : memref<2x128x32xbf16, #tpu.memory_space<vmem>>, vector<1x128x32xbf16>
    %8 = vector.shape_cast %7 : vector<1x128x32xbf16> to vector<128x32xbf16>
    %cst_9 = arith.constant dense<0.000000e+00> : vector<32x32xf32>
    %9 = tpu.matmul %6, %8, %cst_9 {dimension_numbers = #tpu.dot_dimension_numbers<[1], [0], [0], [1], [0, 0, 1, 1], [], []>} : vector<32x128xbf16>, vector<128x32xbf16>, vector<32x32xf32> -> vector<32x32xf32>
    %10 = arith.addf %4, %9 : vector<32x32xf32>
    %11 = arith.truncf %10 : vector<32x32xf32> to vector<32x32xbf16>
    %c0_10 = arith.constant 0 : index
    %c0_11 = arith.constant 0 : index
    %c0_12 = arith.constant 0 : index
    %12 = vector.load %arg3[%c0_10, %c0_11, %c0_12] : memref<1x32x32xbf16, #tpu.memory_space<vmem>>, vector<1x32x32xbf16>
    %13 = vector.shape_cast %12 : vector<1x32x32xbf16> to vector<32x32xbf16>
    %14 = vector.shape_cast %11 : vector<32x32xbf16> to vector<1x32x32xbf16>
    tpu.vector_store %arg3[%c0_10, %c0_11, %c0_12], %14 {strides = array<i32>} : memref<1x32x32xbf16, #tpu.memory_space<vmem>>, vector<1x32x32xbf16>,
    %15 = tpu.iota {dimensions = array<i32: 0>} : vector<32x1xi32>
    %c8_i32 = arith.constant 8 : i32
    %c0_i32 = arith.constant 0 : i32
    %16 = arith.cmpi eq, %c8_i32, %c0_i32 : i32
    %c1_i32 = arith.constant 1 : i32
    %17 = arith.select %16, %c1_i32, %c8_i32 : i32
    %18 = vector.broadcast %17 : i32 to vector<32x1xi32>
    %19 = arith.remsi %15, %18 : vector<32x1xi32>
    %c0_i32_13 = arith.constant 0 : i32
    %20 = vector.broadcast %c0_i32_13 : i32 to vector<32x1xi32>
    %21 = arith.cmpi ne, %19, %20 : vector<32x1xi32>
    %c0_i32_14 = arith.constant 0 : i32
    %22 = vector.broadcast %c0_i32_14 : i32 to vector<32x1xi32>
    %23 = arith.cmpi slt, %19, %22 : vector<32x1xi32>
    %c0_i32_15 = arith.constant 0 : i32
    %24 = arith.cmpi slt, %17, %c0_i32_15 : i32
    %25 = vector.broadcast %24 : i1 to vector<32x1xi1>
    %26 = vector.broadcast %25 : vector<32x1xi1> to vector<32x1xi1>
    %27 = arith.xori %23, %26 : vector<32x1xi1>
    %28 = arith.andi %27, %21 : vector<32x1xi1>
    %29 = vector.broadcast %17 : i32 to vector<32x1xi32>
    %30 = arith.addi %19, %29 : vector<32x1xi32>
    %31 = arith.select %28, %30, %19 : vector<32x1xi1>, vector<32x1xi32>
    %c4_i32 = arith.constant 4 : i32
    %32 = vector.broadcast %c4_i32 : i32 to vector<32x1xi32>
    %33 = arith.cmpi slt, %31, %32 : vector<32x1xi32>
    %cst_16 = arith.constant 0.000000e+00 : f32
    %34 = vector.shape_cast %33 : vector<32x1xi1> to vector<32x1xi1>
    %35 = vector.broadcast %34 : vector<32x1xi1> to vector<32x32xi1>
    %36 = vector.broadcast %cst_16 : f32 to vector<32x32xf32>
    %37 = arith.select %35, %10, %36 : vector<32x32xi1>, vector<32x32xf32>
    %cst_17 = arith.constant dense<0.000000e+00> : vector<32xf32>
    %38 = vector.multi_reduction <add>, %37, %cst_17 [0] : vector<32x32xf32> to vector<32xf32>
    %39 = vector.shape_cast %38 : vector<32xf32> to vector<1x32xf32>
    %c0_18 = arith.constant 0 : index
    %c0_19 = arith.constant 0 : index
    %c0_20 = arith.constant 0 : index
    %40 = vector.load %arg4[%c0_18, %c0_19, %c0_20] : memref<1x2x32xf32, #tpu.memory_space<vmem>>, vector<1x1x32xf32>
    %41 = vector.shape_cast %40 : vector<1x1x32xf32> to vector<1x32xf32>
    %42 = vector.shape_cast %39 : vector<1x32xf32> to vector<1x1x32xf32>
    tpu.vector_store %arg4[%c0_18, %c0_19, %c0_20], %42 {strides = array<i32>} : memref<1x2x32xf32, #tpu.memory_space<vmem>>, vector<1x1x32xf32>,
    %43 = arith.mulf %37, %37 : vector<32x32xf32>
    %cst_21 = arith.constant dense<0.000000e+00> : vector<32xf32>
    %44 = vector.multi_reduction <add>, %43, %cst_21 [0] : vector<32x32xf32> to vector<32xf32>
    %45 = vector.shape_cast %44 : vector<32xf32> to vector<1x32xf32>
    %c0_22 = arith.constant 0 : index
    %c1_23 = arith.constant 1 : index
    %c0_24 = arith.constant 0 : index
    %46 = vector.load %arg4[%c0_22, %c1_23, %c0_24] : memref<1x2x32xf32, #tpu.memory_space<vmem>>, vector<1x1x32xf32>
    %47 = vector.shape_cast %46 : vector<1x1x32xf32> to vector<1x32xf32>
    %48 = vector.shape_cast %45 : vector<1x32xf32> to vector<1x1x32xf32>
    tpu.vector_store %arg4[%c0_22, %c1_23, %c0_24], %48 {strides = array<i32>} : memref<1x2x32xf32, #tpu.memory_space<vmem>>, vector<1x1x32xf32>,
    return
  }
  func.func @transform_0(%arg0: i32) -> (i32, i32, i32) {
    %c0_i32 = arith.constant 0 : i32
    %c0_i32_0 = arith.constant 0 : i32
    %c0_i32_1 = arith.constant 0 : i32
    return %arg0, %c0_i32, %c0_i32_0 : i32, i32, i32
  }
  func.func @transform_1(%arg0: i32) -> (i32, i32, i32) {
    %c0_i32 = arith.constant 0 : i32
    %c0_i32_0 = arith.constant 0 : i32
    %c0_i32_1 = arith.constant 0 : i32
    %c0_i32_2 = arith.constant 0 : i32
    return %c0_i32, %c0_i32_0, %c0_i32_1 : i32, i32, i32
  }
  func.func @transform_2(%arg0: i32) -> (i32, i32, i32) {
    %c0_i32 = arith.constant 0 : i32
    %c0_i32_0 = arith.constant 0 : i32
    %c0_i32_1 = arith.constant 0 : i32
    return %arg0, %c0_i32, %c0_i32_0 : i32, i32, i32
  }
  func.func @transform_3(%arg0: i32) -> (i32, i32, i32) {
    %c0_i32 = arith.constant 0 : i32
    %c0_i32_0 = arith.constant 0 : i32
    %c0_i32_1 = arith.constant 0 : i32
    return %arg0, %c0_i32, %c0_i32_0 : i32, i32, i32
  }
}

module attributes {stable_mosaic.version = 11 : i64} {
  func.func @_conv_down_kernel(%arg0: i32, %arg1: memref<1x24x256xbf16, #tpu.memory_space<vmem>>, %arg2: memref<2x256x64xbf16, #tpu.memory_space<vmem>>, %arg3: memref<1x16x64xbf16, #tpu.memory_space<vmem>>, %arg4: memref<1x2x64xf32, #tpu.memory_space<vmem>>) attributes {dimension_semantics = [#tpu.dimension_semantics<parallel>], iteration_bounds = array<i64: 2>, scalar_prefetch = 0 : i64, scratch_operands = 0 : i64, tpu.core_type = #tpu.core_type<tc>, window_params = [{transform_indices = @transform_0, window_bounds = array<i64: 1, 24, 256>}, {pipeline_mode = #tpu.pipeline_mode<synchronous>, transform_indices = @transform_1, window_bounds = array<i64: 2, 256, 64>}, {transform_indices = @transform_2, window_bounds = array<i64: 1, 16, 64>}, {transform_indices = @transform_3, window_bounds = array<i64: 1, 2, 64>}]} {
    %c0 = arith.constant 0 : index
    %c0_0 = arith.constant 0 : index
    %c0_1 = arith.constant 0 : index
    %0 = vector.load %arg1[%c0, %c0_0, %c0_1] : memref<1x24x256xbf16, #tpu.memory_space<vmem>>, vector<1x16x256xbf16>
    %1 = vector.shape_cast %0 : vector<1x16x256xbf16> to vector<16x256xbf16>
    %c0_2 = arith.constant 0 : index
    %c0_3 = arith.constant 0 : index
    %c0_4 = arith.constant 0 : index
    %2 = vector.load %arg2[%c0_2, %c0_3, %c0_4] : memref<2x256x64xbf16, #tpu.memory_space<vmem>>, vector<1x256x64xbf16>
    %3 = vector.shape_cast %2 : vector<1x256x64xbf16> to vector<256x64xbf16>
    %cst = arith.constant dense<0.000000e+00> : vector<16x64xf32>
    %4 = tpu.matmul %1, %3, %cst {dimension_numbers = #tpu.dot_dimension_numbers<[1], [0], [0], [1], [0, 0, 1, 1], [], []>} : vector<16x256xbf16>, vector<256x64xbf16>, vector<16x64xf32> -> vector<16x64xf32>
    %c0_5 = arith.constant 0 : index
    %c8 = arith.constant 8 : index
    %c0_6 = arith.constant 0 : index
    %5 = vector.load %arg1[%c0_5, %c8, %c0_6] : memref<1x24x256xbf16, #tpu.memory_space<vmem>>, vector<1x16x256xbf16>
    %6 = vector.shape_cast %5 : vector<1x16x256xbf16> to vector<16x256xbf16>
    %c1 = arith.constant 1 : index
    %c0_7 = arith.constant 0 : index
    %c0_8 = arith.constant 0 : index
    %7 = vector.load %arg2[%c1, %c0_7, %c0_8] : memref<2x256x64xbf16, #tpu.memory_space<vmem>>, vector<1x256x64xbf16>
    %8 = vector.shape_cast %7 : vector<1x256x64xbf16> to vector<256x64xbf16>
    %cst_9 = arith.constant dense<0.000000e+00> : vector<16x64xf32>
    %9 = tpu.matmul %6, %8, %cst_9 {dimension_numbers = #tpu.dot_dimension_numbers<[1], [0], [0], [1], [0, 0, 1, 1], [], []>} : vector<16x256xbf16>, vector<256x64xbf16>, vector<16x64xf32> -> vector<16x64xf32>
    %10 = arith.addf %4, %9 : vector<16x64xf32>
    %11 = arith.truncf %10 : vector<16x64xf32> to vector<16x64xbf16>
    %c0_10 = arith.constant 0 : index
    %c0_11 = arith.constant 0 : index
    %c0_12 = arith.constant 0 : index
    %12 = vector.load %arg3[%c0_10, %c0_11, %c0_12] : memref<1x16x64xbf16, #tpu.memory_space<vmem>>, vector<1x16x64xbf16>
    %13 = vector.shape_cast %12 : vector<1x16x64xbf16> to vector<16x64xbf16>
    %14 = vector.shape_cast %11 : vector<16x64xbf16> to vector<1x16x64xbf16>
    tpu.vector_store %arg3[%c0_10, %c0_11, %c0_12], %14 {strides = array<i32>} : memref<1x16x64xbf16, #tpu.memory_space<vmem>>, vector<1x16x64xbf16>,
    %15 = tpu.iota {dimensions = array<i32: 0>} : vector<16x1xi32>
    %c8_i32 = arith.constant 8 : i32
    %c0_i32 = arith.constant 0 : i32
    %16 = arith.cmpi eq, %c8_i32, %c0_i32 : i32
    %c1_i32 = arith.constant 1 : i32
    %17 = arith.select %16, %c1_i32, %c8_i32 : i32
    %18 = vector.broadcast %17 : i32 to vector<16x1xi32>
    %19 = arith.remsi %15, %18 : vector<16x1xi32>
    %c0_i32_13 = arith.constant 0 : i32
    %20 = vector.broadcast %c0_i32_13 : i32 to vector<16x1xi32>
    %21 = arith.cmpi ne, %19, %20 : vector<16x1xi32>
    %c0_i32_14 = arith.constant 0 : i32
    %22 = vector.broadcast %c0_i32_14 : i32 to vector<16x1xi32>
    %23 = arith.cmpi slt, %19, %22 : vector<16x1xi32>
    %c0_i32_15 = arith.constant 0 : i32
    %24 = arith.cmpi slt, %17, %c0_i32_15 : i32
    %25 = vector.broadcast %24 : i1 to vector<16x1xi1>
    %26 = vector.broadcast %25 : vector<16x1xi1> to vector<16x1xi1>
    %27 = arith.xori %23, %26 : vector<16x1xi1>
    %28 = arith.andi %27, %21 : vector<16x1xi1>
    %29 = vector.broadcast %17 : i32 to vector<16x1xi32>
    %30 = arith.addi %19, %29 : vector<16x1xi32>
    %31 = arith.select %28, %30, %19 : vector<16x1xi1>, vector<16x1xi32>
    %c2_i32 = arith.constant 2 : i32
    %32 = vector.broadcast %c2_i32 : i32 to vector<16x1xi32>
    %33 = arith.cmpi slt, %31, %32 : vector<16x1xi32>
    %cst_16 = arith.constant 0.000000e+00 : f32
    %34 = vector.shape_cast %33 : vector<16x1xi1> to vector<16x1xi1>
    %35 = vector.broadcast %34 : vector<16x1xi1> to vector<16x64xi1>
    %36 = vector.broadcast %cst_16 : f32 to vector<16x64xf32>
    %37 = arith.select %35, %10, %36 : vector<16x64xi1>, vector<16x64xf32>
    %cst_17 = arith.constant dense<0.000000e+00> : vector<64xf32>
    %38 = vector.multi_reduction <add>, %37, %cst_17 [0] : vector<16x64xf32> to vector<64xf32>
    %39 = vector.shape_cast %38 : vector<64xf32> to vector<1x64xf32>
    %c0_18 = arith.constant 0 : index
    %c0_19 = arith.constant 0 : index
    %c0_20 = arith.constant 0 : index
    %40 = vector.load %arg4[%c0_18, %c0_19, %c0_20] : memref<1x2x64xf32, #tpu.memory_space<vmem>>, vector<1x1x64xf32>
    %41 = vector.shape_cast %40 : vector<1x1x64xf32> to vector<1x64xf32>
    %42 = vector.shape_cast %39 : vector<1x64xf32> to vector<1x1x64xf32>
    tpu.vector_store %arg4[%c0_18, %c0_19, %c0_20], %42 {strides = array<i32>} : memref<1x2x64xf32, #tpu.memory_space<vmem>>, vector<1x1x64xf32>,
    %43 = arith.mulf %37, %37 : vector<16x64xf32>
    %cst_21 = arith.constant dense<0.000000e+00> : vector<64xf32>
    %44 = vector.multi_reduction <add>, %43, %cst_21 [0] : vector<16x64xf32> to vector<64xf32>
    %45 = vector.shape_cast %44 : vector<64xf32> to vector<1x64xf32>
    %c0_22 = arith.constant 0 : index
    %c1_23 = arith.constant 1 : index
    %c0_24 = arith.constant 0 : index
    %46 = vector.load %arg4[%c0_22, %c1_23, %c0_24] : memref<1x2x64xf32, #tpu.memory_space<vmem>>, vector<1x1x64xf32>
    %47 = vector.shape_cast %46 : vector<1x1x64xf32> to vector<1x64xf32>
    %48 = vector.shape_cast %45 : vector<1x64xf32> to vector<1x1x64xf32>
    tpu.vector_store %arg4[%c0_22, %c1_23, %c0_24], %48 {strides = array<i32>} : memref<1x2x64xf32, #tpu.memory_space<vmem>>, vector<1x1x64xf32>,
    return
  }
  func.func @transform_0(%arg0: i32) -> (i32, i32, i32) {
    %c0_i32 = arith.constant 0 : i32
    %c0_i32_0 = arith.constant 0 : i32
    %c0_i32_1 = arith.constant 0 : i32
    return %arg0, %c0_i32, %c0_i32_0 : i32, i32, i32
  }
  func.func @transform_1(%arg0: i32) -> (i32, i32, i32) {
    %c0_i32 = arith.constant 0 : i32
    %c0_i32_0 = arith.constant 0 : i32
    %c0_i32_1 = arith.constant 0 : i32
    %c0_i32_2 = arith.constant 0 : i32
    return %c0_i32, %c0_i32_0, %c0_i32_1 : i32, i32, i32
  }
  func.func @transform_2(%arg0: i32) -> (i32, i32, i32) {
    %c0_i32 = arith.constant 0 : i32
    %c0_i32_0 = arith.constant 0 : i32
    %c0_i32_1 = arith.constant 0 : i32
    return %arg0, %c0_i32, %c0_i32_0 : i32, i32, i32
  }
  func.func @transform_3(%arg0: i32) -> (i32, i32, i32) {
    %c0_i32 = arith.constant 0 : i32
    %c0_i32_0 = arith.constant 0 : i32
    %c0_i32_1 = arith.constant 0 : i32
    return %arg0, %c0_i32, %c0_i32_0 : i32, i32, i32
  }
}

module attributes {stable_mosaic.version = 11 : i64} {
  func.func @_conv_down_kernel(%arg0: i32, %arg1: memref<1x16x512xbf16, #tpu.memory_space<vmem>>, %arg2: memref<2x512x64xbf16, #tpu.memory_space<vmem>>, %arg3: memref<1x8x64xbf16, #tpu.memory_space<vmem>>) attributes {dimension_semantics = [#tpu.dimension_semantics<parallel>], iteration_bounds = array<i64: 2>, scalar_prefetch = 0 : i64, scratch_operands = 0 : i64, tpu.core_type = #tpu.core_type<tc>, window_params = [{transform_indices = @transform_0, window_bounds = array<i64: 1, 16, 512>}, {pipeline_mode = #tpu.pipeline_mode<synchronous>, transform_indices = @transform_1, window_bounds = array<i64: 2, 512, 64>}, {transform_indices = @transform_2, window_bounds = array<i64: 1, 8, 64>}]} {
    %c0 = arith.constant 0 : index
    %c0_0 = arith.constant 0 : index
    %c0_1 = arith.constant 0 : index
    %0 = vector.load %arg1[%c0, %c0_0, %c0_1] : memref<1x16x512xbf16, #tpu.memory_space<vmem>>, vector<1x8x512xbf16>
    %1 = vector.shape_cast %0 : vector<1x8x512xbf16> to vector<8x512xbf16>
    %c0_2 = arith.constant 0 : index
    %c0_3 = arith.constant 0 : index
    %c0_4 = arith.constant 0 : index
    %2 = vector.load %arg2[%c0_2, %c0_3, %c0_4] : memref<2x512x64xbf16, #tpu.memory_space<vmem>>, vector<1x512x64xbf16>
    %3 = vector.shape_cast %2 : vector<1x512x64xbf16> to vector<512x64xbf16>
    %cst = arith.constant dense<0.000000e+00> : vector<8x64xf32>
    %4 = tpu.matmul %1, %3, %cst {dimension_numbers = #tpu.dot_dimension_numbers<[1], [0], [0], [1], [0, 0, 1, 1], [], []>} : vector<8x512xbf16>, vector<512x64xbf16>, vector<8x64xf32> -> vector<8x64xf32>
    %c0_5 = arith.constant 0 : index
    %c8 = arith.constant 8 : index
    %c0_6 = arith.constant 0 : index
    %5 = vector.load %arg1[%c0_5, %c8, %c0_6] : memref<1x16x512xbf16, #tpu.memory_space<vmem>>, vector<1x8x512xbf16>
    %6 = vector.shape_cast %5 : vector<1x8x512xbf16> to vector<8x512xbf16>
    %c1 = arith.constant 1 : index
    %c0_7 = arith.constant 0 : index
    %c0_8 = arith.constant 0 : index
    %7 = vector.load %arg2[%c1, %c0_7, %c0_8] : memref<2x512x64xbf16, #tpu.memory_space<vmem>>, vector<1x512x64xbf16>
    %8 = vector.shape_cast %7 : vector<1x512x64xbf16> to vector<512x64xbf16>
    %cst_9 = arith.constant dense<0.000000e+00> : vector<8x64xf32>
    %9 = tpu.matmul %6, %8, %cst_9 {dimension_numbers = #tpu.dot_dimension_numbers<[1], [0], [0], [1], [0, 0, 1, 1], [], []>} : vector<8x512xbf16>, vector<512x64xbf16>, vector<8x64xf32> -> vector<8x64xf32>
    %10 = arith.addf %4, %9 : vector<8x64xf32>
    %11 = arith.truncf %10 : vector<8x64xf32> to vector<8x64xbf16>
    %c0_10 = arith.constant 0 : index
    %c0_11 = arith.constant 0 : index
    %c0_12 = arith.constant 0 : index
    %12 = vector.load %arg3[%c0_10, %c0_11, %c0_12] : memref<1x8x64xbf16, #tpu.memory_space<vmem>>, vector<1x8x64xbf16>
    %13 = vector.shape_cast %12 : vector<1x8x64xbf16> to vector<8x64xbf16>
    %14 = vector.shape_cast %11 : vector<8x64xbf16> to vector<1x8x64xbf16>
    tpu.vector_store %arg3[%c0_10, %c0_11, %c0_12], %14 {strides = array<i32>} : memref<1x8x64xbf16, #tpu.memory_space<vmem>>, vector<1x8x64xbf16>,
    return
  }
  func.func @transform_0(%arg0: i32) -> (i32, i32, i32) {
    %c0_i32 = arith.constant 0 : i32
    %c0_i32_0 = arith.constant 0 : i32
    %c0_i32_1 = arith.constant 0 : i32
    return %arg0, %c0_i32, %c0_i32_0 : i32, i32, i32
  }
  func.func @transform_1(%arg0: i32) -> (i32, i32, i32) {
    %c0_i32 = arith.constant 0 : i32
    %c0_i32_0 = arith.constant 0 : i32
    %c0_i32_1 = arith.constant 0 : i32
    %c0_i32_2 = arith.constant 0 : i32
    return %c0_i32, %c0_i32_0, %c0_i32_1 : i32, i32, i32
  }
  func.func @transform_2(%arg0: i32) -> (i32, i32, i32) {
    %c0_i32 = arith.constant 0 : i32
    %c0_i32_0 = arith.constant 0 : i32
    %c0_i32_1 = arith.constant 0 : i32
    return %arg0, %c0_i32, %c0_i32_0 : i32, i32, i32
  }
}

module attributes {stable_mosaic.version = 11 : i64} {
  func.func @_conv_up_kernel(%arg0: i32, %arg1: memref<1x24x192xbf16, #tpu.memory_space<vmem>>, %arg2: memref<4x2x192x64xbf16, #tpu.memory_space<vmem>>, %arg3: memref<1x4x8x64xbf16, #tpu.memory_space<vmem>>, %arg4: memref<1x2x64xf32, #tpu.memory_space<vmem>>) attributes {dimension_semantics = [#tpu.dimension_semantics<parallel>], iteration_bounds = array<i64: 2>, scalar_prefetch = 0 : i64, scratch_operands = 0 : i64, tpu.core_type = #tpu.core_type<tc>, window_params = [{transform_indices = @transform_0, window_bounds = array<i64: 1, 24, 192>}, {pipeline_mode = #tpu.pipeline_mode<synchronous>, transform_indices = @transform_1, window_bounds = array<i64: 4, 2, 192, 64>}, {transform_indices = @transform_2, window_bounds = array<i64: 1, 4, 8, 64>}, {transform_indices = @transform_3, window_bounds = array<i64: 1, 2, 64>}]} {
    %cst = arith.constant 0.000000e+00 : f32
    %0 = vector.broadcast %cst : f32 to vector<1x64xf32>
    %cst_0 = arith.constant 0.000000e+00 : f32
    %1 = vector.broadcast %cst_0 : f32 to vector<1x64xf32>
    %2 = tpu.iota {dimensions = array<i32: 0>} : vector<8x1xi32>
    %c8_i32 = arith.constant 8 : i32
    %c0_i32 = arith.constant 0 : i32
    %3 = arith.cmpi eq, %c8_i32, %c0_i32 : i32
    %c1_i32 = arith.constant 1 : i32
    %4 = arith.select %3, %c1_i32, %c8_i32 : i32
    %5 = vector.broadcast %4 : i32 to vector<8x1xi32>
    %6 = arith.remsi %2, %5 : vector<8x1xi32>
    %c0_i32_1 = arith.constant 0 : i32
    %7 = vector.broadcast %c0_i32_1 : i32 to vector<8x1xi32>
    %8 = arith.cmpi ne, %6, %7 : vector<8x1xi32>
    %c0_i32_2 = arith.constant 0 : i32
    %9 = vector.broadcast %c0_i32_2 : i32 to vector<8x1xi32>
    %10 = arith.cmpi slt, %6, %9 : vector<8x1xi32>
    %c0_i32_3 = arith.constant 0 : i32
    %11 = arith.cmpi slt, %4, %c0_i32_3 : i32
    %12 = vector.broadcast %11 : i1 to vector<8x1xi1>
    %13 = vector.broadcast %12 : vector<8x1xi1> to vector<8x1xi1>
    %14 = arith.xori %10, %13 : vector<8x1xi1>
    %15 = arith.andi %14, %8 : vector<8x1xi1>
    %16 = vector.broadcast %4 : i32 to vector<8x1xi32>
    %17 = arith.addi %6, %16 : vector<8x1xi32>
    %18 = arith.select %15, %17, %6 : vector<8x1xi1>, vector<8x1xi32>
    %c1_i32_4 = arith.constant 1 : i32
    %19 = vector.broadcast %c1_i32_4 : i32 to vector<8x1xi32>
    %20 = arith.cmpi slt, %18, %19 : vector<8x1xi32>
    %cst_5 = arith.constant 0.000000e+00 : f32
    %21 = vector.broadcast %cst_5 : f32 to vector<8x64xf32>
    %c0 = arith.constant 0 : index
    %c8 = arith.constant 8 : index
    %c0_6 = arith.constant 0 : index
    %22 = vector.load %arg1[%c0, %c8, %c0_6] : memref<1x24x192xbf16, #tpu.memory_space<vmem>>, vector<1x8x192xbf16>
    %23 = vector.shape_cast %22 : vector<1x8x192xbf16> to vector<8x192xbf16>
    %c0_7 = arith.constant 0 : index
    %c0_8 = arith.constant 0 : index
    %c0_9 = arith.constant 0 : index
    %c0_10 = arith.constant 0 : index
    %24 = vector.load %arg2[%c0_7, %c0_8, %c0_9, %c0_10] : memref<4x2x192x64xbf16, #tpu.memory_space<vmem>>, vector<1x1x192x64xbf16>
    %25 = vector.shape_cast %24 : vector<1x1x192x64xbf16> to vector<192x64xbf16>
    %cst_11 = arith.constant dense<0.000000e+00> : vector<8x64xf32>
    %26 = tpu.matmul %23, %25, %cst_11 {dimension_numbers = #tpu.dot_dimension_numbers<[1], [0], [0], [1], [0, 0, 1, 1], [], []>} : vector<8x192xbf16>, vector<192x64xbf16>, vector<8x64xf32> -> vector<8x64xf32>
    %27 = arith.addf %21, %26 : vector<8x64xf32>
    %c0_12 = arith.constant 0 : index
    %c0_13 = arith.constant 0 : index
    %c0_14 = arith.constant 0 : index
    %28 = vector.load %arg1[%c0_12, %c0_13, %c0_14] : memref<1x24x192xbf16, #tpu.memory_space<vmem>>, vector<1x8x192xbf16>
    %29 = vector.shape_cast %28 : vector<1x8x192xbf16> to vector<8x192xbf16>
    %c0_15 = arith.constant 0 : index
    %c1 = arith.constant 1 : index
    %c0_16 = arith.constant 0 : index
    %c0_17 = arith.constant 0 : index
    %30 = vector.load %arg2[%c0_15, %c1, %c0_16, %c0_17] : memref<4x2x192x64xbf16, #tpu.memory_space<vmem>>, vector<1x1x192x64xbf16>
    %31 = vector.shape_cast %30 : vector<1x1x192x64xbf16> to vector<192x64xbf16>
    %cst_18 = arith.constant dense<0.000000e+00> : vector<8x64xf32>
    %32 = tpu.matmul %29, %31, %cst_18 {dimension_numbers = #tpu.dot_dimension_numbers<[1], [0], [0], [1], [0, 0, 1, 1], [], []>} : vector<8x192xbf16>, vector<192x64xbf16>, vector<8x64xf32> -> vector<8x64xf32>
    %33 = arith.addf %27, %32 : vector<8x64xf32>
    %34 = arith.truncf %33 : vector<8x64xf32> to vector<8x64xbf16>
    %c0_19 = arith.constant 0 : index
    %c0_20 = arith.constant 0 : index
    %c0_21 = arith.constant 0 : index
    %c0_22 = arith.constant 0 : index
    %35 = vector.load %arg3[%c0_19, %c0_20, %c0_21, %c0_22] : memref<1x4x8x64xbf16, #tpu.memory_space<vmem>>, vector<1x1x8x64xbf16>
    %36 = vector.shape_cast %35 : vector<1x1x8x64xbf16> to vector<8x64xbf16>
    %37 = vector.shape_cast %34 : vector<8x64xbf16> to vector<1x1x8x64xbf16>
    tpu.vector_store %arg3[%c0_19, %c0_20, %c0_21, %c0_22], %37 {strides = array<i32>} : memref<1x4x8x64xbf16, #tpu.memory_space<vmem>>, vector<1x1x8x64xbf16>,
    %cst_23 = arith.constant 0.000000e+00 : f32
    %38 = vector.shape_cast %20 : vector<8x1xi1> to vector<8x1xi1>
    %39 = vector.broadcast %38 : vector<8x1xi1> to vector<8x64xi1>
    %40 = vector.broadcast %cst_23 : f32 to vector<8x64xf32>
    %41 = arith.select %39, %33, %40 : vector<8x64xi1>, vector<8x64xf32>
    %cst_24 = arith.constant dense<0.000000e+00> : vector<64xf32>
    %42 = vector.multi_reduction <add>, %41, %cst_24 [0] : vector<8x64xf32> to vector<64xf32>
    %43 = vector.shape_cast %42 : vector<64xf32> to vector<1x64xf32>
    %44 = arith.addf %0, %43 : vector<1x64xf32>
    %45 = arith.mulf %41, %41 : vector<8x64xf32>
    %cst_25 = arith.constant dense<0.000000e+00> : vector<64xf32>
    %46 = vector.multi_reduction <add>, %45, %cst_25 [0] : vector<8x64xf32> to vector<64xf32>
    %47 = vector.shape_cast %46 : vector<64xf32> to vector<1x64xf32>
    %48 = arith.addf %1, %47 : vector<1x64xf32>
    %cst_26 = arith.constant 0.000000e+00 : f32
    %49 = vector.broadcast %cst_26 : f32 to vector<8x64xf32>
    %c0_27 = arith.constant 0 : index
    %c8_28 = arith.constant 8 : index
    %c0_29 = arith.constant 0 : index
    %50 = vector.load %arg1[%c0_27, %c8_28, %c0_29] : memref<1x24x192xbf16, #tpu.memory_space<vmem>>, vector<1x8x192xbf16>
    %51 = vector.shape_cast %50 : vector<1x8x192xbf16> to vector<8x192xbf16>
    %c1_30 = arith.constant 1 : index
    %c0_31 = arith.constant 0 : index
    %c0_32 = arith.constant 0 : index
    %c0_33 = arith.constant 0 : index
    %52 = vector.load %arg2[%c1_30, %c0_31, %c0_32, %c0_33] : memref<4x2x192x64xbf16, #tpu.memory_space<vmem>>, vector<1x1x192x64xbf16>
    %53 = vector.shape_cast %52 : vector<1x1x192x64xbf16> to vector<192x64xbf16>
    %cst_34 = arith.constant dense<0.000000e+00> : vector<8x64xf32>
    %54 = tpu.matmul %51, %53, %cst_34 {dimension_numbers = #tpu.dot_dimension_numbers<[1], [0], [0], [1], [0, 0, 1, 1], [], []>} : vector<8x192xbf16>, vector<192x64xbf16>, vector<8x64xf32> -> vector<8x64xf32>
    %55 = arith.addf %49, %54 : vector<8x64xf32>
    %c0_35 = arith.constant 0 : index
    %c0_36 = arith.constant 0 : index
    %c0_37 = arith.constant 0 : index
    %56 = vector.load %arg1[%c0_35, %c0_36, %c0_37] : memref<1x24x192xbf16, #tpu.memory_space<vmem>>, vector<1x8x192xbf16>
    %57 = vector.shape_cast %56 : vector<1x8x192xbf16> to vector<8x192xbf16>
    %c1_38 = arith.constant 1 : index
    %c1_39 = arith.constant 1 : index
    %c0_40 = arith.constant 0 : index
    %c0_41 = arith.constant 0 : index
    %58 = vector.load %arg2[%c1_38, %c1_39, %c0_40, %c0_41] : memref<4x2x192x64xbf16, #tpu.memory_space<vmem>>, vector<1x1x192x64xbf16>
    %59 = vector.shape_cast %58 : vector<1x1x192x64xbf16> to vector<192x64xbf16>
    %cst_42 = arith.constant dense<0.000000e+00> : vector<8x64xf32>
    %60 = tpu.matmul %57, %59, %cst_42 {dimension_numbers = #tpu.dot_dimension_numbers<[1], [0], [0], [1], [0, 0, 1, 1], [], []>} : vector<8x192xbf16>, vector<192x64xbf16>, vector<8x64xf32> -> vector<8x64xf32>
    %61 = arith.addf %55, %60 : vector<8x64xf32>
    %62 = arith.truncf %61 : vector<8x64xf32> to vector<8x64xbf16>
    %c0_43 = arith.constant 0 : index
    %c1_44 = arith.constant 1 : index
    %c0_45 = arith.constant 0 : index
    %c0_46 = arith.constant 0 : index
    %63 = vector.load %arg3[%c0_43, %c1_44, %c0_45, %c0_46] : memref<1x4x8x64xbf16, #tpu.memory_space<vmem>>, vector<1x1x8x64xbf16>
    %64 = vector.shape_cast %63 : vector<1x1x8x64xbf16> to vector<8x64xbf16>
    %65 = vector.shape_cast %62 : vector<8x64xbf16> to vector<1x1x8x64xbf16>
    tpu.vector_store %arg3[%c0_43, %c1_44, %c0_45, %c0_46], %65 {strides = array<i32>} : memref<1x4x8x64xbf16, #tpu.memory_space<vmem>>, vector<1x1x8x64xbf16>,
    %cst_47 = arith.constant 0.000000e+00 : f32
    %66 = vector.shape_cast %20 : vector<8x1xi1> to vector<8x1xi1>
    %67 = vector.broadcast %66 : vector<8x1xi1> to vector<8x64xi1>
    %68 = vector.broadcast %cst_47 : f32 to vector<8x64xf32>
    %69 = arith.select %67, %61, %68 : vector<8x64xi1>, vector<8x64xf32>
    %cst_48 = arith.constant dense<0.000000e+00> : vector<64xf32>
    %70 = vector.multi_reduction <add>, %69, %cst_48 [0] : vector<8x64xf32> to vector<64xf32>
    %71 = vector.shape_cast %70 : vector<64xf32> to vector<1x64xf32>
    %72 = arith.addf %44, %71 : vector<1x64xf32>
    %73 = arith.mulf %69, %69 : vector<8x64xf32>
    %cst_49 = arith.constant dense<0.000000e+00> : vector<64xf32>
    %74 = vector.multi_reduction <add>, %73, %cst_49 [0] : vector<8x64xf32> to vector<64xf32>
    %75 = vector.shape_cast %74 : vector<64xf32> to vector<1x64xf32>
    %76 = arith.addf %48, %75 : vector<1x64xf32>
    %cst_50 = arith.constant 0.000000e+00 : f32
    %77 = vector.broadcast %cst_50 : f32 to vector<8x64xf32>
    %c0_51 = arith.constant 0 : index
    %c16 = arith.constant 16 : index
    %c0_52 = arith.constant 0 : index
    %78 = vector.load %arg1[%c0_51, %c16, %c0_52] : memref<1x24x192xbf16, #tpu.memory_space<vmem>>, vector<1x8x192xbf16>
    %79 = vector.shape_cast %78 : vector<1x8x192xbf16> to vector<8x192xbf16>
    %c2 = arith.constant 2 : index
    %c0_53 = arith.constant 0 : index
    %c0_54 = arith.constant 0 : index
    %c0_55 = arith.constant 0 : index
    %80 = vector.load %arg2[%c2, %c0_53, %c0_54, %c0_55] : memref<4x2x192x64xbf16, #tpu.memory_space<vmem>>, vector<1x1x192x64xbf16>
    %81 = vector.shape_cast %80 : vector<1x1x192x64xbf16> to vector<192x64xbf16>
    %cst_56 = arith.constant dense<0.000000e+00> : vector<8x64xf32>
    %82 = tpu.matmul %79, %81, %cst_56 {dimension_numbers = #tpu.dot_dimension_numbers<[1], [0], [0], [1], [0, 0, 1, 1], [], []>} : vector<8x192xbf16>, vector<192x64xbf16>, vector<8x64xf32> -> vector<8x64xf32>
    %83 = arith.addf %77, %82 : vector<8x64xf32>
    %c0_57 = arith.constant 0 : index
    %c8_58 = arith.constant 8 : index
    %c0_59 = arith.constant 0 : index
    %84 = vector.load %arg1[%c0_57, %c8_58, %c0_59] : memref<1x24x192xbf16, #tpu.memory_space<vmem>>, vector<1x8x192xbf16>
    %85 = vector.shape_cast %84 : vector<1x8x192xbf16> to vector<8x192xbf16>
    %c2_60 = arith.constant 2 : index
    %c1_61 = arith.constant 1 : index
    %c0_62 = arith.constant 0 : index
    %c0_63 = arith.constant 0 : index
    %86 = vector.load %arg2[%c2_60, %c1_61, %c0_62, %c0_63] : memref<4x2x192x64xbf16, #tpu.memory_space<vmem>>, vector<1x1x192x64xbf16>
    %87 = vector.shape_cast %86 : vector<1x1x192x64xbf16> to vector<192x64xbf16>
    %cst_64 = arith.constant dense<0.000000e+00> : vector<8x64xf32>
    %88 = tpu.matmul %85, %87, %cst_64 {dimension_numbers = #tpu.dot_dimension_numbers<[1], [0], [0], [1], [0, 0, 1, 1], [], []>} : vector<8x192xbf16>, vector<192x64xbf16>, vector<8x64xf32> -> vector<8x64xf32>
    %89 = arith.addf %83, %88 : vector<8x64xf32>
    %90 = arith.truncf %89 : vector<8x64xf32> to vector<8x64xbf16>
    %c0_65 = arith.constant 0 : index
    %c2_66 = arith.constant 2 : index
    %c0_67 = arith.constant 0 : index
    %c0_68 = arith.constant 0 : index
    %91 = vector.load %arg3[%c0_65, %c2_66, %c0_67, %c0_68] : memref<1x4x8x64xbf16, #tpu.memory_space<vmem>>, vector<1x1x8x64xbf16>
    %92 = vector.shape_cast %91 : vector<1x1x8x64xbf16> to vector<8x64xbf16>
    %93 = vector.shape_cast %90 : vector<8x64xbf16> to vector<1x1x8x64xbf16>
    tpu.vector_store %arg3[%c0_65, %c2_66, %c0_67, %c0_68], %93 {strides = array<i32>} : memref<1x4x8x64xbf16, #tpu.memory_space<vmem>>, vector<1x1x8x64xbf16>,
    %cst_69 = arith.constant 0.000000e+00 : f32
    %94 = vector.shape_cast %20 : vector<8x1xi1> to vector<8x1xi1>
    %95 = vector.broadcast %94 : vector<8x1xi1> to vector<8x64xi1>
    %96 = vector.broadcast %cst_69 : f32 to vector<8x64xf32>
    %97 = arith.select %95, %89, %96 : vector<8x64xi1>, vector<8x64xf32>
    %cst_70 = arith.constant dense<0.000000e+00> : vector<64xf32>
    %98 = vector.multi_reduction <add>, %97, %cst_70 [0] : vector<8x64xf32> to vector<64xf32>
    %99 = vector.shape_cast %98 : vector<64xf32> to vector<1x64xf32>
    %100 = arith.addf %72, %99 : vector<1x64xf32>
    %101 = arith.mulf %97, %97 : vector<8x64xf32>
    %cst_71 = arith.constant dense<0.000000e+00> : vector<64xf32>
    %102 = vector.multi_reduction <add>, %101, %cst_71 [0] : vector<8x64xf32> to vector<64xf32>
    %103 = vector.shape_cast %102 : vector<64xf32> to vector<1x64xf32>
    %104 = arith.addf %76, %103 : vector<1x64xf32>
    %cst_72 = arith.constant 0.000000e+00 : f32
    %105 = vector.broadcast %cst_72 : f32 to vector<8x64xf32>
    %c0_73 = arith.constant 0 : index
    %c16_74 = arith.constant 16 : index
    %c0_75 = arith.constant 0 : index
    %106 = vector.load %arg1[%c0_73, %c16_74, %c0_75] : memref<1x24x192xbf16, #tpu.memory_space<vmem>>, vector<1x8x192xbf16>
    %107 = vector.shape_cast %106 : vector<1x8x192xbf16> to vector<8x192xbf16>
    %c3 = arith.constant 3 : index
    %c0_76 = arith.constant 0 : index
    %c0_77 = arith.constant 0 : index
    %c0_78 = arith.constant 0 : index
    %108 = vector.load %arg2[%c3, %c0_76, %c0_77, %c0_78] : memref<4x2x192x64xbf16, #tpu.memory_space<vmem>>, vector<1x1x192x64xbf16>
    %109 = vector.shape_cast %108 : vector<1x1x192x64xbf16> to vector<192x64xbf16>
    %cst_79 = arith.constant dense<0.000000e+00> : vector<8x64xf32>
    %110 = tpu.matmul %107, %109, %cst_79 {dimension_numbers = #tpu.dot_dimension_numbers<[1], [0], [0], [1], [0, 0, 1, 1], [], []>} : vector<8x192xbf16>, vector<192x64xbf16>, vector<8x64xf32> -> vector<8x64xf32>
    %111 = arith.addf %105, %110 : vector<8x64xf32>
    %c0_80 = arith.constant 0 : index
    %c8_81 = arith.constant 8 : index
    %c0_82 = arith.constant 0 : index
    %112 = vector.load %arg1[%c0_80, %c8_81, %c0_82] : memref<1x24x192xbf16, #tpu.memory_space<vmem>>, vector<1x8x192xbf16>
    %113 = vector.shape_cast %112 : vector<1x8x192xbf16> to vector<8x192xbf16>
    %c3_83 = arith.constant 3 : index
    %c1_84 = arith.constant 1 : index
    %c0_85 = arith.constant 0 : index
    %c0_86 = arith.constant 0 : index
    %114 = vector.load %arg2[%c3_83, %c1_84, %c0_85, %c0_86] : memref<4x2x192x64xbf16, #tpu.memory_space<vmem>>, vector<1x1x192x64xbf16>
    %115 = vector.shape_cast %114 : vector<1x1x192x64xbf16> to vector<192x64xbf16>
    %cst_87 = arith.constant dense<0.000000e+00> : vector<8x64xf32>
    %116 = tpu.matmul %113, %115, %cst_87 {dimension_numbers = #tpu.dot_dimension_numbers<[1], [0], [0], [1], [0, 0, 1, 1], [], []>} : vector<8x192xbf16>, vector<192x64xbf16>, vector<8x64xf32> -> vector<8x64xf32>
    %117 = arith.addf %111, %116 : vector<8x64xf32>
    %118 = arith.truncf %117 : vector<8x64xf32> to vector<8x64xbf16>
    %c0_88 = arith.constant 0 : index
    %c3_89 = arith.constant 3 : index
    %c0_90 = arith.constant 0 : index
    %c0_91 = arith.constant 0 : index
    %119 = vector.load %arg3[%c0_88, %c3_89, %c0_90, %c0_91] : memref<1x4x8x64xbf16, #tpu.memory_space<vmem>>, vector<1x1x8x64xbf16>
    %120 = vector.shape_cast %119 : vector<1x1x8x64xbf16> to vector<8x64xbf16>
    %121 = vector.shape_cast %118 : vector<8x64xbf16> to vector<1x1x8x64xbf16>
    tpu.vector_store %arg3[%c0_88, %c3_89, %c0_90, %c0_91], %121 {strides = array<i32>} : memref<1x4x8x64xbf16, #tpu.memory_space<vmem>>, vector<1x1x8x64xbf16>,
    %cst_92 = arith.constant 0.000000e+00 : f32
    %122 = vector.shape_cast %20 : vector<8x1xi1> to vector<8x1xi1>
    %123 = vector.broadcast %122 : vector<8x1xi1> to vector<8x64xi1>
    %124 = vector.broadcast %cst_92 : f32 to vector<8x64xf32>
    %125 = arith.select %123, %117, %124 : vector<8x64xi1>, vector<8x64xf32>
    %cst_93 = arith.constant dense<0.000000e+00> : vector<64xf32>
    %126 = vector.multi_reduction <add>, %125, %cst_93 [0] : vector<8x64xf32> to vector<64xf32>
    %127 = vector.shape_cast %126 : vector<64xf32> to vector<1x64xf32>
    %128 = arith.addf %100, %127 : vector<1x64xf32>
    %129 = arith.mulf %125, %125 : vector<8x64xf32>
    %cst_94 = arith.constant dense<0.000000e+00> : vector<64xf32>
    %130 = vector.multi_reduction <add>, %129, %cst_94 [0] : vector<8x64xf32> to vector<64xf32>
    %131 = vector.shape_cast %130 : vector<64xf32> to vector<1x64xf32>
    %132 = arith.addf %104, %131 : vector<1x64xf32>
    %c0_95 = arith.constant 0 : index
    %c0_96 = arith.constant 0 : index
    %c0_97 = arith.constant 0 : index
    %133 = vector.load %arg4[%c0_95, %c0_96, %c0_97] : memref<1x2x64xf32, #tpu.memory_space<vmem>>, vector<1x1x64xf32>
    %134 = vector.shape_cast %133 : vector<1x1x64xf32> to vector<1x64xf32>
    %135 = vector.shape_cast %128 : vector<1x64xf32> to vector<1x1x64xf32>
    tpu.vector_store %arg4[%c0_95, %c0_96, %c0_97], %135 {strides = array<i32>} : memref<1x2x64xf32, #tpu.memory_space<vmem>>, vector<1x1x64xf32>,
    %c0_98 = arith.constant 0 : index
    %c1_99 = arith.constant 1 : index
    %c0_100 = arith.constant 0 : index
    %136 = vector.load %arg4[%c0_98, %c1_99, %c0_100] : memref<1x2x64xf32, #tpu.memory_space<vmem>>, vector<1x1x64xf32>
    %137 = vector.shape_cast %136 : vector<1x1x64xf32> to vector<1x64xf32>
    %138 = vector.shape_cast %132 : vector<1x64xf32> to vector<1x1x64xf32>
    tpu.vector_store %arg4[%c0_98, %c1_99, %c0_100], %138 {strides = array<i32>} : memref<1x2x64xf32, #tpu.memory_space<vmem>>, vector<1x1x64xf32>,
    return
  }
  func.func @transform_0(%arg0: i32) -> (i32, i32, i32) {
    %c0_i32 = arith.constant 0 : i32
    %c0_i32_0 = arith.constant 0 : i32
    %c0_i32_1 = arith.constant 0 : i32
    return %arg0, %c0_i32, %c0_i32_0 : i32, i32, i32
  }
  func.func @transform_1(%arg0: i32) -> (i32, i32, i32, i32) {
    %c0_i32 = arith.constant 0 : i32
    %c0_i32_0 = arith.constant 0 : i32
    %c0_i32_1 = arith.constant 0 : i32
    %c0_i32_2 = arith.constant 0 : i32
    %c0_i32_3 = arith.constant 0 : i32
    return %c0_i32, %c0_i32_0, %c0_i32_1, %c0_i32_2 : i32, i32, i32, i32
  }
  func.func @transform_2(%arg0: i32) -> (i32, i32, i32, i32) {
    %c0_i32 = arith.constant 0 : i32
    %c0_i32_0 = arith.constant 0 : i32
    %c0_i32_1 = arith.constant 0 : i32
    %c0_i32_2 = arith.constant 0 : i32
    return %arg0, %c0_i32, %c0_i32_0, %c0_i32_1 : i32, i32, i32, i32
  }
  func.func @transform_3(%arg0: i32) -> (i32, i32, i32) {
    %c0_i32 = arith.constant 0 : i32
    %c0_i32_0 = arith.constant 0 : i32
    %c0_i32_1 = arith.constant 0 : i32
    return %arg0, %c0_i32, %c0_i32_0 : i32, i32, i32
  }
}

module attributes {stable_mosaic.version = 11 : i64} {
  func.func @_conv_up_kernel(%arg0: i32, %arg1: memref<1x32x384xbf16, #tpu.memory_space<vmem>>, %arg2: memref<4x2x384x32xbf16, #tpu.memory_space<vmem>>, %arg3: memref<1x4x16x32xbf16, #tpu.memory_space<vmem>>, %arg4: memref<1x2x32xf32, #tpu.memory_space<vmem>>) attributes {dimension_semantics = [#tpu.dimension_semantics<parallel>], iteration_bounds = array<i64: 2>, scalar_prefetch = 0 : i64, scratch_operands = 0 : i64, tpu.core_type = #tpu.core_type<tc>, window_params = [{transform_indices = @transform_0, window_bounds = array<i64: 1, 32, 384>}, {pipeline_mode = #tpu.pipeline_mode<synchronous>, transform_indices = @transform_1, window_bounds = array<i64: 4, 2, 384, 32>}, {transform_indices = @transform_2, window_bounds = array<i64: 1, 4, 16, 32>}, {transform_indices = @transform_3, window_bounds = array<i64: 1, 2, 32>}]} {
    %cst = arith.constant 0.000000e+00 : f32
    %0 = vector.broadcast %cst : f32 to vector<1x32xf32>
    %cst_0 = arith.constant 0.000000e+00 : f32
    %1 = vector.broadcast %cst_0 : f32 to vector<1x32xf32>
    %2 = tpu.iota {dimensions = array<i32: 0>} : vector<16x1xi32>
    %c8_i32 = arith.constant 8 : i32
    %c0_i32 = arith.constant 0 : i32
    %3 = arith.cmpi eq, %c8_i32, %c0_i32 : i32
    %c1_i32 = arith.constant 1 : i32
    %4 = arith.select %3, %c1_i32, %c8_i32 : i32
    %5 = vector.broadcast %4 : i32 to vector<16x1xi32>
    %6 = arith.remsi %2, %5 : vector<16x1xi32>
    %c0_i32_1 = arith.constant 0 : i32
    %7 = vector.broadcast %c0_i32_1 : i32 to vector<16x1xi32>
    %8 = arith.cmpi ne, %6, %7 : vector<16x1xi32>
    %c0_i32_2 = arith.constant 0 : i32
    %9 = vector.broadcast %c0_i32_2 : i32 to vector<16x1xi32>
    %10 = arith.cmpi slt, %6, %9 : vector<16x1xi32>
    %c0_i32_3 = arith.constant 0 : i32
    %11 = arith.cmpi slt, %4, %c0_i32_3 : i32
    %12 = vector.broadcast %11 : i1 to vector<16x1xi1>
    %13 = vector.broadcast %12 : vector<16x1xi1> to vector<16x1xi1>
    %14 = arith.xori %10, %13 : vector<16x1xi1>
    %15 = arith.andi %14, %8 : vector<16x1xi1>
    %16 = vector.broadcast %4 : i32 to vector<16x1xi32>
    %17 = arith.addi %6, %16 : vector<16x1xi32>
    %18 = arith.select %15, %17, %6 : vector<16x1xi1>, vector<16x1xi32>
    %c2_i32 = arith.constant 2 : i32
    %19 = vector.broadcast %c2_i32 : i32 to vector<16x1xi32>
    %20 = arith.cmpi slt, %18, %19 : vector<16x1xi32>
    %cst_4 = arith.constant 0.000000e+00 : f32
    %21 = vector.broadcast %cst_4 : f32 to vector<16x32xf32>
    %c0 = arith.constant 0 : index
    %c8 = arith.constant 8 : index
    %c0_5 = arith.constant 0 : index
    %22 = vector.load %arg1[%c0, %c8, %c0_5] : memref<1x32x384xbf16, #tpu.memory_space<vmem>>, vector<1x16x384xbf16>
    %23 = vector.shape_cast %22 : vector<1x16x384xbf16> to vector<16x384xbf16>
    %c0_6 = arith.constant 0 : index
    %c0_7 = arith.constant 0 : index
    %c0_8 = arith.constant 0 : index
    %c0_9 = arith.constant 0 : index
    %24 = vector.load %arg2[%c0_6, %c0_7, %c0_8, %c0_9] : memref<4x2x384x32xbf16, #tpu.memory_space<vmem>>, vector<1x1x384x32xbf16>
    %25 = vector.shape_cast %24 : vector<1x1x384x32xbf16> to vector<384x32xbf16>
    %cst_10 = arith.constant dense<0.000000e+00> : vector<16x32xf32>
    %26 = tpu.matmul %23, %25, %cst_10 {dimension_numbers = #tpu.dot_dimension_numbers<[1], [0], [0], [1], [0, 0, 1, 1], [], []>} : vector<16x384xbf16>, vector<384x32xbf16>, vector<16x32xf32> -> vector<16x32xf32>
    %27 = arith.addf %21, %26 : vector<16x32xf32>
    %c0_11 = arith.constant 0 : index
    %c0_12 = arith.constant 0 : index
    %c0_13 = arith.constant 0 : index
    %28 = vector.load %arg1[%c0_11, %c0_12, %c0_13] : memref<1x32x384xbf16, #tpu.memory_space<vmem>>, vector<1x16x384xbf16>
    %29 = vector.shape_cast %28 : vector<1x16x384xbf16> to vector<16x384xbf16>
    %c0_14 = arith.constant 0 : index
    %c1 = arith.constant 1 : index
    %c0_15 = arith.constant 0 : index
    %c0_16 = arith.constant 0 : index
    %30 = vector.load %arg2[%c0_14, %c1, %c0_15, %c0_16] : memref<4x2x384x32xbf16, #tpu.memory_space<vmem>>, vector<1x1x384x32xbf16>
    %31 = vector.shape_cast %30 : vector<1x1x384x32xbf16> to vector<384x32xbf16>
    %cst_17 = arith.constant dense<0.000000e+00> : vector<16x32xf32>
    %32 = tpu.matmul %29, %31, %cst_17 {dimension_numbers = #tpu.dot_dimension_numbers<[1], [0], [0], [1], [0, 0, 1, 1], [], []>} : vector<16x384xbf16>, vector<384x32xbf16>, vector<16x32xf32> -> vector<16x32xf32>
    %33 = arith.addf %27, %32 : vector<16x32xf32>
    %34 = arith.truncf %33 : vector<16x32xf32> to vector<16x32xbf16>
    %c0_18 = arith.constant 0 : index
    %c0_19 = arith.constant 0 : index
    %c0_20 = arith.constant 0 : index
    %c0_21 = arith.constant 0 : index
    %35 = vector.load %arg3[%c0_18, %c0_19, %c0_20, %c0_21] : memref<1x4x16x32xbf16, #tpu.memory_space<vmem>>, vector<1x1x16x32xbf16>
    %36 = vector.shape_cast %35 : vector<1x1x16x32xbf16> to vector<16x32xbf16>
    %37 = vector.shape_cast %34 : vector<16x32xbf16> to vector<1x1x16x32xbf16>
    tpu.vector_store %arg3[%c0_18, %c0_19, %c0_20, %c0_21], %37 {strides = array<i32>} : memref<1x4x16x32xbf16, #tpu.memory_space<vmem>>, vector<1x1x16x32xbf16>,
    %cst_22 = arith.constant 0.000000e+00 : f32
    %38 = vector.shape_cast %20 : vector<16x1xi1> to vector<16x1xi1>
    %39 = vector.broadcast %38 : vector<16x1xi1> to vector<16x32xi1>
    %40 = vector.broadcast %cst_22 : f32 to vector<16x32xf32>
    %41 = arith.select %39, %33, %40 : vector<16x32xi1>, vector<16x32xf32>
    %cst_23 = arith.constant dense<0.000000e+00> : vector<32xf32>
    %42 = vector.multi_reduction <add>, %41, %cst_23 [0] : vector<16x32xf32> to vector<32xf32>
    %43 = vector.shape_cast %42 : vector<32xf32> to vector<1x32xf32>
    %44 = arith.addf %0, %43 : vector<1x32xf32>
    %45 = arith.mulf %41, %41 : vector<16x32xf32>
    %cst_24 = arith.constant dense<0.000000e+00> : vector<32xf32>
    %46 = vector.multi_reduction <add>, %45, %cst_24 [0] : vector<16x32xf32> to vector<32xf32>
    %47 = vector.shape_cast %46 : vector<32xf32> to vector<1x32xf32>
    %48 = arith.addf %1, %47 : vector<1x32xf32>
    %cst_25 = arith.constant 0.000000e+00 : f32
    %49 = vector.broadcast %cst_25 : f32 to vector<16x32xf32>
    %c0_26 = arith.constant 0 : index
    %c8_27 = arith.constant 8 : index
    %c0_28 = arith.constant 0 : index
    %50 = vector.load %arg1[%c0_26, %c8_27, %c0_28] : memref<1x32x384xbf16, #tpu.memory_space<vmem>>, vector<1x16x384xbf16>
    %51 = vector.shape_cast %50 : vector<1x16x384xbf16> to vector<16x384xbf16>
    %c1_29 = arith.constant 1 : index
    %c0_30 = arith.constant 0 : index
    %c0_31 = arith.constant 0 : index
    %c0_32 = arith.constant 0 : index
    %52 = vector.load %arg2[%c1_29, %c0_30, %c0_31, %c0_32] : memref<4x2x384x32xbf16, #tpu.memory_space<vmem>>, vector<1x1x384x32xbf16>
    %53 = vector.shape_cast %52 : vector<1x1x384x32xbf16> to vector<384x32xbf16>
    %cst_33 = arith.constant dense<0.000000e+00> : vector<16x32xf32>
    %54 = tpu.matmul %51, %53, %cst_33 {dimension_numbers = #tpu.dot_dimension_numbers<[1], [0], [0], [1], [0, 0, 1, 1], [], []>} : vector<16x384xbf16>, vector<384x32xbf16>, vector<16x32xf32> -> vector<16x32xf32>
    %55 = arith.addf %49, %54 : vector<16x32xf32>
    %c0_34 = arith.constant 0 : index
    %c0_35 = arith.constant 0 : index
    %c0_36 = arith.constant 0 : index
    %56 = vector.load %arg1[%c0_34, %c0_35, %c0_36] : memref<1x32x384xbf16, #tpu.memory_space<vmem>>, vector<1x16x384xbf16>
    %57 = vector.shape_cast %56 : vector<1x16x384xbf16> to vector<16x384xbf16>
    %c1_37 = arith.constant 1 : index
    %c1_38 = arith.constant 1 : index
    %c0_39 = arith.constant 0 : index
    %c0_40 = arith.constant 0 : index
    %58 = vector.load %arg2[%c1_37, %c1_38, %c0_39, %c0_40] : memref<4x2x384x32xbf16, #tpu.memory_space<vmem>>, vector<1x1x384x32xbf16>
    %59 = vector.shape_cast %58 : vector<1x1x384x32xbf16> to vector<384x32xbf16>
    %cst_41 = arith.constant dense<0.000000e+00> : vector<16x32xf32>
    %60 = tpu.matmul %57, %59, %cst_41 {dimension_numbers = #tpu.dot_dimension_numbers<[1], [0], [0], [1], [0, 0, 1, 1], [], []>} : vector<16x384xbf16>, vector<384x32xbf16>, vector<16x32xf32> -> vector<16x32xf32>
    %61 = arith.addf %55, %60 : vector<16x32xf32>
    %62 = arith.truncf %61 : vector<16x32xf32> to vector<16x32xbf16>
    %c0_42 = arith.constant 0 : index
    %c1_43 = arith.constant 1 : index
    %c0_44 = arith.constant 0 : index
    %c0_45 = arith.constant 0 : index
    %63 = vector.load %arg3[%c0_42, %c1_43, %c0_44, %c0_45] : memref<1x4x16x32xbf16, #tpu.memory_space<vmem>>, vector<1x1x16x32xbf16>
    %64 = vector.shape_cast %63 : vector<1x1x16x32xbf16> to vector<16x32xbf16>
    %65 = vector.shape_cast %62 : vector<16x32xbf16> to vector<1x1x16x32xbf16>
    tpu.vector_store %arg3[%c0_42, %c1_43, %c0_44, %c0_45], %65 {strides = array<i32>} : memref<1x4x16x32xbf16, #tpu.memory_space<vmem>>, vector<1x1x16x32xbf16>,
    %cst_46 = arith.constant 0.000000e+00 : f32
    %66 = vector.shape_cast %20 : vector<16x1xi1> to vector<16x1xi1>
    %67 = vector.broadcast %66 : vector<16x1xi1> to vector<16x32xi1>
    %68 = vector.broadcast %cst_46 : f32 to vector<16x32xf32>
    %69 = arith.select %67, %61, %68 : vector<16x32xi1>, vector<16x32xf32>
    %cst_47 = arith.constant dense<0.000000e+00> : vector<32xf32>
    %70 = vector.multi_reduction <add>, %69, %cst_47 [0] : vector<16x32xf32> to vector<32xf32>
    %71 = vector.shape_cast %70 : vector<32xf32> to vector<1x32xf32>
    %72 = arith.addf %44, %71 : vector<1x32xf32>
    %73 = arith.mulf %69, %69 : vector<16x32xf32>
    %cst_48 = arith.constant dense<0.000000e+00> : vector<32xf32>
    %74 = vector.multi_reduction <add>, %73, %cst_48 [0] : vector<16x32xf32> to vector<32xf32>
    %75 = vector.shape_cast %74 : vector<32xf32> to vector<1x32xf32>
    %76 = arith.addf %48, %75 : vector<1x32xf32>
    %cst_49 = arith.constant 0.000000e+00 : f32
    %77 = vector.broadcast %cst_49 : f32 to vector<16x32xf32>
    %c0_50 = arith.constant 0 : index
    %c16 = arith.constant 16 : index
    %c0_51 = arith.constant 0 : index
    %78 = vector.load %arg1[%c0_50, %c16, %c0_51] : memref<1x32x384xbf16, #tpu.memory_space<vmem>>, vector<1x16x384xbf16>
    %79 = vector.shape_cast %78 : vector<1x16x384xbf16> to vector<16x384xbf16>
    %c2 = arith.constant 2 : index
    %c0_52 = arith.constant 0 : index
    %c0_53 = arith.constant 0 : index
    %c0_54 = arith.constant 0 : index
    %80 = vector.load %arg2[%c2, %c0_52, %c0_53, %c0_54] : memref<4x2x384x32xbf16, #tpu.memory_space<vmem>>, vector<1x1x384x32xbf16>
    %81 = vector.shape_cast %80 : vector<1x1x384x32xbf16> to vector<384x32xbf16>
    %cst_55 = arith.constant dense<0.000000e+00> : vector<16x32xf32>
    %82 = tpu.matmul %79, %81, %cst_55 {dimension_numbers = #tpu.dot_dimension_numbers<[1], [0], [0], [1], [0, 0, 1, 1], [], []>} : vector<16x384xbf16>, vector<384x32xbf16>, vector<16x32xf32> -> vector<16x32xf32>
    %83 = arith.addf %77, %82 : vector<16x32xf32>
    %c0_56 = arith.constant 0 : index
    %c8_57 = arith.constant 8 : index
    %c0_58 = arith.constant 0 : index
    %84 = vector.load %arg1[%c0_56, %c8_57, %c0_58] : memref<1x32x384xbf16, #tpu.memory_space<vmem>>, vector<1x16x384xbf16>
    %85 = vector.shape_cast %84 : vector<1x16x384xbf16> to vector<16x384xbf16>
    %c2_59 = arith.constant 2 : index
    %c1_60 = arith.constant 1 : index
    %c0_61 = arith.constant 0 : index
    %c0_62 = arith.constant 0 : index
    %86 = vector.load %arg2[%c2_59, %c1_60, %c0_61, %c0_62] : memref<4x2x384x32xbf16, #tpu.memory_space<vmem>>, vector<1x1x384x32xbf16>
    %87 = vector.shape_cast %86 : vector<1x1x384x32xbf16> to vector<384x32xbf16>
    %cst_63 = arith.constant dense<0.000000e+00> : vector<16x32xf32>
    %88 = tpu.matmul %85, %87, %cst_63 {dimension_numbers = #tpu.dot_dimension_numbers<[1], [0], [0], [1], [0, 0, 1, 1], [], []>} : vector<16x384xbf16>, vector<384x32xbf16>, vector<16x32xf32> -> vector<16x32xf32>
    %89 = arith.addf %83, %88 : vector<16x32xf32>
    %90 = arith.truncf %89 : vector<16x32xf32> to vector<16x32xbf16>
    %c0_64 = arith.constant 0 : index
    %c2_65 = arith.constant 2 : index
    %c0_66 = arith.constant 0 : index
    %c0_67 = arith.constant 0 : index
    %91 = vector.load %arg3[%c0_64, %c2_65, %c0_66, %c0_67] : memref<1x4x16x32xbf16, #tpu.memory_space<vmem>>, vector<1x1x16x32xbf16>
    %92 = vector.shape_cast %91 : vector<1x1x16x32xbf16> to vector<16x32xbf16>
    %93 = vector.shape_cast %90 : vector<16x32xbf16> to vector<1x1x16x32xbf16>
    tpu.vector_store %arg3[%c0_64, %c2_65, %c0_66, %c0_67], %93 {strides = array<i32>} : memref<1x4x16x32xbf16, #tpu.memory_space<vmem>>, vector<1x1x16x32xbf16>,
    %cst_68 = arith.constant 0.000000e+00 : f32
    %94 = vector.shape_cast %20 : vector<16x1xi1> to vector<16x1xi1>
    %95 = vector.broadcast %94 : vector<16x1xi1> to vector<16x32xi1>
    %96 = vector.broadcast %cst_68 : f32 to vector<16x32xf32>
    %97 = arith.select %95, %89, %96 : vector<16x32xi1>, vector<16x32xf32>
    %cst_69 = arith.constant dense<0.000000e+00> : vector<32xf32>
    %98 = vector.multi_reduction <add>, %97, %cst_69 [0] : vector<16x32xf32> to vector<32xf32>
    %99 = vector.shape_cast %98 : vector<32xf32> to vector<1x32xf32>
    %100 = arith.addf %72, %99 : vector<1x32xf32>
    %101 = arith.mulf %97, %97 : vector<16x32xf32>
    %cst_70 = arith.constant dense<0.000000e+00> : vector<32xf32>
    %102 = vector.multi_reduction <add>, %101, %cst_70 [0] : vector<16x32xf32> to vector<32xf32>
    %103 = vector.shape_cast %102 : vector<32xf32> to vector<1x32xf32>
    %104 = arith.addf %76, %103 : vector<1x32xf32>
    %cst_71 = arith.constant 0.000000e+00 : f32
    %105 = vector.broadcast %cst_71 : f32 to vector<16x32xf32>
    %c0_72 = arith.constant 0 : index
    %c16_73 = arith.constant 16 : index
    %c0_74 = arith.constant 0 : index
    %106 = vector.load %arg1[%c0_72, %c16_73, %c0_74] : memref<1x32x384xbf16, #tpu.memory_space<vmem>>, vector<1x16x384xbf16>
    %107 = vector.shape_cast %106 : vector<1x16x384xbf16> to vector<16x384xbf16>
    %c3 = arith.constant 3 : index
    %c0_75 = arith.constant 0 : index
    %c0_76 = arith.constant 0 : index
    %c0_77 = arith.constant 0 : index
    %108 = vector.load %arg2[%c3, %c0_75, %c0_76, %c0_77] : memref<4x2x384x32xbf16, #tpu.memory_space<vmem>>, vector<1x1x384x32xbf16>
    %109 = vector.shape_cast %108 : vector<1x1x384x32xbf16> to vector<384x32xbf16>
    %cst_78 = arith.constant dense<0.000000e+00> : vector<16x32xf32>
    %110 = tpu.matmul %107, %109, %cst_78 {dimension_numbers = #tpu.dot_dimension_numbers<[1], [0], [0], [1], [0, 0, 1, 1], [], []>} : vector<16x384xbf16>, vector<384x32xbf16>, vector<16x32xf32> -> vector<16x32xf32>
    %111 = arith.addf %105, %110 : vector<16x32xf32>
    %c0_79 = arith.constant 0 : index
    %c8_80 = arith.constant 8 : index
    %c0_81 = arith.constant 0 : index
    %112 = vector.load %arg1[%c0_79, %c8_80, %c0_81] : memref<1x32x384xbf16, #tpu.memory_space<vmem>>, vector<1x16x384xbf16>
    %113 = vector.shape_cast %112 : vector<1x16x384xbf16> to vector<16x384xbf16>
    %c3_82 = arith.constant 3 : index
    %c1_83 = arith.constant 1 : index
    %c0_84 = arith.constant 0 : index
    %c0_85 = arith.constant 0 : index
    %114 = vector.load %arg2[%c3_82, %c1_83, %c0_84, %c0_85] : memref<4x2x384x32xbf16, #tpu.memory_space<vmem>>, vector<1x1x384x32xbf16>
    %115 = vector.shape_cast %114 : vector<1x1x384x32xbf16> to vector<384x32xbf16>
    %cst_86 = arith.constant dense<0.000000e+00> : vector<16x32xf32>
    %116 = tpu.matmul %113, %115, %cst_86 {dimension_numbers = #tpu.dot_dimension_numbers<[1], [0], [0], [1], [0, 0, 1, 1], [], []>} : vector<16x384xbf16>, vector<384x32xbf16>, vector<16x32xf32> -> vector<16x32xf32>
    %117 = arith.addf %111, %116 : vector<16x32xf32>
    %118 = arith.truncf %117 : vector<16x32xf32> to vector<16x32xbf16>
    %c0_87 = arith.constant 0 : index
    %c3_88 = arith.constant 3 : index
    %c0_89 = arith.constant 0 : index
    %c0_90 = arith.constant 0 : index
    %119 = vector.load %arg3[%c0_87, %c3_88, %c0_89, %c0_90] : memref<1x4x16x32xbf16, #tpu.memory_space<vmem>>, vector<1x1x16x32xbf16>
    %120 = vector.shape_cast %119 : vector<1x1x16x32xbf16> to vector<16x32xbf16>
    %121 = vector.shape_cast %118 : vector<16x32xbf16> to vector<1x1x16x32xbf16>
    tpu.vector_store %arg3[%c0_87, %c3_88, %c0_89, %c0_90], %121 {strides = array<i32>} : memref<1x4x16x32xbf16, #tpu.memory_space<vmem>>, vector<1x1x16x32xbf16>,
    %cst_91 = arith.constant 0.000000e+00 : f32
    %122 = vector.shape_cast %20 : vector<16x1xi1> to vector<16x1xi1>
    %123 = vector.broadcast %122 : vector<16x1xi1> to vector<16x32xi1>
    %124 = vector.broadcast %cst_91 : f32 to vector<16x32xf32>
    %125 = arith.select %123, %117, %124 : vector<16x32xi1>, vector<16x32xf32>
    %cst_92 = arith.constant dense<0.000000e+00> : vector<32xf32>
    %126 = vector.multi_reduction <add>, %125, %cst_92 [0] : vector<16x32xf32> to vector<32xf32>
    %127 = vector.shape_cast %126 : vector<32xf32> to vector<1x32xf32>
    %128 = arith.addf %100, %127 : vector<1x32xf32>
    %129 = arith.mulf %125, %125 : vector<16x32xf32>
    %cst_93 = arith.constant dense<0.000000e+00> : vector<32xf32>
    %130 = vector.multi_reduction <add>, %129, %cst_93 [0] : vector<16x32xf32> to vector<32xf32>
    %131 = vector.shape_cast %130 : vector<32xf32> to vector<1x32xf32>
    %132 = arith.addf %104, %131 : vector<1x32xf32>
    %c0_94 = arith.constant 0 : index
    %c0_95 = arith.constant 0 : index
    %c0_96 = arith.constant 0 : index
    %133 = vector.load %arg4[%c0_94, %c0_95, %c0_96] : memref<1x2x32xf32, #tpu.memory_space<vmem>>, vector<1x1x32xf32>
    %134 = vector.shape_cast %133 : vector<1x1x32xf32> to vector<1x32xf32>
    %135 = vector.shape_cast %128 : vector<1x32xf32> to vector<1x1x32xf32>
    tpu.vector_store %arg4[%c0_94, %c0_95, %c0_96], %135 {strides = array<i32>} : memref<1x2x32xf32, #tpu.memory_space<vmem>>, vector<1x1x32xf32>,
    %c0_97 = arith.constant 0 : index
    %c1_98 = arith.constant 1 : index
    %c0_99 = arith.constant 0 : index
    %136 = vector.load %arg4[%c0_97, %c1_98, %c0_99] : memref<1x2x32xf32, #tpu.memory_space<vmem>>, vector<1x1x32xf32>
    %137 = vector.shape_cast %136 : vector<1x1x32xf32> to vector<1x32xf32>
    %138 = vector.shape_cast %132 : vector<1x32xf32> to vector<1x1x32xf32>
    tpu.vector_store %arg4[%c0_97, %c1_98, %c0_99], %138 {strides = array<i32>} : memref<1x2x32xf32, #tpu.memory_space<vmem>>, vector<1x1x32xf32>,
    return
  }
  func.func @transform_0(%arg0: i32) -> (i32, i32, i32) {
    %c0_i32 = arith.constant 0 : i32
    %c0_i32_0 = arith.constant 0 : i32
    %c0_i32_1 = arith.constant 0 : i32
    return %arg0, %c0_i32, %c0_i32_0 : i32, i32, i32
  }
  func.func @transform_1(%arg0: i32) -> (i32, i32, i32, i32) {
    %c0_i32 = arith.constant 0 : i32
    %c0_i32_0 = arith.constant 0 : i32
    %c0_i32_1 = arith.constant 0 : i32
    %c0_i32_2 = arith.constant 0 : i32
    %c0_i32_3 = arith.constant 0 : i32
    return %c0_i32, %c0_i32_0, %c0_i32_1, %c0_i32_2 : i32, i32, i32, i32
  }
  func.func @transform_2(%arg0: i32) -> (i32, i32, i32, i32) {
    %c0_i32 = arith.constant 0 : i32
    %c0_i32_0 = arith.constant 0 : i32
    %c0_i32_1 = arith.constant 0 : i32
    %c0_i32_2 = arith.constant 0 : i32
    return %arg0, %c0_i32, %c0_i32_0, %c0_i32_1 : i32, i32, i32, i32
  }
  func.func @transform_3(%arg0: i32) -> (i32, i32, i32) {
    %c0_i32 = arith.constant 0 : i32
    %c0_i32_0 = arith.constant 0 : i32
    %c0_i32_1 = arith.constant 0 : i32
    return %arg0, %c0_i32, %c0_i32_0 : i32, i32, i32
  }
}

module attributes {stable_mosaic.version = 11 : i64} {
  func.func @_conv_up_kernel(%arg0: i32, %arg1: memref<1x48x192xbf16, #tpu.memory_space<vmem>>, %arg2: memref<4x2x192x16xbf16, #tpu.memory_space<vmem>>, %arg3: memref<1x4x32x16xbf16, #tpu.memory_space<vmem>>, %arg4: memref<1x2x16xf32, #tpu.memory_space<vmem>>) attributes {dimension_semantics = [#tpu.dimension_semantics<parallel>], iteration_bounds = array<i64: 2>, scalar_prefetch = 0 : i64, scratch_operands = 0 : i64, tpu.core_type = #tpu.core_type<tc>, window_params = [{transform_indices = @transform_0, window_bounds = array<i64: 1, 48, 192>}, {pipeline_mode = #tpu.pipeline_mode<synchronous>, transform_indices = @transform_1, window_bounds = array<i64: 4, 2, 192, 16>}, {transform_indices = @transform_2, window_bounds = array<i64: 1, 4, 32, 16>}, {transform_indices = @transform_3, window_bounds = array<i64: 1, 2, 16>}]} {
    %cst = arith.constant 0.000000e+00 : f32
    %0 = vector.broadcast %cst : f32 to vector<1x16xf32>
    %cst_0 = arith.constant 0.000000e+00 : f32
    %1 = vector.broadcast %cst_0 : f32 to vector<1x16xf32>
    %2 = tpu.iota {dimensions = array<i32: 0>} : vector<32x1xi32>
    %c8_i32 = arith.constant 8 : i32
    %c0_i32 = arith.constant 0 : i32
    %3 = arith.cmpi eq, %c8_i32, %c0_i32 : i32
    %c1_i32 = arith.constant 1 : i32
    %4 = arith.select %3, %c1_i32, %c8_i32 : i32
    %5 = vector.broadcast %4 : i32 to vector<32x1xi32>
    %6 = arith.remsi %2, %5 : vector<32x1xi32>
    %c0_i32_1 = arith.constant 0 : i32
    %7 = vector.broadcast %c0_i32_1 : i32 to vector<32x1xi32>
    %8 = arith.cmpi ne, %6, %7 : vector<32x1xi32>
    %c0_i32_2 = arith.constant 0 : i32
    %9 = vector.broadcast %c0_i32_2 : i32 to vector<32x1xi32>
    %10 = arith.cmpi slt, %6, %9 : vector<32x1xi32>
    %c0_i32_3 = arith.constant 0 : i32
    %11 = arith.cmpi slt, %4, %c0_i32_3 : i32
    %12 = vector.broadcast %11 : i1 to vector<32x1xi1>
    %13 = vector.broadcast %12 : vector<32x1xi1> to vector<32x1xi1>
    %14 = arith.xori %10, %13 : vector<32x1xi1>
    %15 = arith.andi %14, %8 : vector<32x1xi1>
    %16 = vector.broadcast %4 : i32 to vector<32x1xi32>
    %17 = arith.addi %6, %16 : vector<32x1xi32>
    %18 = arith.select %15, %17, %6 : vector<32x1xi1>, vector<32x1xi32>
    %c4_i32 = arith.constant 4 : i32
    %19 = vector.broadcast %c4_i32 : i32 to vector<32x1xi32>
    %20 = arith.cmpi slt, %18, %19 : vector<32x1xi32>
    %cst_4 = arith.constant 0.000000e+00 : f32
    %21 = vector.broadcast %cst_4 : f32 to vector<32x16xf32>
    %c0 = arith.constant 0 : index
    %c8 = arith.constant 8 : index
    %c0_5 = arith.constant 0 : index
    %22 = vector.load %arg1[%c0, %c8, %c0_5] : memref<1x48x192xbf16, #tpu.memory_space<vmem>>, vector<1x32x192xbf16>
    %23 = vector.shape_cast %22 : vector<1x32x192xbf16> to vector<32x192xbf16>
    %c0_6 = arith.constant 0 : index
    %c0_7 = arith.constant 0 : index
    %c0_8 = arith.constant 0 : index
    %c0_9 = arith.constant 0 : index
    %24 = vector.load %arg2[%c0_6, %c0_7, %c0_8, %c0_9] : memref<4x2x192x16xbf16, #tpu.memory_space<vmem>>, vector<1x1x192x16xbf16>
    %25 = vector.shape_cast %24 : vector<1x1x192x16xbf16> to vector<192x16xbf16>
    %cst_10 = arith.constant dense<0.000000e+00> : vector<32x16xf32>
    %26 = tpu.matmul %23, %25, %cst_10 {dimension_numbers = #tpu.dot_dimension_numbers<[1], [0], [0], [1], [0, 0, 1, 1], [], []>} : vector<32x192xbf16>, vector<192x16xbf16>, vector<32x16xf32> -> vector<32x16xf32>
    %27 = arith.addf %21, %26 : vector<32x16xf32>
    %c0_11 = arith.constant 0 : index
    %c0_12 = arith.constant 0 : index
    %c0_13 = arith.constant 0 : index
    %28 = vector.load %arg1[%c0_11, %c0_12, %c0_13] : memref<1x48x192xbf16, #tpu.memory_space<vmem>>, vector<1x32x192xbf16>
    %29 = vector.shape_cast %28 : vector<1x32x192xbf16> to vector<32x192xbf16>
    %c0_14 = arith.constant 0 : index
    %c1 = arith.constant 1 : index
    %c0_15 = arith.constant 0 : index
    %c0_16 = arith.constant 0 : index
    %30 = vector.load %arg2[%c0_14, %c1, %c0_15, %c0_16] : memref<4x2x192x16xbf16, #tpu.memory_space<vmem>>, vector<1x1x192x16xbf16>
    %31 = vector.shape_cast %30 : vector<1x1x192x16xbf16> to vector<192x16xbf16>
    %cst_17 = arith.constant dense<0.000000e+00> : vector<32x16xf32>
    %32 = tpu.matmul %29, %31, %cst_17 {dimension_numbers = #tpu.dot_dimension_numbers<[1], [0], [0], [1], [0, 0, 1, 1], [], []>} : vector<32x192xbf16>, vector<192x16xbf16>, vector<32x16xf32> -> vector<32x16xf32>
    %33 = arith.addf %27, %32 : vector<32x16xf32>
    %34 = arith.truncf %33 : vector<32x16xf32> to vector<32x16xbf16>
    %c0_18 = arith.constant 0 : index
    %c0_19 = arith.constant 0 : index
    %c0_20 = arith.constant 0 : index
    %c0_21 = arith.constant 0 : index
    %35 = vector.load %arg3[%c0_18, %c0_19, %c0_20, %c0_21] : memref<1x4x32x16xbf16, #tpu.memory_space<vmem>>, vector<1x1x32x16xbf16>
    %36 = vector.shape_cast %35 : vector<1x1x32x16xbf16> to vector<32x16xbf16>
    %37 = vector.shape_cast %34 : vector<32x16xbf16> to vector<1x1x32x16xbf16>
    tpu.vector_store %arg3[%c0_18, %c0_19, %c0_20, %c0_21], %37 {strides = array<i32>} : memref<1x4x32x16xbf16, #tpu.memory_space<vmem>>, vector<1x1x32x16xbf16>,
    %cst_22 = arith.constant 0.000000e+00 : f32
    %38 = vector.shape_cast %20 : vector<32x1xi1> to vector<32x1xi1>
    %39 = vector.broadcast %38 : vector<32x1xi1> to vector<32x16xi1>
    %40 = vector.broadcast %cst_22 : f32 to vector<32x16xf32>
    %41 = arith.select %39, %33, %40 : vector<32x16xi1>, vector<32x16xf32>
    %cst_23 = arith.constant dense<0.000000e+00> : vector<16xf32>
    %42 = vector.multi_reduction <add>, %41, %cst_23 [0] : vector<32x16xf32> to vector<16xf32>
    %43 = vector.shape_cast %42 : vector<16xf32> to vector<1x16xf32>
    %44 = arith.addf %0, %43 : vector<1x16xf32>
    %45 = arith.mulf %41, %41 : vector<32x16xf32>
    %cst_24 = arith.constant dense<0.000000e+00> : vector<16xf32>
    %46 = vector.multi_reduction <add>, %45, %cst_24 [0] : vector<32x16xf32> to vector<16xf32>
    %47 = vector.shape_cast %46 : vector<16xf32> to vector<1x16xf32>
    %48 = arith.addf %1, %47 : vector<1x16xf32>
    %cst_25 = arith.constant 0.000000e+00 : f32
    %49 = vector.broadcast %cst_25 : f32 to vector<32x16xf32>
    %c0_26 = arith.constant 0 : index
    %c8_27 = arith.constant 8 : index
    %c0_28 = arith.constant 0 : index
    %50 = vector.load %arg1[%c0_26, %c8_27, %c0_28] : memref<1x48x192xbf16, #tpu.memory_space<vmem>>, vector<1x32x192xbf16>
    %51 = vector.shape_cast %50 : vector<1x32x192xbf16> to vector<32x192xbf16>
    %c1_29 = arith.constant 1 : index
    %c0_30 = arith.constant 0 : index
    %c0_31 = arith.constant 0 : index
    %c0_32 = arith.constant 0 : index
    %52 = vector.load %arg2[%c1_29, %c0_30, %c0_31, %c0_32] : memref<4x2x192x16xbf16, #tpu.memory_space<vmem>>, vector<1x1x192x16xbf16>
    %53 = vector.shape_cast %52 : vector<1x1x192x16xbf16> to vector<192x16xbf16>
    %cst_33 = arith.constant dense<0.000000e+00> : vector<32x16xf32>
    %54 = tpu.matmul %51, %53, %cst_33 {dimension_numbers = #tpu.dot_dimension_numbers<[1], [0], [0], [1], [0, 0, 1, 1], [], []>} : vector<32x192xbf16>, vector<192x16xbf16>, vector<32x16xf32> -> vector<32x16xf32>
    %55 = arith.addf %49, %54 : vector<32x16xf32>
    %c0_34 = arith.constant 0 : index
    %c0_35 = arith.constant 0 : index
    %c0_36 = arith.constant 0 : index
    %56 = vector.load %arg1[%c0_34, %c0_35, %c0_36] : memref<1x48x192xbf16, #tpu.memory_space<vmem>>, vector<1x32x192xbf16>
    %57 = vector.shape_cast %56 : vector<1x32x192xbf16> to vector<32x192xbf16>
    %c1_37 = arith.constant 1 : index
    %c1_38 = arith.constant 1 : index
    %c0_39 = arith.constant 0 : index
    %c0_40 = arith.constant 0 : index
    %58 = vector.load %arg2[%c1_37, %c1_38, %c0_39, %c0_40] : memref<4x2x192x16xbf16, #tpu.memory_space<vmem>>, vector<1x1x192x16xbf16>
    %59 = vector.shape_cast %58 : vector<1x1x192x16xbf16> to vector<192x16xbf16>
    %cst_41 = arith.constant dense<0.000000e+00> : vector<32x16xf32>
    %60 = tpu.matmul %57, %59, %cst_41 {dimension_numbers = #tpu.dot_dimension_numbers<[1], [0], [0], [1], [0, 0, 1, 1], [], []>} : vector<32x192xbf16>, vector<192x16xbf16>, vector<32x16xf32> -> vector<32x16xf32>
    %61 = arith.addf %55, %60 : vector<32x16xf32>
    %62 = arith.truncf %61 : vector<32x16xf32> to vector<32x16xbf16>
    %c0_42 = arith.constant 0 : index
    %c1_43 = arith.constant 1 : index
    %c0_44 = arith.constant 0 : index
    %c0_45 = arith.constant 0 : index
    %63 = vector.load %arg3[%c0_42, %c1_43, %c0_44, %c0_45] : memref<1x4x32x16xbf16, #tpu.memory_space<vmem>>, vector<1x1x32x16xbf16>
    %64 = vector.shape_cast %63 : vector<1x1x32x16xbf16> to vector<32x16xbf16>
    %65 = vector.shape_cast %62 : vector<32x16xbf16> to vector<1x1x32x16xbf16>
    tpu.vector_store %arg3[%c0_42, %c1_43, %c0_44, %c0_45], %65 {strides = array<i32>} : memref<1x4x32x16xbf16, #tpu.memory_space<vmem>>, vector<1x1x32x16xbf16>,
    %cst_46 = arith.constant 0.000000e+00 : f32
    %66 = vector.shape_cast %20 : vector<32x1xi1> to vector<32x1xi1>
    %67 = vector.broadcast %66 : vector<32x1xi1> to vector<32x16xi1>
    %68 = vector.broadcast %cst_46 : f32 to vector<32x16xf32>
    %69 = arith.select %67, %61, %68 : vector<32x16xi1>, vector<32x16xf32>
    %cst_47 = arith.constant dense<0.000000e+00> : vector<16xf32>
    %70 = vector.multi_reduction <add>, %69, %cst_47 [0] : vector<32x16xf32> to vector<16xf32>
    %71 = vector.shape_cast %70 : vector<16xf32> to vector<1x16xf32>
    %72 = arith.addf %44, %71 : vector<1x16xf32>
    %73 = arith.mulf %69, %69 : vector<32x16xf32>
    %cst_48 = arith.constant dense<0.000000e+00> : vector<16xf32>
    %74 = vector.multi_reduction <add>, %73, %cst_48 [0] : vector<32x16xf32> to vector<16xf32>
    %75 = vector.shape_cast %74 : vector<16xf32> to vector<1x16xf32>
    %76 = arith.addf %48, %75 : vector<1x16xf32>
    %cst_49 = arith.constant 0.000000e+00 : f32
    %77 = vector.broadcast %cst_49 : f32 to vector<32x16xf32>
    %c0_50 = arith.constant 0 : index
    %c16 = arith.constant 16 : index
    %c0_51 = arith.constant 0 : index
    %78 = vector.load %arg1[%c0_50, %c16, %c0_51] : memref<1x48x192xbf16, #tpu.memory_space<vmem>>, vector<1x32x192xbf16>
    %79 = vector.shape_cast %78 : vector<1x32x192xbf16> to vector<32x192xbf16>
    %c2 = arith.constant 2 : index
    %c0_52 = arith.constant 0 : index
    %c0_53 = arith.constant 0 : index
    %c0_54 = arith.constant 0 : index
    %80 = vector.load %arg2[%c2, %c0_52, %c0_53, %c0_54] : memref<4x2x192x16xbf16, #tpu.memory_space<vmem>>, vector<1x1x192x16xbf16>
    %81 = vector.shape_cast %80 : vector<1x1x192x16xbf16> to vector<192x16xbf16>
    %cst_55 = arith.constant dense<0.000000e+00> : vector<32x16xf32>
    %82 = tpu.matmul %79, %81, %cst_55 {dimension_numbers = #tpu.dot_dimension_numbers<[1], [0], [0], [1], [0, 0, 1, 1], [], []>} : vector<32x192xbf16>, vector<192x16xbf16>, vector<32x16xf32> -> vector<32x16xf32>
    %83 = arith.addf %77, %82 : vector<32x16xf32>
    %c0_56 = arith.constant 0 : index
    %c8_57 = arith.constant 8 : index
    %c0_58 = arith.constant 0 : index
    %84 = vector.load %arg1[%c0_56, %c8_57, %c0_58] : memref<1x48x192xbf16, #tpu.memory_space<vmem>>, vector<1x32x192xbf16>
    %85 = vector.shape_cast %84 : vector<1x32x192xbf16> to vector<32x192xbf16>
    %c2_59 = arith.constant 2 : index
    %c1_60 = arith.constant 1 : index
    %c0_61 = arith.constant 0 : index
    %c0_62 = arith.constant 0 : index
    %86 = vector.load %arg2[%c2_59, %c1_60, %c0_61, %c0_62] : memref<4x2x192x16xbf16, #tpu.memory_space<vmem>>, vector<1x1x192x16xbf16>
    %87 = vector.shape_cast %86 : vector<1x1x192x16xbf16> to vector<192x16xbf16>
    %cst_63 = arith.constant dense<0.000000e+00> : vector<32x16xf32>
    %88 = tpu.matmul %85, %87, %cst_63 {dimension_numbers = #tpu.dot_dimension_numbers<[1], [0], [0], [1], [0, 0, 1, 1], [], []>} : vector<32x192xbf16>, vector<192x16xbf16>, vector<32x16xf32> -> vector<32x16xf32>
    %89 = arith.addf %83, %88 : vector<32x16xf32>
    %90 = arith.truncf %89 : vector<32x16xf32> to vector<32x16xbf16>
    %c0_64 = arith.constant 0 : index
    %c2_65 = arith.constant 2 : index
    %c0_66 = arith.constant 0 : index
    %c0_67 = arith.constant 0 : index
    %91 = vector.load %arg3[%c0_64, %c2_65, %c0_66, %c0_67] : memref<1x4x32x16xbf16, #tpu.memory_space<vmem>>, vector<1x1x32x16xbf16>
    %92 = vector.shape_cast %91 : vector<1x1x32x16xbf16> to vector<32x16xbf16>
    %93 = vector.shape_cast %90 : vector<32x16xbf16> to vector<1x1x32x16xbf16>
    tpu.vector_store %arg3[%c0_64, %c2_65, %c0_66, %c0_67], %93 {strides = array<i32>} : memref<1x4x32x16xbf16, #tpu.memory_space<vmem>>, vector<1x1x32x16xbf16>,
    %cst_68 = arith.constant 0.000000e+00 : f32
    %94 = vector.shape_cast %20 : vector<32x1xi1> to vector<32x1xi1>
    %95 = vector.broadcast %94 : vector<32x1xi1> to vector<32x16xi1>
    %96 = vector.broadcast %cst_68 : f32 to vector<32x16xf32>
    %97 = arith.select %95, %89, %96 : vector<32x16xi1>, vector<32x16xf32>
    %cst_69 = arith.constant dense<0.000000e+00> : vector<16xf32>
    %98 = vector.multi_reduction <add>, %97, %cst_69 [0] : vector<32x16xf32> to vector<16xf32>
    %99 = vector.shape_cast %98 : vector<16xf32> to vector<1x16xf32>
    %100 = arith.addf %72, %99 : vector<1x16xf32>
    %101 = arith.mulf %97, %97 : vector<32x16xf32>
    %cst_70 = arith.constant dense<0.000000e+00> : vector<16xf32>
    %102 = vector.multi_reduction <add>, %101, %cst_70 [0] : vector<32x16xf32> to vector<16xf32>
    %103 = vector.shape_cast %102 : vector<16xf32> to vector<1x16xf32>
    %104 = arith.addf %76, %103 : vector<1x16xf32>
    %cst_71 = arith.constant 0.000000e+00 : f32
    %105 = vector.broadcast %cst_71 : f32 to vector<32x16xf32>
    %c0_72 = arith.constant 0 : index
    %c16_73 = arith.constant 16 : index
    %c0_74 = arith.constant 0 : index
    %106 = vector.load %arg1[%c0_72, %c16_73, %c0_74] : memref<1x48x192xbf16, #tpu.memory_space<vmem>>, vector<1x32x192xbf16>
    %107 = vector.shape_cast %106 : vector<1x32x192xbf16> to vector<32x192xbf16>
    %c3 = arith.constant 3 : index
    %c0_75 = arith.constant 0 : index
    %c0_76 = arith.constant 0 : index
    %c0_77 = arith.constant 0 : index
    %108 = vector.load %arg2[%c3, %c0_75, %c0_76, %c0_77] : memref<4x2x192x16xbf16, #tpu.memory_space<vmem>>, vector<1x1x192x16xbf16>
    %109 = vector.shape_cast %108 : vector<1x1x192x16xbf16> to vector<192x16xbf16>
    %cst_78 = arith.constant dense<0.000000e+00> : vector<32x16xf32>
    %110 = tpu.matmul %107, %109, %cst_78 {dimension_numbers = #tpu.dot_dimension_numbers<[1], [0], [0], [1], [0, 0, 1, 1], [], []>} : vector<32x192xbf16>, vector<192x16xbf16>, vector<32x16xf32> -> vector<32x16xf32>
    %111 = arith.addf %105, %110 : vector<32x16xf32>
    %c0_79 = arith.constant 0 : index
    %c8_80 = arith.constant 8 : index
    %c0_81 = arith.constant 0 : index
    %112 = vector.load %arg1[%c0_79, %c8_80, %c0_81] : memref<1x48x192xbf16, #tpu.memory_space<vmem>>, vector<1x32x192xbf16>
    %113 = vector.shape_cast %112 : vector<1x32x192xbf16> to vector<32x192xbf16>
    %c3_82 = arith.constant 3 : index
    %c1_83 = arith.constant 1 : index
    %c0_84 = arith.constant 0 : index
    %c0_85 = arith.constant 0 : index
    %114 = vector.load %arg2[%c3_82, %c1_83, %c0_84, %c0_85] : memref<4x2x192x16xbf16, #tpu.memory_space<vmem>>, vector<1x1x192x16xbf16>
    %115 = vector.shape_cast %114 : vector<1x1x192x16xbf16> to vector<192x16xbf16>
    %cst_86 = arith.constant dense<0.000000e+00> : vector<32x16xf32>
    %116 = tpu.matmul %113, %115, %cst_86 {dimension_numbers = #tpu.dot_dimension_numbers<[1], [0], [0], [1], [0, 0, 1, 1], [], []>} : vector<32x192xbf16>, vector<192x16xbf16>, vector<32x16xf32> -> vector<32x16xf32>
    %117 = arith.addf %111, %116 : vector<32x16xf32>
    %118 = arith.truncf %117 : vector<32x16xf32> to vector<32x16xbf16>
    %c0_87 = arith.constant 0 : index
    %c3_88 = arith.constant 3 : index
    %c0_89 = arith.constant 0 : index
    %c0_90 = arith.constant 0 : index
    %119 = vector.load %arg3[%c0_87, %c3_88, %c0_89, %c0_90] : memref<1x4x32x16xbf16, #tpu.memory_space<vmem>>, vector<1x1x32x16xbf16>
    %120 = vector.shape_cast %119 : vector<1x1x32x16xbf16> to vector<32x16xbf16>
    %121 = vector.shape_cast %118 : vector<32x16xbf16> to vector<1x1x32x16xbf16>
    tpu.vector_store %arg3[%c0_87, %c3_88, %c0_89, %c0_90], %121 {strides = array<i32>} : memref<1x4x32x16xbf16, #tpu.memory_space<vmem>>, vector<1x1x32x16xbf16>,
    %cst_91 = arith.constant 0.000000e+00 : f32
    %122 = vector.shape_cast %20 : vector<32x1xi1> to vector<32x1xi1>
    %123 = vector.broadcast %122 : vector<32x1xi1> to vector<32x16xi1>
    %124 = vector.broadcast %cst_91 : f32 to vector<32x16xf32>
    %125 = arith.select %123, %117, %124 : vector<32x16xi1>, vector<32x16xf32>
    %cst_92 = arith.constant dense<0.000000e+00> : vector<16xf32>
    %126 = vector.multi_reduction <add>, %125, %cst_92 [0] : vector<32x16xf32> to vector<16xf32>
    %127 = vector.shape_cast %126 : vector<16xf32> to vector<1x16xf32>
    %128 = arith.addf %100, %127 : vector<1x16xf32>
    %129 = arith.mulf %125, %125 : vector<32x16xf32>
    %cst_93 = arith.constant dense<0.000000e+00> : vector<16xf32>
    %130 = vector.multi_reduction <add>, %129, %cst_93 [0] : vector<32x16xf32> to vector<16xf32>
    %131 = vector.shape_cast %130 : vector<16xf32> to vector<1x16xf32>
    %132 = arith.addf %104, %131 : vector<1x16xf32>
    %c0_94 = arith.constant 0 : index
    %c0_95 = arith.constant 0 : index
    %c0_96 = arith.constant 0 : index
    %133 = vector.load %arg4[%c0_94, %c0_95, %c0_96] : memref<1x2x16xf32, #tpu.memory_space<vmem>>, vector<1x1x16xf32>
    %134 = vector.shape_cast %133 : vector<1x1x16xf32> to vector<1x16xf32>
    %135 = vector.shape_cast %128 : vector<1x16xf32> to vector<1x1x16xf32>
    tpu.vector_store %arg4[%c0_94, %c0_95, %c0_96], %135 {strides = array<i32>} : memref<1x2x16xf32, #tpu.memory_space<vmem>>, vector<1x1x16xf32>,
    %c0_97 = arith.constant 0 : index
    %c1_98 = arith.constant 1 : index
    %c0_99 = arith.constant 0 : index
    %136 = vector.load %arg4[%c0_97, %c1_98, %c0_99] : memref<1x2x16xf32, #tpu.memory_space<vmem>>, vector<1x1x16xf32>
    %137 = vector.shape_cast %136 : vector<1x1x16xf32> to vector<1x16xf32>
    %138 = vector.shape_cast %132 : vector<1x16xf32> to vector<1x1x16xf32>
    tpu.vector_store %arg4[%c0_97, %c1_98, %c0_99], %138 {strides = array<i32>} : memref<1x2x16xf32, #tpu.memory_space<vmem>>, vector<1x1x16xf32>,
    return
  }
  func.func @transform_0(%arg0: i32) -> (i32, i32, i32) {
    %c0_i32 = arith.constant 0 : i32
    %c0_i32_0 = arith.constant 0 : i32
    %c0_i32_1 = arith.constant 0 : i32
    return %arg0, %c0_i32, %c0_i32_0 : i32, i32, i32
  }
  func.func @transform_1(%arg0: i32) -> (i32, i32, i32, i32) {
    %c0_i32 = arith.constant 0 : i32
    %c0_i32_0 = arith.constant 0 : i32
    %c0_i32_1 = arith.constant 0 : i32
    %c0_i32_2 = arith.constant 0 : i32
    %c0_i32_3 = arith.constant 0 : i32
    return %c0_i32, %c0_i32_0, %c0_i32_1, %c0_i32_2 : i32, i32, i32, i32
  }
  func.func @transform_2(%arg0: i32) -> (i32, i32, i32, i32) {
    %c0_i32 = arith.constant 0 : i32
    %c0_i32_0 = arith.constant 0 : i32
    %c0_i32_1 = arith.constant 0 : i32
    %c0_i32_2 = arith.constant 0 : i32
    return %arg0, %c0_i32, %c0_i32_0, %c0_i32_1 : i32, i32, i32, i32
  }
  func.func @transform_3(%arg0: i32) -> (i32, i32, i32) {
    %c0_i32 = arith.constant 0 : i32
    %c0_i32_0 = arith.constant 0 : i32
    %c0_i32_1 = arith.constant 0 : i32
    return %arg0, %c0_i32, %c0_i32_0 : i32, i32, i32
  }
}

module attributes {stable_mosaic.version = 11 : i64} {
  func.func @_conv_up_kernel(%arg0: i32, %arg1: memref<1x80x96xbf16, #tpu.memory_space<vmem>>, %arg2: memref<4x2x96x8xbf16, #tpu.memory_space<vmem>>, %arg3: memref<1x4x64x8xbf16, #tpu.memory_space<vmem>>, %arg4: memref<1x2x8xf32, #tpu.memory_space<vmem>>) attributes {dimension_semantics = [#tpu.dimension_semantics<parallel>], iteration_bounds = array<i64: 2>, scalar_prefetch = 0 : i64, scratch_operands = 0 : i64, tpu.core_type = #tpu.core_type<tc>, window_params = [{transform_indices = @transform_0, window_bounds = array<i64: 1, 80, 96>}, {pipeline_mode = #tpu.pipeline_mode<synchronous>, transform_indices = @transform_1, window_bounds = array<i64: 4, 2, 96, 8>}, {transform_indices = @transform_2, window_bounds = array<i64: 1, 4, 64, 8>}, {transform_indices = @transform_3, window_bounds = array<i64: 1, 2, 8>}]} {
    %cst = arith.constant 0.000000e+00 : f32
    %0 = vector.broadcast %cst : f32 to vector<1x8xf32>
    %cst_0 = arith.constant 0.000000e+00 : f32
    %1 = vector.broadcast %cst_0 : f32 to vector<1x8xf32>
    %cst_1 = arith.constant 0.000000e+00 : f32
    %2 = vector.broadcast %cst_1 : f32 to vector<64x8xf32>
    %c0 = arith.constant 0 : index
    %c8 = arith.constant 8 : index
    %c0_2 = arith.constant 0 : index
    %3 = vector.load %arg1[%c0, %c8, %c0_2] : memref<1x80x96xbf16, #tpu.memory_space<vmem>>, vector<1x64x96xbf16>
    %4 = vector.shape_cast %3 : vector<1x64x96xbf16> to vector<64x96xbf16>
    %c0_3 = arith.constant 0 : index
    %c0_4 = arith.constant 0 : index
    %c0_5 = arith.constant 0 : index
    %c0_6 = arith.constant 0 : index
    %5 = vector.load %arg2[%c0_3, %c0_4, %c0_5, %c0_6] : memref<4x2x96x8xbf16, #tpu.memory_space<vmem>>, vector<1x1x96x8xbf16>
    %6 = vector.shape_cast %5 : vector<1x1x96x8xbf16> to vector<96x8xbf16>
    %cst_7 = arith.constant dense<0.000000e+00> : vector<64x8xf32>
    %7 = tpu.matmul %4, %6, %cst_7 {dimension_numbers = #tpu.dot_dimension_numbers<[1], [0], [0], [1], [0, 0, 1, 1], [], []>} : vector<64x96xbf16>, vector<96x8xbf16>, vector<64x8xf32> -> vector<64x8xf32>
    %8 = arith.addf %2, %7 : vector<64x8xf32>
    %c0_8 = arith.constant 0 : index
    %c0_9 = arith.constant 0 : index
    %c0_10 = arith.constant 0 : index
    %9 = vector.load %arg1[%c0_8, %c0_9, %c0_10] : memref<1x80x96xbf16, #tpu.memory_space<vmem>>, vector<1x64x96xbf16>
    %10 = vector.shape_cast %9 : vector<1x64x96xbf16> to vector<64x96xbf16>
    %c0_11 = arith.constant 0 : index
    %c1 = arith.constant 1 : index
    %c0_12 = arith.constant 0 : index
    %c0_13 = arith.constant 0 : index
    %11 = vector.load %arg2[%c0_11, %c1, %c0_12, %c0_13] : memref<4x2x96x8xbf16, #tpu.memory_space<vmem>>, vector<1x1x96x8xbf16>
    %12 = vector.shape_cast %11 : vector<1x1x96x8xbf16> to vector<96x8xbf16>
    %cst_14 = arith.constant dense<0.000000e+00> : vector<64x8xf32>
    %13 = tpu.matmul %10, %12, %cst_14 {dimension_numbers = #tpu.dot_dimension_numbers<[1], [0], [0], [1], [0, 0, 1, 1], [], []>} : vector<64x96xbf16>, vector<96x8xbf16>, vector<64x8xf32> -> vector<64x8xf32>
    %14 = arith.addf %8, %13 : vector<64x8xf32>
    %15 = arith.truncf %14 : vector<64x8xf32> to vector<64x8xbf16>
    %c0_15 = arith.constant 0 : index
    %c0_16 = arith.constant 0 : index
    %c0_17 = arith.constant 0 : index
    %c0_18 = arith.constant 0 : index
    %16 = vector.load %arg3[%c0_15, %c0_16, %c0_17, %c0_18] : memref<1x4x64x8xbf16, #tpu.memory_space<vmem>>, vector<1x1x64x8xbf16>
    %17 = vector.shape_cast %16 : vector<1x1x64x8xbf16> to vector<64x8xbf16>
    %18 = vector.shape_cast %15 : vector<64x8xbf16> to vector<1x1x64x8xbf16>
    tpu.vector_store %arg3[%c0_15, %c0_16, %c0_17, %c0_18], %18 {strides = array<i32>} : memref<1x4x64x8xbf16, #tpu.memory_space<vmem>>, vector<1x1x64x8xbf16>,
    %cst_19 = arith.constant dense<0.000000e+00> : vector<8xf32>
    %19 = vector.multi_reduction <add>, %14, %cst_19 [0] : vector<64x8xf32> to vector<8xf32>
    %20 = vector.shape_cast %19 : vector<8xf32> to vector<1x8xf32>
    %21 = arith.addf %0, %20 : vector<1x8xf32>
    %22 = arith.mulf %14, %14 : vector<64x8xf32>
    %cst_20 = arith.constant dense<0.000000e+00> : vector<8xf32>
    %23 = vector.multi_reduction <add>, %22, %cst_20 [0] : vector<64x8xf32> to vector<8xf32>
    %24 = vector.shape_cast %23 : vector<8xf32> to vector<1x8xf32>
    %25 = arith.addf %1, %24 : vector<1x8xf32>
    %cst_21 = arith.constant 0.000000e+00 : f32
    %26 = vector.broadcast %cst_21 : f32 to vector<64x8xf32>
    %c0_22 = arith.constant 0 : index
    %c8_23 = arith.constant 8 : index
    %c0_24 = arith.constant 0 : index
    %27 = vector.load %arg1[%c0_22, %c8_23, %c0_24] : memref<1x80x96xbf16, #tpu.memory_space<vmem>>, vector<1x64x96xbf16>
    %28 = vector.shape_cast %27 : vector<1x64x96xbf16> to vector<64x96xbf16>
    %c1_25 = arith.constant 1 : index
    %c0_26 = arith.constant 0 : index
    %c0_27 = arith.constant 0 : index
    %c0_28 = arith.constant 0 : index
    %29 = vector.load %arg2[%c1_25, %c0_26, %c0_27, %c0_28] : memref<4x2x96x8xbf16, #tpu.memory_space<vmem>>, vector<1x1x96x8xbf16>
    %30 = vector.shape_cast %29 : vector<1x1x96x8xbf16> to vector<96x8xbf16>
    %cst_29 = arith.constant dense<0.000000e+00> : vector<64x8xf32>
    %31 = tpu.matmul %28, %30, %cst_29 {dimension_numbers = #tpu.dot_dimension_numbers<[1], [0], [0], [1], [0, 0, 1, 1], [], []>} : vector<64x96xbf16>, vector<96x8xbf16>, vector<64x8xf32> -> vector<64x8xf32>
    %32 = arith.addf %26, %31 : vector<64x8xf32>
    %c0_30 = arith.constant 0 : index
    %c0_31 = arith.constant 0 : index
    %c0_32 = arith.constant 0 : index
    %33 = vector.load %arg1[%c0_30, %c0_31, %c0_32] : memref<1x80x96xbf16, #tpu.memory_space<vmem>>, vector<1x64x96xbf16>
    %34 = vector.shape_cast %33 : vector<1x64x96xbf16> to vector<64x96xbf16>
    %c1_33 = arith.constant 1 : index
    %c1_34 = arith.constant 1 : index
    %c0_35 = arith.constant 0 : index
    %c0_36 = arith.constant 0 : index
    %35 = vector.load %arg2[%c1_33, %c1_34, %c0_35, %c0_36] : memref<4x2x96x8xbf16, #tpu.memory_space<vmem>>, vector<1x1x96x8xbf16>
    %36 = vector.shape_cast %35 : vector<1x1x96x8xbf16> to vector<96x8xbf16>
    %cst_37 = arith.constant dense<0.000000e+00> : vector<64x8xf32>
    %37 = tpu.matmul %34, %36, %cst_37 {dimension_numbers = #tpu.dot_dimension_numbers<[1], [0], [0], [1], [0, 0, 1, 1], [], []>} : vector<64x96xbf16>, vector<96x8xbf16>, vector<64x8xf32> -> vector<64x8xf32>
    %38 = arith.addf %32, %37 : vector<64x8xf32>
    %39 = arith.truncf %38 : vector<64x8xf32> to vector<64x8xbf16>
    %c0_38 = arith.constant 0 : index
    %c1_39 = arith.constant 1 : index
    %c0_40 = arith.constant 0 : index
    %c0_41 = arith.constant 0 : index
    %40 = vector.load %arg3[%c0_38, %c1_39, %c0_40, %c0_41] : memref<1x4x64x8xbf16, #tpu.memory_space<vmem>>, vector<1x1x64x8xbf16>
    %41 = vector.shape_cast %40 : vector<1x1x64x8xbf16> to vector<64x8xbf16>
    %42 = vector.shape_cast %39 : vector<64x8xbf16> to vector<1x1x64x8xbf16>
    tpu.vector_store %arg3[%c0_38, %c1_39, %c0_40, %c0_41], %42 {strides = array<i32>} : memref<1x4x64x8xbf16, #tpu.memory_space<vmem>>, vector<1x1x64x8xbf16>,
    %cst_42 = arith.constant dense<0.000000e+00> : vector<8xf32>
    %43 = vector.multi_reduction <add>, %38, %cst_42 [0] : vector<64x8xf32> to vector<8xf32>
    %44 = vector.shape_cast %43 : vector<8xf32> to vector<1x8xf32>
    %45 = arith.addf %21, %44 : vector<1x8xf32>
    %46 = arith.mulf %38, %38 : vector<64x8xf32>
    %cst_43 = arith.constant dense<0.000000e+00> : vector<8xf32>
    %47 = vector.multi_reduction <add>, %46, %cst_43 [0] : vector<64x8xf32> to vector<8xf32>
    %48 = vector.shape_cast %47 : vector<8xf32> to vector<1x8xf32>
    %49 = arith.addf %25, %48 : vector<1x8xf32>
    %cst_44 = arith.constant 0.000000e+00 : f32
    %50 = vector.broadcast %cst_44 : f32 to vector<64x8xf32>
    %c0_45 = arith.constant 0 : index
    %c16 = arith.constant 16 : index
    %c0_46 = arith.constant 0 : index
    %51 = vector.load %arg1[%c0_45, %c16, %c0_46] : memref<1x80x96xbf16, #tpu.memory_space<vmem>>, vector<1x64x96xbf16>
    %52 = vector.shape_cast %51 : vector<1x64x96xbf16> to vector<64x96xbf16>
    %c2 = arith.constant 2 : index
    %c0_47 = arith.constant 0 : index
    %c0_48 = arith.constant 0 : index
    %c0_49 = arith.constant 0 : index
    %53 = vector.load %arg2[%c2, %c0_47, %c0_48, %c0_49] : memref<4x2x96x8xbf16, #tpu.memory_space<vmem>>, vector<1x1x96x8xbf16>
    %54 = vector.shape_cast %53 : vector<1x1x96x8xbf16> to vector<96x8xbf16>
    %cst_50 = arith.constant dense<0.000000e+00> : vector<64x8xf32>
    %55 = tpu.matmul %52, %54, %cst_50 {dimension_numbers = #tpu.dot_dimension_numbers<[1], [0], [0], [1], [0, 0, 1, 1], [], []>} : vector<64x96xbf16>, vector<96x8xbf16>, vector<64x8xf32> -> vector<64x8xf32>
    %56 = arith.addf %50, %55 : vector<64x8xf32>
    %c0_51 = arith.constant 0 : index
    %c8_52 = arith.constant 8 : index
    %c0_53 = arith.constant 0 : index
    %57 = vector.load %arg1[%c0_51, %c8_52, %c0_53] : memref<1x80x96xbf16, #tpu.memory_space<vmem>>, vector<1x64x96xbf16>
    %58 = vector.shape_cast %57 : vector<1x64x96xbf16> to vector<64x96xbf16>
    %c2_54 = arith.constant 2 : index
    %c1_55 = arith.constant 1 : index
    %c0_56 = arith.constant 0 : index
    %c0_57 = arith.constant 0 : index
    %59 = vector.load %arg2[%c2_54, %c1_55, %c0_56, %c0_57] : memref<4x2x96x8xbf16, #tpu.memory_space<vmem>>, vector<1x1x96x8xbf16>
    %60 = vector.shape_cast %59 : vector<1x1x96x8xbf16> to vector<96x8xbf16>
    %cst_58 = arith.constant dense<0.000000e+00> : vector<64x8xf32>
    %61 = tpu.matmul %58, %60, %cst_58 {dimension_numbers = #tpu.dot_dimension_numbers<[1], [0], [0], [1], [0, 0, 1, 1], [], []>} : vector<64x96xbf16>, vector<96x8xbf16>, vector<64x8xf32> -> vector<64x8xf32>
    %62 = arith.addf %56, %61 : vector<64x8xf32>
    %63 = arith.truncf %62 : vector<64x8xf32> to vector<64x8xbf16>
    %c0_59 = arith.constant 0 : index
    %c2_60 = arith.constant 2 : index
    %c0_61 = arith.constant 0 : index
    %c0_62 = arith.constant 0 : index
    %64 = vector.load %arg3[%c0_59, %c2_60, %c0_61, %c0_62] : memref<1x4x64x8xbf16, #tpu.memory_space<vmem>>, vector<1x1x64x8xbf16>
    %65 = vector.shape_cast %64 : vector<1x1x64x8xbf16> to vector<64x8xbf16>
    %66 = vector.shape_cast %63 : vector<64x8xbf16> to vector<1x1x64x8xbf16>
    tpu.vector_store %arg3[%c0_59, %c2_60, %c0_61, %c0_62], %66 {strides = array<i32>} : memref<1x4x64x8xbf16, #tpu.memory_space<vmem>>, vector<1x1x64x8xbf16>,
    %cst_63 = arith.constant dense<0.000000e+00> : vector<8xf32>
    %67 = vector.multi_reduction <add>, %62, %cst_63 [0] : vector<64x8xf32> to vector<8xf32>
    %68 = vector.shape_cast %67 : vector<8xf32> to vector<1x8xf32>
    %69 = arith.addf %45, %68 : vector<1x8xf32>
    %70 = arith.mulf %62, %62 : vector<64x8xf32>
    %cst_64 = arith.constant dense<0.000000e+00> : vector<8xf32>
    %71 = vector.multi_reduction <add>, %70, %cst_64 [0] : vector<64x8xf32> to vector<8xf32>
    %72 = vector.shape_cast %71 : vector<8xf32> to vector<1x8xf32>
    %73 = arith.addf %49, %72 : vector<1x8xf32>
    %cst_65 = arith.constant 0.000000e+00 : f32
    %74 = vector.broadcast %cst_65 : f32 to vector<64x8xf32>
    %c0_66 = arith.constant 0 : index
    %c16_67 = arith.constant 16 : index
    %c0_68 = arith.constant 0 : index
    %75 = vector.load %arg1[%c0_66, %c16_67, %c0_68] : memref<1x80x96xbf16, #tpu.memory_space<vmem>>, vector<1x64x96xbf16>
    %76 = vector.shape_cast %75 : vector<1x64x96xbf16> to vector<64x96xbf16>
    %c3 = arith.constant 3 : index
    %c0_69 = arith.constant 0 : index
    %c0_70 = arith.constant 0 : index
    %c0_71 = arith.constant 0 : index
    %77 = vector.load %arg2[%c3, %c0_69, %c0_70, %c0_71] : memref<4x2x96x8xbf16, #tpu.memory_space<vmem>>, vector<1x1x96x8xbf16>
    %78 = vector.shape_cast %77 : vector<1x1x96x8xbf16> to vector<96x8xbf16>
    %cst_72 = arith.constant dense<0.000000e+00> : vector<64x8xf32>
    %79 = tpu.matmul %76, %78, %cst_72 {dimension_numbers = #tpu.dot_dimension_numbers<[1], [0], [0], [1], [0, 0, 1, 1], [], []>} : vector<64x96xbf16>, vector<96x8xbf16>, vector<64x8xf32> -> vector<64x8xf32>
    %80 = arith.addf %74, %79 : vector<64x8xf32>
    %c0_73 = arith.constant 0 : index
    %c8_74 = arith.constant 8 : index
    %c0_75 = arith.constant 0 : index
    %81 = vector.load %arg1[%c0_73, %c8_74, %c0_75] : memref<1x80x96xbf16, #tpu.memory_space<vmem>>, vector<1x64x96xbf16>
    %82 = vector.shape_cast %81 : vector<1x64x96xbf16> to vector<64x96xbf16>
    %c3_76 = arith.constant 3 : index
    %c1_77 = arith.constant 1 : index
    %c0_78 = arith.constant 0 : index
    %c0_79 = arith.constant 0 : index
    %83 = vector.load %arg2[%c3_76, %c1_77, %c0_78, %c0_79] : memref<4x2x96x8xbf16, #tpu.memory_space<vmem>>, vector<1x1x96x8xbf16>
    %84 = vector.shape_cast %83 : vector<1x1x96x8xbf16> to vector<96x8xbf16>
    %cst_80 = arith.constant dense<0.000000e+00> : vector<64x8xf32>
    %85 = tpu.matmul %82, %84, %cst_80 {dimension_numbers = #tpu.dot_dimension_numbers<[1], [0], [0], [1], [0, 0, 1, 1], [], []>} : vector<64x96xbf16>, vector<96x8xbf16>, vector<64x8xf32> -> vector<64x8xf32>
    %86 = arith.addf %80, %85 : vector<64x8xf32>
    %87 = arith.truncf %86 : vector<64x8xf32> to vector<64x8xbf16>
    %c0_81 = arith.constant 0 : index
    %c3_82 = arith.constant 3 : index
    %c0_83 = arith.constant 0 : index
    %c0_84 = arith.constant 0 : index
    %88 = vector.load %arg3[%c0_81, %c3_82, %c0_83, %c0_84] : memref<1x4x64x8xbf16, #tpu.memory_space<vmem>>, vector<1x1x64x8xbf16>
    %89 = vector.shape_cast %88 : vector<1x1x64x8xbf16> to vector<64x8xbf16>
    %90 = vector.shape_cast %87 : vector<64x8xbf16> to vector<1x1x64x8xbf16>
    tpu.vector_store %arg3[%c0_81, %c3_82, %c0_83, %c0_84], %90 {strides = array<i32>} : memref<1x4x64x8xbf16, #tpu.memory_space<vmem>>, vector<1x1x64x8xbf16>,
    %cst_85 = arith.constant dense<0.000000e+00> : vector<8xf32>
    %91 = vector.multi_reduction <add>, %86, %cst_85 [0] : vector<64x8xf32> to vector<8xf32>
    %92 = vector.shape_cast %91 : vector<8xf32> to vector<1x8xf32>
    %93 = arith.addf %69, %92 : vector<1x8xf32>
    %94 = arith.mulf %86, %86 : vector<64x8xf32>
    %cst_86 = arith.constant dense<0.000000e+00> : vector<8xf32>
    %95 = vector.multi_reduction <add>, %94, %cst_86 [0] : vector<64x8xf32> to vector<8xf32>
    %96 = vector.shape_cast %95 : vector<8xf32> to vector<1x8xf32>
    %97 = arith.addf %73, %96 : vector<1x8xf32>
    %c0_87 = arith.constant 0 : index
    %c0_88 = arith.constant 0 : index
    %c0_89 = arith.constant 0 : index
    %98 = vector.load %arg4[%c0_87, %c0_88, %c0_89] : memref<1x2x8xf32, #tpu.memory_space<vmem>>, vector<1x1x8xf32>
    %99 = vector.shape_cast %98 : vector<1x1x8xf32> to vector<1x8xf32>
    %100 = vector.shape_cast %93 : vector<1x8xf32> to vector<1x1x8xf32>
    tpu.vector_store %arg4[%c0_87, %c0_88, %c0_89], %100 {strides = array<i32>} : memref<1x2x8xf32, #tpu.memory_space<vmem>>, vector<1x1x8xf32>,
    %c0_90 = arith.constant 0 : index
    %c1_91 = arith.constant 1 : index
    %c0_92 = arith.constant 0 : index
    %101 = vector.load %arg4[%c0_90, %c1_91, %c0_92] : memref<1x2x8xf32, #tpu.memory_space<vmem>>, vector<1x1x8xf32>
    %102 = vector.shape_cast %101 : vector<1x1x8xf32> to vector<1x8xf32>
    %103 = vector.shape_cast %97 : vector<1x8xf32> to vector<1x1x8xf32>
    tpu.vector_store %arg4[%c0_90, %c1_91, %c0_92], %103 {strides = array<i32>} : memref<1x2x8xf32, #tpu.memory_space<vmem>>, vector<1x1x8xf32>,
    return
  }
  func.func @transform_0(%arg0: i32) -> (i32, i32, i32) {
    %c0_i32 = arith.constant 0 : i32
    %c0_i32_0 = arith.constant 0 : i32
    %c0_i32_1 = arith.constant 0 : i32
    return %arg0, %c0_i32, %c0_i32_0 : i32, i32, i32
  }
  func.func @transform_1(%arg0: i32) -> (i32, i32, i32, i32) {
    %c0_i32 = arith.constant 0 : i32
    %c0_i32_0 = arith.constant 0 : i32
    %c0_i32_1 = arith.constant 0 : i32
    %c0_i32_2 = arith.constant 0 : i32
    %c0_i32_3 = arith.constant 0 : i32
    return %c0_i32, %c0_i32_0, %c0_i32_1, %c0_i32_2 : i32, i32, i32, i32
  }
  func.func @transform_2(%arg0: i32) -> (i32, i32, i32, i32) {
    %c0_i32 = arith.constant 0 : i32
    %c0_i32_0 = arith.constant 0 : i32
    %c0_i32_1 = arith.constant 0 : i32
    %c0_i32_2 = arith.constant 0 : i32
    return %arg0, %c0_i32, %c0_i32_0, %c0_i32_1 : i32, i32, i32, i32
  }
  func.func @transform_3(%arg0: i32) -> (i32, i32, i32) {
    %c0_i32 = arith.constant 0 : i32
    %c0_i32_0 = arith.constant 0 : i32
    %c0_i32_1 = arith.constant 0 : i32
    return %arg0, %c0_i32, %c0_i32_0 : i32, i32, i32
  }
}

module attributes {stable_mosaic.version = 11 : i64} {
  func.func @_conv_up_kernel(%arg0: i32, %arg1: memref<1x288x48xbf16, #tpu.memory_space<vmem>>, %arg2: memref<4x2x48x2xbf16, #tpu.memory_space<vmem>>, %arg3: memref<1x2xf32, #tpu.memory_space<vmem>>, %arg4: memref<1x4x256x2xf32, #tpu.memory_space<vmem>>) attributes {dimension_semantics = [#tpu.dimension_semantics<parallel>], iteration_bounds = array<i64: 2>, scalar_prefetch = 0 : i64, scratch_operands = 0 : i64, tpu.core_type = #tpu.core_type<tc>, window_params = [{transform_indices = @transform_0, window_bounds = array<i64: 1, 288, 48>}, {pipeline_mode = #tpu.pipeline_mode<synchronous>, transform_indices = @transform_1, window_bounds = array<i64: 4, 2, 48, 2>}, {pipeline_mode = #tpu.pipeline_mode<synchronous>, transform_indices = @transform_2, window_bounds = array<i64: 1, 2>}, {transform_indices = @transform_3, window_bounds = array<i64: 1, 4, 256, 2>}]} {
    %cst = arith.constant 0.000000e+00 : f32
    %0 = vector.broadcast %cst : f32 to vector<256x2xf32>
    %c0 = arith.constant 0 : index
    %c16 = arith.constant 16 : index
    %c0_0 = arith.constant 0 : index
    %1 = vector.load %arg1[%c0, %c16, %c0_0] : memref<1x288x48xbf16, #tpu.memory_space<vmem>>, vector<1x256x48xbf16>
    %2 = vector.shape_cast %1 : vector<1x256x48xbf16> to vector<256x48xbf16>
    %c0_1 = arith.constant 0 : index
    %c0_2 = arith.constant 0 : index
    %c0_3 = arith.constant 0 : index
    %c0_4 = arith.constant 0 : index
    %3 = vector.load %arg2[%c0_1, %c0_2, %c0_3, %c0_4] : memref<4x2x48x2xbf16, #tpu.memory_space<vmem>>, vector<1x1x48x2xbf16>
    %4 = vector.shape_cast %3 : vector<1x1x48x2xbf16> to vector<48x2xbf16>
    %cst_5 = arith.constant dense<0.000000e+00> : vector<256x2xf32>
    %5 = tpu.matmul %2, %4, %cst_5 {dimension_numbers = #tpu.dot_dimension_numbers<[1], [0], [0], [1], [0, 0, 1, 1], [], []>} : vector<256x48xbf16>, vector<48x2xbf16>, vector<256x2xf32> -> vector<256x2xf32>
    %6 = arith.addf %0, %5 : vector<256x2xf32>
    %c0_6 = arith.constant 0 : index
    %c0_7 = arith.constant 0 : index
    %c0_8 = arith.constant 0 : index
    %7 = vector.load %arg1[%c0_6, %c0_7, %c0_8] : memref<1x288x48xbf16, #tpu.memory_space<vmem>>, vector<1x256x48xbf16>
    %8 = vector.shape_cast %7 : vector<1x256x48xbf16> to vector<256x48xbf16>
    %c0_9 = arith.constant 0 : index
    %c1 = arith.constant 1 : index
    %c0_10 = arith.constant 0 : index
    %c0_11 = arith.constant 0 : index
    %9 = vector.load %arg2[%c0_9, %c1, %c0_10, %c0_11] : memref<4x2x48x2xbf16, #tpu.memory_space<vmem>>, vector<1x1x48x2xbf16>
    %10 = vector.shape_cast %9 : vector<1x1x48x2xbf16> to vector<48x2xbf16>
    %cst_12 = arith.constant dense<0.000000e+00> : vector<256x2xf32>
    %11 = tpu.matmul %8, %10, %cst_12 {dimension_numbers = #tpu.dot_dimension_numbers<[1], [0], [0], [1], [0, 0, 1, 1], [], []>} : vector<256x48xbf16>, vector<48x2xbf16>, vector<256x2xf32> -> vector<256x2xf32>
    %12 = arith.addf %6, %11 : vector<256x2xf32>
    %c0_13 = arith.constant 0 : index
    %c0_14 = arith.constant 0 : index
    %13 = vector.load %arg3[%c0_13, %c0_14] : memref<1x2xf32, #tpu.memory_space<vmem>>, vector<1x2xf32>
    %14 = vector.broadcast %13 : vector<1x2xf32> to vector<256x2xf32>
    %15 = arith.addf %12, %14 : vector<256x2xf32>
    %16 = math.tanh %15 : vector<256x2xf32>
    %c0_15 = arith.constant 0 : index
    %c0_16 = arith.constant 0 : index
    %c0_17 = arith.constant 0 : index
    %c0_18 = arith.constant 0 : index
    %17 = vector.load %arg4[%c0_15, %c0_16, %c0_17, %c0_18] : memref<1x4x256x2xf32, #tpu.memory_space<vmem>>, vector<1x1x256x2xf32>
    %18 = vector.shape_cast %17 : vector<1x1x256x2xf32> to vector<256x2xf32>
    %19 = vector.shape_cast %16 : vector<256x2xf32> to vector<1x1x256x2xf32>
    tpu.vector_store %arg4[%c0_15, %c0_16, %c0_17, %c0_18], %19 {strides = array<i32>} : memref<1x4x256x2xf32, #tpu.memory_space<vmem>>, vector<1x1x256x2xf32>,
    %cst_19 = arith.constant 0.000000e+00 : f32
    %20 = vector.broadcast %cst_19 : f32 to vector<256x2xf32>
    %c0_20 = arith.constant 0 : index
    %c16_21 = arith.constant 16 : index
    %c0_22 = arith.constant 0 : index
    %21 = vector.load %arg1[%c0_20, %c16_21, %c0_22] : memref<1x288x48xbf16, #tpu.memory_space<vmem>>, vector<1x256x48xbf16>
    %22 = vector.shape_cast %21 : vector<1x256x48xbf16> to vector<256x48xbf16>
    %c1_23 = arith.constant 1 : index
    %c0_24 = arith.constant 0 : index
    %c0_25 = arith.constant 0 : index
    %c0_26 = arith.constant 0 : index
    %23 = vector.load %arg2[%c1_23, %c0_24, %c0_25, %c0_26] : memref<4x2x48x2xbf16, #tpu.memory_space<vmem>>, vector<1x1x48x2xbf16>
    %24 = vector.shape_cast %23 : vector<1x1x48x2xbf16> to vector<48x2xbf16>
    %cst_27 = arith.constant dense<0.000000e+00> : vector<256x2xf32>
    %25 = tpu.matmul %22, %24, %cst_27 {dimension_numbers = #tpu.dot_dimension_numbers<[1], [0], [0], [1], [0, 0, 1, 1], [], []>} : vector<256x48xbf16>, vector<48x2xbf16>, vector<256x2xf32> -> vector<256x2xf32>
    %26 = arith.addf %20, %25 : vector<256x2xf32>
    %c0_28 = arith.constant 0 : index
    %c0_29 = arith.constant 0 : index
    %c0_30 = arith.constant 0 : index
    %27 = vector.load %arg1[%c0_28, %c0_29, %c0_30] : memref<1x288x48xbf16, #tpu.memory_space<vmem>>, vector<1x256x48xbf16>
    %28 = vector.shape_cast %27 : vector<1x256x48xbf16> to vector<256x48xbf16>
    %c1_31 = arith.constant 1 : index
    %c1_32 = arith.constant 1 : index
    %c0_33 = arith.constant 0 : index
    %c0_34 = arith.constant 0 : index
    %29 = vector.load %arg2[%c1_31, %c1_32, %c0_33, %c0_34] : memref<4x2x48x2xbf16, #tpu.memory_space<vmem>>, vector<1x1x48x2xbf16>
    %30 = vector.shape_cast %29 : vector<1x1x48x2xbf16> to vector<48x2xbf16>
    %cst_35 = arith.constant dense<0.000000e+00> : vector<256x2xf32>
    %31 = tpu.matmul %28, %30, %cst_35 {dimension_numbers = #tpu.dot_dimension_numbers<[1], [0], [0], [1], [0, 0, 1, 1], [], []>} : vector<256x48xbf16>, vector<48x2xbf16>, vector<256x2xf32> -> vector<256x2xf32>
    %32 = arith.addf %26, %31 : vector<256x2xf32>
    %c0_36 = arith.constant 0 : index
    %c0_37 = arith.constant 0 : index
    %33 = vector.load %arg3[%c0_36, %c0_37] : memref<1x2xf32, #tpu.memory_space<vmem>>, vector<1x2xf32>
    %34 = vector.broadcast %33 : vector<1x2xf32> to vector<256x2xf32>
    %35 = arith.addf %32, %34 : vector<256x2xf32>
    %36 = math.tanh %35 : vector<256x2xf32>
    %c0_38 = arith.constant 0 : index
    %c1_39 = arith.constant 1 : index
    %c0_40 = arith.constant 0 : index
    %c0_41 = arith.constant 0 : index
    %37 = vector.load %arg4[%c0_38, %c1_39, %c0_40, %c0_41] : memref<1x4x256x2xf32, #tpu.memory_space<vmem>>, vector<1x1x256x2xf32>
    %38 = vector.shape_cast %37 : vector<1x1x256x2xf32> to vector<256x2xf32>
    %39 = vector.shape_cast %36 : vector<256x2xf32> to vector<1x1x256x2xf32>
    tpu.vector_store %arg4[%c0_38, %c1_39, %c0_40, %c0_41], %39 {strides = array<i32>} : memref<1x4x256x2xf32, #tpu.memory_space<vmem>>, vector<1x1x256x2xf32>,
    %cst_42 = arith.constant 0.000000e+00 : f32
    %40 = vector.broadcast %cst_42 : f32 to vector<256x2xf32>
    %c0_43 = arith.constant 0 : index
    %c32 = arith.constant 32 : index
    %c0_44 = arith.constant 0 : index
    %41 = vector.load %arg1[%c0_43, %c32, %c0_44] : memref<1x288x48xbf16, #tpu.memory_space<vmem>>, vector<1x256x48xbf16>
    %42 = vector.shape_cast %41 : vector<1x256x48xbf16> to vector<256x48xbf16>
    %c2 = arith.constant 2 : index
    %c0_45 = arith.constant 0 : index
    %c0_46 = arith.constant 0 : index
    %c0_47 = arith.constant 0 : index
    %43 = vector.load %arg2[%c2, %c0_45, %c0_46, %c0_47] : memref<4x2x48x2xbf16, #tpu.memory_space<vmem>>, vector<1x1x48x2xbf16>
    %44 = vector.shape_cast %43 : vector<1x1x48x2xbf16> to vector<48x2xbf16>
    %cst_48 = arith.constant dense<0.000000e+00> : vector<256x2xf32>
    %45 = tpu.matmul %42, %44, %cst_48 {dimension_numbers = #tpu.dot_dimension_numbers<[1], [0], [0], [1], [0, 0, 1, 1], [], []>} : vector<256x48xbf16>, vector<48x2xbf16>, vector<256x2xf32> -> vector<256x2xf32>
    %46 = arith.addf %40, %45 : vector<256x2xf32>
    %c0_49 = arith.constant 0 : index
    %c16_50 = arith.constant 16 : index
    %c0_51 = arith.constant 0 : index
    %47 = vector.load %arg1[%c0_49, %c16_50, %c0_51] : memref<1x288x48xbf16, #tpu.memory_space<vmem>>, vector<1x256x48xbf16>
    %48 = vector.shape_cast %47 : vector<1x256x48xbf16> to vector<256x48xbf16>
    %c2_52 = arith.constant 2 : index
    %c1_53 = arith.constant 1 : index
    %c0_54 = arith.constant 0 : index
    %c0_55 = arith.constant 0 : index
    %49 = vector.load %arg2[%c2_52, %c1_53, %c0_54, %c0_55] : memref<4x2x48x2xbf16, #tpu.memory_space<vmem>>, vector<1x1x48x2xbf16>
    %50 = vector.shape_cast %49 : vector<1x1x48x2xbf16> to vector<48x2xbf16>
    %cst_56 = arith.constant dense<0.000000e+00> : vector<256x2xf32>
    %51 = tpu.matmul %48, %50, %cst_56 {dimension_numbers = #tpu.dot_dimension_numbers<[1], [0], [0], [1], [0, 0, 1, 1], [], []>} : vector<256x48xbf16>, vector<48x2xbf16>, vector<256x2xf32> -> vector<256x2xf32>
    %52 = arith.addf %46, %51 : vector<256x2xf32>
    %c0_57 = arith.constant 0 : index
    %c0_58 = arith.constant 0 : index
    %53 = vector.load %arg3[%c0_57, %c0_58] : memref<1x2xf32, #tpu.memory_space<vmem>>, vector<1x2xf32>
    %54 = vector.broadcast %53 : vector<1x2xf32> to vector<256x2xf32>
    %55 = arith.addf %52, %54 : vector<256x2xf32>
    %56 = math.tanh %55 : vector<256x2xf32>
    %c0_59 = arith.constant 0 : index
    %c2_60 = arith.constant 2 : index
    %c0_61 = arith.constant 0 : index
    %c0_62 = arith.constant 0 : index
    %57 = vector.load %arg4[%c0_59, %c2_60, %c0_61, %c0_62] : memref<1x4x256x2xf32, #tpu.memory_space<vmem>>, vector<1x1x256x2xf32>
    %58 = vector.shape_cast %57 : vector<1x1x256x2xf32> to vector<256x2xf32>
    %59 = vector.shape_cast %56 : vector<256x2xf32> to vector<1x1x256x2xf32>
    tpu.vector_store %arg4[%c0_59, %c2_60, %c0_61, %c0_62], %59 {strides = array<i32>} : memref<1x4x256x2xf32, #tpu.memory_space<vmem>>, vector<1x1x256x2xf32>,
    %cst_63 = arith.constant 0.000000e+00 : f32
    %60 = vector.broadcast %cst_63 : f32 to vector<256x2xf32>
    %c0_64 = arith.constant 0 : index
    %c32_65 = arith.constant 32 : index
    %c0_66 = arith.constant 0 : index
    %61 = vector.load %arg1[%c0_64, %c32_65, %c0_66] : memref<1x288x48xbf16, #tpu.memory_space<vmem>>, vector<1x256x48xbf16>
    %62 = vector.shape_cast %61 : vector<1x256x48xbf16> to vector<256x48xbf16>
    %c3 = arith.constant 3 : index
    %c0_67 = arith.constant 0 : index
    %c0_68 = arith.constant 0 : index
    %c0_69 = arith.constant 0 : index
    %63 = vector.load %arg2[%c3, %c0_67, %c0_68, %c0_69] : memref<4x2x48x2xbf16, #tpu.memory_space<vmem>>, vector<1x1x48x2xbf16>
    %64 = vector.shape_cast %63 : vector<1x1x48x2xbf16> to vector<48x2xbf16>
    %cst_70 = arith.constant dense<0.000000e+00> : vector<256x2xf32>
    %65 = tpu.matmul %62, %64, %cst_70 {dimension_numbers = #tpu.dot_dimension_numbers<[1], [0], [0], [1], [0, 0, 1, 1], [], []>} : vector<256x48xbf16>, vector<48x2xbf16>, vector<256x2xf32> -> vector<256x2xf32>
    %66 = arith.addf %60, %65 : vector<256x2xf32>
    %c0_71 = arith.constant 0 : index
    %c16_72 = arith.constant 16 : index
    %c0_73 = arith.constant 0 : index
    %67 = vector.load %arg1[%c0_71, %c16_72, %c0_73] : memref<1x288x48xbf16, #tpu.memory_space<vmem>>, vector<1x256x48xbf16>
    %68 = vector.shape_cast %67 : vector<1x256x48xbf16> to vector<256x48xbf16>
    %c3_74 = arith.constant 3 : index
    %c1_75 = arith.constant 1 : index
    %c0_76 = arith.constant 0 : index
    %c0_77 = arith.constant 0 : index
    %69 = vector.load %arg2[%c3_74, %c1_75, %c0_76, %c0_77] : memref<4x2x48x2xbf16, #tpu.memory_space<vmem>>, vector<1x1x48x2xbf16>
    %70 = vector.shape_cast %69 : vector<1x1x48x2xbf16> to vector<48x2xbf16>
    %cst_78 = arith.constant dense<0.000000e+00> : vector<256x2xf32>
    %71 = tpu.matmul %68, %70, %cst_78 {dimension_numbers = #tpu.dot_dimension_numbers<[1], [0], [0], [1], [0, 0, 1, 1], [], []>} : vector<256x48xbf16>, vector<48x2xbf16>, vector<256x2xf32> -> vector<256x2xf32>
    %72 = arith.addf %66, %71 : vector<256x2xf32>
    %c0_79 = arith.constant 0 : index
    %c0_80 = arith.constant 0 : index
    %73 = vector.load %arg3[%c0_79, %c0_80] : memref<1x2xf32, #tpu.memory_space<vmem>>, vector<1x2xf32>
    %74 = vector.broadcast %73 : vector<1x2xf32> to vector<256x2xf32>
    %75 = arith.addf %72, %74 : vector<256x2xf32>
    %76 = math.tanh %75 : vector<256x2xf32>
    %c0_81 = arith.constant 0 : index
    %c3_82 = arith.constant 3 : index
    %c0_83 = arith.constant 0 : index
    %c0_84 = arith.constant 0 : index
    %77 = vector.load %arg4[%c0_81, %c3_82, %c0_83, %c0_84] : memref<1x4x256x2xf32, #tpu.memory_space<vmem>>, vector<1x1x256x2xf32>
    %78 = vector.shape_cast %77 : vector<1x1x256x2xf32> to vector<256x2xf32>
    %79 = vector.shape_cast %76 : vector<256x2xf32> to vector<1x1x256x2xf32>
    tpu.vector_store %arg4[%c0_81, %c3_82, %c0_83, %c0_84], %79 {strides = array<i32>} : memref<1x4x256x2xf32, #tpu.memory_space<vmem>>, vector<1x1x256x2xf32>,
    return
  }
  func.func @transform_0(%arg0: i32) -> (i32, i32, i32) {
    %c0_i32 = arith.constant 0 : i32
    %c0_i32_0 = arith.constant 0 : i32
    %c0_i32_1 = arith.constant 0 : i32
    return %arg0, %c0_i32, %c0_i32_0 : i32, i32, i32
  }
  func.func @transform_1(%arg0: i32) -> (i32, i32, i32, i32) {
    %c0_i32 = arith.constant 0 : i32
    %c0_i32_0 = arith.constant 0 : i32
    %c0_i32_1 = arith.constant 0 : i32
    %c0_i32_2 = arith.constant 0 : i32
    %c0_i32_3 = arith.constant 0 : i32
    return %c0_i32, %c0_i32_0, %c0_i32_1, %c0_i32_2 : i32, i32, i32, i32
  }
  func.func @transform_2(%arg0: i32) -> (i32, i32) {
    %c0_i32 = arith.constant 0 : i32
    %c0_i32_0 = arith.constant 0 : i32
    %c0_i32_1 = arith.constant 0 : i32
    return %c0_i32, %c0_i32_0 : i32, i32
  }
  func.func @transform_3(%arg0: i32) -> (i32, i32, i32, i32) {
    %c0_i32 = arith.constant 0 : i32
    %c0_i32_0 = arith.constant 0 : i32
    %c0_i32_1 = arith.constant 0 : i32
    %c0_i32_2 = arith.constant 0 : i32
    return %arg0, %c0_i32, %c0_i32_0, %c0_i32_1 : i32, i32, i32, i32
  }
}

</mosaic_0001>

<bundles_post_ra>
// kernel: _lambda_.10
= control target key start
LH: loop header
LB: loop body
LE: loop exit
PB: predicated region body
PF: predicated region fallthrough
CT: control target
= control target key end

     0   :  { %s1142_s9 = smov 0   ;;  %s1286_s0 = inlined_call_operand.vmem [shape: bf16[2,272,8], index: 0, kind: input, shape index: {}]   ;;  %s1287_s1 = inlined_call_operand.vmem [shape: bf16[2,8,8], index: 1, kind: input, shape index: {}]   ;;  %s1288_s2 = inlined_call_operand.vmem [shape: bf16[2,256,8], index: 2, kind: output, shape index: {}]  }
   0x1 LB: > { %s864_s10 = sadd.s32 4294967295, %s1125_s9   ;;  %p868_p0 = scmp.ge.s32.totalorder %s1125_s9, 1  ;;  %s1125_s9 = sphi %s1142_s9, %s12_s9  }
   0x2   : > { %p112_p1 = scmp.lt.s32.totalorder %s1125_s9, 3 }
   0x4   : > { %p113_p2 = pnand %p868_p0, %p112_p1 }
   0x5   : > { %p134_p3 = scmp.lt.s32.totalorder (!%p113_p2), %s864_s10, 1 }
   0x6   : > { %116 = sbr.rel (%p113_p2) target bundleno = 277 (0x115), region = 28 }
   0xb   : > { %v872_v0 = vld [vmem:[%s1287_s1 + $0x4] sm:$0xf]  ;;  %vm311_vm0 = vcmask 1043456   ;;  %v177_v1 = vld [vmem:[%s1287_s1] sm:$0xf]  ;;  %s1290_s10 = smov (!%p134_p3, %s864_s10), 1 }
   0xc   : > { %1091 = vmatprep.subr.msk.bf16.mxu0 %vm311_vm0, %v872_v0  ;;  %1092 = vmatprep.subr.msk.bf16.mxu1 %vm311_vm0, %v177_v1  ;;  %v313_v2 = vsel %vm311_vm0, %v872_v0, 0  ;;  %v485_v3 = vsel %vm311_vm0, %v177_v1, 0  ;;  %s1093_s15 = smul.u32 136, %s1290_s10  ;;  %vm262_vm1 = vcmask 64512   ;;  %s956_s19 = sshll.u32 %s1290_s10, 7  ;;  %vm776_vm2 = vcmask 60416  }
   0xd   : > { %1024 = vmatpush3.bf16.msra.mxu0 %v313_v2  ;;  %1058 = vmatpush3.bf16.msra.mxu1 %v485_v3  ;;  %s1217_s22 = scalar_lea.vmem %s1288_s2, %s956_s19 }
   0xe   : > { %s1162_s18 = scalar_lea.vmem %s1286_s0, %s1093_s15 }
   0xf   : > { %v1102_v4 = vld [vmem:[%s1162_s18 + $0x8] sm:$0xff]   ;;  %v1103_v5 = vld [vmem:[%s1162_s18] sm:$0xff]   ;;  %v1104_v6 = vld [vmem:[%s1162_s18 + $0x10] sm:$0xff]  }
  0x10   : > { %1025 = vmatprep.mubr.msk.bf16.mxu0 %vm262_vm1, %v1102_v4  ;;  %1059 = vmatprep.mubr.msk.bf16.mxu1 %vm262_vm1, %v1103_v5  ;;  %v1105_v7 = vld [vmem:[%s1162_s18 + $0x18] sm:$0xff]   ;;  %v1106_v8 = vld [vmem:[%s1162_s18 + $0x20] sm:$0xff]   ;;  %v1107_v9 = vld [vmem:[%s1162_s18 + $0x28] sm:$0xff]  }
  0x11   : > { %1026 = vmatmul.mubr.msk.bf16.vlgmr.msra.gmra.mxu0 %vm262_vm1, %v1104_v6  ;;  %1060 = vmatmul.mubr.msk.bf16.vlgmr.msra.gmra.mxu1 %vm262_vm1, %v1102_v4  ;;  %v1108_v10 = vld [vmem:[%s1162_s18 + $0x30] sm:$0xff]   ;;  %v1109_v11 = vld [vmem:[%s1162_s18 + $0x38] sm:$0xff]   ;;  %v1110_v12 = vld [vmem:[%s1162_s18 + $0x40] sm:$0xff]  }
  0x12   : > { %1029 = vmatprep.mubr.msk.bf16.mxu0 %vm262_vm1, %v1105_v7  ;;  %1063 = vmatprep.mubr.msk.bf16.mxu1 %vm262_vm1, %v1104_v6  ;;  %v1111_v13 = vld [vmem:[%s1162_s18 + $0x48] sm:$0xff]   ;;  %v1112_v14 = vld [vmem:[%s1162_s18 + $0x50] sm:$0xff]   ;;  %v1113_v15 = vld [vmem:[%s1162_s18 + $0x58] sm:$0xff]  }
  0x13   : > { %v1114_v16 = vld [vmem:[%s1162_s18 + $0x60] sm:$0xff]   ;;  %v1115_v17 = vld [vmem:[%s1162_s18 + $0x68] sm:$0xff]   ;;  %v1116_v18 = vld [vmem:[%s1162_s18 + $0x70] sm:$0xff]  }
  0x14   : > { %v1117_v19 = vld [vmem:[%s1162_s18 + $0x78] sm:$0xff]   ;;  %v1118_v20 = vld [vmem:[%s1162_s18 + $0x80] sm:$0xff]  }
  0x19   : > { %1030 = vmatmul.mubr.msk.bf16.gmra.mxu0 %vm262_vm1, %v1106_v8  ;;  %1064 = vmatmul.mubr.msk.bf16.gmra.mxu1 %vm262_vm1, %v1105_v7 }
  0x1a   : > { %1033 = vmatprep.mubr.msk.bf16.mxu0 %vm262_vm1, %v1107_v9  ;;  %1067 = vmatprep.mubr.msk.bf16.mxu1 %vm262_vm1, %v1106_v8 }
  0x21   : > { %1034 = vmatmul.mubr.msk.bf16.gmra.mxu0 %vm262_vm1, %v1108_v10  ;;  %1068 = vmatmul.mubr.msk.bf16.gmra.mxu1 %vm262_vm1, %v1107_v9 }
  0x22   : > { %1037 = vmatprep.mubr.msk.bf16.mxu0 %vm262_vm1, %v1109_v11  ;;  %1071 = vmatprep.mubr.msk.bf16.mxu1 %vm262_vm1, %v1108_v10 }
  0x29   : > { %1038 = vmatmul.mubr.msk.bf16.gmra.mxu0 %vm262_vm1, %v1110_v12  ;;  %1072 = vmatmul.mubr.msk.bf16.gmra.mxu1 %vm262_vm1, %v1109_v11 }
  0x2a   : > { %1041 = vmatprep.mubr.msk.bf16.mxu0 %vm262_vm1, %v1111_v13  ;;  %1075 = vmatprep.mubr.msk.bf16.mxu1 %vm262_vm1, %v1110_v12 }
  0x31   : > { %1042 = vmatmul.mubr.msk.bf16.gmra.mxu0 %vm262_vm1, %v1112_v14  ;;  %1076 = vmatmul.mubr.msk.bf16.gmra.mxu1 %vm262_vm1, %v1111_v13 }
  0x32   : > { %1045 = vmatprep.mubr.msk.bf16.mxu0 %vm262_vm1, %v1113_v15  ;;  %1079 = vmatprep.mubr.msk.bf16.mxu1 %vm262_vm1, %v1112_v14 }
  0x39   : > { %1046 = vmatmul.mubr.msk.bf16.gmra.mxu0 %vm262_vm1, %v1114_v16  ;;  %1080 = vmatmul.mubr.msk.bf16.gmra.mxu1 %vm262_vm1, %v1113_v15 }
  0x3a   : > { %1049 = vmatprep.mubr.msk.bf16.mxu0 %vm262_vm1, %v1115_v17  ;;  %1083 = vmatprep.mubr.msk.bf16.mxu1 %vm262_vm1, %v1114_v16 }
  0x41   : > { %1050 = vmatmul.mubr.msk.bf16.gmra.mxu0 %vm262_vm1, %v1116_v18  ;;  %1084 = vmatmul.mubr.msk.bf16.gmra.mxu1 %vm262_vm1, %v1115_v17 }
  0x42   : > { %1053 = vmatprep.mubr.msk.bf16.mxu0 %vm262_vm1, %v1117_v19  ;;  %1087 = vmatprep.mubr.msk.bf16.mxu1 %vm262_vm1, %v1116_v18 }
  0x49   : > { %1054 = vmatmul.mubr.msk.bf16.gmra.mxu0 %vm262_vm1, %v1118_v20  ;;  %1088 = vmatmul.mubr.msk.bf16.gmra.mxu1 %vm262_vm1, %v1117_v19 }
  0xd1   : > { %v1027_v21 = vpop.f32.mrf.mxu0  ;;  %v1061_v22 = vpop.f32.mrf.mxu1 }
  0xd2   : > { %v530_v23 = vadd.f32 %v1061_v22, %v1027_v21 }
  0xd3   : > { %v349_v24 = vpop.f32.mrf.mxu0  ;;  %v521_v25 = vpop.f32.mrf.mxu1 }
  0xd4   : > { %v959_v26 = vpack.c.bf16 %v530_v23, %v530_v23  ;;  %v522_v27 = vadd.f32 %v521_v25, %v349_v24 }
  0xd5   : > { %v1028_v28 = vpop.f32.mrf.mxu0  ;;  %v1062_v29 = vpop.f32.mrf.mxu1 }
  0xd6   : > { %779 = vst.msk [vmem:[%s1217_s22 + $0x8] sm:$0xf] %vm776_vm2, %v959_v26  ;;  %v957_v30 = vpack.c.bf16 %v522_v27, %v522_v27  ;;  %v533_v31 = vadd.f32 %v1062_v29, %v1028_v28 }
  0xd7   : > { %v352_v32 = vpop.f32.mrf.mxu0  ;;  %v524_v33 = vpop.f32.mrf.mxu1 }
  0xd8   : > { %777 = vst.msk [vmem:[%s1217_s22] sm:$0xf] %vm776_vm2, %v957_v30  ;;  %v960_v34 = vpack.c.bf16 %v533_v31, %v533_v31  ;;  %v525_v35 = vadd.f32 %v524_v33, %v352_v32 }
  0xd9   : > { %v1031_v36 = vpop.f32.mrf.mxu0  ;;  %v1065_v37 = vpop.f32.mrf.mxu1 }
  0xda   : > { %780 = vst.msk [vmem:[%s1217_s22 + $0xc] sm:$0xf] %vm776_vm2, %v960_v34  ;;  %v958_v38 = vpack.c.bf16 %v525_v35, %v525_v35  ;;  %v546_v39 = vadd.f32 %v1065_v37, %v1031_v36 }
  0xdb   : > { %v365_v40 = vpop.f32.mrf.mxu0  ;;  %v537_v41 = vpop.f32.mrf.mxu1 }
  0xdc   : > { %778 = vst.msk [vmem:[%s1217_s22 + $0x4] sm:$0xf] %vm776_vm2, %v958_v38  ;;  %v963_v42 = vpack.c.bf16 %v546_v39, %v546_v39  ;;  %v538_v43 = vadd.f32 %v537_v41, %v365_v40 }
  0xdd   : > { %v1032_v44 = vpop.f32.mrf.mxu0  ;;  %v1066_v45 = vpop.f32.mrf.mxu1 }
  0xde   : > { %783 = vst.msk [vmem:[%s1217_s22 + $0x18] sm:$0xf] %vm776_vm2, %v963_v42  ;;  %v961_v46 = vpack.c.bf16 %v538_v43, %v538_v43  ;;  %v549_v47 = vadd.f32 %v1066_v45, %v1032_v44 }
  0xdf   : > { %v368_v48 = vpop.f32.mrf.mxu0  ;;  %v540_v49 = vpop.f32.mrf.mxu1 }
  0xe0   : > { %781 = vst.msk [vmem:[%s1217_s22 + $0x10] sm:$0xf] %vm776_vm2, %v961_v46  ;;  %v964_v50 = vpack.c.bf16 %v549_v47, %v549_v47  ;;  %v541_v51 = vadd.f32 %v540_v49, %v368_v48 }
  0xe1   : > { %v1035_v52 = vpop.f32.mrf.mxu0  ;;  %v1069_v53 = vpop.f32.mrf.mxu1 }
  0xe2   : > { %784 = vst.msk [vmem:[%s1217_s22 + $0x1c] sm:$0xf] %vm776_vm2, %v964_v50  ;;  %v962_v54 = vpack.c.bf16 %v541_v51, %v541_v51  ;;  %v562_v55 = vadd.f32 %v1069_v53, %v1035_v52 }
  0xe3   : > { %v381_v56 = vpop.f32.mrf.mxu0  ;;  %v553_v57 = vpop.f32.mrf.mxu1 }
  0xe4   : > { %782 = vst.msk [vmem:[%s1217_s22 + $0x14] sm:$0xf] %vm776_vm2, %v962_v54  ;;  %v967_v58 = vpack.c.bf16 %v562_v55, %v562_v55  ;;  %v554_v59 = vadd.f32 %v553_v57, %v381_v56 }
  0xe5   : > { %v1036_v60 = vpop.f32.mrf.mxu0  ;;  %v1070_v61 = vpop.f32.mrf.mxu1 }
  0xe6   : > { %787 = vst.msk [vmem:[%s1217_s22 + $0x28] sm:$0xf] %vm776_vm2, %v967_v58  ;;  %v965_v62 = vpack.c.bf16 %v554_v59, %v554_v59  ;;  %v565_v63 = vadd.f32 %v1070_v61, %v1036_v60 }
  0xe7   : > { %v384_v0 = vpop.f32.mrf.mxu0  ;;  %v556_v1 = vpop.f32.mrf.mxu1 }
  0xe8   : > { %785 = vst.msk [vmem:[%s1217_s22 + $0x20] sm:$0xf] %vm776_vm2, %v965_v62  ;;  %v968_v2 = vpack.c.bf16 %v565_v63, %v565_v63  ;;  %v557_v3 = vadd.f32 %v556_v1, %v384_v0 }
  0xe9   : > { %v1039_v4 = vpop.f32.mrf.mxu0  ;;  %v1073_v5 = vpop.f32.mrf.mxu1 }
  0xea   : > { %788 = vst.msk [vmem:[%s1217_s22 + $0x2c] sm:$0xf] %vm776_vm2, %v968_v2  ;;  %v966_v6 = vpack.c.bf16 %v557_v3, %v557_v3  ;;  %v578_v7 = vadd.f32 %v1073_v5, %v1039_v4 }
  0xeb   : > { %v397_v8 = vpop.f32.mrf.mxu0  ;;  %v569_v9 = vpop.f32.mrf.mxu1 }
  0xec   : > { %786 = vst.msk [vmem:[%s1217_s22 + $0x24] sm:$0xf] %vm776_vm2, %v966_v6  ;;  %v971_v10 = vpack.c.bf16 %v578_v7, %v578_v7  ;;  %v570_v11 = vadd.f32 %v569_v9, %v397_v8 }
  0xed   : > { %v1040_v12 = vpop.f32.mrf.mxu0  ;;  %v1074_v13 = vpop.f32.mrf.mxu1 }
  0xee   : > { %791 = vst.msk [vmem:[%s1217_s22 + $0x38] sm:$0xf] %vm776_vm2, %v971_v10  ;;  %v969_v14 = vpack.c.bf16 %v570_v11, %v570_v11  ;;  %v581_v15 = vadd.f32 %v1074_v13, %v1040_v12 }
  0xef   : > { %v400_v16 = vpop.f32.mrf.mxu0  ;;  %v572_v17 = vpop.f32.mrf.mxu1 }
  0xf0   : > { %789 = vst.msk [vmem:[%s1217_s22 + $0x30] sm:$0xf] %vm776_vm2, %v969_v14  ;;  %v972_v18 = vpack.c.bf16 %v581_v15, %v581_v15  ;;  %v573_v19 = vadd.f32 %v572_v17, %v400_v16 }
  0xf1   : > { %v1043_v20 = vpop.f32.mrf.mxu0  ;;  %v1077_v21 = vpop.f32.mrf.mxu1 }
  0xf2   : > { %792 = vst.msk [vmem:[%s1217_s22 + $0x3c] sm:$0xf] %vm776_vm2, %v972_v18  ;;  %v970_v22 = vpack.c.bf16 %v573_v19, %v573_v19  ;;  %v594_v23 = vadd.f32 %v1077_v21, %v1043_v20 }
  0xf3   : > { %v413_v24 = vpop.f32.mrf.mxu0  ;;  %v585_v25 = vpop.f32.mrf.mxu1 }
  0xf4   : > { %790 = vst.msk [vmem:[%s1217_s22 + $0x34] sm:$0xf] %vm776_vm2, %v970_v22  ;;  %v975_v26 = vpack.c.bf16 %v594_v23, %v594_v23  ;;  %v586_v27 = vadd.f32 %v585_v25, %v413_v24 }
  0xf5   : > { %v1044_v28 = vpop.f32.mrf.mxu0  ;;  %v1078_v29 = vpop.f32.mrf.mxu1 }
  0xf6   : > { %795 = vst.msk [vmem:[%s1217_s22 + $0x48] sm:$0xf] %vm776_vm2, %v975_v26  ;;  %v973_v30 = vpack.c.bf16 %v586_v27, %v586_v27  ;;  %v597_v31 = vadd.f32 %v1078_v29, %v1044_v28 }
  0xf7   : > { %v416_v32 = vpop.f32.mrf.mxu0  ;;  %v588_v33 = vpop.f32.mrf.mxu1 }
  0xf8   : > { %793 = vst.msk [vmem:[%s1217_s22 + $0x40] sm:$0xf] %vm776_vm2, %v973_v30  ;;  %v976_v34 = vpack.c.bf16 %v597_v31, %v597_v31  ;;  %v589_v35 = vadd.f32 %v588_v33, %v416_v32 }
  0xf9   : > { %v1047_v36 = vpop.f32.mrf.mxu0  ;;  %v1081_v37 = vpop.f32.mrf.mxu1 }
  0xfa   : > { %796 = vst.msk [vmem:[%s1217_s22 + $0x4c] sm:$0xf] %vm776_vm2, %v976_v34  ;;  %v974_v38 = vpack.c.bf16 %v589_v35, %v589_v35  ;;  %v610_v39 = vadd.f32 %v1081_v37, %v1047_v36 }
  0xfb   : > { %v429_v40 = vpop.f32.mrf.mxu0  ;;  %v601_v41 = vpop.f32.mrf.mxu1 }
  0xfc   : > { %794 = vst.msk [vmem:[%s1217_s22 + $0x44] sm:$0xf] %vm776_vm2, %v974_v38  ;;  %v979_v42 = vpack.c.bf16 %v610_v39, %v610_v39  ;;  %v602_v43 = vadd.f32 %v601_v41, %v429_v40 }
  0xfd   : > { %v1048_v44 = vpop.f32.mrf.mxu0  ;;  %v1082_v45 = vpop.f32.mrf.mxu1 }
  0xfe   : > { %799 = vst.msk [vmem:[%s1217_s22 + $0x58] sm:$0xf] %vm776_vm2, %v979_v42  ;;  %v977_v46 = vpack.c.bf16 %v602_v43, %v602_v43  ;;  %v613_v47 = vadd.f32 %v1082_v45, %v1048_v44 }
  0xff   : > { %v432_v48 = vpop.f32.mrf.mxu0  ;;  %v604_v49 = vpop.f32.mrf.mxu1 }
 0x100   : > { %797 = vst.msk [vmem:[%s1217_s22 + $0x50] sm:$0xf] %vm776_vm2, %v977_v46  ;;  %v980_v50 = vpack.c.bf16 %v613_v47, %v613_v47  ;;  %v605_v51 = vadd.f32 %v604_v49, %v432_v48 }
 0x101   : > { %v1051_v52 = vpop.f32.mrf.mxu0  ;;  %v1085_v53 = vpop.f32.mrf.mxu1 }
 0x102   : > { %800 = vst.msk [vmem:[%s1217_s22 + $0x5c] sm:$0xf] %vm776_vm2, %v980_v50  ;;  %v978_v54 = vpack.c.bf16 %v605_v51, %v605_v51  ;;  %v626_v55 = vadd.f32 %v1085_v53, %v1051_v52 }
 0x103   : > { %v445_v56 = vpop.f32.mrf.mxu0  ;;  %v617_v57 = vpop.f32.mrf.mxu1 }
 0x104   : > { %798 = vst.msk [vmem:[%s1217_s22 + $0x54] sm:$0xf] %vm776_vm2, %v978_v54  ;;  %v983_v58 = vpack.c.bf16 %v626_v55, %v626_v55  ;;  %v618_v59 = vadd.f32 %v617_v57, %v445_v56 }
 0x105   : > { %v1052_v60 = vpop.f32.mrf.mxu0  ;;  %v1086_v61 = vpop.f32.mrf.mxu1 }
 0x106   : > { %803 = vst.msk [vmem:[%s1217_s22 + $0x68] sm:$0xf] %vm776_vm2, %v983_v58  ;;  %v981_v62 = vpack.c.bf16 %v618_v59, %v618_v59  ;;  %v629_v63 = vadd.f32 %v1086_v61, %v1052_v60 }
 0x107   : > { %v448_v0 = vpop.f32.mrf.mxu0  ;;  %v620_v1 = vpop.f32.mrf.mxu1 }
 0x108   : > { %801 = vst.msk [vmem:[%s1217_s22 + $0x60] sm:$0xf] %vm776_vm2, %v981_v62  ;;  %v984_v2 = vpack.c.bf16 %v629_v63, %v629_v63  ;;  %v621_v3 = vadd.f32 %v620_v1, %v448_v0 }
 0x109   : > { %v1055_v4 = vpop.f32.mrf.mxu0  ;;  %v1089_v5 = vpop.f32.mrf.mxu1 }
 0x10a   : > { %804 = vst.msk [vmem:[%s1217_s22 + $0x6c] sm:$0xf] %vm776_vm2, %v984_v2  ;;  %v982_v6 = vpack.c.bf16 %v621_v3, %v621_v3  ;;  %v642_v7 = vadd.f32 %v1089_v5, %v1055_v4 }
 0x10b   : > { %v461_v8 = vpop.f32.mrf.mxu0  ;;  %v633_v9 = vpop.f32.mrf.mxu1 }
 0x10c   : > { %802 = vst.msk [vmem:[%s1217_s22 + $0x64] sm:$0xf] %vm776_vm2, %v982_v6  ;;  %v987_v10 = vpack.c.bf16 %v642_v7, %v642_v7  ;;  %v634_v11 = vadd.f32 %v633_v9, %v461_v8 }
 0x10d   : > { %v1056_v12 = vpop.f32.mrf.mxu0  ;;  %v1090_v13 = vpop.f32.mrf.mxu1 }
 0x10e   : > { %807 = vst.msk [vmem:[%s1217_s22 + $0x78] sm:$0xf] %vm776_vm2, %v987_v10  ;;  %v985_v14 = vpack.c.bf16 %v634_v11, %v634_v11  ;;  %v645_v15 = vadd.f32 %v1090_v13, %v1056_v12 }
 0x10f   : > { %v464_v16 = vpop.f32.mrf.mxu0  ;;  %v636_v17 = vpop.f32.mrf.mxu1 }
 0x110   : > { %805 = vst.msk [vmem:[%s1217_s22 + $0x70] sm:$0xf] %vm776_vm2, %v985_v14  ;;  %v988_v18 = vpack.c.bf16 %v645_v15, %v645_v15  ;;  %v637_v19 = vadd.f32 %v636_v17, %v464_v16 }
 0x112   : > { %808 = vst.msk [vmem:[%s1217_s22 + $0x7c] sm:$0xf] %vm776_vm2, %v988_v18  ;;  %v986_v20 = vpack.c.bf16 %v637_v19, %v637_v19 }
 0x114   : > { %806 = vst.msk [vmem:[%s1217_s22 + $0x74] sm:$0xf] %vm776_vm2, %v986_v20 }
 0x115 PF: > { %s12_s9 = sadd.s32 1, %s1125_s9  }
 0x116   : > { %p9_p4 = scmp.ge.s32.totalorder %s12_s9, 4  }
 0x118   :  { %11 = sbr.rel (!%p9_p4) target bundleno = 1 (0x1), region = 59 }

// kernel: _lambda_.11
= control target key start
LH: loop header
LB: loop body
LE: loop exit
PB: predicated region body
PF: predicated region fallthrough
CT: control target
= control target key end

     0   :  { %s780_s12 = smov 0   ;;  %s882_s0 = inlined_call_operand.vmem [shape: bf16[2,72,64], index: 0, kind: input, shape index: {}]   ;;  %s883_s1 = inlined_call_operand.vmem [shape: bf16[2,64,16], index: 1, kind: input, shape index: {}]   ;;  %s884_s2 = inlined_call_operand.vmem [shape: bf16[2,64,16], index: 2, kind: output, shape index: {0}]   ;;  %s885_s3 = inlined_call_operand.vmem [shape: f32[2,2,16], index: 3, kind: output, shape index: {1}]  }
   0x1 LB: > { %s619_s13 = sadd.s32 4294967295, %s758_s12   ;;  %p623_p0 = scmp.ge.s32.totalorder %s758_s12, 1  ;;  %s758_s12 = sphi %s780_s12, %s14_s12  }
   0x2   : > { %p140_p1 = scmp.lt.s32.totalorder %s758_s12, 3 }
   0x4   : > { %p141_p2 = pnand %p623_p0, %p140_p1 }
   0x5   : > { %p168_p3 = scmp.lt.s32.totalorder (!%p141_p2), %s619_s13, 1 }
   0x6   : > { %144 = sbr.rel (%p141_p2) target bundleno = 260 (0x104), region = 28 }
   0xb   : > { %v736_v0 = vld [vmem:[%s883_s1 + $0x38] sm:$0xff]   ;;  %v738_v2 = vld [vmem:[%s883_s1 + $0x30] sm:$0xff]   ;;  %s887_s13 = smov (!%p168_p3, %s619_s13), 1  ;;  %v740_v4 = vld [vmem:[%s883_s1 + $0x28] sm:$0xff]   ;;  %vm253_vm0 = vcmask 523264   ;;  %vm470_vm1 = vcmask 125952  }
   0xc   : > { %v737_v1 = vld [vmem:[%s883_s1 + $0x18] sm:$0xff]   ;;  %695 = vmatprep.subr.bf16.mxu0 %v736_v0  ;;  %v739_v3 = vld [vmem:[%s883_s1 + $0x10] sm:$0xff]   ;;  %s727_s24 = smul.u32 36, %s887_s13  ;;  %v741_v5 = vld [vmem:[%s883_s1 + $0x8] sm:$0xff]   ;;  %s670_s7 = sshll.u32 %s887_s13, 5  ;;  %vm479_vm2 = vcmask 130048  }
   0xd   : > { %711 = vmatprep.subr.bf16.mxu1 %v737_v1  ;;  %696 = vmatpush3.bf16.msra.mxu0 %v736_v0  ;;  %v742_v6 = vld [vmem:[%s883_s1 + $0x20] sm:$0xff]   ;;  %s841_s10 = scalar_lea.vmem %s884_s2, %s670_s7  ;;  %s627_s11 = sshll.u32 %s887_s13, 1  ;;  %vm501_vm3 = vcmask 122880  }
   0xe   : > { %712 = vmatpush3.bf16.msra.mxu1 %v737_v1  ;;  %697 = vmatprep.subr.bf16.mxu0 %v738_v2  ;;  %s812_s29 = scalar_lea.vmem %s882_s0, %s727_s24  ;;  %v743_v9 = vld [vmem:[%s883_s1] sm:$0xff]   ;;  %s181_s16 = scalar_lea.vmem %s885_s3, %s627_s11 }
   0xf   : > { %713 = vmatprep.subr.bf16.mxu1 %v739_v3  ;;  %v184_v7 = vld [vmem:[%s812_s29 + $0x4] sm:$0xf]  ;;  %v185_v8 = vld [vmem:[%s812_s29 + $0x8] sm:$0xf]  ;;  %v183_v11 = vld [vmem:[%s812_s29] sm:$0xf] }
  0x10   : > { %v636_v10 = vcombine.low %v184_v7, %v185_v8  ;;  %v648_v12 = vcombine.low %v183_v11, %v184_v7  ;;  %v186_v13 = vld [vmem:[%s812_s29 + $0xc] sm:$0xf]  ;;  %v187_v14 = vld [vmem:[%s812_s29 + $0x10] sm:$0xf]  ;;  %v188_v15 = vld [vmem:[%s812_s29 + $0x14] sm:$0xf] }
  0x11   : > { %698 = vmatpush3.bf16.msra.mxu0 %v738_v2  ;;  %v189_v16 = vld [vmem:[%s812_s29 + $0x18] sm:$0xf]  ;;  %v637_v17 = vcombine.low %v186_v13, %v187_v14  ;;  %v649_v18 = vcombine.low %v185_v8, %v186_v13  ;;  %v650_v20 = vcombine.low %v187_v14, %v188_v15  ;;  %v190_v21 = vld [vmem:[%s812_s29 + $0x1c] sm:$0xf]  ;;  %v199_v22 = vld [vmem:[%s812_s29 + $0x20] sm:$0xf] }
  0x12   : > { %714 = vmatpush3.bf16.msra.mxu1 %v739_v3  ;;  %699 = vmatprep.subr.bf16.mxu0 %v740_v4  ;;  %v638_v19 = vcombine.low %v188_v15, %v189_v16  ;;  %v639_v23 = vcombine.low %v190_v21, %v199_v22  ;;  %v651_v24 = vcombine.low %v189_v16, %v190_v21 }
  0x13   : > { %715 = vmatprep.subr.bf16.mxu1 %v741_v5  ;;  %703 = vmatprep.mubr.msk.bf16.mxu0 %vm253_vm0, %v636_v10 }
  0x14   : > { %719 = vmatprep.mubr.msk.bf16.mxu1 %vm253_vm0, %v648_v12 }
  0x15   : > { %700 = vmatpush3.bf16.msra.mxu0 %v740_v4 }
  0x16   : > { %716 = vmatpush3.bf16.msra.mxu1 %v741_v5  ;;  %701 = vmatprep.subr.bf16.mxu0 %v742_v6 }
  0x17   : > { %717 = vmatprep.subr.bf16.mxu1 %v743_v9 }
  0x19   : > { %702 = vmatpush3.bf16.msra.mxu0 %v742_v6 }
  0x1a   : > { %718 = vmatpush3.bf16.msra.mxu1 %v743_v9 }
  0x1c   : > { %704 = vmatmul.mubr.msk.bf16.vlgmr.msra.gmra.mxu0 %vm253_vm0, %v637_v17 }
  0x1d   : > { %720 = vmatmul.mubr.msk.bf16.vlgmr.msra.gmra.mxu1 %vm253_vm0, %v649_v18  ;;  %707 = vmatprep.mubr.msk.bf16.mxu0 %vm253_vm0, %v638_v19 }
  0x1e   : > { %723 = vmatprep.mubr.msk.bf16.mxu1 %vm253_vm0, %v650_v20 }
  0x24   : > { %708 = vmatmul.mubr.msk.bf16.gmra.mxu0 %vm253_vm0, %v639_v23 }
  0x25   : > { %724 = vmatmul.mubr.msk.bf16.gmra.mxu1 %vm253_vm0, %v651_v24 }
  0xdc   : > { %v705_v25 = vpop.f32.mrf.mxu0 }
  0xdd   : > { %v721_v26 = vpop.f32.mrf.mxu1 }
  0xde   : > { %v416_v27 = vadd.f32 %v721_v26, %v705_v25  ;;  %v300_v28 = vpop.f32.mrf.mxu0 }
  0xdf   : > { %v407_v29 = vpop.f32.mrf.mxu1 }
  0xe0   : > { %v673_v30 = vpack.c.bf16 %v416_v27, %v416_v27  ;;  %v408_v31 = vadd.f32 %v407_v29, %v300_v28  ;;  %v706_v32 = vpop.f32.mrf.mxu0  ;;  %v505_v41 = vmul.f32 %v416_v27, %v416_v27  ;;  %v483_v50 = vsel %vm479_vm2, %v416_v27, 0.0 }
  0xe1   : > { %v722_v33 = vpop.f32.mrf.mxu1 }
  0xe2   : > { %473 = vst.msk [vmem:[%s841_s10 + $0x8] sm:$0xf] %vm470_vm1, %v673_v30  ;;  %v671_v34 = vpack.c.bf16 %v408_v31, %v408_v31  ;;  %v303_v35 = vpop.f32.mrf.mxu0  ;;  %v419_v36 = vadd.f32 %v722_v33, %v706_v32  ;;  %v503_v38 = vmul.f32 %v408_v31, %v408_v31  ;;  %v480_v42 = vsel %vm479_vm2, %v408_v31, 0.0 }
  0xe3   : > { %v410_v37 = vpop.f32.mrf.mxu1  ;;  %v514_v62 = vsel %vm479_vm2, %v505_v41, 0.0 }
  0xe4   : > { %471 = vst.msk [vmem:[%s841_s10] sm:$0xf] %vm470_vm1, %v671_v34  ;;  %v411_v39 = vadd.f32 %v410_v37, %v303_v35  ;;  %v709_v40 = vpop.f32.mrf.mxu0  ;;  %v674_v43 = vpack.c.bf16 %v419_v36, %v419_v36  ;;  %v511_v53 = vsel %vm479_vm2, %v503_v38, 0.0  ;;  %v506_v54 = vmul.f32 %v419_v36, %v419_v36 }
  0xe5   : > { %v725_v44 = vpop.f32.mrf.mxu1  ;;  %v485_v63 = vsel %vm479_vm2, %v419_v36, 0.0 }
  0xe6   : > { %v672_v45 = vpack.c.bf16 %v411_v39, %v411_v39  ;;  %v481_v46 = vsel %vm479_vm2, %v411_v39, 0.0  ;;  %v504_v47 = vmul.f32 %v411_v39, %v411_v39  ;;  %v432_v48 = vadd.f32 %v725_v44, %v709_v40  ;;  %v316_v49 = vpop.f32.mrf.mxu0  ;;  %474 = vst.msk [vmem:[%s841_s10 + $0xc] sm:$0xf] %vm470_vm1, %v674_v43 }
  0xe7   : > { %v482_v51 = vadd.f32 %v481_v46, %v480_v42  ;;  %v423_v52 = vpop.f32.mrf.mxu1  ;;  %v516_v6 = vsel %vm479_vm2, %v506_v54, 0.0 }
  0xe8   : > { %472 = vst.msk [vmem:[%s841_s10 + $0x4] sm:$0xf] %vm470_vm1, %v672_v45  ;;  %v512_v55 = vsel %vm479_vm2, %v504_v47, 0.0  ;;  %v677_v56 = vpack.c.bf16 %v432_v48, %v432_v48  ;;  %v710_v57 = vpop.f32.mrf.mxu0  ;;  %v424_v60 = vadd.f32 %v423_v52, %v316_v49  ;;  %v509_v13 = vmul.f32 %v432_v48, %v432_v48 }
  0xe9   : > { %v484_v58 = vadd.f32 %v483_v50, %v482_v51  ;;  %v513_v59 = vadd.f32 %v512_v55, %v511_v53  ;;  %v726_v61 = vpop.f32.mrf.mxu1  ;;  %v491_v20 = vsel %vm479_vm2, %v432_v48, 0.0 }
  0xea   : > { %477 = vst.msk [vmem:[%s841_s10 + $0x18] sm:$0xf] %vm470_vm1, %v677_v56  ;;  %v435_v0 = vadd.f32 %v726_v61, %v710_v57  ;;  %v319_v1 = vpop.f32.mrf.mxu0  ;;  %v675_v3 = vpack.c.bf16 %v424_v60, %v424_v60  ;;  %v487_v7 = vsel %vm479_vm2, %v424_v60, 0.0  ;;  %v507_v8 = vmul.f32 %v424_v60, %v424_v60 }
  0xeb   : > { %v515_v2 = vadd.f32 %v514_v62, %v513_v59  ;;  %v486_v4 = vadd.f32 %v485_v63, %v484_v58  ;;  %v426_v5 = vpop.f32.mrf.mxu1  ;;  %v522_v25 = vsel %vm479_vm2, %v509_v13, 0.0 }
  0xec   : > { %v678_v9 = vpack.c.bf16 %v435_v0, %v435_v0  ;;  %475 = vst.msk [vmem:[%s841_s10 + $0x10] sm:$0xf] %vm470_vm1, %v675_v3  ;;  %v427_v12 = vadd.f32 %v426_v5, %v319_v1  ;;  %v518_v14 = vsel %vm479_vm2, %v507_v8, 0.0  ;;  %v510_v21 = vmul.f32 %v435_v0, %v435_v0 }
  0xed   : > { %v488_v10 = vadd.f32 %v487_v7, %v486_v4  ;;  %v517_v11 = vadd.f32 %v516_v6, %v515_v2  ;;  %v493_v26 = vsel %vm479_vm2, %v435_v0, 0.0 }
  0xee   : > { %478 = vst.msk [vmem:[%s841_s10 + $0x1c] sm:$0xf] %vm470_vm1, %v678_v9  ;;  %v676_v16 = vpack.c.bf16 %v427_v12, %v427_v12  ;;  %v489_v17 = vsel %vm479_vm2, %v427_v12, 0.0  ;;  %v508_v18 = vmul.f32 %v427_v12, %v427_v12  ;;  %v524_v29 = vsel %vm479_vm2, %v510_v21, 0.0 }
  0xef   : > { %v519_v15 = vadd.f32 %v518_v14, %v517_v11  ;;  %v490_v19 = vadd.f32 %v489_v17, %v488_v10 }
  0xf0   : > { %476 = vst.msk [vmem:[%s841_s10 + $0x14] sm:$0xf] %vm470_vm1, %v676_v16  ;;  %v520_v22 = vsel %vm479_vm2, %v508_v18, 0.0 }
  0xf1   : > { %v492_v23 = vadd.f32 %v491_v20, %v490_v19  ;;  %v521_v24 = vadd.f32 %v520_v22, %v519_v15 }
  0xf3   : > { %v494_v27 = vadd.f32 %v493_v26, %v492_v23  ;;  %v523_v28 = vadd.f32 %v522_v25, %v521_v24 }
  0xf5   : > { %v495_v30 = vrot.slane %v494_v27, 4  ;;  %v525_v31 = vadd.f32 %v524_v29, %v523_v28 }
  0xf7   : > { %v496_v32 = vadd.f32 %v495_v30, %v494_v27  ;;  %v526_v33 = vrot.slane %v525_v31, 4 }
  0xf9   : > { %v497_v34 = vrot.slane %v496_v32, 2  ;;  %v527_v35 = vadd.f32 %v526_v33, %v525_v31 }
  0xfb   : > { %v498_v36 = vadd.f32 %v497_v34, %v496_v32  ;;  %v528_v37 = vrot.slane %v527_v35, 2 }
  0xfd   : > { %v499_v38 = vrot.slane %v498_v36, 1  ;;  %v529_v39 = vadd.f32 %v528_v37, %v527_v35 }
  0xff   : > { %v500_v40 = vadd.f32 %v499_v38, %v498_v36  ;;  %v530_v41 = vrot.slane %v529_v39, 1 }
 0x101   : > { %502 = vst.msk [vmem:[%s181_s16] sm:$0x1] %vm501_vm3, %v500_v40  ;;  %v531_v42 = vadd.f32 %v530_v41, %v529_v39 }
 0x103   : > { %532 = vst.msk [vmem:[%s181_s16 + $0x1] sm:$0x1] %vm501_vm3, %v531_v42 }
 0x104 PF: > { %s14_s12 = sadd.s32 1, %s758_s12  }
 0x105   : > { %p11_p4 = scmp.ge.s32.totalorder %s14_s12, 4  }
 0x107   :  { %13 = sbr.rel (!%p11_p4) target bundleno = 1 (0x1), region = 71 }

// kernel: _lambda_.12
= control target key start
LH: loop header
LB: loop body
LE: loop exit
PB: predicated region body
PF: predicated region fallthrough
CT: control target
= control target key end

     0   :  { %s825_s12 = smov 0   ;;  %s916_s0 = inlined_call_operand.vmem [shape: bf16[2,40,128], index: 0, kind: input, shape index: {}]   ;;  %s917_s1 = inlined_call_operand.vmem [shape: bf16[2,128,32], index: 1, kind: input, shape index: {}]   ;;  %s918_s2 = inlined_call_operand.vmem [shape: bf16[2,32,32], index: 2, kind: output, shape index: {0}]   ;;  %s919_s3 = inlined_call_operand.vmem [shape: f32[2,2,32], index: 3, kind: output, shape index: {1}]  }
   0x1 LB: > { %s652_s13 = sadd.s32 4294967295, %s803_s12   ;;  %p656_p0 = scmp.ge.s32.totalorder %s803_s12, 1  ;;  %s803_s12 = sphi %s825_s12, %s14_s12  }
   0x2   : > { %p140_p1 = scmp.lt.s32.totalorder %s803_s12, 3 }
   0x4   : > { %p141_p2 = pnand %p656_p0, %p140_p1 }
   0x5   : > { %p168_p3 = scmp.lt.s32.totalorder (!%p141_p2), %s652_s13, 1 }
   0x6   : > { %144 = sbr.rel (%p141_p2) target bundleno = 269 (0x10d), region = 28 }
   0xb   : > { %v777_v0 = vld [vmem:[%s917_s1 + $0x78] sm:$0xff]   ;;  %v779_v2 = vld [vmem:[%s917_s1 + $0x70] sm:$0xff]   ;;  %v781_v4 = vld [vmem:[%s917_s1 + $0x68] sm:$0xff]   ;;  %s921_s13 = smov (!%p168_p3, %s652_s13), 1  ;;  %v463_v20 = vlaneseq  ;;  %vm458_vm0 = vcmask 257024   ;;  %vm532_vm5 = vcmask 261120  }
   0xc   : > { %v778_v1 = vld [vmem:[%s917_s1 + $0x38] sm:$0xff]   ;;  %728 = vmatprep.subr.bf16.mxu0 %v777_v0  ;;  %v780_v3 = vld [vmem:[%s917_s1 + $0x30] sm:$0xff]   ;;  %v782_v5 = vld [vmem:[%s917_s1 + $0x28] sm:$0xff]   ;;  %s768_s30 = smul.u32 20, %s921_s13  ;;  %s703_s25 = sshll.u32 %s921_s13, 4  ;;  %vm546_vm6 = vcmask 253952  }
   0xd   : > { %748 = vmatprep.subr.bf16.mxu1 %v778_v1  ;;  %729 = vmatpush3.bf16.msra.mxu0 %v777_v0  ;;  %v783_v6 = vld [vmem:[%s917_s1 + $0x60] sm:$0xff]   ;;  %v785_v8 = vld [vmem:[%s917_s1 + $0x58] sm:$0xff]   ;;  %v787_v10 = vld [vmem:[%s917_s1 + $0x50] sm:$0xff]   ;;  %v464_v21 = vshrl.u32 %v463_v20, 7  ;;  %s891_s28 = scalar_lea.vmem %s918_s2, %s703_s25  ;;  %s660_s29 = sshll.u32 %s921_s13, 1 }
   0xe   : > { %749 = vmatpush3.bf16.msra.mxu1 %v778_v1  ;;  %730 = vmatprep.subr.bf16.mxu0 %v779_v2  ;;  %v784_v7 = vld [vmem:[%s917_s1 + $0x20] sm:$0xff]   ;;  %v786_v9 = vld [vmem:[%s917_s1 + $0x18] sm:$0xff]   ;;  %s172_s10 = scalar_lea.vmem %s916_s0, %s768_s30  ;;  %v788_v11 = vld [vmem:[%s917_s1 + $0x10] sm:$0xff]   ;;  %s181_s5 = scalar_lea.vmem %s919_s3, %s660_s29 }
   0xf   : > { %750 = vmatprep.subr.bf16.mxu1 %v780_v3  ;;  %v793_v12 = vld [vmem:[%s172_s10 + $0x4] sm:$0xff]   ;;  %v795_v18 = vld [vmem:[%s172_s10 + $0xc] sm:$0xff]   ;;  %v466_v22 = vadd.s32 16, %v464_v21  ;;  %v472_v23 = vand.u32 7, %v464_v21  ;;  %v467_v24 = vadd.s32 24, %v464_v21  ;;  %v465_v25 = vadd.s32 8, %v464_v21 }
  0x10   : > { %v794_v13 = vld [vmem:[%s172_s10] sm:$0xff]   ;;  %744 = vmatprep.mubr.bf16.mxu0 %v793_v12  ;;  %v789_v14 = vld [vmem:[%s917_s1 + $0x48] sm:$0xff]  }
  0x11   : > { %731 = vmatpush3.bf16.msra.mxu0 %v779_v2  ;;  %764 = vmatprep.mubr.bf16.mxu1 %v794_v13  ;;  %v790_v15 = vld [vmem:[%s917_s1 + $0x8] sm:$0xff]   ;;  %v791_v16 = vld [vmem:[%s917_s1 + $0x40] sm:$0xff]   ;;  %v486_v28 = vand.u32 7, %v466_v22  ;;  %vm516_vm1 = vcmp.lt.s32.totalorder %v472_v23, 4  ;;  %v493_v32 = vand.u32 7, %v467_v24  ;;  %v479_v33 = vand.u32 7, %v465_v25 }
  0x12   : > { %751 = vmatpush3.bf16.msra.mxu1 %v780_v3  ;;  %732 = vmatprep.subr.bf16.mxu0 %v781_v4  ;;  %v792_v17 = vld [vmem:[%s917_s1] sm:$0xff]   ;;  %v796_v19 = vld [vmem:[%s172_s10 + $0x8] sm:$0xff]  }
  0x13   : > { %752 = vmatprep.subr.bf16.mxu1 %v782_v5  ;;  %vm518_vm2 = vcmp.lt.s32.totalorder %v486_v28, 4  ;;  %vm519_vm3 = vcmp.lt.s32.totalorder %v493_v32, 4  ;;  %vm517_vm4 = vcmp.lt.s32.totalorder %v479_v33, 4 }
  0x15   : > { %733 = vmatpush3.bf16.msra.mxu0 %v781_v4 }
  0x16   : > { %753 = vmatpush3.bf16.msra.mxu1 %v782_v5  ;;  %734 = vmatprep.subr.bf16.mxu0 %v783_v6 }
  0x17   : > { %754 = vmatprep.subr.bf16.mxu1 %v784_v7 }
  0x19   : > { %735 = vmatpush3.bf16.msra.mxu0 %v783_v6 }
  0x1a   : > { %755 = vmatpush3.bf16.msra.mxu1 %v784_v7  ;;  %736 = vmatprep.subr.bf16.mxu0 %v785_v8 }
  0x1b   : > { %756 = vmatprep.subr.bf16.mxu1 %v786_v9 }
  0x1d   : > { %737 = vmatpush3.bf16.msra.mxu0 %v785_v8 }
  0x1e   : > { %757 = vmatpush3.bf16.msra.mxu1 %v786_v9  ;;  %738 = vmatprep.subr.bf16.mxu0 %v787_v10 }
  0x1f   : > { %758 = vmatprep.subr.bf16.mxu1 %v788_v11 }
  0x21   : > { %739 = vmatpush3.bf16.msra.mxu0 %v787_v10 }
  0x22   : > { %759 = vmatpush3.bf16.msra.mxu1 %v788_v11  ;;  %740 = vmatprep.subr.bf16.mxu0 %v789_v14 }
  0x23   : > { %760 = vmatprep.subr.bf16.mxu1 %v790_v15 }
  0x25   : > { %741 = vmatpush3.bf16.msra.mxu0 %v789_v14 }
  0x26   : > { %761 = vmatpush3.bf16.msra.mxu1 %v790_v15  ;;  %742 = vmatprep.subr.bf16.mxu0 %v791_v16 }
  0x27   : > { %762 = vmatprep.subr.bf16.mxu1 %v792_v17 }
  0x29   : > { %743 = vmatpush3.bf16.msra.mxu0 %v791_v16 }
  0x2a   : > { %763 = vmatpush3.bf16.msra.mxu1 %v792_v17 }
  0x2c   : > { %745 = vmatmul.mubr.bf16.vlgmr.msra.gmra.mxu0 %v795_v18 }
  0x2d   : > { %765 = vmatmul.mubr.bf16.vlgmr.msra.gmra.mxu1 %v796_v19 }
  0xec   : > { %v746_v26 = vpop.f32.mrf.mxu0 }
  0xed   : > { %v766_v27 = vpop.f32.mrf.mxu1 }
  0xee   : > { %v436_v29 = vadd.f32 %v766_v27, %v746_v26  ;;  %v318_v30 = vpop.f32.mrf.mxu0 }
  0xef   : > { %v427_v31 = vpop.f32.mrf.mxu1 }
  0xf0   : > { %v706_v34 = vpack.c.bf16 %v436_v29, %v436_v29  ;;  %v428_v35 = vadd.f32 %v427_v31, %v318_v30  ;;  %v747_v36 = vpop.f32.mrf.mxu0  ;;  %v530_v43 = vsel %vm518_vm2, %v436_v29, 0.0 }
  0xf1   : > { %v767_v37 = vpop.f32.mrf.mxu1  ;;  %v550_v50 = vmul.f32 %v530_v43, %v530_v43  ;;  %v536_v55 = vsel %vm532_vm5, %v530_v43, 0.0 }
  0xf2   : > { %461 = vst.msk [vmem:[%s891_s28 + $0x8] sm:$0xf] %vm458_vm0, %v706_v34  ;;  %v704_v38 = vpack.c.bf16 %v428_v35, %v428_v35  ;;  %v528_v39 = vsel %vm516_vm1, %v428_v35, 0.0  ;;  %v439_v40 = vadd.f32 %v767_v37, %v747_v36  ;;  %v321_v41 = vpop.f32.mrf.mxu0 }
  0xf3   : > { %v430_v42 = vpop.f32.mrf.mxu1  ;;  %v548_v46 = vmul.f32 %v528_v39, %v528_v39  ;;  %v533_v51 = vsel %vm532_vm5, %v528_v39, 0.0  ;;  %v555_v61 = vsel %vm532_vm5, %v550_v50, 0.0 }
  0xf4   : > { %459 = vst.msk [vmem:[%s891_s28] sm:$0xf] %vm458_vm0, %v704_v38  ;;  %v707_v44 = vpack.c.bf16 %v439_v40, %v439_v40  ;;  %v431_v45 = vadd.f32 %v430_v42, %v321_v41  ;;  %v531_v47 = vsel %vm519_vm3, %v439_v40, 0.0 }
  0xf5   : > { %v552_v56 = vsel %vm532_vm5, %v548_v46, 0.0  ;;  %v551_v57 = vmul.f32 %v531_v47, %v531_v47  ;;  %v538_v62 = vsel %vm532_vm5, %v531_v47, 0.0 }
  0xf6   : > { %462 = vst.msk [vmem:[%s891_s28 + $0xc] sm:$0xf] %vm458_vm0, %v707_v44  ;;  %v705_v48 = vpack.c.bf16 %v431_v45, %v431_v45  ;;  %v529_v49 = vsel %vm517_vm4, %v431_v45, 0.0 }
  0xf7   : > { %v534_v52 = vsel %vm532_vm5, %v529_v49, 0.0  ;;  %v549_v53 = vmul.f32 %v529_v49, %v529_v49  ;;  %v557_v1 = vsel %vm532_vm5, %v551_v57, 0.0 }
  0xf8   : > { %460 = vst.msk [vmem:[%s891_s28 + $0x4] sm:$0xf] %vm458_vm0, %v705_v48  ;;  %v535_v54 = vadd.f32 %v534_v52, %v533_v51 }
  0xf9   : > { %v553_v58 = vsel %vm532_vm5, %v549_v53, 0.0 }
  0xfa   : > { %v537_v59 = vadd.f32 %v536_v55, %v535_v54  ;;  %v554_v60 = vadd.f32 %v553_v58, %v552_v56 }
  0xfc   : > { %v539_v63 = vadd.f32 %v538_v62, %v537_v59  ;;  %v556_v0 = vadd.f32 %v555_v61, %v554_v60 }
  0xfe   : > { %v540_v2 = vrot.slane %v539_v63, 4  ;;  %v558_v3 = vadd.f32 %v557_v1, %v556_v0 }
 0x100   : > { %v541_v4 = vadd.f32 %v540_v2, %v539_v63  ;;  %v559_v5 = vrot.slane %v558_v3, 4 }
 0x102   : > { %v542_v6 = vrot.slane %v541_v4, 2  ;;  %v560_v7 = vadd.f32 %v559_v5, %v558_v3 }
 0x104   : > { %v543_v8 = vadd.f32 %v542_v6, %v541_v4  ;;  %v561_v9 = vrot.slane %v560_v7, 2 }
 0x106   : > { %v544_v10 = vrot.slane %v543_v8, 1  ;;  %v562_v11 = vadd.f32 %v561_v9, %v560_v7 }
 0x108   : > { %v545_v12 = vadd.f32 %v544_v10, %v543_v8  ;;  %v563_v13 = vrot.slane %v562_v11, 1 }
 0x10a   : > { %547 = vst.msk [vmem:[%s181_s5] sm:$0x1] %vm546_vm6, %v545_v12  ;;  %v564_v14 = vadd.f32 %v563_v13, %v562_v11 }
 0x10c   : > { %565 = vst.msk [vmem:[%s181_s5 + $0x1] sm:$0x1] %vm546_vm6, %v564_v14 }
 0x10d PF: > { %s14_s12 = sadd.s32 1, %s803_s12  }
 0x10e   : > { %p11_p4 = scmp.ge.s32.totalorder %s14_s12, 4  }
 0x110   :  { %13 = sbr.rel (!%p11_p4) target bundleno = 1 (0x1), region = 71 }

// kernel: _lambda_.13
= control target key start
LH: loop header
LB: loop body
LE: loop exit
PB: predicated region body
PF: predicated region fallthrough
CT: control target
= control target key end

     0   :  { %s903_s12 = smov 0   ;;  %s1030_s0 = inlined_call_operand.vmem [shape: bf16[2,24,256], index: 0, kind: input, shape index: {}]   ;;  %s1031_s1 = inlined_call_operand.vmem [shape: bf16[2,256,64], index: 1, kind: input, shape index: {}]   ;;  %s1032_s2 = inlined_call_operand.vmem [shape: bf16[2,16,64], index: 2, kind: output, shape index: {0}]   ;;  %s1033_s3 = inlined_call_operand.vmem [shape: f32[2,2,64], index: 3, kind: output, shape index: {1}]  }
   0x1 LB: > { %s702_s13 = sadd.s32 4294967295, %s881_s12   ;;  %p706_p0 = scmp.ge.s32.totalorder %s881_s12, 1  ;;  %s881_s12 = sphi %s903_s12, %s14_s12  }
   0x2   : > { %p140_p1 = scmp.lt.s32.totalorder %s881_s12, 3 }
   0x4   : > { %p141_p2 = pnand %p706_p0, %p140_p1 }
   0x5   : > { %p168_p3 = scmp.lt.s32.totalorder (!%p141_p2), %s702_s13, 1 }
   0x6   : > { %144 = sbr.rel (%p141_p2) target bundleno = 268 (0x10c), region = 28 }
   0xb   : > { %v839_v0 = vld [vmem:[%s1031_s1 + $0xf8] sm:$0xff]   ;;  %v843_v4 = vld [vmem:[%s1031_s1 + $0xf0] sm:$0xff]   ;;  %v847_v8 = vld [vmem:[%s1031_s1 + $0xe8] sm:$0xff]   ;;  %s1035_s13 = smov (!%p168_p3, %s702_s13), 1  ;;  %v557_v39 = vlaneseq  ;;  %vm554_vm1 = vcmask 519168   ;;  %vm592_vm3 = vcmask 523264  }
   0xc   : > { %v840_v1 = vld [vmem:[%s1031_s1 + $0x78] sm:$0xff]   ;;  %786 = vmatprep.subr.bf16.mxu0 %v839_v0  ;;  %v844_v5 = vld [vmem:[%s1031_s1 + $0x70] sm:$0xff]   ;;  %v848_v9 = vld [vmem:[%s1031_s1 + $0x68] sm:$0xff]   ;;  %s830_s16 = smul.u32 24, %s1035_s13  ;;  %s783_s5 = sshll.u32 %s1035_s13, 3  ;;  %vm602_vm4 = vcmask 516096  }
   0xd   : > { %v841_v2 = vld [vmem:[%s1031_s1 + $0xb8] sm:$0xff]   ;;  %808 = vmatprep.subr.bf16.mxu1 %v840_v1  ;;  %v845_v6 = vld [vmem:[%s1031_s1 + $0xb0] sm:$0xff]   ;;  %v849_v10 = vld [vmem:[%s1031_s1 + $0xa8] sm:$0xff]   ;;  %v558_v40 = vshrl.u32 %v557_v39, 7  ;;  %s177_s8 = scalar_lea.vmem %s1032_s2, %s783_s5  ;;  %s710_s9 = sshll.u32 %s1035_s13, 1 }
   0xe   : > { %v842_v3 = vld [vmem:[%s1031_s1 + $0x38] sm:$0xff]   ;;  %787 = vmatpush3.bf16.msra.mxu0 %v841_v2  ;;  %v846_v7 = vld [vmem:[%s1031_s1 + $0x30] sm:$0xff]   ;;  %v850_v11 = vld [vmem:[%s1031_s1 + $0x28] sm:$0xff]   ;;  %s172_s27 = scalar_lea.vmem %s1030_s0, %s830_s16  ;;  %s181_s14 = scalar_lea.vmem %s1033_s3, %s710_s9 }
   0xf   : > { %809 = vmatpush3.bf16.msra.mxu1 %v842_v3  ;;  %788 = vmatprep.subr.bf16.mxu0 %v843_v4  ;;  %v851_v12 = vld [vmem:[%s1031_s1 + $0xe0] sm:$0xff]   ;;  %v855_v16 = vld [vmem:[%s1031_s1 + $0xd8] sm:$0xff]   ;;  %v859_v20 = vld [vmem:[%s1031_s1 + $0xd0] sm:$0xff]   ;;  %v564_v43 = vand.u32 7, %v558_v40  ;;  %v559_v44 = vadd.s32 8, %v558_v40 }
  0x10   : > { %810 = vmatprep.subr.bf16.mxu1 %v844_v5  ;;  %v852_v13 = vld [vmem:[%s1031_s1 + $0x60] sm:$0xff]   ;;  %v856_v17 = vld [vmem:[%s1031_s1 + $0x58] sm:$0xff]   ;;  %v860_v21 = vld [vmem:[%s1031_s1 + $0x50] sm:$0xff]  }
  0x11   : > { %v853_v14 = vld [vmem:[%s1031_s1 + $0xa0] sm:$0xff]   ;;  %v857_v18 = vld [vmem:[%s1031_s1 + $0x98] sm:$0xff]   ;;  %v861_v22 = vld [vmem:[%s1031_s1 + $0x90] sm:$0xff]   ;;  %vm584_vm0 = vcmp.lt.s32.totalorder %v564_v43, 2  ;;  %v571_v51 = vand.u32 7, %v559_v44 }
  0x12   : > { %789 = vmatpush3.bf16.msra.mxu0 %v845_v6  ;;  %v854_v15 = vld [vmem:[%s1031_s1 + $0x20] sm:$0xff]   ;;  %v858_v19 = vld [vmem:[%s1031_s1 + $0x18] sm:$0xff]   ;;  %v862_v23 = vld [vmem:[%s1031_s1 + $0x10] sm:$0xff]  }
  0x13   : > { %811 = vmatpush3.bf16.msra.mxu1 %v846_v7  ;;  %790 = vmatprep.subr.bf16.mxu0 %v847_v8  ;;  %v863_v24 = vld [vmem:[%s1031_s1 + $0xc8] sm:$0xff]   ;;  %v867_v28 = vld [vmem:[%s1031_s1 + $0xc0] sm:$0xff]   ;;  %v218_v33 = vld [vmem:[%s172_s27 + $0x10] sm:$0xff]  ;;  %vm585_vm2 = vcmp.lt.s32.totalorder %v571_v51, 2 }
  0x14   : > { %812 = vmatprep.subr.bf16.mxu1 %v848_v9  ;;  %v864_v25 = vld [vmem:[%s1031_s1 + $0x48] sm:$0xff]   ;;  %v868_v29 = vld [vmem:[%s1031_s1 + $0x40] sm:$0xff]  }
  0x15   : > { %v865_v26 = vld [vmem:[%s1031_s1 + $0x88] sm:$0xff]   ;;  %v869_v30 = vld [vmem:[%s1031_s1 + $0x80] sm:$0xff]  }
  0x16   : > { %791 = vmatpush3.bf16.msra.mxu0 %v849_v10  ;;  %v866_v27 = vld [vmem:[%s1031_s1 + $0x8] sm:$0xff]   ;;  %v870_v31 = vld [vmem:[%s1031_s1] sm:$0xff]  }
  0x17   : > { %813 = vmatpush3.bf16.msra.mxu1 %v850_v11  ;;  %792 = vmatprep.subr.bf16.mxu0 %v851_v12  ;;  %v217_v32 = vld [vmem:[%s172_s27 + $0x8] sm:$0xff]  ;;  %v183_v34 = vld [vmem:[%s172_s27] sm:$0xff] }
  0x18   : > { %814 = vmatprep.subr.bf16.mxu1 %v852_v13  ;;  %v743_v35 = vcombine.low %v217_v32, %v218_v33  ;;  %v744_v36 = vcombine.high %v217_v32, %v218_v33  ;;  %v761_v37 = vcombine.low %v183_v34, %v217_v32  ;;  %v762_v38 = vcombine.high %v183_v34, %v217_v32 }
  0x1a   : > { %793 = vmatpush3.bf16.msra.mxu0 %v853_v14  ;;  %390 = vmatprep.mubr.bf16.mxu0 %v744_v36 }
  0x1b   : > { %815 = vmatpush3.bf16.msra.mxu1 %v854_v15  ;;  %794 = vmatprep.subr.bf16.mxu0 %v855_v16 }
  0x1c   : > { %816 = vmatprep.subr.bf16.mxu1 %v856_v17  ;;  %537 = vmatprep.mubr.bf16.mxu1 %v762_v38 }
  0x1e   : > { %795 = vmatpush3.bf16.msra.mxu0 %v857_v18 }
  0x1f   : > { %817 = vmatpush3.bf16.msra.mxu1 %v858_v19  ;;  %796 = vmatprep.subr.bf16.mxu0 %v859_v20 }
  0x20   : > { %818 = vmatprep.subr.bf16.mxu1 %v860_v21 }
  0x22   : > { %797 = vmatpush3.bf16.msra.mxu0 %v861_v22 }
  0x23   : > { %819 = vmatpush3.bf16.msra.mxu1 %v862_v23  ;;  %798 = vmatprep.subr.bf16.mxu0 %v863_v24 }
  0x24   : > { %820 = vmatprep.subr.bf16.mxu1 %v864_v25 }
  0x26   : > { %799 = vmatpush3.bf16.msra.mxu0 %v865_v26 }
  0x27   : > { %821 = vmatpush3.bf16.msra.mxu1 %v866_v27  ;;  %800 = vmatprep.subr.bf16.mxu0 %v867_v28 }
  0x28   : > { %822 = vmatprep.subr.bf16.mxu1 %v868_v29 }
  0x2a   : > { %801 = vmatpush3.bf16.msra.mxu0 %v869_v30 }
  0x2b   : > { %823 = vmatpush3.bf16.msra.mxu1 %v870_v31 }
  0x2d   : > { %391 = vmatmul.mubr.bf16.vlgmr.msra.gmra.mxu0 %v743_v35 }
  0x2e   : > { %538 = vmatmul.mubr.bf16.vlgmr.msra.gmra.mxu1 %v761_v37 }
  0xed   : > { %v802_v41 = vpop.f32.mrf.mxu0 }
  0xee   : > { %v824_v42 = vpop.f32.mrf.mxu1 }
  0xef   : > { %v803_v45 = vpop.f32.mrf.mxu0 }
  0xf0   : > { %v825_v46 = vpop.f32.mrf.mxu1  ;;  %v804_v47 = vadd.f32 %v803_v45, %v802_v41 }
  0xf1   : > { %v826_v48 = vadd.f32 %v825_v46, %v824_v42  ;;  %v805_v49 = vpop.f32.mrf.mxu0 }
  0xf2   : > { %v827_v50 = vpop.f32.mrf.mxu1 }
  0xf3   : > { %v540_v52 = vadd.f32 %v826_v48, %v804_v47  ;;  %v806_v53 = vpop.f32.mrf.mxu0 }
  0xf4   : > { %v828_v54 = vpop.f32.mrf.mxu1  ;;  %v807_v57 = vadd.f32 %v806_v53, %v805_v49 }
  0xf5   : > { %v784_v55 = vpack.c.bf16 %v540_v52, %v540_v52  ;;  %v590_v56 = vsel %vm584_vm0, %v540_v52, 0.0  ;;  %v829_v58 = vadd.f32 %v828_v54, %v827_v50 }
  0xf6   : > { %v604_v60 = vmul.f32 %v590_v56, %v590_v56  ;;  %v593_v63 = vsel %vm592_vm3, %v590_v56, 0.0 }
  0xf7   : > { %555 = vst.msk [vmem:[%s177_s8] sm:$0xf] %vm554_vm1, %v784_v55  ;;  %v543_v59 = vadd.f32 %v829_v58, %v807_v57 }
  0xf8   : > { %v606_v3 = vsel %vm592_vm3, %v604_v60, 0.0 }
  0xf9   : > { %v785_v61 = vpack.c.bf16 %v543_v59, %v543_v59  ;;  %v591_v62 = vsel %vm585_vm2, %v543_v59, 0.0 }
  0xfa   : > { %v594_v0 = vsel %vm592_vm3, %v591_v62, 0.0  ;;  %v605_v1 = vmul.f32 %v591_v62, %v591_v62 }
  0xfb   : > { %556 = vst.msk [vmem:[%s177_s8 + $0x4] sm:$0xf] %vm554_vm1, %v785_v61  ;;  %v595_v2 = vadd.f32 %v594_v0, %v593_v63 }
  0xfc   : > { %v607_v4 = vsel %vm592_vm3, %v605_v1, 0.0 }
  0xfd   : > { %v596_v5 = vrot.slane %v595_v2, 4  ;;  %v608_v6 = vadd.f32 %v607_v4, %v606_v3 }
  0xff   : > { %v597_v7 = vadd.f32 %v596_v5, %v595_v2  ;;  %v609_v8 = vrot.slane %v608_v6, 4 }
 0x101   : > { %v598_v9 = vrot.slane %v597_v7, 2  ;;  %v610_v10 = vadd.f32 %v609_v8, %v608_v6 }
 0x103   : > { %v599_v11 = vadd.f32 %v598_v9, %v597_v7  ;;  %v611_v12 = vrot.slane %v610_v10, 2 }
 0x105   : > { %v600_v13 = vrot.slane %v599_v11, 1  ;;  %v612_v14 = vadd.f32 %v611_v12, %v610_v10 }
 0x107   : > { %v601_v15 = vadd.f32 %v600_v13, %v599_v11  ;;  %v613_v16 = vrot.slane %v612_v14, 1 }
 0x109   : > { %603 = vst.msk [vmem:[%s181_s14] sm:$0x1] %vm602_vm4, %v601_v15  ;;  %v614_v17 = vadd.f32 %v613_v16, %v612_v14 }
 0x10b   : > { %615 = vst.msk [vmem:[%s181_s14 + $0x1] sm:$0x1] %vm602_vm4, %v614_v17 }
 0x10c PF: > { %s14_s12 = sadd.s32 1, %s881_s12  }
 0x10d   : > { %p11_p4 = scmp.ge.s32.totalorder %s14_s12, 4  }
 0x10f   :  { %13 = sbr.rel (!%p11_p4) target bundleno = 1 (0x1), region = 71 }

// kernel: _lambda_.14
= control target key start
LH: loop header
LB: loop body
LE: loop exit
PB: predicated region body
PF: predicated region fallthrough
CT: control target
= control target key end

     0   :  { %s1242_s9 = smov 0   ;;  %s1465_s0 = inlined_call_operand.vmem [shape: bf16[2,16,512], index: 0, kind: input, shape index: {}]   ;;  %s1466_s1 = inlined_call_operand.vmem [shape: bf16[2,512,64], index: 1, kind: input, shape index: {}]   ;;  %s1467_s2 = inlined_call_operand.vmem [shape: bf16[2,8,64], index: 2, kind: output, shape index: {}]  }
   0x1 LB: > { %s904_s10 = sadd.s32 4294967295, %s1225_s9   ;;  %p908_p0 = scmp.ge.s32.totalorder %s1225_s9, 1  ;;  %s1225_s9 = sphi %s1242_s9, %s12_s9  }
   0x2   : > { %p112_p1 = scmp.lt.s32.totalorder %s1225_s9, 3 }
   0x4   : > { %p113_p2 = pnand %p908_p0, %p112_p1 }
   0x5   : > { %p133_p3 = scmp.lt.s32.totalorder (!%p113_p2), %s904_s10, 1 }
   0x6   : > { %116 = sbr.rel (%p113_p2) target bundleno = 281 (0x119), region = 28 }
   0xb   : > { %v1147_v0 = vld [vmem:[%s1466_s1 + $0x178] sm:$0xff]   ;;  %v1151_v4 = vld [vmem:[%s1466_s1 + $0x170] sm:$0xff]   ;;  %v1155_v8 = vld [vmem:[%s1466_s1 + $0x168] sm:$0xff]   ;;  %s1469_s10 = smov (!%p133_p3, %s904_s10), 1  ;;  %vm849_vm0 = vcmask 519168  }
   0xc   : > { %v1148_v1 = vld [vmem:[%s1466_s1 + $0x1f8] sm:$0xff]   ;;  %1051 = vmatprep.subr.bf16.mxu0 %v1147_v0  ;;  %v1152_v5 = vld [vmem:[%s1466_s1 + $0x1f0] sm:$0xff]   ;;  %v1156_v9 = vld [vmem:[%s1466_s1 + $0x1e8] sm:$0xff]   ;;  %s1050_s13 = sshll.u32 %s1469_s10, 5 }
   0xd   : > { %v1149_v2 = vld [vmem:[%s1466_s1 + $0x138] sm:$0xff]   ;;  %1073 = vmatprep.subr.bf16.mxu1 %v1148_v1  ;;  %v1153_v6 = vld [vmem:[%s1466_s1 + $0x130] sm:$0xff]   ;;  %v1157_v10 = vld [vmem:[%s1466_s1 + $0x128] sm:$0xff]   ;;  %s1350_s22 = scalar_lea.vmem %s1465_s0, %s1050_s13 }
   0xe   : > { %v1150_v3 = vld [vmem:[%s1466_s1 + $0x1b8] sm:$0xff]   ;;  %1052 = vmatpush3.bf16.msra.mxu0 %v1149_v2  ;;  %v1154_v7 = vld [vmem:[%s1466_s1 + $0x1b0] sm:$0xff]   ;;  %v1158_v11 = vld [vmem:[%s1466_s1 + $0x1a8] sm:$0xff]  }
   0xf   : > { %1074 = vmatpush3.bf16.msra.mxu1 %v1150_v3  ;;  %1053 = vmatprep.subr.bf16.mxu0 %v1151_v4  ;;  %v1159_v12 = vld [vmem:[%s1466_s1 + $0x160] sm:$0xff]   ;;  %v1163_v16 = vld [vmem:[%s1466_s1 + $0x158] sm:$0xff]   ;;  %v1167_v20 = vld [vmem:[%s1466_s1 + $0x150] sm:$0xff]  }
  0x10   : > { %1075 = vmatprep.subr.bf16.mxu1 %v1152_v5  ;;  %v1160_v13 = vld [vmem:[%s1466_s1 + $0x1e0] sm:$0xff]   ;;  %v1164_v17 = vld [vmem:[%s1466_s1 + $0x1d8] sm:$0xff]   ;;  %v1168_v21 = vld [vmem:[%s1466_s1 + $0x1d0] sm:$0xff]  }
  0x11   : > { %v1161_v14 = vld [vmem:[%s1466_s1 + $0x120] sm:$0xff]   ;;  %v1165_v18 = vld [vmem:[%s1466_s1 + $0x118] sm:$0xff]   ;;  %v1169_v22 = vld [vmem:[%s1466_s1 + $0x110] sm:$0xff]  }
  0x12   : > { %1054 = vmatpush3.bf16.msra.mxu0 %v1153_v6  ;;  %v1162_v15 = vld [vmem:[%s1466_s1 + $0x1a0] sm:$0xff]   ;;  %v1166_v19 = vld [vmem:[%s1466_s1 + $0x198] sm:$0xff]   ;;  %v1170_v23 = vld [vmem:[%s1466_s1 + $0x190] sm:$0xff]  }
  0x13   : > { %1076 = vmatpush3.bf16.msra.mxu1 %v1154_v7  ;;  %1055 = vmatprep.subr.bf16.mxu0 %v1155_v8  ;;  %v1171_v24 = vld [vmem:[%s1466_s1 + $0x148] sm:$0xff]   ;;  %v1175_v28 = vld [vmem:[%s1466_s1 + $0x140] sm:$0xff]   ;;  %v209_v32 = vld [vmem:[%s1350_s22 + $0x10] sm:$0xff] }
  0x14   : > { %1077 = vmatprep.subr.bf16.mxu1 %v1156_v9  ;;  %v1172_v25 = vld [vmem:[%s1466_s1 + $0x1c8] sm:$0xff]   ;;  %v1176_v29 = vld [vmem:[%s1466_s1 + $0x1c0] sm:$0xff]   ;;  %v210_v33 = vld [vmem:[%s1350_s22 + $0x18] sm:$0xff]  ;;  %v976_v34 = vcombine.low %v209_v32, %v209_v32  ;;  %v977_v35 = vcombine.high %v209_v32, %v209_v32 }
  0x15   : > { %v1173_v26 = vld [vmem:[%s1466_s1 + $0x108] sm:$0xff]   ;;  %v1177_v30 = vld [vmem:[%s1466_s1 + $0x100] sm:$0xff]   ;;  %v978_v36 = vcombine.low %v210_v33, %v210_v33  ;;  %v979_v37 = vcombine.high %v210_v33, %v210_v33  ;;  %v1183_v38 = vld [vmem:[%s1466_s1 + $0x78] sm:$0xff]  }
  0x16   : > { %1056 = vmatpush3.bf16.msra.mxu0 %v1157_v10  ;;  %v1174_v27 = vld [vmem:[%s1466_s1 + $0x188] sm:$0xff]   ;;  %v1178_v31 = vld [vmem:[%s1466_s1 + $0x180] sm:$0xff]   ;;  %v1184_v39 = vld [vmem:[%s1466_s1 + $0xf8] sm:$0xff]   ;;  %514 = vmatprep.mubr.bf16.mxu0 %v977_v35 }
  0x17   : > { %1078 = vmatpush3.bf16.msra.mxu1 %v1158_v11  ;;  %1057 = vmatprep.subr.bf16.mxu0 %v1159_v12  ;;  %v1185_v40 = vld [vmem:[%s1466_s1 + $0x38] sm:$0xff]   ;;  %v1187_v42 = vld [vmem:[%s1466_s1 + $0x70] sm:$0xff]   ;;  %v1191_v46 = vld [vmem:[%s1466_s1 + $0x68] sm:$0xff]  }
  0x18   : > { %1079 = vmatprep.subr.bf16.mxu1 %v1160_v13  ;;  %554 = vmatprep.mubr.bf16.mxu1 %v979_v37  ;;  %v1186_v41 = vld [vmem:[%s1466_s1 + $0xb8] sm:$0xff]   ;;  %v1188_v43 = vld [vmem:[%s1466_s1 + $0xf0] sm:$0xff]   ;;  %v1192_v47 = vld [vmem:[%s1466_s1 + $0xe8] sm:$0xff]  }
  0x19   : > { %v1189_v44 = vld [vmem:[%s1466_s1 + $0x30] sm:$0xff]   ;;  %v1193_v48 = vld [vmem:[%s1466_s1 + $0x28] sm:$0xff]   ;;  %v1195_v50 = vld [vmem:[%s1466_s1 + $0x60] sm:$0xff]  }
  0x1a   : > { %1058 = vmatpush3.bf16.msra.mxu0 %v1161_v14  ;;  %v1190_v45 = vld [vmem:[%s1466_s1 + $0xb0] sm:$0xff]   ;;  %v1194_v49 = vld [vmem:[%s1466_s1 + $0xa8] sm:$0xff]   ;;  %v1196_v51 = vld [vmem:[%s1466_s1 + $0xe0] sm:$0xff]  }
  0x1b   : > { %1080 = vmatpush3.bf16.msra.mxu1 %v1162_v15  ;;  %1059 = vmatprep.subr.bf16.mxu0 %v1163_v16  ;;  %v1197_v52 = vld [vmem:[%s1466_s1 + $0x20] sm:$0xff]   ;;  %v1199_v54 = vld [vmem:[%s1466_s1 + $0x58] sm:$0xff]   ;;  %v1203_v58 = vld [vmem:[%s1466_s1 + $0x50] sm:$0xff]  }
  0x1c   : > { %1081 = vmatprep.subr.bf16.mxu1 %v1164_v17  ;;  %v1198_v53 = vld [vmem:[%s1466_s1 + $0xa0] sm:$0xff]   ;;  %v1200_v55 = vld [vmem:[%s1466_s1 + $0xd8] sm:$0xff]   ;;  %v1204_v59 = vld [vmem:[%s1466_s1 + $0xd0] sm:$0xff]  }
  0x1d   : > { %v1201_v56 = vld [vmem:[%s1466_s1 + $0x18] sm:$0xff]   ;;  %v1205_v60 = vld [vmem:[%s1466_s1 + $0x10] sm:$0xff]   ;;  %v1207_v62 = vld [vmem:[%s1466_s1 + $0x48] sm:$0xff]  }
  0x1e   : > { %1060 = vmatpush3.bf16.msra.mxu0 %v1165_v18  ;;  %v1202_v57 = vld [vmem:[%s1466_s1 + $0x98] sm:$0xff]   ;;  %v1206_v61 = vld [vmem:[%s1466_s1 + $0x90] sm:$0xff]   ;;  %v1208_v63 = vld [vmem:[%s1466_s1 + $0xc8] sm:$0xff]  }
  0x1f   : > { %1082 = vmatpush3.bf16.msra.mxu1 %v1166_v19  ;;  %1061 = vmatprep.subr.bf16.mxu0 %v1167_v20  ;;  %v1209_v0 = vld [vmem:[%s1466_s1 + $0x8] sm:$0xff]   ;;  %v1211_v2 = vld [vmem:[%s1466_s1 + $0x40] sm:$0xff]  }
  0x20   : > { %1083 = vmatprep.subr.bf16.mxu1 %v1168_v21  ;;  %v1210_v1 = vld [vmem:[%s1466_s1 + $0x88] sm:$0xff]   ;;  %v1212_v3 = vld [vmem:[%s1466_s1 + $0xc0] sm:$0xff]  }
  0x21   : > { %v1213_v4 = vld [vmem:[%s1466_s1] sm:$0xff]   ;;  %v144_v9 = vld [vmem:[%s1350_s22 + $0x8] sm:$0xff] }
  0x22   : > { %1062 = vmatpush3.bf16.msra.mxu0 %v1169_v22  ;;  %v1214_v5 = vld [vmem:[%s1466_s1 + $0x80] sm:$0xff]   ;;  %v1014_v10 = vcombine.low %v144_v9, %v144_v9  ;;  %v1015_v11 = vcombine.high %v144_v9, %v144_v9 }
  0x23   : > { %1084 = vmatpush3.bf16.msra.mxu1 %v1170_v23  ;;  %1063 = vmatprep.subr.bf16.mxu0 %v1171_v24  ;;  %v143_v6 = vld [vmem:[%s1350_s22] sm:$0xff]  ;;  %s911_s22 = sshll.u32 %s1469_s10, 2 }
  0x24   : > { %1085 = vmatprep.subr.bf16.mxu1 %v1172_v25  ;;  %v1012_v7 = vcombine.low %v143_v6, %v143_v6  ;;  %v1013_v8 = vcombine.high %v143_v6, %v143_v6  ;;  %s141_s17 = scalar_lea.vmem %s1467_s2, %s911_s22 }
  0x26   : > { %1064 = vmatpush3.bf16.msra.mxu0 %v1173_v26 }
  0x27   : > { %1086 = vmatpush3.bf16.msra.mxu1 %v1174_v27  ;;  %1065 = vmatprep.subr.bf16.mxu0 %v1175_v28 }
  0x28   : > { %1087 = vmatprep.subr.bf16.mxu1 %v1176_v29 }
  0x2a   : > { %1066 = vmatpush3.bf16.msra.mxu0 %v1177_v30 }
  0x2b   : > { %1088 = vmatpush3.bf16.msra.mxu1 %v1178_v31  ;;  %1095 = vmatprep.subr.bf16.mxu0 %v1183_v38 }
  0x2c   : > { %1117 = vmatprep.subr.bf16.mxu1 %v1184_v39 }
  0x2d   : > { %515 = vmatmul.mubr.bf16.vlgmr.msra.gmra.mxu0 %v976_v34 }
  0x2e   : > { %555 = vmatmul.mubr.bf16.vlgmr.msra.gmra.mxu1 %v978_v36  ;;  %1096 = vmatpush3.bf16.msra.mxu0 %v1185_v40 }
  0x2f   : > { %1118 = vmatpush3.bf16.msra.mxu1 %v1186_v41  ;;  %1097 = vmatprep.subr.bf16.mxu0 %v1187_v42 }
  0x30   : > { %1119 = vmatprep.subr.bf16.mxu1 %v1188_v43  ;;  %800 = vmatprep.mubr.bf16.mxu0 %v1013_v8 }
  0x31   : > { %840 = vmatprep.mubr.bf16.mxu1 %v1015_v11 }
  0x32   : > { %1098 = vmatpush3.bf16.msra.mxu0 %v1189_v44 }
  0x33   : > { %1120 = vmatpush3.bf16.msra.mxu1 %v1190_v45  ;;  %1099 = vmatprep.subr.bf16.mxu0 %v1191_v46 }
  0x34   : > { %1121 = vmatprep.subr.bf16.mxu1 %v1192_v47 }
  0x36   : > { %1100 = vmatpush3.bf16.msra.mxu0 %v1193_v48 }
  0x37   : > { %1122 = vmatpush3.bf16.msra.mxu1 %v1194_v49  ;;  %1101 = vmatprep.subr.bf16.mxu0 %v1195_v50 }
  0x38   : > { %1123 = vmatprep.subr.bf16.mxu1 %v1196_v51 }
  0x3a   : > { %1102 = vmatpush3.bf16.msra.mxu0 %v1197_v52 }
  0x3b   : > { %1124 = vmatpush3.bf16.msra.mxu1 %v1198_v53  ;;  %1103 = vmatprep.subr.bf16.mxu0 %v1199_v54 }
  0x3c   : > { %1125 = vmatprep.subr.bf16.mxu1 %v1200_v55 }
  0x3e   : > { %1104 = vmatpush3.bf16.msra.mxu0 %v1201_v56 }
  0x3f   : > { %1126 = vmatpush3.bf16.msra.mxu1 %v1202_v57  ;;  %1105 = vmatprep.subr.bf16.mxu0 %v1203_v58 }
  0x40   : > { %1127 = vmatprep.subr.bf16.mxu1 %v1204_v59 }
  0x42   : > { %1106 = vmatpush3.bf16.msra.mxu0 %v1205_v60 }
  0x43   : > { %1128 = vmatpush3.bf16.msra.mxu1 %v1206_v61  ;;  %1107 = vmatprep.subr.bf16.mxu0 %v1207_v62 }
  0x44   : > { %1129 = vmatprep.subr.bf16.mxu1 %v1208_v63 }
  0x46   : > { %1108 = vmatpush3.bf16.msra.mxu0 %v1209_v0 }
  0x47   : > { %1130 = vmatpush3.bf16.msra.mxu1 %v1210_v1  ;;  %1109 = vmatprep.subr.bf16.mxu0 %v1211_v2 }
  0x48   : > { %1131 = vmatprep.subr.bf16.mxu1 %v1212_v3 }
  0x4a   : > { %1110 = vmatpush3.bf16.msra.mxu0 %v1213_v4 }
  0x4b   : > { %1132 = vmatpush3.bf16.msra.mxu1 %v1214_v5 }
  0x4d   : > { %801 = vmatmul.mubr.bf16.vlgmr.msra.gmra.mxu0 %v1012_v7 }
  0x4e   : > { %841 = vmatmul.mubr.bf16.vlgmr.msra.gmra.mxu1 %v1014_v10 }
  0xed   : > { %v1067_v12 = vpop.f32.mrf.mxu0 }
  0xee   : > { %v1089_v13 = vpop.f32.mrf.mxu1 }
  0xef   : > { %v1068_v14 = vpop.f32.mrf.mxu0 }
  0xf0   : > { %v1090_v15 = vpop.f32.mrf.mxu1  ;;  %v1069_v20 = vadd.f32 %v1068_v14, %v1067_v12 }
  0xf1   : > { %v1070_v16 = vpop.f32.mrf.mxu0  ;;  %v1091_v21 = vadd.f32 %v1090_v15, %v1089_v13 }
  0xf2   : > { %v1092_v17 = vpop.f32.mrf.mxu1 }
  0xf3   : > { %v1071_v18 = vpop.f32.mrf.mxu0  ;;  %v557_v26 = vadd.f32 %v1091_v21, %v1069_v20 }
  0xf4   : > { %v1093_v19 = vpop.f32.mrf.mxu1 }
 0x10d   : > { %v1111_v22 = vpop.f32.mrf.mxu0 }
 0x10e   : > { %v1133_v23 = vpop.f32.mrf.mxu1 }
 0x10f   : > { %v1112_v24 = vpop.f32.mrf.mxu0 }
 0x110   : > { %v1134_v25 = vpop.f32.mrf.mxu1  ;;  %v1113_v27 = vadd.f32 %v1112_v24, %v1111_v22 }
 0x111   : > { %v1114_v28 = vpop.f32.mrf.mxu0  ;;  %v1135_v31 = vadd.f32 %v1134_v25, %v1133_v23 }
 0x112   : > { %v1136_v29 = vpop.f32.mrf.mxu1  ;;  %v803_v30 = vadd.f32 %v1113_v27, %v557_v26 }
 0x113   : > { %v1115_v32 = vpop.f32.mrf.mxu0 }
 0x114   : > { %v1137_v33 = vpop.f32.mrf.mxu1  ;;  %v843_v34 = vadd.f32 %v1135_v31, %v803_v30 }
 0x116   : > { %v848_v35 = vpack.c.bf16 %v843_v34, %v843_v34 }
 0x118   : > { %850 = vst.msk [vmem:[%s141_s17] sm:$0xf] %vm849_vm0, %v848_v35 }
 0x119 PF: > { %s12_s9 = sadd.s32 1, %s1225_s9  }
 0x11a   : > { %p9_p4 = scmp.ge.s32.totalorder %s12_s9, 4  }
 0x11c   :  { %11 = sbr.rel (!%p9_p4) target bundleno = 1 (0x1), region = 59 }

// kernel: _lambda_.15
= control target key start
LH: loop header
LB: loop body
LE: loop exit
PB: predicated region body
PF: predicated region fallthrough
CT: control target
= control target key end

     0   :  { %s1993_s12 = smov 0   ;;  %s2475_s0 = inlined_call_operand.vmem [shape: bf16[2,24,192], index: 0, kind: input, shape index: {}]   ;;  %s2476_s1 = inlined_call_operand.vmem [shape: bf16[4,2,192,64], index: 1, kind: input, shape index: {}]   ;;  %s2477_s2 = inlined_call_operand.vmem [shape: bf16[2,4,8,64], index: 2, kind: output, shape index: {0}]   ;;  %s2478_s3 = inlined_call_operand.vmem [shape: f32[2,2,64], index: 3, kind: output, shape index: {1}]  }
   0x1 LB: > { %s1549_s13 = sadd.s32 4294967295, %s1970_s12   ;;  %p1553_p0 = scmp.ge.s32.totalorder %s1970_s12, 1  ;;  %s1970_s12 = sphi %s1993_s12, %s14_s12  }
   0x2   : > { %p140_p1 = scmp.lt.s32.totalorder %s1970_s12, 3 }
   0x4   : > { %p141_p2 = pnand %p1553_p0, %p140_p1 }
   0x5   : > { %p168_p3 = scmp.lt.s32.totalorder (!%p141_p2), %s1549_s13, 1 }
   0x6   : > { %144 = sbr.rel (%p141_p2) target bundleno = 418 (0x1a2), region = 28 }
   0xb   : > { %v1862_v0 = vld [vmem:[%s2476_s1 + $0x98] sm:$0xff]   ;;  %v1972_v1 = vmov 0   ;;  %v1864_v3 = vld [vmem:[%s2476_s1 + $0x90] sm:$0xff]   ;;  %v1866_v5 = vld [vmem:[%s2476_s1 + $0x88] sm:$0xff]   ;;  %s2482_s13 = smov (!%p168_p3, %s1549_s13), 1  ;;  %vm327_vm0 = vcmask 523264  }
   0xc   : > { %331 = vmatprep.subr.bf16.mxu0 %v1972_v1  ;;  %452 = vmatprep.subr.bf16.mxu1 %v1972_v1  ;;  %v1863_v2 = vld [vmem:[%s2476_s1 + $0x38] sm:$0xff]   ;;  %v1865_v4 = vld [vmem:[%s2476_s1 + $0x30] sm:$0xff]   ;;  %v1867_v6 = vld [vmem:[%s2476_s1 + $0x28] sm:$0xff]   ;;  %s1852_s7 = smul.u32 24, %s2482_s13  ;;  %s1851_s10 = sshll.u32 %s2482_s13, 4  ;;  %vm493_vm1 = vcmask 519168  }
   0xd   : > { %332 = vmatpush1.bf16.msra.mxu0 %v1862_v0  ;;  %453 = vmatpush1.bf16.msra.mxu1 %v1863_v2  ;;  %v1868_v7 = vld [vmem:[%s2476_s1 + $0x80] sm:$0xff]   ;;  %v1870_v9 = vld [vmem:[%s2476_s1 + $0x78] sm:$0xff]   ;;  %v1872_v11 = vld [vmem:[%s2476_s1 + $0x70] sm:$0xff]   ;;  %s2438_s15 = scalar_lea.vmem %s2477_s2, %s1851_s10  ;;  %s1557_s17 = sshll.u32 %s2482_s13, 1  ;;  %vm1460_vm3 = vcmask 516096  }
   0xe   : > { %333 = vmatprep.subr.bf16.mxu0 %v1972_v1  ;;  %454 = vmatprep.subr.bf16.mxu1 %v1972_v1  ;;  %v1869_v8 = vld [vmem:[%s2476_s1 + $0x20] sm:$0xff]   ;;  %v1871_v10 = vld [vmem:[%s2476_s1 + $0x18] sm:$0xff]   ;;  %v1873_v12 = vld [vmem:[%s2476_s1 + $0x10] sm:$0xff]   ;;  %s2055_s16 = scalar_lea.vmem %s2475_s0, %s1852_s7  ;;  %s181_s20 = scalar_lea.vmem %s2478_s3, %s1557_s17 }
   0xf   : > { %v1874_v13 = vld [vmem:[%s2476_s1 + $0x68] sm:$0xff]   ;;  %v223_v15 = vld [vmem:[%s2055_s16] sm:$0xff]  ;;  %v1878_v21 = vld [vmem:[%s2476_s1 + $0xb8] sm:$0xff]  }
  0x10   : > { %v1875_v14 = vld [vmem:[%s2476_s1 + $0x8] sm:$0xff]   ;;  %v1583_v17 = vcombine.high %v223_v15, %v223_v15  ;;  %v1876_v19 = vld [vmem:[%s2476_s1 + $0x60] sm:$0xff]   ;;  %v1879_v22 = vld [vmem:[%s2476_s1 + $0x58] sm:$0xff]   ;;  %v2112_v29 = vcombine.low %v223_v15, %v223_v15 }
  0x11   : > { %334 = vmatpush1.bf16.msra.mxu0 %v1864_v3  ;;  %455 = vmatpush1.bf16.msra.mxu1 %v1865_v4  ;;  %v198_v16 = vld [vmem:[%s2055_s16 + $0x8] sm:$0xff]  ;;  %v1877_v20 = vld [vmem:[%s2476_s1] sm:$0xff]   ;;  %v1880_v23 = vld [vmem:[%s2476_s1 + $0xb0] sm:$0xff]  }
  0x12   : > { %335 = vmatprep.subr.bf16.mxu0 %v1972_v1  ;;  %456 = vmatprep.subr.bf16.mxu1 %v1972_v1  ;;  %v2067_v18 = vcombine.high %v198_v16, %v198_v16  ;;  %v1881_v24 = vld [vmem:[%s2476_s1 + $0x50] sm:$0xff]   ;;  %v1882_v25 = vld [vmem:[%s2476_s1 + $0xa8] sm:$0xff]   ;;  %v1884_v27 = vld [vmem:[%s2476_s1 + $0xa0] sm:$0xff]   ;;  %v2114_v30 = vcombine.low %v198_v16, %v198_v16 }
  0x13   : > { %1596 = vmatprep.mubr.msk.bf16.mxu0 %vm327_vm0, %v1583_v17  ;;  %v1883_v26 = vld [vmem:[%s2476_s1 + $0x48] sm:$0xff]   ;;  %v1885_v28 = vld [vmem:[%s2476_s1 + $0x40] sm:$0xff]   ;;  %v1890_v31 = vld [vmem:[%s2476_s1 + $0x158] sm:$0xff]  }
  0x14   : > { %1611 = vmatprep.mubr.msk.bf16.mxu1 %vm327_vm0, %v2067_v18  ;;  %v1891_v32 = vld [vmem:[%s2476_s1 + $0xf8] sm:$0xff]   ;;  %v1892_v33 = vld [vmem:[%s2476_s1 + $0x150] sm:$0xff]   ;;  %v1894_v35 = vld [vmem:[%s2476_s1 + $0x148] sm:$0xff]  }
  0x15   : > { %336 = vmatpush1.bf16.msra.mxu0 %v1866_v5  ;;  %457 = vmatpush1.bf16.msra.mxu1 %v1867_v6  ;;  %v1893_v34 = vld [vmem:[%s2476_s1 + $0xf0] sm:$0xff]   ;;  %v1895_v36 = vld [vmem:[%s2476_s1 + $0xe8] sm:$0xff]   ;;  %v1896_v37 = vld [vmem:[%s2476_s1 + $0x140] sm:$0xff]  }
  0x16   : > { %337 = vmatprep.subr.bf16.mxu0 %v1972_v1  ;;  %458 = vmatprep.subr.bf16.mxu1 %v1972_v1  ;;  %v1897_v38 = vld [vmem:[%s2476_s1 + $0xe0] sm:$0xff]   ;;  %v1898_v39 = vld [vmem:[%s2476_s1 + $0x138] sm:$0xff]   ;;  %v1900_v41 = vld [vmem:[%s2476_s1 + $0x130] sm:$0xff]  }
  0x17   : > { %v1899_v40 = vld [vmem:[%s2476_s1 + $0xd8] sm:$0xff]   ;;  %v1901_v42 = vld [vmem:[%s2476_s1 + $0xd0] sm:$0xff]   ;;  %v1902_v43 = vld [vmem:[%s2476_s1 + $0x128] sm:$0xff]  }
  0x18   : > { %v1903_v44 = vld [vmem:[%s2476_s1 + $0xc8] sm:$0xff]   ;;  %v1904_v45 = vld [vmem:[%s2476_s1 + $0x120] sm:$0xff]   ;;  %v1906_v47 = vld [vmem:[%s2476_s1 + $0x178] sm:$0xff]  }
  0x19   : > { %338 = vmatpush1.bf16.msra.mxu0 %v1868_v7  ;;  %459 = vmatpush1.bf16.msra.mxu1 %v1869_v8  ;;  %v1905_v46 = vld [vmem:[%s2476_s1 + $0xc0] sm:$0xff]   ;;  %v1907_v48 = vld [vmem:[%s2476_s1 + $0x118] sm:$0xff]   ;;  %v1908_v49 = vld [vmem:[%s2476_s1 + $0x170] sm:$0xff]  }
  0x1a   : > { %339 = vmatprep.subr.bf16.mxu0 %v1972_v1  ;;  %460 = vmatprep.subr.bf16.mxu1 %v1972_v1  ;;  %v1909_v50 = vld [vmem:[%s2476_s1 + $0x110] sm:$0xff]   ;;  %v1910_v51 = vld [vmem:[%s2476_s1 + $0x168] sm:$0xff]   ;;  %v1912_v53 = vld [vmem:[%s2476_s1 + $0x160] sm:$0xff]  }
  0x1b   : > { %v1911_v52 = vld [vmem:[%s2476_s1 + $0x108] sm:$0xff]   ;;  %v1913_v54 = vld [vmem:[%s2476_s1 + $0x100] sm:$0xff]   ;;  %v1914_v55 = vld [vmem:[%s2476_s1 + $0x218] sm:$0xff]  }
  0x1c   : > { %v2221_v56 = vld [vmem:[%s2055_s16 + $0x10] sm:$0xff]  ;;  %v1915_v57 = vld [vmem:[%s2476_s1 + $0x1b8] sm:$0xff]   ;;  %v1918_v61 = vld [vmem:[%s2476_s1 + $0x208] sm:$0xff]  }
  0x1d   : > { %340 = vmatpush1.bf16.msra.mxu0 %v1870_v9  ;;  %461 = vmatpush1.bf16.msra.mxu1 %v1871_v10  ;;  %v2231_v58 = vcombine.high %v2221_v56, %v2221_v56  ;;  %v1916_v59 = vld [vmem:[%s2476_s1 + $0x210] sm:$0xff]   ;;  %v1919_v62 = vld [vmem:[%s2476_s1 + $0x1a8] sm:$0xff]   ;;  %v1920_v63 = vld [vmem:[%s2476_s1 + $0x200] sm:$0xff]  }
  0x1e   : > { %341 = vmatprep.subr.bf16.mxu0 %v1972_v1  ;;  %462 = vmatprep.subr.bf16.mxu1 %v1972_v1  ;;  %v1917_v60 = vld [vmem:[%s2476_s1 + $0x1b0] sm:$0xff]   ;;  %v1921_v0 = vld [vmem:[%s2476_s1 + $0x1a0] sm:$0xff]   ;;  %v1922_v2 = vld [vmem:[%s2476_s1 + $0x1f8] sm:$0xff]  }
  0x1f   : > { %v1923_v3 = vld [vmem:[%s2476_s1 + $0x198] sm:$0xff]   ;;  %v1924_v4 = vld [vmem:[%s2476_s1 + $0x1f0] sm:$0xff]   ;;  %v1926_v6 = vld [vmem:[%s2476_s1 + $0x1e8] sm:$0xff]  }
  0x20   : > { %v1925_v5 = vld [vmem:[%s2476_s1 + $0x190] sm:$0xff]   ;;  %v1927_v7 = vld [vmem:[%s2476_s1 + $0x188] sm:$0xff]   ;;  %v1928_v8 = vld [vmem:[%s2476_s1 + $0x1e0] sm:$0xff]  }
  0x21   : > { %342 = vmatpush1.bf16.msra.mxu0 %v1872_v11  ;;  %463 = vmatpush1.bf16.msra.mxu1 %v1873_v12  ;;  %v1929_v9 = vld [vmem:[%s2476_s1 + $0x180] sm:$0xff]   ;;  %v1930_v10 = vld [vmem:[%s2476_s1 + $0x238] sm:$0xff]   ;;  %v1932_v12 = vld [vmem:[%s2476_s1 + $0x230] sm:$0xff]  }
  0x22   : > { %343 = vmatprep.subr.bf16.mxu0 %v1972_v1  ;;  %464 = vmatprep.subr.bf16.mxu1 %v1972_v1  ;;  %v1931_v11 = vld [vmem:[%s2476_s1 + $0x1d8] sm:$0xff]   ;;  %v1935_v15 = vld [vmem:[%s2476_s1 + $0x1c8] sm:$0xff]   ;;  %v1936_v16 = vld [vmem:[%s2476_s1 + $0x220] sm:$0xff]  }
  0x25   : > { %344 = vmatpush1.bf16.msra.mxu0 %v1874_v13  ;;  %465 = vmatpush1.bf16.msra.mxu1 %v1875_v14  ;;  %v1933_v13 = vld [vmem:[%s2476_s1 + $0x1d0] sm:$0xff]   ;;  %v1934_v14 = vld [vmem:[%s2476_s1 + $0x228] sm:$0xff]  }
  0x26   : > { %345 = vmatprep.subr.bf16.mxu0 %v1972_v1  ;;  %466 = vmatprep.subr.bf16.mxu1 %v1972_v1 }
  0x29   : > { %346 = vmatpush1.bf16.msra.mxu0 %v1876_v19  ;;  %467 = vmatpush1.bf16.msra.mxu1 %v1877_v20  ;;  %v2328_v19 = vcombine.low %v2221_v56, %v2221_v56  ;;  %v1940_v20 = vld [vmem:[%s2476_s1 + $0x2d8] sm:$0xff]  }
  0x2a   : > { %355 = vmatprep.subr.bf16.mxu0 %v1972_v1  ;;  %476 = vmatprep.subr.bf16.mxu1 %v1972_v1 }
  0x2d   : > { %356 = vmatpush2.bf16.msra.mxu0 %v1878_v21  ;;  %477 = vmatpush2.bf16.msra.mxu1 %v1879_v22  ;;  %v1941_v21 = vld [vmem:[%s2476_s1 + $0x278] sm:$0xff]   ;;  %v1942_v22 = vld [vmem:[%s2476_s1 + $0x2d0] sm:$0xff]  }
  0x2e   : > { %357 = vmatprep.subr.bf16.mxu0 %v1972_v1  ;;  %478 = vmatprep.subr.bf16.mxu1 %v1972_v1 }
  0x31   : > { %358 = vmatpush2.bf16.msra.mxu0 %v1880_v23  ;;  %479 = vmatpush2.bf16.msra.mxu1 %v1881_v24  ;;  %v1943_v23 = vld [vmem:[%s2476_s1 + $0x270] sm:$0xff]   ;;  %v1944_v24 = vld [vmem:[%s2476_s1 + $0x2c8] sm:$0xff]  }
  0x32   : > { %359 = vmatprep.subr.bf16.mxu0 %v1972_v1  ;;  %480 = vmatprep.subr.bf16.mxu1 %v1972_v1 }
  0x35   : > { %360 = vmatpush2.bf16.msra.mxu0 %v1882_v25  ;;  %481 = vmatpush2.bf16.msra.mxu1 %v1883_v26  ;;  %v1945_v25 = vld [vmem:[%s2476_s1 + $0x268] sm:$0xff]   ;;  %v1947_v26 = vld [vmem:[%s2476_s1 + $0x260] sm:$0xff]  }
  0x36   : > { %361 = vmatprep.subr.bf16.mxu0 %v1972_v1  ;;  %482 = vmatprep.subr.bf16.mxu1 %v1972_v1 }
  0x39   : > { %362 = vmatpush2.bf16.msra.mxu0 %v1884_v27  ;;  %483 = vmatpush2.bf16.msra.mxu1 %v1885_v28  ;;  %v1948_v27 = vld [vmem:[%s2476_s1 + $0x2b8] sm:$0xff]  }
  0x3a   : > { %648 = vmatprep.subr.bf16.mxu0 %v1972_v1  ;;  %769 = vmatprep.subr.bf16.mxu1 %v1972_v1  ;;  %v1949_v28 = vld [vmem:[%s2476_s1 + $0x258] sm:$0xff]  }
  0x3c   : > { %364 = vmatmul.mubr.bf16.vlgmr.msra.gmra.mxu0 %v2112_v29  ;;  %485 = vmatmul.mubr.bf16.vlgmr.msra.gmra.mxu1 %v2114_v30 }
  0x3d   : > { %649 = vmatpush1.bf16.msra.mxu0 %v1890_v31  ;;  %770 = vmatpush1.bf16.msra.mxu1 %v1891_v32  ;;  %v1951_v31 = vld [vmem:[%s2476_s1 + $0x250] sm:$0xff]   ;;  %v1952_v32 = vld [vmem:[%s2476_s1 + $0x2a8] sm:$0xff]  }
  0x3e   : > { %650 = vmatprep.subr.bf16.mxu0 %v1972_v1  ;;  %771 = vmatprep.subr.bf16.mxu1 %v1972_v1 }
  0x3f   : > { %1674 = vmatprep.mubr.msk.bf16.mxu0 %vm327_vm0, %v1583_v17  ;;  %1689 = vmatprep.mubr.msk.bf16.mxu1 %vm327_vm0, %v2067_v18  ;;  %v1937_v17 = vld [vmem:[%s2476_s1 + $0x1c0] sm:$0xff]  }
  0x41   : > { %651 = vmatpush1.bf16.msra.mxu0 %v1892_v33  ;;  %772 = vmatpush1.bf16.msra.mxu1 %v1893_v34  ;;  %v1953_v33 = vld [vmem:[%s2476_s1 + $0x248] sm:$0xff]   ;;  %v1954_v34 = vld [vmem:[%s2476_s1 + $0x2a0] sm:$0xff]  }
  0x42   : > { %652 = vmatprep.subr.bf16.mxu0 %v1972_v1  ;;  %773 = vmatprep.subr.bf16.mxu1 %v1972_v1 }
  0x45   : > { %653 = vmatpush1.bf16.msra.mxu0 %v1894_v35  ;;  %774 = vmatpush1.bf16.msra.mxu1 %v1895_v36  ;;  %v1955_v35 = vld [vmem:[%s2476_s1 + $0x240] sm:$0xff]   ;;  %v1956_v36 = vld [vmem:[%s2476_s1 + $0x2f8] sm:$0xff]  }
  0x46   : > { %654 = vmatprep.subr.bf16.mxu0 %v1972_v1  ;;  %775 = vmatprep.subr.bf16.mxu1 %v1972_v1 }
  0x49   : > { %655 = vmatpush1.bf16.msra.mxu0 %v1896_v37  ;;  %776 = vmatpush1.bf16.msra.mxu1 %v1897_v38  ;;  %v1957_v37 = vld [vmem:[%s2476_s1 + $0x298] sm:$0xff]   ;;  %v1958_v38 = vld [vmem:[%s2476_s1 + $0x2f0] sm:$0xff]  }
  0x4a   : > { %656 = vmatprep.subr.bf16.mxu0 %v1972_v1  ;;  %777 = vmatprep.subr.bf16.mxu1 %v1972_v1 }
  0x4d   : > { %657 = vmatpush1.bf16.msra.mxu0 %v1898_v39  ;;  %778 = vmatpush1.bf16.msra.mxu1 %v1899_v40  ;;  %v1959_v39 = vld [vmem:[%s2476_s1 + $0x290] sm:$0xff]   ;;  %v1960_v40 = vld [vmem:[%s2476_s1 + $0x2e8] sm:$0xff]  }
  0x4e   : > { %658 = vmatprep.subr.bf16.mxu0 %v1972_v1  ;;  %779 = vmatprep.subr.bf16.mxu1 %v1972_v1 }
  0x51   : > { %659 = vmatpush1.bf16.msra.mxu0 %v1900_v41  ;;  %780 = vmatpush1.bf16.msra.mxu1 %v1901_v42  ;;  %v1961_v41 = vld [vmem:[%s2476_s1 + $0x288] sm:$0xff]   ;;  %v1962_v42 = vld [vmem:[%s2476_s1 + $0x2e0] sm:$0xff]  }
  0x52   : > { %660 = vmatprep.subr.bf16.mxu0 %v1972_v1  ;;  %781 = vmatprep.subr.bf16.mxu1 %v1972_v1 }
  0x55   : > { %661 = vmatpush1.bf16.msra.mxu0 %v1902_v43  ;;  %782 = vmatpush1.bf16.msra.mxu1 %v1903_v44  ;;  %v1963_v43 = vld [vmem:[%s2476_s1 + $0x280] sm:$0xff]  }
  0x56   : > { %662 = vmatprep.subr.bf16.mxu0 %v1972_v1  ;;  %783 = vmatprep.subr.bf16.mxu1 %v1972_v1 }
  0x59   : > { %663 = vmatpush1.bf16.msra.mxu0 %v1904_v45  ;;  %784 = vmatpush1.bf16.msra.mxu1 %v1905_v46 }
  0x5a   : > { %672 = vmatprep.subr.bf16.mxu0 %v1972_v1  ;;  %793 = vmatprep.subr.bf16.mxu1 %v1972_v1 }
  0x5d   : > { %673 = vmatpush2.bf16.msra.mxu0 %v1906_v47  ;;  %794 = vmatpush2.bf16.msra.mxu1 %v1907_v48 }
  0x5e   : > { %674 = vmatprep.subr.bf16.mxu0 %v1972_v1  ;;  %795 = vmatprep.subr.bf16.mxu1 %v1972_v1 }
  0x61   : > { %675 = vmatpush2.bf16.msra.mxu0 %v1908_v49  ;;  %796 = vmatpush2.bf16.msra.mxu1 %v1909_v50 }
  0x62   : > { %676 = vmatprep.subr.bf16.mxu0 %v1972_v1  ;;  %797 = vmatprep.subr.bf16.mxu1 %v1972_v1 }
  0x65   : > { %677 = vmatpush2.bf16.msra.mxu0 %v1910_v51  ;;  %798 = vmatpush2.bf16.msra.mxu1 %v1911_v52  ;;  %v183_v52 = vlaneseq }
  0x66   : > { %678 = vmatprep.subr.bf16.mxu0 %v1972_v1  ;;  %799 = vmatprep.subr.bf16.mxu1 %v1972_v1 }
  0x69   : > { %679 = vmatpush2.bf16.msra.mxu0 %v1912_v53  ;;  %800 = vmatpush2.bf16.msra.mxu1 %v1913_v54  ;;  %v184_v53 = vshrl.u32 %v183_v52, 7 }
  0x6a   : > { %963 = vmatprep.subr.bf16.mxu0 %v1972_v1  ;;  %1084 = vmatprep.subr.bf16.mxu1 %v1972_v1 }
  0x6b   : > { %v189_v54 = vand.u32 7, %v184_v53 }
  0x6c   : > { %681 = vmatmul.mubr.bf16.vlgmr.msra.gmra.mxu0 %v2112_v29  ;;  %802 = vmatmul.mubr.bf16.vlgmr.msra.gmra.mxu1 %v2114_v30  ;;  %v1950_v29 = vld [vmem:[%s2476_s1 + $0x2b0] sm:$0xff]  }
  0x6d   : > { %964 = vmatpush1.bf16.msra.mxu0 %v1914_v55  ;;  %1085 = vmatpush1.bf16.msra.mxu1 %v1915_v57  ;;  %vm2442_vm2 = vcmp.lt.s32.totalorder %v189_v54, 1 }
  0x6e   : > { %965 = vmatprep.subr.bf16.mxu0 %v1972_v1  ;;  %1086 = vmatprep.subr.bf16.mxu1 %v1972_v1 }
  0x6f   : > { %1753 = vmatprep.mubr.msk.bf16.mxu0 %vm327_vm0, %v2067_v18  ;;  %1768 = vmatprep.mubr.msk.bf16.mxu1 %vm327_vm0, %v2231_v58 }
  0x71   : > { %966 = vmatpush1.bf16.msra.mxu0 %v1916_v59  ;;  %1087 = vmatpush1.bf16.msra.mxu1 %v1917_v60 }
  0x72   : > { %967 = vmatprep.subr.bf16.mxu0 %v1972_v1  ;;  %1088 = vmatprep.subr.bf16.mxu1 %v1972_v1 }
  0x75   : > { %968 = vmatpush1.bf16.msra.mxu0 %v1918_v61  ;;  %1089 = vmatpush1.bf16.msra.mxu1 %v1919_v62 }
  0x76   : > { %969 = vmatprep.subr.bf16.mxu0 %v1972_v1  ;;  %1090 = vmatprep.subr.bf16.mxu1 %v1972_v1 }
  0x79   : > { %970 = vmatpush1.bf16.msra.mxu0 %v1920_v63  ;;  %1091 = vmatpush1.bf16.msra.mxu1 %v1921_v0 }
  0x7a   : > { %971 = vmatprep.subr.bf16.mxu0 %v1972_v1  ;;  %1092 = vmatprep.subr.bf16.mxu1 %v1972_v1 }
  0x7d   : > { %972 = vmatpush1.bf16.msra.mxu0 %v1922_v2  ;;  %1093 = vmatpush1.bf16.msra.mxu1 %v1923_v3 }
  0x7e   : > { %973 = vmatprep.subr.bf16.mxu0 %v1972_v1  ;;  %1094 = vmatprep.subr.bf16.mxu1 %v1972_v1 }
  0x81   : > { %974 = vmatpush1.bf16.msra.mxu0 %v1924_v4  ;;  %1095 = vmatpush1.bf16.msra.mxu1 %v1925_v5 }
  0x82   : > { %975 = vmatprep.subr.bf16.mxu0 %v1972_v1  ;;  %1096 = vmatprep.subr.bf16.mxu1 %v1972_v1 }
  0x85   : > { %976 = vmatpush1.bf16.msra.mxu0 %v1926_v6  ;;  %1097 = vmatpush1.bf16.msra.mxu1 %v1927_v7 }
  0x86   : > { %977 = vmatprep.subr.bf16.mxu0 %v1972_v1  ;;  %1098 = vmatprep.subr.bf16.mxu1 %v1972_v1 }
  0x89   : > { %978 = vmatpush1.bf16.msra.mxu0 %v1928_v8  ;;  %1099 = vmatpush1.bf16.msra.mxu1 %v1929_v9 }
  0x8a   : > { %987 = vmatprep.subr.bf16.mxu0 %v1972_v1  ;;  %1108 = vmatprep.subr.bf16.mxu1 %v1972_v1 }
  0x8d   : > { %988 = vmatpush2.bf16.msra.mxu0 %v1930_v10  ;;  %1109 = vmatpush2.bf16.msra.mxu1 %v1931_v11 }
  0x8e   : > { %989 = vmatprep.subr.bf16.mxu0 %v1972_v1  ;;  %1110 = vmatprep.subr.bf16.mxu1 %v1972_v1 }
  0x91   : > { %990 = vmatpush2.bf16.msra.mxu0 %v1932_v12  ;;  %1111 = vmatpush2.bf16.msra.mxu1 %v1933_v13 }
  0x92   : > { %991 = vmatprep.subr.bf16.mxu0 %v1972_v1  ;;  %1112 = vmatprep.subr.bf16.mxu1 %v1972_v1 }
  0x95   : > { %992 = vmatpush2.bf16.msra.mxu0 %v1934_v14  ;;  %1113 = vmatpush2.bf16.msra.mxu1 %v1935_v15 }
  0x96   : > { %993 = vmatprep.subr.bf16.mxu0 %v1972_v1  ;;  %1114 = vmatprep.subr.bf16.mxu1 %v1972_v1 }
  0x99   : > { %994 = vmatpush2.bf16.msra.mxu0 %v1936_v16  ;;  %1115 = vmatpush2.bf16.msra.mxu1 %v1937_v17 }
  0x9a   : > { %1278 = vmatprep.subr.bf16.mxu0 %v1972_v1  ;;  %1399 = vmatprep.subr.bf16.mxu1 %v1972_v1 }
  0x9c   : > { %996 = vmatmul.mubr.bf16.vlgmr.msra.gmra.mxu0 %v2114_v30  ;;  %1117 = vmatmul.mubr.bf16.vlgmr.msra.gmra.mxu1 %v2328_v19 }
  0x9d   : > { %1279 = vmatpush1.bf16.msra.mxu0 %v1940_v20  ;;  %1400 = vmatpush1.bf16.msra.mxu1 %v1941_v21 }
  0x9e   : > { %1280 = vmatprep.subr.bf16.mxu0 %v1972_v1  ;;  %1401 = vmatprep.subr.bf16.mxu1 %v1972_v1 }
  0x9f   : > { %1832 = vmatprep.mubr.msk.bf16.mxu0 %vm327_vm0, %v2067_v18  ;;  %1847 = vmatprep.mubr.msk.bf16.mxu1 %vm327_vm0, %v2231_v58  ;;  %v1946_v18 = vld [vmem:[%s2476_s1 + $0x2c0] sm:$0xff]  }
  0xa1   : > { %1281 = vmatpush1.bf16.msra.mxu0 %v1942_v22  ;;  %1402 = vmatpush1.bf16.msra.mxu1 %v1943_v23 }
  0xa2   : > { %1282 = vmatprep.subr.bf16.mxu0 %v1972_v1  ;;  %1403 = vmatprep.subr.bf16.mxu1 %v1972_v1 }
  0xa5   : > { %1283 = vmatpush1.bf16.msra.mxu0 %v1944_v24  ;;  %1404 = vmatpush1.bf16.msra.mxu1 %v1945_v25 }
  0xa6   : > { %1284 = vmatprep.subr.bf16.mxu0 %v1972_v1  ;;  %1405 = vmatprep.subr.bf16.mxu1 %v1972_v1 }
  0xa9   : > { %1285 = vmatpush1.bf16.msra.mxu0 %v1946_v18  ;;  %1406 = vmatpush1.bf16.msra.mxu1 %v1947_v26 }
  0xaa   : > { %1286 = vmatprep.subr.bf16.mxu0 %v1972_v1  ;;  %1407 = vmatprep.subr.bf16.mxu1 %v1972_v1 }
  0xad   : > { %1287 = vmatpush1.bf16.msra.mxu0 %v1948_v27  ;;  %1408 = vmatpush1.bf16.msra.mxu1 %v1949_v28 }
  0xae   : > { %1288 = vmatprep.subr.bf16.mxu0 %v1972_v1  ;;  %1409 = vmatprep.subr.bf16.mxu1 %v1972_v1 }
  0xb1   : > { %1289 = vmatpush1.bf16.msra.mxu0 %v1950_v29  ;;  %1410 = vmatpush1.bf16.msra.mxu1 %v1951_v31 }
  0xb2   : > { %1290 = vmatprep.subr.bf16.mxu0 %v1972_v1  ;;  %1411 = vmatprep.subr.bf16.mxu1 %v1972_v1 }
  0xb5   : > { %1291 = vmatpush1.bf16.msra.mxu0 %v1952_v32  ;;  %1412 = vmatpush1.bf16.msra.mxu1 %v1953_v33 }
  0xb6   : > { %1292 = vmatprep.subr.bf16.mxu0 %v1972_v1  ;;  %1413 = vmatprep.subr.bf16.mxu1 %v1972_v1 }
  0xb9   : > { %1293 = vmatpush1.bf16.msra.mxu0 %v1954_v34  ;;  %1414 = vmatpush1.bf16.msra.mxu1 %v1955_v35 }
  0xba   : > { %1302 = vmatprep.subr.bf16.mxu0 %v1972_v1  ;;  %1423 = vmatprep.subr.bf16.mxu1 %v1972_v1 }
  0xbd   : > { %1303 = vmatpush2.bf16.msra.mxu0 %v1956_v36  ;;  %1424 = vmatpush2.bf16.msra.mxu1 %v1957_v37 }
  0xbe   : > { %1304 = vmatprep.subr.bf16.mxu0 %v1972_v1  ;;  %1425 = vmatprep.subr.bf16.mxu1 %v1972_v1 }
  0xc1   : > { %1305 = vmatpush2.bf16.msra.mxu0 %v1958_v38  ;;  %1426 = vmatpush2.bf16.msra.mxu1 %v1959_v39 }
  0xc2   : > { %1306 = vmatprep.subr.bf16.mxu0 %v1972_v1  ;;  %1427 = vmatprep.subr.bf16.mxu1 %v1972_v1 }
  0xc5   : > { %1307 = vmatpush2.bf16.msra.mxu0 %v1960_v40  ;;  %1428 = vmatpush2.bf16.msra.mxu1 %v1961_v41 }
  0xc6   : > { %1308 = vmatprep.subr.bf16.mxu0 %v1972_v1  ;;  %1429 = vmatprep.subr.bf16.mxu1 %v1972_v1 }
  0xc9   : > { %1309 = vmatpush2.bf16.msra.mxu0 %v1962_v42  ;;  %1430 = vmatpush2.bf16.msra.mxu1 %v1963_v43 }
  0xcc   : > { %1311 = vmatmul.mubr.bf16.vlgmr.msra.gmra.mxu0 %v2114_v30  ;;  %1432 = vmatmul.mubr.bf16.vlgmr.msra.gmra.mxu1 %v2328_v19 }
  0xfc   : > { %v365_v44 = vpop.f32.mrf.mxu0  ;;  %v486_v45 = vpop.f32.mrf.mxu1 }
  0xfd   : > { %v487_v46 = vadd.f32 %v486_v45, %v365_v44 }
  0xfe   : > { %v367_v47 = vpop.f32.mrf.mxu0  ;;  %v488_v48 = vpop.f32.mrf.mxu1 }
  0xff   : > { %v492_v1 = vpack.c.bf16 %v487_v46, %v487_v46  ;;  %v497_v56 = vsel %vm2442_vm2, %v487_v46, 0.0 }
 0x100   : > { %v368_v49 = vpop.f32.mrf.mxu0  ;;  %v489_v50 = vpop.f32.mrf.mxu1  ;;  %v506_v57 = vmul.f32 %v497_v56, %v497_v56  ;;  %v498_v58 = vsel %vm327_vm0, %v497_v56, 0.0 }
 0x101   : > { %494 = vst.msk [vmem:[%s2438_s15] sm:$0xf] %vm493_vm1, %v492_v1  ;;  %v499_v60 = vrot.slane %v498_v58, 4 }
 0x102   : > { %v369_v30 = vpop.f32.mrf.mxu0  ;;  %v490_v51 = vpop.f32.mrf.mxu1  ;;  %v507_v59 = vsel %vm327_vm0, %v506_v57, 0.0 }
 0x103   : > { %v508_v61 = vrot.slane %v507_v59, 4  ;;  %v500_v62 = vadd.f32 %v499_v60, %v498_v58 }
 0x105   : > { %v509_v2 = vadd.f32 %v508_v61, %v507_v59  ;;  %v501_v6 = vrot.slane %v500_v62, 2 }
 0x107   : > { %v510_v13 = vrot.slane %v509_v2, 2  ;;  %v502_v19 = vadd.f32 %v501_v6, %v500_v62 }
 0x109   : > { %v511_v22 = vadd.f32 %v510_v13, %v509_v2  ;;  %v503_v25 = vrot.slane %v502_v19, 1 }
 0x10b   : > { %v512_v27 = vrot.slane %v511_v22, 1  ;;  %v504_v31 = vadd.f32 %v503_v25, %v502_v19 }
 0x10d   : > { %v513_v34 = vadd.f32 %v512_v27, %v511_v22 }
 0x12c   : > { %v682_v63 = vpop.f32.mrf.mxu0  ;;  %v803_v0 = vpop.f32.mrf.mxu1 }
 0x12d   : > { %v804_v3 = vadd.f32 %v803_v0, %v682_v63 }
 0x12e   : > { %v684_v4 = vpop.f32.mrf.mxu0  ;;  %v805_v5 = vpop.f32.mrf.mxu1 }
 0x12f   : > { %v809_v7 = vpack.c.bf16 %v804_v3, %v804_v3  ;;  %v812_v8 = vsel %vm2442_vm2, %v804_v3, 0.0 }
 0x130   : > { %v685_v9 = vpop.f32.mrf.mxu0  ;;  %v813_v10 = vsel %vm327_vm0, %v812_v8, 0.0  ;;  %v821_v11 = vmul.f32 %v812_v8, %v812_v8  ;;  %v806_v12 = vpop.f32.mrf.mxu1 }
 0x131   : > { %1690 = vst.msk [vmem:[%s2438_s15 + $0x4] sm:$0xf] %vm493_vm1, %v809_v7  ;;  %v814_v14 = vrot.slane %v813_v10, 4 }
 0x132   : > { %v686_v15 = vpop.f32.mrf.mxu0  ;;  %v822_v16 = vsel %vm327_vm0, %v821_v11, 0.0  ;;  %v807_v17 = vpop.f32.mrf.mxu1 }
 0x133   : > { %v815_v20 = vadd.f32 %v814_v14, %v813_v10  ;;  %v823_v21 = vrot.slane %v822_v16, 4 }
 0x135   : > { %v816_v23 = vrot.slane %v815_v20, 2  ;;  %v824_v24 = vadd.f32 %v823_v21, %v822_v16 }
 0x137   : > { %v817_v18 = vadd.f32 %v816_v23, %v815_v20  ;;  %v825_v26 = vrot.slane %v824_v24, 2 }
 0x139   : > { %v818_v28 = vrot.slane %v817_v18, 1  ;;  %v826_v29 = vadd.f32 %v825_v26, %v824_v24 }
 0x13b   : > { %v819_v32 = vadd.f32 %v818_v28, %v817_v18  ;;  %v827_v33 = vrot.slane %v826_v29, 1 }
 0x13d   : > { %v820_v35 = vadd.f32 %v819_v32, %v504_v31  ;;  %v828_v36 = vadd.f32 %v827_v33, %v826_v29 }
 0x13f   : > { %v829_v37 = vadd.f32 %v828_v36, %v513_v34 }
 0x15c   : > { %v997_v38 = vpop.f32.mrf.mxu0  ;;  %v1118_v39 = vpop.f32.mrf.mxu1 }
 0x15d   : > { %v1119_v40 = vadd.f32 %v1118_v39, %v997_v38 }
 0x15e   : > { %v999_v41 = vpop.f32.mrf.mxu0  ;;  %v1120_v42 = vpop.f32.mrf.mxu1 }
 0x15f   : > { %v1124_v43 = vpack.c.bf16 %v1119_v40, %v1119_v40  ;;  %v1127_v48 = vsel %vm2442_vm2, %v1119_v40, 0.0 }
 0x160   : > { %v1000_v44 = vpop.f32.mrf.mxu0  ;;  %v1121_v45 = vpop.f32.mrf.mxu1  ;;  %v1136_v1 = vmul.f32 %v1127_v48, %v1127_v48  ;;  %v1128_v49 = vsel %vm327_vm0, %v1127_v48, 0.0 }
 0x161   : > { %1769 = vst.msk [vmem:[%s2438_s15 + $0x8] sm:$0xf] %vm493_vm1, %v1124_v43  ;;  %v1129_v30 = vrot.slane %v1128_v49, 4 }
 0x162   : > { %v1001_v46 = vpop.f32.mrf.mxu0  ;;  %v1122_v47 = vpop.f32.mrf.mxu1  ;;  %v1137_v50 = vsel %vm327_vm0, %v1136_v1, 0.0 }
 0x163   : > { %v1138_v51 = vrot.slane %v1137_v50, 4  ;;  %v1130_v52 = vadd.f32 %v1129_v30, %v1128_v49 }
 0x165   : > { %v1139_v53 = vadd.f32 %v1138_v51, %v1137_v50  ;;  %v1131_v54 = vrot.slane %v1130_v52, 2 }
 0x167   : > { %v1140_v58 = vrot.slane %v1139_v53, 2  ;;  %v1132_v62 = vadd.f32 %v1131_v54, %v1130_v52 }
 0x169   : > { %v1141_v6 = vadd.f32 %v1140_v58, %v1139_v53  ;;  %v1133_v11 = vrot.slane %v1132_v62, 1 }
 0x16b   : > { %v1142_v14 = vrot.slane %v1141_v6, 1  ;;  %v1134_v16 = vadd.f32 %v1133_v11, %v1132_v62 }
 0x16d   : > { %v1143_v20 = vadd.f32 %v1142_v14, %v1141_v6  ;;  %v1135_v23 = vadd.f32 %v1134_v16, %v820_v35 }
 0x16f   : > { %v1144_v18 = vadd.f32 %v1143_v20, %v829_v37 }
 0x18c   : > { %v1312_v56 = vpop.f32.mrf.mxu0  ;;  %v1433_v57 = vpop.f32.mrf.mxu1 }
 0x18d   : > { %v1434_v59 = vadd.f32 %v1433_v57, %v1312_v56 }
 0x18e   : > { %v1314_v60 = vpop.f32.mrf.mxu0  ;;  %v1435_v61 = vpop.f32.mrf.mxu1 }
 0x18f   : > { %v1439_v63 = vpack.c.bf16 %v1434_v59, %v1434_v59  ;;  %v1442_v0 = vsel %vm2442_vm2, %v1434_v59, 0.0 }
 0x190   : > { %v1315_v2 = vpop.f32.mrf.mxu0  ;;  %v1443_v3 = vsel %vm327_vm0, %v1442_v0, 0.0  ;;  %v1451_v4 = vmul.f32 %v1442_v0, %v1442_v0  ;;  %v1436_v5 = vpop.f32.mrf.mxu1 }
 0x191   : > { %1848 = vst.msk [vmem:[%s2438_s15 + $0xc] sm:$0xf] %vm493_vm1, %v1439_v63  ;;  %v1444_v7 = vrot.slane %v1443_v3, 4 }
 0x192   : > { %v1316_v8 = vpop.f32.mrf.mxu0  ;;  %v1452_v9 = vsel %vm327_vm0, %v1451_v4, 0.0  ;;  %v1437_v10 = vpop.f32.mrf.mxu1 }
 0x193   : > { %v1445_v12 = vadd.f32 %v1444_v7, %v1443_v3  ;;  %v1453_v13 = vrot.slane %v1452_v9, 4 }
 0x195   : > { %v1446_v55 = vrot.slane %v1445_v12, 2  ;;  %v1454_v15 = vadd.f32 %v1453_v13, %v1452_v9 }
 0x197   : > { %v1447_v17 = vadd.f32 %v1446_v55, %v1445_v12  ;;  %v1455_v19 = vrot.slane %v1454_v15, 2 }
 0x199   : > { %v1448_v21 = vrot.slane %v1447_v17, 1  ;;  %v1456_v22 = vadd.f32 %v1455_v19, %v1454_v15 }
 0x19b   : > { %v1449_v24 = vadd.f32 %v1448_v21, %v1447_v17  ;;  %v1457_v25 = vrot.slane %v1456_v22, 1 }
 0x19d   : > { %v1450_v26 = vadd.f32 %v1449_v24, %v1135_v23  ;;  %v1458_v27 = vadd.f32 %v1457_v25, %v1456_v22 }
 0x19f   : > { %v1459_v28 = vadd.f32 %v1458_v27, %v1144_v18  ;;  %1461 = vst.msk [vmem:[%s181_s20] sm:$0x1] %vm1460_vm3, %v1450_v26 }
 0x1a1   : > { %1462 = vst.msk [vmem:[%s181_s20 + $0x1] sm:$0x1] %vm1460_vm3, %v1459_v28 }
 0x1a2 PF: > { %s14_s12 = sadd.s32 1, %s1970_s12  }
 0x1a3   : > { %p11_p4 = scmp.ge.s32.totalorder %s14_s12, 4  }
 0x1a5   :  { %13 = sbr.rel (!%p11_p4) target bundleno = 1 (0x1), region = 80 }

// kernel: _lambda_.16
= control target key start
LH: loop header
LB: loop body
LE: loop exit
PB: predicated region body
PF: predicated region fallthrough
CT: control target
= control target key end

     0   :  { %s4037_s12 = smov 0   ;;  %s4858_s0 = inlined_call_operand.vmem [shape: bf16[2,32,384], index: 0, kind: input, shape index: {}]   ;;  %s4859_s1 = inlined_call_operand.vmem [shape: bf16[4,2,384,32], index: 1, kind: input, shape index: {}]   ;;  %s4860_s2 = inlined_call_operand.vmem [shape: bf16[2,4,16,32], index: 2, kind: output, shape index: {0}]   ;;  %s4861_s3 = inlined_call_operand.vmem [shape: f32[2,2,32], index: 3, kind: output, shape index: {1}]  }
   0x1 LB: > { %s2791_s13 = sadd.s32 4294967295, %s4013_s12   ;;  %p2795_p0 = scmp.ge.s32.totalorder %s4013_s12, 1  ;;  %s4013_s12 = sphi %s4037_s12, %s14_s12  }
   0x2   : > { %p140_p1 = scmp.lt.s32.totalorder %s4013_s12, 3 }
   0x4   : > { %p141_p2 = pnand %p2795_p0, %p140_p1 }
   0x5   : > { %p168_p3 = scmp.lt.s32.totalorder (!%p141_p2), %s2791_s13, 1 }
   0x6   : > { %144 = sbr.rel (%p141_p2) target bundleno = 494 (0x1ee), region = 28 }
   0xb   : > { %v3796_v0 = vld [vmem:[%s4859_s1 + $0x138] sm:$0xff]   ;;  %v4015_v1 = vmov 0.0   ;;  %v3799_v4 = vld [vmem:[%s4859_s1 + $0x130] sm:$0xff]   ;;  %vm4016_vm0 = vmmov 0   ;;  %v3802_v7 = vld [vmem:[%s4859_s1 + $0x128] sm:$0xff]   ;;  %s4867_s13 = smov (!%p168_p3, %s2791_s13), 1 }
   0xc   : > { %3625 = vmatprep.subr.bf16.mxu1 %v4015_v1  ;;  %v3797_v2 = vld [vmem:[%s4859_s1 + $0xf8] sm:$0xff]   ;;  %3377 = vmatprep.subr.bf16.mxu0 %v3796_v0  ;;  %v3800_v5 = vld [vmem:[%s4859_s1 + $0xf0] sm:$0xff]   ;;  %v3803_v8 = vld [vmem:[%s4859_s1 + $0xe8] sm:$0xff]   ;;  %s3785_s21 = smul.u32 48, %s4867_s13  ;;  %s3368_s16 = sshll.u32 %s4867_s13, 5  ;;  %vm802_vm2 = vcmask 257024  }
   0xd   : > { %v3798_v3 = vld [vmem:[%s4859_s1 + $0x178] sm:$0xff]   ;;  %3378 = vmatpush3.bf16.msra.mxu0 %v3797_v2  ;;  %3641 = vmatprep.mubr.msk.bf16.mxu1 %vm4016_vm0, %v4015_v1  ;;  %v3801_v6 = vld [vmem:[%s4859_s1 + $0x170] sm:$0xff]   ;;  %v3804_v9 = vld [vmem:[%s4859_s1 + $0x168] sm:$0xff]   ;;  %s4797_s18 = scalar_lea.vmem %s4860_s2, %s3368_s16  ;;  %vm811_vm4 = vcmask 261120   ;;  %s2799_s19 = sshll.u32 %s4867_s13, 1  ;;  %vm2702_vm5 = vcmask 253952  }
   0xe   : > { %3626 = vmatpush3.bf16.msra.mxu1 %v3798_v3  ;;  %3379 = vmatprep.subr.bf16.mxu0 %v3799_v4  ;;  %v3805_v10 = vld [vmem:[%s4859_s1 + $0x120] sm:$0xff]   ;;  %v3808_v13 = vld [vmem:[%s4859_s1 + $0x118] sm:$0xff]   ;;  %v3811_v16 = vld [vmem:[%s4859_s1 + $0x110] sm:$0xff]   ;;  %s4123_s5 = scalar_lea.vmem %s4858_s0, %s3785_s21  ;;  %s181_s22 = scalar_lea.vmem %s4861_s3, %s2799_s19 }
   0xf   : > { %3627 = vmatprep.subr.bf16.mxu1 %v4015_v1  ;;  %v3806_v11 = vld [vmem:[%s4859_s1 + $0xe0] sm:$0xff]   ;;  %v3809_v14 = vld [vmem:[%s4859_s1 + $0xd8] sm:$0xff]   ;;  %v3812_v17 = vld [vmem:[%s4859_s1 + $0xd0] sm:$0xff]  }
  0x10   : > { %v3807_v12 = vld [vmem:[%s4859_s1 + $0x160] sm:$0xff]   ;;  %v3810_v15 = vld [vmem:[%s4859_s1 + $0x158] sm:$0xff]   ;;  %v3813_v18 = vld [vmem:[%s4859_s1 + $0x150] sm:$0xff]  }
  0x11   : > { %3380 = vmatpush3.bf16.msra.mxu0 %v3800_v5  ;;  %v3814_v19 = vld [vmem:[%s4859_s1 + $0x108] sm:$0xff]   ;;  %v3817_v22 = vld [vmem:[%s4859_s1 + $0x100] sm:$0xff]   ;;  %v3822_v28 = vld [vmem:[%s4859_s1 + $0x78] sm:$0xff]  }
  0x12   : > { %3628 = vmatpush3.bf16.msra.mxu1 %v3801_v6  ;;  %3381 = vmatprep.subr.bf16.mxu0 %v3802_v7  ;;  %v3815_v20 = vld [vmem:[%s4859_s1 + $0xc8] sm:$0xff]   ;;  %v264_v24 = vld [vmem:[%s4123_s5] sm:$0xff]  ;;  %v4150_v29 = vld [vmem:[%s4123_s5 + $0x14] sm:$0xf] }
  0x13   : > { %3629 = vmatprep.subr.bf16.mxu1 %v4015_v1  ;;  %v3816_v21 = vld [vmem:[%s4859_s1 + $0x148] sm:$0xff]   ;;  %v3818_v25 = vld [vmem:[%s4859_s1 + $0xc0] sm:$0xff]   ;;  %v3825_v32 = vld [vmem:[%s4859_s1 + $0x38] sm:$0xff]  }
  0x14   : > { %v4132_v23 = vld [vmem:[%s4123_s5 + $0xc] sm:$0xff]  ;;  %v3819_v27 = vld [vmem:[%s4859_s1 + $0x140] sm:$0xff]   ;;  %v265_v30 = vld [vmem:[%s4123_s5 + $0x8] sm:$0xf] }
  0x15   : > { %3382 = vmatpush3.bf16.msra.mxu0 %v3803_v8  ;;  %v4140_v26 = vcombine.high %v264_v24, %v4132_v23  ;;  %v4155_v31 = vcombine.low %v264_v24, %v4132_v23  ;;  %v2850_v33 = vcombine.low %v265_v30, %v4150_v29  ;;  %v3826_v34 = vld [vmem:[%s4859_s1 + $0xb8] sm:$0xff]   ;;  %v3827_v35 = vld [vmem:[%s4859_s1 + $0x70] sm:$0xff]   ;;  %v3830_v38 = vld [vmem:[%s4859_s1 + $0x68] sm:$0xff]  }
  0x16   : > { %3630 = vmatpush3.bf16.msra.mxu1 %v3804_v9  ;;  %3383 = vmatprep.subr.bf16.mxu0 %v3805_v10  ;;  %v3828_v36 = vld [vmem:[%s4859_s1 + $0x30] sm:$0xff]   ;;  %v3831_v39 = vld [vmem:[%s4859_s1 + $0x28] sm:$0xff]   ;;  %v3833_v41 = vld [vmem:[%s4859_s1 + $0x60] sm:$0xff]  }
  0x17   : > { %3631 = vmatprep.subr.bf16.mxu1 %v4015_v1  ;;  %507 = vmatprep.mubr.bf16.mxu0 %v4140_v26  ;;  %v3829_v37 = vld [vmem:[%s4859_s1 + $0xb0] sm:$0xff]   ;;  %v3832_v40 = vld [vmem:[%s4859_s1 + $0xa8] sm:$0xff]   ;;  %v3834_v42 = vld [vmem:[%s4859_s1 + $0x20] sm:$0xff]  }
  0x18   : > { %v3835_v43 = vld [vmem:[%s4859_s1 + $0xa0] sm:$0xff]   ;;  %v3836_v44 = vld [vmem:[%s4859_s1 + $0x58] sm:$0xff]   ;;  %v3839_v47 = vld [vmem:[%s4859_s1 + $0x50] sm:$0xff]  }
  0x19   : > { %3384 = vmatpush3.bf16.msra.mxu0 %v3806_v11  ;;  %v3837_v45 = vld [vmem:[%s4859_s1 + $0x18] sm:$0xff]   ;;  %v3840_v49 = vld [vmem:[%s4859_s1 + $0x10] sm:$0xff]   ;;  %v3842_v52 = vld [vmem:[%s4859_s1 + $0x48] sm:$0xff]  }
  0x1a   : > { %3632 = vmatpush3.bf16.msra.mxu1 %v3807_v12  ;;  %3385 = vmatprep.subr.bf16.mxu0 %v3808_v13  ;;  %v3838_v46 = vld [vmem:[%s4859_s1 + $0x98] sm:$0xff]   ;;  %v3841_v51 = vld [vmem:[%s4859_s1 + $0x90] sm:$0xff]   ;;  %v3843_v53 = vld [vmem:[%s4859_s1 + $0x8] sm:$0xff]  }
  0x1b   : > { %3633 = vmatprep.subr.bf16.mxu1 %v4015_v1  ;;  %v4212_v48 = vld [vmem:[%s4123_s5 + $0x18] sm:$0xff]  ;;  %v3844_v54 = vld [vmem:[%s4859_s1 + $0x88] sm:$0xff]   ;;  %v3845_v55 = vld [vmem:[%s4859_s1 + $0x40] sm:$0xff]  }
  0x1c   : > { %v4219_v50 = vcombine.high %v4132_v23, %v4212_v48  ;;  %v215_v56 = vld [vmem:[%s4123_s5 + $0x20] sm:$0xf]  ;;  %v3850_v59 = vld [vmem:[%s4859_s1 + $0x2b8] sm:$0xff]   ;;  %v4252_v60 = vcombine.low %v4132_v23, %v4212_v48  ;;  %v3853_v0 = vld [vmem:[%s4859_s1 + $0x2b0] sm:$0xff]  }
  0x1d   : > { %3386 = vmatpush3.bf16.msra.mxu0 %v3809_v14  ;;  %v3846_v57 = vld [vmem:[%s4859_s1] sm:$0xff]   ;;  %v3851_v61 = vld [vmem:[%s4859_s1 + $0x278] sm:$0xff]   ;;  %v2877_v62 = vcombine.low %v4150_v29, %v215_v56  ;;  %v3854_v2 = vld [vmem:[%s4859_s1 + $0x270] sm:$0xff]  }
  0x1e   : > { %3634 = vmatpush3.bf16.msra.mxu1 %v3810_v15  ;;  %3387 = vmatprep.subr.bf16.mxu0 %v3811_v16  ;;  %v3847_v58 = vld [vmem:[%s4859_s1 + $0x80] sm:$0xff]   ;;  %v3852_v63 = vld [vmem:[%s4859_s1 + $0x2f8] sm:$0xff]   ;;  %v3855_v3 = vld [vmem:[%s4859_s1 + $0x2f0] sm:$0xff]  }
  0x1f   : > { %3635 = vmatprep.subr.bf16.mxu1 %v4015_v1  ;;  %v3856_v4 = vld [vmem:[%s4859_s1 + $0x2a8] sm:$0xff]   ;;  %v3859_v7 = vld [vmem:[%s4859_s1 + $0x2a0] sm:$0xff]   ;;  %v3862_v10 = vld [vmem:[%s4859_s1 + $0x298] sm:$0xff]  }
  0x20   : > { %v3857_v5 = vld [vmem:[%s4859_s1 + $0x268] sm:$0xff]   ;;  %v3860_v8 = vld [vmem:[%s4859_s1 + $0x260] sm:$0xff]   ;;  %v3863_v11 = vld [vmem:[%s4859_s1 + $0x258] sm:$0xff]  }
  0x21   : > { %3388 = vmatpush3.bf16.msra.mxu0 %v3812_v17  ;;  %v3858_v6 = vld [vmem:[%s4859_s1 + $0x2e8] sm:$0xff]   ;;  %v3861_v9 = vld [vmem:[%s4859_s1 + $0x2e0] sm:$0xff]   ;;  %v3864_v12 = vld [vmem:[%s4859_s1 + $0x2d8] sm:$0xff]  }
  0x22   : > { %3636 = vmatpush3.bf16.msra.mxu1 %v3813_v18  ;;  %3389 = vmatprep.subr.bf16.mxu0 %v3814_v19  ;;  %v3865_v13 = vld [vmem:[%s4859_s1 + $0x290] sm:$0xff]   ;;  %v3868_v16 = vld [vmem:[%s4859_s1 + $0x288] sm:$0xff]   ;;  %v3871_v19 = vld [vmem:[%s4859_s1 + $0x280] sm:$0xff]  }
  0x23   : > { %3637 = vmatprep.subr.bf16.mxu1 %v4015_v1  ;;  %v3866_v14 = vld [vmem:[%s4859_s1 + $0x250] sm:$0xff]   ;;  %v3869_v17 = vld [vmem:[%s4859_s1 + $0x248] sm:$0xff]  }
  0x24   : > { %v3867_v15 = vld [vmem:[%s4859_s1 + $0x2d0] sm:$0xff]   ;;  %v3870_v18 = vld [vmem:[%s4859_s1 + $0x2c8] sm:$0xff]  }
  0x25   : > { %3390 = vmatpush3.bf16.msra.mxu0 %v3815_v20  ;;  %v3872_v20 = vld [vmem:[%s4859_s1 + $0x240] sm:$0xff]   ;;  %v4339_v23 = vld [vmem:[%s4123_s5 + $0x14] sm:$0xf]  ;;  %v888_v24 = vld [vmem:[%s4123_s5 + $0x8] sm:$0xf] }
  0x26   : > { %3638 = vmatpush3.bf16.msra.mxu1 %v3816_v21  ;;  %3391 = vmatprep.subr.bf16.mxu0 %v3817_v22  ;;  %v3873_v21 = vld [vmem:[%s4859_s1 + $0x2c0] sm:$0xff]   ;;  %v3874_v22 = vld [vmem:[%s4859_s1 + $0x1f8] sm:$0xff]   ;;  %v3879_v29 = vld [vmem:[%s4859_s1 + $0x1b0] sm:$0xff]  }
  0x27   : > { %3639 = vmatprep.subr.bf16.mxu1 %v4015_v1  ;;  %v3880_v30 = vld [vmem:[%s4859_s1 + $0x230] sm:$0xff]  }
  0x28   : > { %v3903_v56 = vld [vmem:[%s4859_s1 + $0x430] sm:$0xff]  }
  0x29   : > { %3392 = vmatpush3.bf16.msra.mxu0 %v3818_v25  ;;  %v3876_v25 = vld [vmem:[%s4859_s1 + $0x1b8] sm:$0xff]  }
  0x2a   : > { %3640 = vmatpush3.bf16.msra.mxu1 %v3819_v27  ;;  %3408 = vmatprep.subr.bf16.mxu0 %v3822_v28  ;;  %v3877_v27 = vld [vmem:[%s4859_s1 + $0x238] sm:$0xff]   ;;  %v3878_v28 = vld [vmem:[%s4859_s1 + $0x1f0] sm:$0xff]  }
  0x2b   : > { %3645 = vmatprep.subr.bf16.mxu1 %v4015_v1 }
  0x2c   : > { %508 = vmatmul.mubr.bf16.vlgmr.msra.gmra.mxu0 %v4155_v31 }
  0x2d   : > { %3642 = vmatmul.mubr.bf16.vlgmr.msra.gmra.mxu1 %v2850_v33  ;;  %3409 = vmatpush3.bf16.msra.mxu0 %v3825_v32  ;;  %v3881_v32 = vld [vmem:[%s4859_s1 + $0x1e8] sm:$0xff]  }
  0x2e   : > { %3646 = vmatpush3.bf16.msra.mxu1 %v3826_v34  ;;  %3410 = vmatprep.subr.bf16.mxu0 %v3827_v35  ;;  %v3883_v33 = vld [vmem:[%s4859_s1 + $0x228] sm:$0xff]   ;;  %v3884_v34 = vld [vmem:[%s4859_s1 + $0x1e0] sm:$0xff]  }
  0x2f   : > { %3647 = vmatprep.subr.bf16.mxu1 %v4015_v1  ;;  %3661 = vmatprep.mubr.msk.bf16.mxu1 %vm4016_vm0, %v4015_v1  ;;  %v3885_v35 = vld [vmem:[%s4859_s1 + $0x1a0] sm:$0xff]  }
  0x30   : > { %744 = vmatprep.mubr.bf16.mxu0 %v4219_v50 }
  0x31   : > { %3411 = vmatpush3.bf16.msra.mxu0 %v3828_v36  ;;  %v3886_v36 = vld [vmem:[%s4859_s1 + $0x220] sm:$0xff]  }
  0x32   : > { %3648 = vmatpush3.bf16.msra.mxu1 %v3829_v37  ;;  %3412 = vmatprep.subr.bf16.mxu0 %v3830_v38  ;;  %v3887_v37 = vld [vmem:[%s4859_s1 + $0x1d8] sm:$0xff]  }
  0x33   : > { %3649 = vmatprep.subr.bf16.mxu1 %v4015_v1  ;;  %v3888_v38 = vld [vmem:[%s4859_s1 + $0x198] sm:$0xff]  }
  0x35   : > { %3413 = vmatpush3.bf16.msra.mxu0 %v3831_v39  ;;  %v3889_v39 = vld [vmem:[%s4859_s1 + $0x218] sm:$0xff]  }
  0x36   : > { %3650 = vmatpush3.bf16.msra.mxu1 %v3832_v40  ;;  %3414 = vmatprep.subr.bf16.mxu0 %v3833_v41  ;;  %v3890_v40 = vld [vmem:[%s4859_s1 + $0x1d0] sm:$0xff]  }
  0x37   : > { %3651 = vmatprep.subr.bf16.mxu1 %v4015_v1  ;;  %v3891_v41 = vld [vmem:[%s4859_s1 + $0x190] sm:$0xff]  }
  0x39   : > { %3415 = vmatpush3.bf16.msra.mxu0 %v3834_v42  ;;  %v3892_v42 = vld [vmem:[%s4859_s1 + $0x210] sm:$0xff]  }
  0x3a   : > { %3652 = vmatpush3.bf16.msra.mxu1 %v3835_v43  ;;  %3416 = vmatprep.subr.bf16.mxu0 %v3836_v44  ;;  %v3893_v43 = vld [vmem:[%s4859_s1 + $0x1c8] sm:$0xff]  }
  0x3b   : > { %3653 = vmatprep.subr.bf16.mxu1 %v4015_v1  ;;  %v3894_v44 = vld [vmem:[%s4859_s1 + $0x188] sm:$0xff]  }
  0x3d   : > { %3417 = vmatpush3.bf16.msra.mxu0 %v3837_v45  ;;  %v3895_v45 = vld [vmem:[%s4859_s1 + $0x208] sm:$0xff]  }
  0x3e   : > { %3654 = vmatpush3.bf16.msra.mxu1 %v3838_v46  ;;  %3418 = vmatprep.subr.bf16.mxu0 %v3839_v47  ;;  %v3896_v46 = vld [vmem:[%s4859_s1 + $0x1c0] sm:$0xff]  }
  0x3f   : > { %3655 = vmatprep.subr.bf16.mxu1 %v4015_v1  ;;  %v3897_v47 = vld [vmem:[%s4859_s1 + $0x180] sm:$0xff]  }
  0x41   : > { %3419 = vmatpush3.bf16.msra.mxu0 %v3840_v49  ;;  %v3898_v49 = vld [vmem:[%s4859_s1 + $0x200] sm:$0xff]  }
  0x42   : > { %3656 = vmatpush3.bf16.msra.mxu1 %v3841_v51  ;;  %3420 = vmatprep.subr.bf16.mxu0 %v3842_v52  ;;  %v3899_v51 = vld [vmem:[%s4859_s1 + $0x438] sm:$0xff]   ;;  %v837_v52 = vld [vmem:[%s4123_s5 + $0x20] sm:$0xf] }
  0x43   : > { %3657 = vmatprep.subr.bf16.mxu1 %v4015_v1 }
  0x45   : > { %3421 = vmatpush3.bf16.msra.mxu0 %v3843_v53  ;;  %v3901_v53 = vld [vmem:[%s4859_s1 + $0x3f8] sm:$0xff]  }
  0x46   : > { %3658 = vmatpush3.bf16.msra.mxu1 %v3844_v54  ;;  %3422 = vmatprep.subr.bf16.mxu0 %v3845_v55  ;;  %v3029_v54 = vcombine.low %v4339_v23, %v837_v52  ;;  %v3902_v55 = vld [vmem:[%s4859_s1 + $0x478] sm:$0xff]   ;;  %v3957_v52 = vld [vmem:[%s4859_s1 + $0x5f0] sm:$0xff]  }
  0x47   : > { %3659 = vmatprep.subr.bf16.mxu1 %v4015_v1 }
  0x49   : > { %3423 = vmatpush3.bf16.msra.mxu0 %v3846_v57  ;;  %v3904_v57 = vld [vmem:[%s4859_s1 + $0x3f0] sm:$0xff]  }
  0x4a   : > { %3660 = vmatpush3.bf16.msra.mxu1 %v3847_v58  ;;  %3439 = vmatprep.subr.bf16.mxu0 %v3850_v59  ;;  %v3905_v58 = vld [vmem:[%s4859_s1 + $0x470] sm:$0xff]   ;;  %v3906_v59 = vld [vmem:[%s4859_s1 + $0x428] sm:$0xff]  }
  0x4b   : > { %3665 = vmatprep.subr.bf16.mxu1 %v4015_v1 }
  0x4c   : > { %745 = vmatmul.mubr.bf16.vlgmr.msra.gmra.mxu0 %v4252_v60 }
  0x4d   : > { %3662 = vmatmul.mubr.bf16.vlgmr.msra.gmra.mxu1 %v2877_v62  ;;  %3440 = vmatpush3.bf16.msra.mxu0 %v3851_v61  ;;  %v3907_v61 = vld [vmem:[%s4859_s1 + $0x3e8] sm:$0xff]  }
  0x4e   : > { %3666 = vmatpush3.bf16.msra.mxu1 %v3852_v63  ;;  %3441 = vmatprep.subr.bf16.mxu0 %v3853_v0  ;;  %v3908_v62 = vld [vmem:[%s4859_s1 + $0x468] sm:$0xff]   ;;  %v3909_v63 = vld [vmem:[%s4859_s1 + $0x420] sm:$0xff]  }
  0x4f   : > { %3667 = vmatprep.subr.bf16.mxu1 %v4015_v1  ;;  %1130 = vmatprep.mubr.bf16.mxu0 %v4140_v26  ;;  %v3002_v26 = vcombine.low %v888_v24, %v4339_v23  ;;  %v3911_v0 = vld [vmem:[%s4859_s1 + $0x460] sm:$0xff]   ;;  %v3931_v23 = vld [vmem:[%s4859_s1 + $0x368] sm:$0xff]  }
  0x50   : > { %3681 = vmatprep.mubr.msk.bf16.mxu1 %vm4016_vm0, %v4015_v1  ;;  %v3934_v24 = vld [vmem:[%s4859_s1 + $0x360] sm:$0xff]  }
  0x51   : > { %3442 = vmatpush3.bf16.msra.mxu0 %v3854_v2  ;;  %v3912_v2 = vld [vmem:[%s4859_s1 + $0x418] sm:$0xff]  }
  0x52   : > { %3668 = vmatpush3.bf16.msra.mxu1 %v3855_v3  ;;  %3443 = vmatprep.subr.bf16.mxu0 %v3856_v4  ;;  %v3913_v3 = vld [vmem:[%s4859_s1 + $0x3d8] sm:$0xff]  }
  0x53   : > { %3669 = vmatprep.subr.bf16.mxu1 %v4015_v1  ;;  %v3914_v4 = vld [vmem:[%s4859_s1 + $0x458] sm:$0xff]  }
  0x55   : > { %3444 = vmatpush3.bf16.msra.mxu0 %v3857_v5  ;;  %v3915_v5 = vld [vmem:[%s4859_s1 + $0x410] sm:$0xff]  }
  0x56   : > { %3670 = vmatpush3.bf16.msra.mxu1 %v3858_v6  ;;  %3445 = vmatprep.subr.bf16.mxu0 %v3859_v7  ;;  %v3916_v6 = vld [vmem:[%s4859_s1 + $0x3d0] sm:$0xff]  }
  0x57   : > { %3671 = vmatprep.subr.bf16.mxu1 %v4015_v1  ;;  %v3917_v7 = vld [vmem:[%s4859_s1 + $0x450] sm:$0xff]  }
  0x59   : > { %3446 = vmatpush3.bf16.msra.mxu0 %v3860_v8  ;;  %v3918_v8 = vld [vmem:[%s4859_s1 + $0x408] sm:$0xff]  }
  0x5a   : > { %3672 = vmatpush3.bf16.msra.mxu1 %v3861_v9  ;;  %3447 = vmatprep.subr.bf16.mxu0 %v3862_v10  ;;  %v3919_v9 = vld [vmem:[%s4859_s1 + $0x3c8] sm:$0xff]  }
  0x5b   : > { %3673 = vmatprep.subr.bf16.mxu1 %v4015_v1  ;;  %v3920_v10 = vld [vmem:[%s4859_s1 + $0x448] sm:$0xff]  }
  0x5d   : > { %3448 = vmatpush3.bf16.msra.mxu0 %v3863_v11  ;;  %v3921_v11 = vld [vmem:[%s4859_s1 + $0x400] sm:$0xff]  }
  0x5e   : > { %3674 = vmatpush3.bf16.msra.mxu1 %v3864_v12  ;;  %3449 = vmatprep.subr.bf16.mxu0 %v3865_v13  ;;  %v3922_v12 = vld [vmem:[%s4859_s1 + $0x3c0] sm:$0xff]  }
  0x5f   : > { %3675 = vmatprep.subr.bf16.mxu1 %v4015_v1  ;;  %v3923_v13 = vld [vmem:[%s4859_s1 + $0x440] sm:$0xff]  }
  0x61   : > { %3450 = vmatpush3.bf16.msra.mxu0 %v3866_v14  ;;  %v3924_v14 = vld [vmem:[%s4859_s1 + $0x378] sm:$0xff]  }
  0x62   : > { %3676 = vmatpush3.bf16.msra.mxu1 %v3867_v15  ;;  %3451 = vmatprep.subr.bf16.mxu0 %v3868_v16  ;;  %v3925_v15 = vld [vmem:[%s4123_s5 + $0x14] ss:$12 sps:$4 sm:$0xff]   ;;  %v3926_v16 = vld [vmem:[%s4859_s1 + $0x338] sm:$0xff]  }
  0x63   : > { %3677 = vmatprep.subr.bf16.mxu1 %v4015_v1 }
  0x65   : > { %3452 = vmatpush3.bf16.msra.mxu0 %v3869_v17  ;;  %v4519_v17 = vld [vmem:[%s4123_s5 + $0x24] sm:$0xff] }
  0x66   : > { %3678 = vmatpush3.bf16.msra.mxu1 %v3870_v18  ;;  %3453 = vmatprep.subr.bf16.mxu0 %v3871_v19  ;;  %v3927_v18 = vld [vmem:[%s4859_s1 + $0x3b8] sm:$0xff]   ;;  %v3928_v19 = vld [vmem:[%s4859_s1 + $0x370] sm:$0xff]  }
  0x67   : > { %3679 = vmatprep.subr.bf16.mxu1 %v4015_v1 }
  0x69   : > { %3454 = vmatpush3.bf16.msra.mxu0 %v3872_v20  ;;  %v3182_v20 = vcombine.high %v4212_v48, %v4519_v17  ;;  %v3932_v48 = vld [vmem:[%s4859_s1 + $0x328] sm:$0xff]  }
  0x6a   : > { %3680 = vmatpush3.bf16.msra.mxu1 %v3873_v21  ;;  %3470 = vmatprep.subr.bf16.mxu0 %v3874_v22  ;;  %v3929_v21 = vld [vmem:[%s4859_s1 + $0x330] sm:$0xff]  }
  0x6b   : > { %3685 = vmatprep.subr.bf16.mxu1 %v4015_v1  ;;  %v3930_v22 = vld [vmem:[%s4859_s1 + $0x3b0] sm:$0xff]  }
  0x6c   : > { %1131 = vmatmul.mubr.bf16.vlgmr.msra.gmra.mxu0 %v4155_v31  ;;  %v3882_v31 = vld [vmem:[%s4859_s1 + $0x1a8] sm:$0xff]  }
  0x6d   : > { %3682 = vmatmul.mubr.bf16.vlgmr.msra.gmra.mxu1 %v3002_v26  ;;  %3471 = vmatpush3.bf16.msra.mxu0 %v3876_v25  ;;  %v3935_v25 = vld [vmem:[%s4859_s1 + $0x320] sm:$0xff]  }
  0x6e   : > { %3686 = vmatpush3.bf16.msra.mxu1 %v3877_v27  ;;  %3472 = vmatprep.subr.bf16.mxu0 %v3878_v28  ;;  %v3936_v26 = vld [vmem:[%s4859_s1 + $0x3a0] sm:$0xff]   ;;  %v3937_v27 = vld [vmem:[%s4859_s1 + $0x358] sm:$0xff]  }
  0x6f   : > { %3687 = vmatprep.subr.bf16.mxu1 %v4015_v1  ;;  %1367 = vmatprep.mubr.bf16.mxu0 %v4219_v50  ;;  %v3938_v28 = vld [vmem:[%s4859_s1 + $0x318] sm:$0xff]  }
  0x70   : > { %3701 = vmatprep.mubr.msk.bf16.mxu1 %vm4016_vm0, %v4015_v1 }
  0x71   : > { %3473 = vmatpush3.bf16.msra.mxu0 %v3879_v29  ;;  %v3939_v29 = vld [vmem:[%s4859_s1 + $0x398] sm:$0xff]  }
  0x72   : > { %3688 = vmatpush3.bf16.msra.mxu1 %v3880_v30  ;;  %3474 = vmatprep.subr.bf16.mxu0 %v3881_v32  ;;  %v3940_v30 = vld [vmem:[%s4859_s1 + $0x350] sm:$0xff]  }
  0x73   : > { %3689 = vmatprep.subr.bf16.mxu1 %v4015_v1  ;;  %v3941_v32 = vld [vmem:[%s4859_s1 + $0x310] sm:$0xff]  }
  0x75   : > { %3475 = vmatpush3.bf16.msra.mxu0 %v3882_v31  ;;  %v3942_v31 = vld [vmem:[%s4859_s1 + $0x390] sm:$0xff]  }
  0x76   : > { %3690 = vmatpush3.bf16.msra.mxu1 %v3883_v33  ;;  %3476 = vmatprep.subr.bf16.mxu0 %v3884_v34  ;;  %v3943_v33 = vld [vmem:[%s4859_s1 + $0x348] sm:$0xff]  }
  0x77   : > { %3691 = vmatprep.subr.bf16.mxu1 %v4015_v1  ;;  %v3944_v34 = vld [vmem:[%s4859_s1 + $0x308] sm:$0xff]  }
  0x79   : > { %3477 = vmatpush3.bf16.msra.mxu0 %v3885_v35  ;;  %v3945_v35 = vld [vmem:[%s4859_s1 + $0x388] sm:$0xff]  }
  0x7a   : > { %3692 = vmatpush3.bf16.msra.mxu1 %v3886_v36  ;;  %3478 = vmatprep.subr.bf16.mxu0 %v3887_v37  ;;  %v3946_v36 = vld [vmem:[%s4859_s1 + $0x340] sm:$0xff]  }
  0x7b   : > { %3693 = vmatprep.subr.bf16.mxu1 %v4015_v1  ;;  %v3947_v37 = vld [vmem:[%s4859_s1 + $0x300] sm:$0xff]  }
  0x7d   : > { %3479 = vmatpush3.bf16.msra.mxu0 %v3888_v38  ;;  %v3948_v38 = vld [vmem:[%s4859_s1 + $0x380] sm:$0xff]  }
  0x7e   : > { %3694 = vmatpush3.bf16.msra.mxu1 %v3889_v39  ;;  %3480 = vmatprep.subr.bf16.mxu0 %v3890_v40  ;;  %v3951_v39 = vld [vmem:[%s4859_s1 + $0x5b8] sm:$0xff]   ;;  %v3952_v40 = vld [vmem:[%s4123_s5 + $0x20] ss:$12 sps:$4 sm:$0xff]  }
  0x7f   : > { %3695 = vmatprep.subr.bf16.mxu1 %v4015_v1 }
  0x81   : > { %3481 = vmatpush3.bf16.msra.mxu0 %v3891_v41  ;;  %v3953_v41 = vld [vmem:[%s4859_s1 + $0x578] sm:$0xff]  }
  0x82   : > { %3696 = vmatpush3.bf16.msra.mxu1 %v3892_v42  ;;  %3482 = vmatprep.subr.bf16.mxu0 %v3893_v43  ;;  %v4608_v42 = vld [vmem:[%s4123_s5 + $0xc] sm:$0xff]  ;;  %v4006_v43 = vld [vmem:[%s4123_s5 + $0x18] sm:$0xff] }
  0x83   : > { %3697 = vmatprep.subr.bf16.mxu1 %v4015_v1 }
  0x85   : > { %3483 = vmatpush3.bf16.msra.mxu0 %v3894_v44  ;;  %v3181_v44 = vcombine.low %v4006_v43, %v4519_v17  ;;  %v4005_v43 = vld [vmem:[%s4123_s5 + $0x20] ss:$12 sps:$4 sm:$0xff]  }
  0x86   : > { %3698 = vmatpush3.bf16.msra.mxu1 %v3895_v45  ;;  %3484 = vmatprep.subr.bf16.mxu0 %v3896_v46  ;;  %v4613_v45 = vld [vmem:[%s4123_s5 + $0x18] sm:$0xff] }
  0x87   : > { %3699 = vmatprep.subr.bf16.mxu1 %v4015_v1  ;;  %v3954_v46 = vld [vmem:[%s4859_s1 + $0x5f8] sm:$0xff]  }
  0x89   : > { %3485 = vmatpush3.bf16.msra.mxu0 %v3897_v47  ;;  %v3955_v47 = vld [vmem:[%s4859_s1 + $0x5b0] sm:$0xff]  }
  0x8a   : > { %3700 = vmatpush3.bf16.msra.mxu1 %v3898_v49  ;;  %3501 = vmatprep.subr.bf16.mxu0 %v3899_v51  ;;  %v3309_v49 = vcombine.high %v4608_v42, %v4613_v45  ;;  %v3956_v51 = vld [vmem:[%s4859_s1 + $0x570] sm:$0xff]  }
  0x8b   : > { %3705 = vmatprep.subr.bf16.mxu1 %v4015_v1 }
  0x8c   : > { %1368 = vmatmul.mubr.bf16.vlgmr.msra.gmra.mxu0 %v4252_v60 }
  0x8d   : > { %3702 = vmatmul.mubr.bf16.vlgmr.msra.gmra.mxu1 %v3029_v54  ;;  %3502 = vmatpush3.bf16.msra.mxu0 %v3901_v53  ;;  %v3958_v53 = vld [vmem:[%s4859_s1 + $0x5a8] sm:$0xff]  }
  0x8e   : > { %3706 = vmatpush3.bf16.msra.mxu1 %v3902_v55  ;;  %3503 = vmatprep.subr.bf16.mxu0 %v3903_v56  ;;  %v3959_v54 = vld [vmem:[%s4859_s1 + $0x568] sm:$0xff]   ;;  %v3961_v56 = vld [vmem:[%s4859_s1 + $0x5a0] sm:$0xff]  }
  0x8f   : > { %3707 = vmatprep.subr.bf16.mxu1 %v4015_v1  ;;  %1750 = vmatprep.mubr.bf16.mxu0 %v4219_v50  ;;  %v3910_v50 = vld [vmem:[%s4859_s1 + $0x3e0] sm:$0xff]   ;;  %v3960_v55 = vld [vmem:[%s4859_s1 + $0x5e8] sm:$0xff]  }
  0x90   : > { %3721 = vmatprep.mubr.msk.bf16.mxu1 %vm4016_vm0, %v4015_v1 }
  0x91   : > { %3504 = vmatpush3.bf16.msra.mxu0 %v3904_v57  ;;  %v3962_v57 = vld [vmem:[%s4859_s1 + $0x560] sm:$0xff]  }
  0x92   : > { %3708 = vmatpush3.bf16.msra.mxu1 %v3905_v58  ;;  %3505 = vmatprep.subr.bf16.mxu0 %v3906_v59  ;;  %v3963_v58 = vld [vmem:[%s4859_s1 + $0x5e0] sm:$0xff]   ;;  %v3964_v59 = vld [vmem:[%s4859_s1 + $0x598] sm:$0xff]  }
  0x93   : > { %3709 = vmatprep.subr.bf16.mxu1 %v4015_v1 }
  0x95   : > { %3506 = vmatpush3.bf16.msra.mxu0 %v3907_v61  ;;  %v3965_v61 = vld [vmem:[%s4859_s1 + $0x558] sm:$0xff]  }
  0x96   : > { %3710 = vmatpush3.bf16.msra.mxu1 %v3908_v62  ;;  %3507 = vmatprep.subr.bf16.mxu0 %v3909_v63  ;;  %v3966_v62 = vld [vmem:[%s4859_s1 + $0x5d8] sm:$0xff]   ;;  %v3967_v63 = vld [vmem:[%s4859_s1 + $0x590] sm:$0xff]  }
  0x97   : > { %3711 = vmatprep.subr.bf16.mxu1 %v4015_v1 }
  0x99   : > { %3508 = vmatpush3.bf16.msra.mxu0 %v3910_v50  ;;  %v3968_v50 = vld [vmem:[%s4859_s1 + $0x550] sm:$0xff]  }
  0x9a   : > { %3712 = vmatpush3.bf16.msra.mxu1 %v3911_v0  ;;  %3509 = vmatprep.subr.bf16.mxu0 %v3912_v2  ;;  %v3969_v0 = vld [vmem:[%s4859_s1 + $0x5d0] sm:$0xff]   ;;  %v3970_v2 = vld [vmem:[%s4859_s1 + $0x588] sm:$0xff]  }
  0x9b   : > { %3713 = vmatprep.subr.bf16.mxu1 %v4015_v1 }
  0x9d   : > { %3510 = vmatpush3.bf16.msra.mxu0 %v3913_v3  ;;  %v3971_v3 = vld [vmem:[%s4859_s1 + $0x548] sm:$0xff]  }
  0x9e   : > { %3714 = vmatpush3.bf16.msra.mxu1 %v3914_v4  ;;  %3511 = vmatprep.subr.bf16.mxu0 %v3915_v5  ;;  %v3972_v4 = vld [vmem:[%s4859_s1 + $0x5c8] sm:$0xff]   ;;  %v3973_v5 = vld [vmem:[%s4859_s1 + $0x580] sm:$0xff]  }
  0x9f   : > { %3715 = vmatprep.subr.bf16.mxu1 %v4015_v1 }
  0xa1   : > { %3512 = vmatpush3.bf16.msra.mxu0 %v3916_v6  ;;  %v3974_v6 = vld [vmem:[%s4859_s1 + $0x540] sm:$0xff]  }
  0xa2   : > { %3716 = vmatpush3.bf16.msra.mxu1 %v3917_v7  ;;  %3513 = vmatprep.subr.bf16.mxu0 %v3918_v8  ;;  %v3975_v7 = vld [vmem:[%s4859_s1 + $0x5c0] sm:$0xff]   ;;  %v3978_v8 = vld [vmem:[%s4859_s1 + $0x4f8] sm:$0xff]  }
  0xa3   : > { %3717 = vmatprep.subr.bf16.mxu1 %v4015_v1 }
  0xa5   : > { %3514 = vmatpush3.bf16.msra.mxu0 %v3919_v9  ;;  %v3308_v9 = vcombine.low %v4608_v42, %v4613_v45  ;;  %v3335_v42 = vcombine.low %v4613_v45, %v4519_v17 }
  0xa6   : > { %3718 = vmatpush3.bf16.msra.mxu1 %v3920_v10  ;;  %3515 = vmatprep.subr.bf16.mxu0 %v3921_v11  ;;  %v3979_v10 = vld [vmem:[%s4123_s5 + $0x14] ss:$12 sps:$4 sm:$0xff]   ;;  %v3980_v11 = vld [vmem:[%s4859_s1 + $0x4b8] sm:$0xff]  }
  0xa7   : > { %3719 = vmatprep.subr.bf16.mxu1 %v4015_v1 }
  0xa9   : > { %3516 = vmatpush3.bf16.msra.mxu0 %v3922_v12  ;;  %v3981_v12 = vld [vmem:[%s4859_s1 + $0x538] sm:$0xff]  }
  0xaa   : > { %3720 = vmatpush3.bf16.msra.mxu1 %v3923_v13  ;;  %3532 = vmatprep.subr.bf16.mxu0 %v3924_v14  ;;  %v3982_v13 = vld [vmem:[%s4859_s1 + $0x4f0] sm:$0xff]   ;;  %v3336_v14 = vcombine.high %v4613_v45, %v4519_v17 }
  0xab   : > { %3725 = vmatprep.subr.bf16.mxu1 %v4015_v1 }
  0xac   : > { %1751 = vmatmul.mubr.bf16.vlgmr.msra.gmra.mxu0 %v4252_v60  ;;  %v3933_v60 = vld [vmem:[%s4859_s1 + $0x3a8] sm:$0xff]  }
  0xad   : > { %3722 = vmatmul.mubr.bf16.vlgmr.msra.gmra.mxu1 %v3925_v15  ;;  %3533 = vmatpush3.bf16.msra.mxu0 %v3926_v16  ;;  %v3983_v16 = vld [vmem:[%s4859_s1 + $0x4b0] sm:$0xff]  }
  0xae   : > { %3726 = vmatpush3.bf16.msra.mxu1 %v3927_v18  ;;  %3534 = vmatprep.subr.bf16.mxu0 %v3928_v19  ;;  %v3984_v18 = vld [vmem:[%s4859_s1 + $0x530] sm:$0xff]   ;;  %v3985_v19 = vld [vmem:[%s4859_s1 + $0x4e8] sm:$0xff]  }
  0xaf   : > { %3727 = vmatprep.subr.bf16.mxu1 %v4015_v1  ;;  %1992 = vmatprep.mubr.bf16.mxu0 %v3182_v20 }
  0xb0   : > { %3741 = vmatprep.mubr.msk.bf16.mxu1 %vm4016_vm0, %v4015_v1 }
  0xb1   : > { %3535 = vmatpush3.bf16.msra.mxu0 %v3929_v21 }
  0xb2   : > { %3728 = vmatpush3.bf16.msra.mxu1 %v3930_v22  ;;  %3536 = vmatprep.subr.bf16.mxu0 %v3931_v23  ;;  %v3986_v22 = vld [vmem:[%s4859_s1 + $0x4a8] sm:$0xff]  }
  0xb3   : > { %3729 = vmatprep.subr.bf16.mxu1 %v4015_v1  ;;  %v3987_v23 = vld [vmem:[%s4859_s1 + $0x528] sm:$0xff]  }
  0xb5   : > { %3537 = vmatpush3.bf16.msra.mxu0 %v3932_v48  ;;  %v3988_v48 = vld [vmem:[%s4859_s1 + $0x4e0] sm:$0xff]  }
  0xb6   : > { %3730 = vmatpush3.bf16.msra.mxu1 %v3933_v60  ;;  %3538 = vmatprep.subr.bf16.mxu0 %v3934_v24  ;;  %v3989_v24 = vld [vmem:[%s4859_s1 + $0x4a0] sm:$0xff]  }
  0xb7   : > { %3731 = vmatprep.subr.bf16.mxu1 %v4015_v1 }
  0xb9   : > { %3539 = vmatpush3.bf16.msra.mxu0 %v3935_v25  ;;  %v3990_v25 = vld [vmem:[%s4859_s1 + $0x520] sm:$0xff]  }
  0xba   : > { %3732 = vmatpush3.bf16.msra.mxu1 %v3936_v26  ;;  %3540 = vmatprep.subr.bf16.mxu0 %v3937_v27  ;;  %v3991_v26 = vld [vmem:[%s4859_s1 + $0x4d8] sm:$0xff]  }
  0xbb   : > { %3733 = vmatprep.subr.bf16.mxu1 %v4015_v1  ;;  %v3992_v27 = vld [vmem:[%s4859_s1 + $0x498] sm:$0xff]  }
  0xbd   : > { %3541 = vmatpush3.bf16.msra.mxu0 %v3938_v28  ;;  %v3993_v28 = vld [vmem:[%s4859_s1 + $0x518] sm:$0xff]  }
  0xbe   : > { %3734 = vmatpush3.bf16.msra.mxu1 %v3939_v29  ;;  %3542 = vmatprep.subr.bf16.mxu0 %v3940_v30  ;;  %v3994_v29 = vld [vmem:[%s4859_s1 + $0x4d0] sm:$0xff]  }
  0xbf   : > { %3735 = vmatprep.subr.bf16.mxu1 %v4015_v1  ;;  %v3995_v30 = vld [vmem:[%s4859_s1 + $0x490] sm:$0xff]  }
  0xc1   : > { %3543 = vmatpush3.bf16.msra.mxu0 %v3941_v32 }
  0xc2   : > { %3736 = vmatpush3.bf16.msra.mxu1 %v3942_v31  ;;  %3544 = vmatprep.subr.bf16.mxu0 %v3943_v33  ;;  %v3996_v31 = vld [vmem:[%s4859_s1 + $0x510] sm:$0xff]   ;;  %v3997_v33 = vld [vmem:[%s4859_s1 + $0x4c8] sm:$0xff]  }
  0xc3   : > { %3737 = vmatprep.subr.bf16.mxu1 %v4015_v1 }
  0xc5   : > { %3545 = vmatpush3.bf16.msra.mxu0 %v3944_v34  ;;  %v3998_v34 = vld [vmem:[%s4859_s1 + $0x488] sm:$0xff]  }
  0xc6   : > { %3738 = vmatpush3.bf16.msra.mxu1 %v3945_v35  ;;  %3546 = vmatprep.subr.bf16.mxu0 %v3946_v36  ;;  %v3999_v36 = vld [vmem:[%s4859_s1 + $0x508] sm:$0xff]  }
  0xc7   : > { %3739 = vmatprep.subr.bf16.mxu1 %v4015_v1 }
  0xc9   : > { %3547 = vmatpush3.bf16.msra.mxu0 %v3947_v37  ;;  %v4000_v37 = vld [vmem:[%s4859_s1 + $0x4c0] sm:$0xff]  }
  0xca   : > { %3740 = vmatpush3.bf16.msra.mxu1 %v3948_v38  ;;  %3563 = vmatprep.subr.bf16.mxu0 %v3951_v39  ;;  %v4001_v38 = vld [vmem:[%s4859_s1 + $0x480] sm:$0xff]  }
  0xcb   : > { %3745 = vmatprep.subr.bf16.mxu1 %v4015_v1 }
  0xcc   : > { %1993 = vmatmul.mubr.bf16.vlgmr.msra.gmra.mxu0 %v3181_v44 }
  0xcd   : > { %3742 = vmatmul.mubr.bf16.vlgmr.msra.gmra.mxu1 %v3952_v40  ;;  %3564 = vmatpush3.bf16.msra.mxu0 %v3953_v41  ;;  %v4002_v40 = vld [vmem:[%s4859_s1 + $0x500] sm:$0xff]   ;;  %v183_v41 = vlaneseq }
  0xce   : > { %3746 = vmatpush3.bf16.msra.mxu1 %v3954_v46  ;;  %3565 = vmatprep.subr.bf16.mxu0 %v3955_v47 }
  0xcf   : > { %3747 = vmatprep.subr.bf16.mxu1 %v4015_v1  ;;  %2375 = vmatprep.mubr.bf16.mxu0 %v3309_v49  ;;  %v184_v46 = vshrl.u32 %v183_v41, 7 }
  0xd0   : > { %3761 = vmatprep.mubr.msk.bf16.mxu1 %vm4016_vm0, %v4015_v1 }
  0xd1   : > { %3566 = vmatpush3.bf16.msra.mxu0 %v3956_v51 }
  0xd2   : > { %3748 = vmatpush3.bf16.msra.mxu1 %v3957_v52  ;;  %3567 = vmatprep.subr.bf16.mxu0 %v3958_v53  ;;  %v190_v52 = vand.u32 7, %v184_v46 }
  0xd3   : > { %3749 = vmatprep.subr.bf16.mxu1 %v4015_v1 }
  0xd4   : > { %vm4789_vm1 = vcmp.lt.s32.totalorder %v190_v52, 2 }
  0xd5   : > { %3568 = vmatpush3.bf16.msra.mxu0 %v3959_v54  ;;  %v185_v54 = vadd.s32 8, %v184_v46 }
  0xd6   : > { %3750 = vmatpush3.bf16.msra.mxu1 %v3960_v55  ;;  %3569 = vmatprep.subr.bf16.mxu0 %v3961_v56 }
  0xd7   : > { %3751 = vmatprep.subr.bf16.mxu1 %v4015_v1 }
  0xd9   : > { %3570 = vmatpush3.bf16.msra.mxu0 %v3962_v57 }
  0xda   : > { %3752 = vmatpush3.bf16.msra.mxu1 %v3963_v58  ;;  %3571 = vmatprep.subr.bf16.mxu0 %v3964_v59 }
  0xdb   : > { %3753 = vmatprep.subr.bf16.mxu1 %v4015_v1 }
  0xdd   : > { %3572 = vmatpush3.bf16.msra.mxu0 %v3965_v61  ;;  %v197_v61 = vand.u32 7, %v185_v54 }
  0xde   : > { %3754 = vmatpush3.bf16.msra.mxu1 %v3966_v62  ;;  %3573 = vmatprep.subr.bf16.mxu0 %v3967_v63 }
  0xdf   : > { %3755 = vmatprep.subr.bf16.mxu1 %v4015_v1  ;;  %vm4801_vm3 = vcmp.lt.s32.totalorder %v197_v61, 2 }
  0xe1   : > { %3574 = vmatpush3.bf16.msra.mxu0 %v3968_v50 }
  0xe2   : > { %3756 = vmatpush3.bf16.msra.mxu1 %v3969_v0  ;;  %3575 = vmatprep.subr.bf16.mxu0 %v3970_v2 }
  0xe3   : > { %3757 = vmatprep.subr.bf16.mxu1 %v4015_v1 }
  0xe5   : > { %3576 = vmatpush3.bf16.msra.mxu0 %v3971_v3 }
  0xe6   : > { %3758 = vmatpush3.bf16.msra.mxu1 %v3972_v4  ;;  %3577 = vmatprep.subr.bf16.mxu0 %v3973_v5 }
  0xe7   : > { %3759 = vmatprep.subr.bf16.mxu1 %v4015_v1 }
  0xe9   : > { %3578 = vmatpush3.bf16.msra.mxu0 %v3974_v6 }
  0xea   : > { %3760 = vmatpush3.bf16.msra.mxu1 %v3975_v7  ;;  %3594 = vmatprep.subr.bf16.mxu0 %v3978_v8 }
  0xeb   : > { %3765 = vmatprep.subr.bf16.mxu1 %v4015_v1 }
  0xec   : > { %2376 = vmatmul.mubr.bf16.vlgmr.msra.gmra.mxu0 %v3308_v9  ;;  %v3393_v32 = vpop.f32.mrf.mxu0 }
  0xed   : > { %v4711_v15 = vpop.f32.mrf.mxu1  ;;  %3762 = vmatmul.mubr.bf16.vlgmr.msra.gmra.mxu1 %v3979_v10  ;;  %3595 = vmatpush3.bf16.msra.mxu0 %v3980_v11 }
  0xee   : > { %3766 = vmatpush3.bf16.msra.mxu1 %v3981_v12  ;;  %3596 = vmatprep.subr.bf16.mxu0 %v3982_v13  ;;  %v3394_v35 = vpop.f32.mrf.mxu0 }
  0xef   : > { %v3643_v20 = vpop.f32.mrf.mxu1  ;;  %3767 = vmatprep.subr.bf16.mxu1 %v4015_v1  ;;  %2617 = vmatprep.mubr.bf16.mxu0 %v3336_v14  ;;  %v3395_v47 = vadd.f32 %v3394_v35, %v3393_v32 }
  0xf0   : > { %3781 = vmatprep.mubr.msk.bf16.mxu1 %vm4016_vm0, %v4015_v1  ;;  %v3396_v39 = vpop.f32.mrf.mxu0 }
  0xf1   : > { %v4725_v21 = vpop.f32.mrf.mxu1  ;;  %3597 = vmatpush3.bf16.msra.mxu0 %v3983_v16  ;;  %v551_v55 = vadd.f32 %v3395_v47, %v4711_v15 }
  0xf2   : > { %3768 = vmatpush3.bf16.msra.mxu1 %v3984_v18  ;;  %3598 = vmatprep.subr.bf16.mxu0 %v3985_v19  ;;  %v3397_v44 = vpop.f32.mrf.mxu0 }
  0xf3   : > { %v3644_v60 = vpop.f32.mrf.mxu1  ;;  %3769 = vmatprep.subr.bf16.mxu1 %v4015_v1 }
  0xf5   : > { %3599 = vmatpush3.bf16.msra.mxu0 %v3986_v22 }
  0xf6   : > { %3770 = vmatpush3.bf16.msra.mxu1 %v3987_v23  ;;  %3600 = vmatprep.subr.bf16.mxu0 %v3988_v48 }
  0xf7   : > { %3771 = vmatprep.subr.bf16.mxu1 %v4015_v1 }
  0xf9   : > { %3601 = vmatpush3.bf16.msra.mxu0 %v3989_v24 }
  0xfa   : > { %3772 = vmatpush3.bf16.msra.mxu1 %v3990_v25  ;;  %3602 = vmatprep.subr.bf16.mxu0 %v3991_v26 }
  0xfb   : > { %3773 = vmatprep.subr.bf16.mxu1 %v4015_v1 }
  0xfd   : > { %3603 = vmatpush3.bf16.msra.mxu0 %v3992_v27 }
  0xfe   : > { %3774 = vmatpush3.bf16.msra.mxu1 %v3993_v28  ;;  %3604 = vmatprep.subr.bf16.mxu0 %v3994_v29 }
  0xff   : > { %3775 = vmatprep.subr.bf16.mxu1 %v4015_v1 }
 0x101   : > { %3605 = vmatpush3.bf16.msra.mxu0 %v3995_v30 }
 0x102   : > { %3776 = vmatpush3.bf16.msra.mxu1 %v3996_v31  ;;  %3606 = vmatprep.subr.bf16.mxu0 %v3997_v33 }
 0x103   : > { %3777 = vmatprep.subr.bf16.mxu1 %v4015_v1 }
 0x105   : > { %3607 = vmatpush3.bf16.msra.mxu0 %v3998_v34 }
 0x106   : > { %3778 = vmatpush3.bf16.msra.mxu1 %v3999_v36  ;;  %3608 = vmatprep.subr.bf16.mxu0 %v4000_v37 }
 0x107   : > { %3779 = vmatprep.subr.bf16.mxu1 %v4015_v1  ;;  %v3398_v1 = vadd.f32 %v3397_v44, %v3396_v39 }
 0x109   : > { %3609 = vmatpush3.bf16.msra.mxu0 %v4001_v38  ;;  %v554_v63 = vadd.f32 %v3398_v1, %v4725_v21 }
 0x10a   : > { %3780 = vmatpush3.bf16.msra.mxu1 %v4002_v40 }
 0x10c   : > { %v3424_v49 = vpop.f32.mrf.mxu0  ;;  %2618 = vmatmul.mubr.bf16.vlgmr.msra.gmra.mxu0 %v3335_v42 }
 0x10d   : > { %3782 = vmatmul.mubr.bf16.vlgmr.msra.gmra.mxu1 %v4005_v43  ;;  %v787_v51 = vpop.f32.mrf.mxu1 }
 0x10e   : > { %v3425_v53 = vpop.f32.mrf.mxu0 }
 0x10f   : > { %v3426_v56 = vadd.f32 %v3425_v53, %v3424_v49  ;;  %v3663_v57 = vpop.f32.mrf.mxu1 }
 0x110   : > { %v3427_v17 = vpop.f32.mrf.mxu0 }
 0x111   : > { %v747_v45 = vadd.f32 %v3426_v56, %v551_v55  ;;  %v790_v58 = vpop.f32.mrf.mxu1 }
 0x112   : > { %v3428_v62 = vpop.f32.mrf.mxu0 }
 0x113   : > { %v788_v50 = vadd.f32 %v787_v51, %v747_v45  ;;  %v3429_v0 = vadd.f32 %v3428_v62, %v3427_v17  ;;  %v3664_v2 = vpop.f32.mrf.mxu1 }
 0x115   : > { %v3369_v3 = vpack.c.bf16 %v788_v50, %v788_v50  ;;  %v809_v4 = vsel %vm4789_vm1, %v788_v50, 0.0  ;;  %v750_v5 = vadd.f32 %v3429_v0, %v554_v63 }
 0x116   : > { %v822_v8 = vmul.f32 %v809_v4, %v809_v4  ;;  %v812_v11 = vsel %vm811_vm4, %v809_v4, 0.0 }
 0x117   : > { %803 = vst.msk [vmem:[%s4797_s18] sm:$0xf] %vm802_vm2, %v3369_v3  ;;  %v791_v7 = vadd.f32 %v790_v58, %v750_v5 }
 0x118   : > { %v824_v15 = vsel %vm811_vm4, %v822_v8, 0.0 }
 0x119   : > { %v3370_v9 = vpack.c.bf16 %v791_v7, %v791_v7  ;;  %v810_v10 = vsel %vm4801_vm3, %v791_v7, 0.0 }
 0x11a   : > { %v813_v12 = vsel %vm811_vm4, %v810_v10, 0.0  ;;  %v823_v13 = vmul.f32 %v810_v10, %v810_v10 }
 0x11b   : > { %804 = vst.msk [vmem:[%s4797_s18 + $0x4] sm:$0xf] %vm802_vm2, %v3370_v9  ;;  %v814_v14 = vadd.f32 %v813_v12, %v812_v11 }
 0x11c   : > { %v825_v16 = vsel %vm811_vm4, %v823_v13, 0.0 }
 0x11d   : > { %v826_v18 = vadd.f32 %v825_v16, %v824_v15  ;;  %v815_v37 = vrot.slane %v814_v14, 4 }
 0x11f   : > { %v827_v42 = vrot.slane %v826_v18, 4  ;;  %v816_v47 = vadd.f32 %v815_v37, %v814_v14 }
 0x121   : > { %v828_v52 = vadd.f32 %v827_v42, %v826_v18  ;;  %v817_v57 = vrot.slane %v816_v47, 2 }
 0x123   : > { %v829_v61 = vrot.slane %v828_v52, 2  ;;  %v818_v50 = vadd.f32 %v817_v57, %v816_v47 }
 0x125   : > { %v830_v3 = vadd.f32 %v829_v61, %v828_v52  ;;  %v819_v7 = vrot.slane %v818_v50, 1 }
 0x127   : > { %v831_v10 = vrot.slane %v830_v3, 1  ;;  %v820_v13 = vadd.f32 %v819_v7, %v818_v50 }
 0x129   : > { %v832_v16 = vadd.f32 %v831_v10, %v830_v3 }
 0x12c   : > { %v3455_v23 = vpop.f32.mrf.mxu0 }
 0x12d   : > { %v1173_v19 = vpop.f32.mrf.mxu1 }
 0x12e   : > { %v3456_v48 = vpop.f32.mrf.mxu0 }
 0x12f   : > { %v3683_v20 = vpop.f32.mrf.mxu1  ;;  %v3457_v25 = vadd.f32 %v3456_v48, %v3455_v23 }
 0x130   : > { %v3458_v60 = vpop.f32.mrf.mxu0 }
 0x131   : > { %v1176_v21 = vpop.f32.mrf.mxu1  ;;  %v1174_v29 = vadd.f32 %v3457_v25, %v1173_v19 }
 0x132   : > { %v3459_v24 = vpop.f32.mrf.mxu0 }
 0x133   : > { %v3684_v22 = vpop.f32.mrf.mxu1  ;;  %v3460_v30 = vadd.f32 %v3459_v24, %v3458_v60 }
 0x135   : > { %v1177_v38 = vadd.f32 %v3460_v30, %v1176_v21 }
 0x14c   : > { %v3486_v26 = vpop.f32.mrf.mxu0 }
 0x14d   : > { %v1410_v27 = vpop.f32.mrf.mxu1 }
 0x14e   : > { %v3487_v28 = vpop.f32.mrf.mxu0 }
 0x14f   : > { %v3488_v32 = vadd.f32 %v3487_v28, %v3486_v26  ;;  %v3703_v31 = vpop.f32.mrf.mxu1 }
 0x150   : > { %v3489_v33 = vpop.f32.mrf.mxu0 }
 0x151   : > { %v1370_v34 = vadd.f32 %v3488_v32, %v1174_v29  ;;  %v1413_v35 = vpop.f32.mrf.mxu1 }
 0x152   : > { %v3490_v36 = vpop.f32.mrf.mxu0 }
 0x153   : > { %v1411_v39 = vadd.f32 %v1410_v27, %v1370_v34  ;;  %v3491_v40 = vadd.f32 %v3490_v36, %v3489_v33  ;;  %v3704_v41 = vpop.f32.mrf.mxu1 }
 0x155   : > { %v3371_v43 = vpack.c.bf16 %v1411_v39, %v1411_v39  ;;  %v1428_v44 = vsel %vm4789_vm1, %v1411_v39, 0.0  ;;  %v1373_v46 = vadd.f32 %v3491_v40, %v1177_v38 }
 0x156   : > { %v1440_v51 = vmul.f32 %v1428_v44, %v1428_v44  ;;  %v1430_v55 = vsel %vm811_vm4, %v1428_v44, 0.0 }
 0x157   : > { %3056 = vst.msk [vmem:[%s4797_s18 + $0x8] sm:$0xf] %vm802_vm2, %v3371_v43  ;;  %v1414_v49 = vadd.f32 %v1413_v35, %v1373_v46 }
 0x158   : > { %v1442_v45 = vsel %vm811_vm4, %v1440_v51, 0.0 }
 0x159   : > { %v3372_v53 = vpack.c.bf16 %v1414_v49, %v1414_v49  ;;  %v1429_v54 = vsel %vm4801_vm3, %v1414_v49, 0.0 }
 0x15a   : > { %v1431_v1 = vsel %vm811_vm4, %v1429_v54, 0.0  ;;  %v1441_v56 = vmul.f32 %v1429_v54, %v1429_v54 }
 0x15b   : > { %3057 = vst.msk [vmem:[%s4797_s18 + $0xc] sm:$0xf] %vm802_vm2, %v3372_v53  ;;  %v1432_v17 = vadd.f32 %v1431_v1, %v1430_v55 }
 0x15c   : > { %v1443_v58 = vsel %vm811_vm4, %v1441_v56, 0.0 }
 0x15d   : > { %v1433_v62 = vrot.slane %v1432_v17, 4  ;;  %v1444_v63 = vadd.f32 %v1443_v58, %v1442_v45 }
 0x15f   : > { %v1434_v0 = vadd.f32 %v1433_v62, %v1432_v17  ;;  %v1445_v2 = vrot.slane %v1444_v63, 4 }
 0x161   : > { %v1435_v4 = vrot.slane %v1434_v0, 2  ;;  %v1446_v5 = vadd.f32 %v1445_v2, %v1444_v63 }
 0x163   : > { %v1436_v8 = vadd.f32 %v1435_v4, %v1434_v0  ;;  %v1447_v9 = vrot.slane %v1446_v5, 2 }
 0x165   : > { %v1437_v11 = vrot.slane %v1436_v8, 1  ;;  %v1448_v12 = vadd.f32 %v1447_v9, %v1446_v5 }
 0x167   : > { %v1438_v14 = vadd.f32 %v1437_v11, %v1436_v8  ;;  %v1449_v15 = vrot.slane %v1448_v12, 1 }
 0x169   : > { %v1439_v18 = vadd.f32 %v1438_v14, %v820_v13  ;;  %v1450_v19 = vadd.f32 %v1449_v15, %v1448_v12 }
 0x16b   : > { %v1451_v20 = vadd.f32 %v1450_v19, %v832_v16 }
 0x16c   : > { %v3517_v60 = vpop.f32.mrf.mxu0 }
 0x16d   : > { %v1793_v21 = vpop.f32.mrf.mxu1 }
 0x16e   : > { %v3518_v24 = vpop.f32.mrf.mxu0 }
 0x16f   : > { %v3723_v22 = vpop.f32.mrf.mxu1  ;;  %v3519_v27 = vadd.f32 %v3518_v24, %v3517_v60 }
 0x170   : > { %v3520_v25 = vpop.f32.mrf.mxu0 }
 0x171   : > { %v1796_v23 = vpop.f32.mrf.mxu1  ;;  %v1794_v32 = vadd.f32 %v3519_v27, %v1793_v21 }
 0x172   : > { %v3521_v26 = vpop.f32.mrf.mxu0 }
 0x173   : > { %v3724_v48 = vpop.f32.mrf.mxu1  ;;  %v3522_v31 = vadd.f32 %v3521_v26, %v3520_v25 }
 0x175   : > { %v1797_v39 = vadd.f32 %v3522_v31, %v1796_v23 }
 0x18c   : > { %v3548_v28 = vpop.f32.mrf.mxu0 }
 0x18d   : > { %v2035_v29 = vpop.f32.mrf.mxu1 }
 0x18e   : > { %v3549_v30 = vpop.f32.mrf.mxu0 }
 0x18f   : > { %v3550_v33 = vadd.f32 %v3549_v30, %v3548_v28  ;;  %v3743_v34 = vpop.f32.mrf.mxu1 }
 0x190   : > { %v3551_v35 = vpop.f32.mrf.mxu0 }
 0x191   : > { %v1995_v36 = vadd.f32 %v3550_v33, %v1794_v32  ;;  %v2038_v37 = vpop.f32.mrf.mxu1 }
 0x192   : > { %v3552_v38 = vpop.f32.mrf.mxu0 }
 0x193   : > { %v2036_v40 = vadd.f32 %v2035_v29, %v1995_v36  ;;  %v3553_v41 = vadd.f32 %v3552_v38, %v3551_v35  ;;  %v3744_v42 = vpop.f32.mrf.mxu1 }
 0x195   : > { %v3373_v43 = vpack.c.bf16 %v2036_v40, %v2036_v40  ;;  %v2053_v44 = vsel %vm4789_vm1, %v2036_v40, 0.0  ;;  %v1998_v46 = vadd.f32 %v3553_v41, %v1797_v39 }
 0x196   : > { %v2065_v49 = vmul.f32 %v2053_v44, %v2053_v44  ;;  %v2055_v53 = vsel %vm811_vm4, %v2053_v44, 0.0 }
 0x197   : > { %3210 = vst.msk [vmem:[%s4797_s18 + $0x10] sm:$0xf] %vm802_vm2, %v3373_v43  ;;  %v2039_v47 = vadd.f32 %v2038_v37, %v1998_v46 }
 0x198   : > { %v2067_v56 = vsel %vm811_vm4, %v2065_v49, 0.0 }
 0x199   : > { %v3374_v51 = vpack.c.bf16 %v2039_v47, %v2039_v47  ;;  %v2054_v52 = vsel %vm4801_vm3, %v2039_v47, 0.0 }
 0x19a   : > { %v2056_v54 = vsel %vm811_vm4, %v2054_v52, 0.0  ;;  %v2066_v55 = vmul.f32 %v2054_v52, %v2054_v52 }
 0x19b   : > { %3211 = vst.msk [vmem:[%s4797_s18 + $0x14] sm:$0xf] %vm802_vm2, %v3374_v51  ;;  %v2057_v1 = vadd.f32 %v2056_v54, %v2055_v53 }
 0x19c   : > { %v2068_v57 = vsel %vm811_vm4, %v2066_v55, 0.0 }
 0x19d   : > { %v2058_v17 = vrot.slane %v2057_v1, 4  ;;  %v2069_v45 = vadd.f32 %v2068_v57, %v2067_v56 }
 0x19f   : > { %v2059_v58 = vadd.f32 %v2058_v17, %v2057_v1  ;;  %v2070_v61 = vrot.slane %v2069_v45, 4 }
 0x1a1   : > { %v2060_v62 = vrot.slane %v2059_v58, 2  ;;  %v2071_v63 = vadd.f32 %v2070_v61, %v2069_v45 }
 0x1a3   : > { %v2061_v50 = vadd.f32 %v2060_v62, %v2059_v58  ;;  %v2072_v0 = vrot.slane %v2071_v63, 2 }
 0x1a5   : > { %v2062_v2 = vrot.slane %v2061_v50, 1  ;;  %v2073_v3 = vadd.f32 %v2072_v0, %v2071_v63 }
 0x1a7   : > { %v2063_v4 = vadd.f32 %v2062_v2, %v2061_v50  ;;  %v2074_v5 = vrot.slane %v2073_v3, 1 }
 0x1a9   : > { %v2064_v7 = vadd.f32 %v2063_v4, %v1439_v18  ;;  %v2075_v8 = vadd.f32 %v2074_v5, %v2073_v3 }
 0x1ab   : > { %v2076_v9 = vadd.f32 %v2075_v8, %v1451_v20 }
 0x1ac   : > { %v3579_v14 = vpop.f32.mrf.mxu0 }
 0x1ad   : > { %v2418_v10 = vpop.f32.mrf.mxu1 }
 0x1ae   : > { %v3580_v15 = vpop.f32.mrf.mxu0 }
 0x1af   : > { %v3763_v11 = vpop.f32.mrf.mxu1  ;;  %v3581_v21 = vadd.f32 %v3580_v15, %v3579_v14 }
 0x1b0   : > { %v3582_v16 = vpop.f32.mrf.mxu0 }
 0x1b1   : > { %v2421_v12 = vpop.f32.mrf.mxu1  ;;  %v2419_v60 = vadd.f32 %v3581_v21, %v2418_v10 }
 0x1b2   : > { %v3583_v19 = vpop.f32.mrf.mxu0 }
 0x1b3   : > { %v3764_v13 = vpop.f32.mrf.mxu1  ;;  %v3584_v24 = vadd.f32 %v3583_v19, %v3582_v16 }
 0x1b5   : > { %v2422_v29 = vadd.f32 %v3584_v24, %v2421_v12 }
 0x1cc   : > { %v3610_v22 = vpop.f32.mrf.mxu0 }
 0x1cd   : > { %v2660_v23 = vpop.f32.mrf.mxu1 }
 0x1ce   : > { %v3611_v48 = vpop.f32.mrf.mxu0 }
 0x1cf   : > { %v3612_v25 = vadd.f32 %v3611_v48, %v3610_v22  ;;  %v3783_v26 = vpop.f32.mrf.mxu1 }
 0x1d0   : > { %v3613_v18 = vpop.f32.mrf.mxu0 }
 0x1d1   : > { %v2620_v27 = vadd.f32 %v3612_v25, %v2419_v60  ;;  %v2663_v20 = vpop.f32.mrf.mxu1 }
 0x1d2   : > { %v3614_v28 = vpop.f32.mrf.mxu0 }
 0x1d3   : > { %v2661_v30 = vadd.f32 %v2660_v23, %v2620_v27  ;;  %v3615_v32 = vadd.f32 %v3614_v28, %v3613_v18  ;;  %v3784_v31 = vpop.f32.mrf.mxu1 }
 0x1d5   : > { %v3375_v33 = vpack.c.bf16 %v2661_v30, %v2661_v30  ;;  %v2678_v34 = vsel %vm4789_vm1, %v2661_v30, 0.0  ;;  %v2623_v35 = vadd.f32 %v3615_v32, %v2422_v29 }
 0x1d6   : > { %v2690_v37 = vmul.f32 %v2678_v34, %v2678_v34  ;;  %v2680_v40 = vsel %vm811_vm4, %v2678_v34, 0.0 }
 0x1d7   : > { %3364 = vst.msk [vmem:[%s4797_s18 + $0x18] sm:$0xf] %vm802_vm2, %v3375_v33  ;;  %v2664_v36 = vadd.f32 %v2663_v20, %v2623_v35 }
 0x1d8   : > { %v2692_v59 = vsel %vm811_vm4, %v2690_v37, 0.0 }
 0x1d9   : > { %v3376_v38 = vpack.c.bf16 %v2664_v36, %v2664_v36  ;;  %v2679_v39 = vsel %vm4801_vm3, %v2664_v36, 0.0 }
 0x1da   : > { %v2681_v41 = vsel %vm811_vm4, %v2679_v39, 0.0  ;;  %v2691_v42 = vmul.f32 %v2679_v39, %v2679_v39 }
 0x1db   : > { %3365 = vst.msk [vmem:[%s4797_s18 + $0x1c] sm:$0xf] %vm802_vm2, %v3376_v38  ;;  %v2682_v43 = vadd.f32 %v2681_v41, %v2680_v40 }
 0x1dc   : > { %v2693_v44 = vsel %vm811_vm4, %v2691_v42, 0.0 }
 0x1dd   : > { %v2683_v46 = vrot.slane %v2682_v43, 4  ;;  %v2694_v47 = vadd.f32 %v2693_v44, %v2692_v59 }
 0x1df   : > { %v2684_v49 = vadd.f32 %v2683_v46, %v2682_v43  ;;  %v2695_v51 = vrot.slane %v2694_v47, 4 }
 0x1e1   : > { %v2685_v52 = vrot.slane %v2684_v49, 2  ;;  %v2696_v6 = vadd.f32 %v2695_v51, %v2694_v47 }
 0x1e3   : > { %v2686_v53 = vadd.f32 %v2685_v52, %v2684_v49  ;;  %v2697_v54 = vrot.slane %v2696_v6, 2 }
 0x1e5   : > { %v2687_v55 = vrot.slane %v2686_v53, 1  ;;  %v2698_v1 = vadd.f32 %v2697_v54, %v2696_v6 }
 0x1e7   : > { %v2688_v56 = vadd.f32 %v2687_v55, %v2686_v53  ;;  %v2699_v57 = vrot.slane %v2698_v1, 1 }
 0x1e9   : > { %v2689_v17 = vadd.f32 %v2688_v56, %v2064_v7  ;;  %v2700_v45 = vadd.f32 %v2699_v57, %v2698_v1 }
 0x1eb   : > { %v2701_v58 = vadd.f32 %v2700_v45, %v2076_v9  ;;  %2703 = vst.msk [vmem:[%s181_s22] sm:$0x1] %vm2702_vm5, %v2689_v17 }
 0x1ed   : > { %2704 = vst.msk [vmem:[%s181_s22 + $0x1] sm:$0x1] %vm2702_vm5, %v2701_v58 }
 0x1ee PF: > { %s14_s12 = sadd.s32 1, %s4013_s12  }
 0x1ef   : > { %p11_p4 = scmp.ge.s32.totalorder %s14_s12, 4  }
 0x1f1   :  { %13 = sbr.rel (!%p11_p4) target bundleno = 1 (0x1), region = 80 }

// kernel: _lambda_.17
= control target key start
LH: loop header
LB: loop body
LE: loop exit
PB: predicated region body
PF: predicated region fallthrough
CT: control target
= control target key end

     0   :  { %s2423_s12 = smov 0   ;;  %s3034_s0 = inlined_call_operand.vmem [shape: bf16[2,48,192], index: 0, kind: input, shape index: {}]   ;;  %s3035_s1 = inlined_call_operand.vmem [shape: bf16[4,2,192,16], index: 1, kind: input, shape index: {}]   ;;  %s3036_s2 = inlined_call_operand.vmem [shape: bf16[2,4,32,16], index: 2, kind: output, shape index: {0}]   ;;  %s3037_s3 = inlined_call_operand.vmem [shape: f32[2,2,16], index: 3, kind: output, shape index: {1}]  }
   0x1 LB: > { %s1910_s13 = sadd.s32 4294967295, %s2400_s12   ;;  %p1914_p0 = scmp.ge.s32.totalorder %s2400_s12, 1  ;;  %s2400_s12 = sphi %s2423_s12, %s14_s12  }
   0x2   : > { %p140_p1 = scmp.lt.s32.totalorder %s2400_s12, 3 }
   0x4   : > { %p141_p2 = pnand %p1914_p0, %p140_p1 }
   0x5   : > { %p168_p3 = scmp.lt.s32.totalorder (!%p141_p2), %s1910_s13, 1 }
   0x6   : > { %144 = sbr.rel (%p141_p2) target bundleno = 432 (0x1b0), region = 28 }
   0xb   : > { %v2288_v0 = vld [vmem:[%s3035_s1 + $0x98] sm:$0xff]   ;;  %v2402_v1 = vmov 0   ;;  %v2290_v3 = vld [vmem:[%s3035_s1 + $0x90] sm:$0xff]   ;;  %v2292_v5 = vld [vmem:[%s3035_s1 + $0x88] sm:$0xff]   ;;  %s3047_s13 = smov (!%p168_p3, %s1910_s13), 1  ;;  %vm384_vm0 = vcmask 523264  }
   0xc   : > { %391 = vmatprep.subr.bf16.mxu0 %v2402_v1  ;;  %527 = vmatprep.subr.bf16.mxu1 %v2402_v1  ;;  %v2289_v2 = vld [vmem:[%s3035_s1 + $0x38] sm:$0xff]   ;;  %v2291_v4 = vld [vmem:[%s3035_s1 + $0x30] sm:$0xff]   ;;  %v2293_v6 = vld [vmem:[%s3035_s1 + $0x28] sm:$0xff]   ;;  %s2278_s7 = smul.u32 48, %s3047_s13  ;;  %s2261_s9 = sshll.u32 %s3047_s13, 6  ;;  %vm592_vm2 = vcmask 125952  }
   0xd   : > { %392 = vmatpush1.bf16.msra.mxu0 %v2288_v0  ;;  %528 = vmatpush1.bf16.msra.mxu1 %v2289_v2  ;;  %v2294_v7 = vld [vmem:[%s3035_s1 + $0x80] sm:$0xff]   ;;  %v2296_v9 = vld [vmem:[%s3035_s1 + $0x78] sm:$0xff]   ;;  %v2298_v11 = vld [vmem:[%s3035_s1 + $0x70] sm:$0xff]   ;;  %s2911_s14 = scalar_lea.vmem %s3036_s2, %s2261_s9  ;;  %vm609_vm4 = vcmask 130048   ;;  %s1918_s15 = sshll.u32 %s3047_s13, 1  ;;  %vm1821_vm7 = vcmask 122880  }
   0xe   : > { %393 = vmatprep.subr.bf16.mxu0 %v2402_v1  ;;  %529 = vmatprep.subr.bf16.mxu1 %v2402_v1  ;;  %v2295_v8 = vld [vmem:[%s3035_s1 + $0x20] sm:$0xff]   ;;  %v2297_v10 = vld [vmem:[%s3035_s1 + $0x18] sm:$0xff]   ;;  %v2299_v12 = vld [vmem:[%s3035_s1 + $0x10] sm:$0xff]   ;;  %s2485_s16 = scalar_lea.vmem %s3034_s0, %s2278_s7  ;;  %s181_s19 = scalar_lea.vmem %s3037_s3, %s1918_s15 }
   0xf   : > { %v2300_v13 = vld [vmem:[%s3035_s1 + $0x68] sm:$0xff]   ;;  %v268_v16 = vld [vmem:[%s2485_s16] sm:$0xff]  ;;  %v241_v17 = vld [vmem:[%s2485_s16 + $0x10] sm:$0xff] }
  0x10   : > { %v2301_v14 = vld [vmem:[%s3035_s1 + $0x8] sm:$0xff]   ;;  %v2302_v20 = vld [vmem:[%s3035_s1 + $0x60] sm:$0xff]   ;;  %v2304_v22 = vld [vmem:[%s3035_s1 + $0xb8] sm:$0xff]  }
  0x11   : > { %394 = vmatpush1.bf16.msra.mxu0 %v2290_v3  ;;  %530 = vmatpush1.bf16.msra.mxu1 %v2291_v4  ;;  %v240_v15 = vld [vmem:[%s2485_s16 + $0x8] sm:$0xff]  ;;  %v2303_v21 = vld [vmem:[%s3035_s1] sm:$0xff]   ;;  %v2305_v23 = vld [vmem:[%s3035_s1 + $0x58] sm:$0xff]  }
  0x12   : > { %395 = vmatprep.subr.bf16.mxu0 %v2402_v1  ;;  %531 = vmatprep.subr.bf16.mxu1 %v2402_v1  ;;  %v2498_v18 = vcombine.high %v268_v16, %v240_v15  ;;  %v2500_v19 = vcombine.high %v240_v15, %v241_v17  ;;  %v2306_v24 = vld [vmem:[%s3035_s1 + $0xb0] sm:$0xff]   ;;  %v2308_v26 = vld [vmem:[%s3035_s1 + $0xa8] sm:$0xff]   ;;  %v2310_v28 = vld [vmem:[%s3035_s1 + $0xa0] sm:$0xff]   ;;  %v2549_v31 = vcombine.low %v268_v16, %v240_v15 }
  0x13   : > { %v2307_v25 = vld [vmem:[%s3035_s1 + $0x50] sm:$0xff]   ;;  %v2309_v27 = vld [vmem:[%s3035_s1 + $0x48] sm:$0xff]   ;;  %v2311_v29 = vld [vmem:[%s3035_s1 + $0x40] sm:$0xff]   ;;  %v2552_v33 = vcombine.low %v240_v15, %v241_v17 }
  0x14   : > { %1959 = vmatprep.mubr.msk.bf16.mxu0 %vm384_vm0, %v2498_v18  ;;  %1977 = vmatprep.mubr.msk.bf16.mxu1 %vm384_vm0, %v2500_v19  ;;  %v2316_v30 = vld [vmem:[%s3035_s1 + $0x158] sm:$0xff]   ;;  %v2555_v34 = vld [vmem:[%s2485_s16 + $0x20] sm:$0xff]  ;;  %v2318_v38 = vld [vmem:[%s3035_s1 + $0x150] sm:$0xff]  }
  0x15   : > { %396 = vmatpush1.bf16.msra.mxu0 %v2292_v5  ;;  %532 = vmatpush1.bf16.msra.mxu1 %v2293_v6  ;;  %v242_v32 = vld [vmem:[%s2485_s16 + $0x18] sm:$0xff]  ;;  %v2319_v39 = vld [vmem:[%s3035_s1 + $0xf0] sm:$0xff]   ;;  %v2324_v42 = vld [vmem:[%s3035_s1 + $0x148] sm:$0xff]  }
  0x16   : > { %397 = vmatprep.subr.bf16.mxu0 %v2402_v1  ;;  %533 = vmatprep.subr.bf16.mxu1 %v2402_v1  ;;  %v2317_v35 = vld [vmem:[%s3035_s1 + $0xf8] sm:$0xff]   ;;  %v2562_v36 = vcombine.high %v241_v17, %v242_v32  ;;  %v2566_v37 = vcombine.high %v242_v32, %v2555_v34  ;;  %v2581_v40 = vcombine.low %v241_v17, %v242_v32  ;;  %v2325_v43 = vld [vmem:[%s3035_s1 + $0xe8] sm:$0xff]   ;;  %v2326_v44 = vld [vmem:[%s3035_s1 + $0x140] sm:$0xff]  }
  0x17   : > { %v2584_v41 = vcombine.low %v242_v32, %v2555_v34  ;;  %v2327_v45 = vld [vmem:[%s3035_s1 + $0xe0] sm:$0xff]   ;;  %v2328_v46 = vld [vmem:[%s3035_s1 + $0x138] sm:$0xff]   ;;  %v2330_v48 = vld [vmem:[%s3035_s1 + $0x130] sm:$0xff]  }
  0x18   : > { %v2329_v47 = vld [vmem:[%s3035_s1 + $0xd8] sm:$0xff]   ;;  %v2331_v49 = vld [vmem:[%s3035_s1 + $0xd0] sm:$0xff]   ;;  %v2332_v50 = vld [vmem:[%s3035_s1 + $0x128] sm:$0xff]  }
  0x19   : > { %398 = vmatpush1.bf16.msra.mxu0 %v2294_v7  ;;  %534 = vmatpush1.bf16.msra.mxu1 %v2295_v8  ;;  %v2333_v51 = vld [vmem:[%s3035_s1 + $0xc8] sm:$0xff]   ;;  %v2334_v52 = vld [vmem:[%s3035_s1 + $0x120] sm:$0xff]   ;;  %v2336_v55 = vld [vmem:[%s3035_s1 + $0x178] sm:$0xff]  }
  0x1a   : > { %399 = vmatprep.subr.bf16.mxu0 %v2402_v1  ;;  %535 = vmatprep.subr.bf16.mxu1 %v2402_v1  ;;  %v2335_v53 = vld [vmem:[%s3035_s1 + $0xc0] sm:$0xff]   ;;  %v1038_v54 = vld [vmem:[%s2485_s16 + $0x28] sm:$0xff]  ;;  %v2337_v58 = vld [vmem:[%s3035_s1 + $0x118] sm:$0xff]  }
  0x1b   : > { %v2645_v56 = vcombine.high %v2555_v34, %v1038_v54  ;;  %v2648_v57 = vcombine.low %v2555_v34, %v1038_v54  ;;  %v2338_v59 = vld [vmem:[%s3035_s1 + $0x170] sm:$0xff]   ;;  %v2340_v61 = vld [vmem:[%s3035_s1 + $0x168] sm:$0xff]   ;;  %v2342_v63 = vld [vmem:[%s3035_s1 + $0x160] sm:$0xff]   ;;  %v183_v54 = vlaneseq }
  0x1c   : > { %v2339_v60 = vld [vmem:[%s3035_s1 + $0x110] sm:$0xff]   ;;  %v2341_v62 = vld [vmem:[%s3035_s1 + $0x108] sm:$0xff]   ;;  %v2343_v0 = vld [vmem:[%s3035_s1 + $0x100] sm:$0xff]  }
  0x1d   : > { %400 = vmatpush1.bf16.msra.mxu0 %v2296_v9  ;;  %536 = vmatpush1.bf16.msra.mxu1 %v2297_v10  ;;  %v2344_v2 = vld [vmem:[%s3035_s1 + $0x218] sm:$0xff]   ;;  %v2346_v4 = vld [vmem:[%s3035_s1 + $0x210] sm:$0xff]   ;;  %v2348_v6 = vld [vmem:[%s3035_s1 + $0x208] sm:$0xff]  }
  0x1e   : > { %401 = vmatprep.subr.bf16.mxu0 %v2402_v1  ;;  %537 = vmatprep.subr.bf16.mxu1 %v2402_v1  ;;  %v2345_v3 = vld [vmem:[%s3035_s1 + $0x1b8] sm:$0xff]   ;;  %v2347_v5 = vld [vmem:[%s3035_s1 + $0x1b0] sm:$0xff]   ;;  %v2349_v7 = vld [vmem:[%s3035_s1 + $0x1a8] sm:$0xff]  }
  0x1f   : > { %v2350_v8 = vld [vmem:[%s3035_s1 + $0x200] sm:$0xff]   ;;  %v2352_v10 = vld [vmem:[%s3035_s1 + $0x1f8] sm:$0xff]   ;;  %v2357_v15 = vld [vmem:[%s3035_s1 + $0x188] sm:$0xff]  }
  0x20   : > { %v2351_v9 = vld [vmem:[%s3035_s1 + $0x1a0] sm:$0xff]   ;;  %v2375_v32 = vld [vmem:[%s3035_s1 + $0x268] sm:$0xff]  }
  0x21   : > { %402 = vmatpush1.bf16.msra.mxu0 %v2298_v11  ;;  %538 = vmatpush1.bf16.msra.mxu1 %v2299_v12  ;;  %v2353_v11 = vld [vmem:[%s3035_s1 + $0x198] sm:$0xff]   ;;  %v2354_v12 = vld [vmem:[%s3035_s1 + $0x1f0] sm:$0xff]   ;;  %v2358_v16 = vld [vmem:[%s3035_s1 + $0x1e0] sm:$0xff]  }
  0x22   : > { %403 = vmatprep.subr.bf16.mxu0 %v2402_v1  ;;  %539 = vmatprep.subr.bf16.mxu1 %v2402_v1  ;;  %v2359_v17 = vld [vmem:[%s3035_s1 + $0x180] sm:$0xff]  }
  0x23   : > { %v2376_v34 = vld [vmem:[%s3035_s1 + $0x2c0] sm:$0xff]  }
  0x25   : > { %404 = vmatpush1.bf16.msra.mxu0 %v2300_v13  ;;  %540 = vmatpush1.bf16.msra.mxu1 %v2301_v14  ;;  %v2355_v13 = vld [vmem:[%s3035_s1 + $0x190] sm:$0xff]   ;;  %v2356_v14 = vld [vmem:[%s3035_s1 + $0x1e8] sm:$0xff]  }
  0x26   : > { %405 = vmatprep.subr.bf16.mxu0 %v2402_v1  ;;  %541 = vmatprep.subr.bf16.mxu1 %v2402_v1 }
  0x29   : > { %406 = vmatpush1.bf16.msra.mxu0 %v2302_v20  ;;  %542 = vmatpush1.bf16.msra.mxu1 %v2303_v21  ;;  %v2361_v20 = vld [vmem:[%s3035_s1 + $0x1d8] sm:$0xff]   ;;  %v2362_v21 = vld [vmem:[%s3035_s1 + $0x230] sm:$0xff]  }
  0x2a   : > { %415 = vmatprep.subr.bf16.mxu0 %v2402_v1  ;;  %551 = vmatprep.subr.bf16.mxu1 %v2402_v1 }
  0x2d   : > { %416 = vmatpush2.bf16.msra.mxu0 %v2304_v22  ;;  %552 = vmatpush2.bf16.msra.mxu1 %v2305_v23  ;;  %v2363_v22 = vld [vmem:[%s3035_s1 + $0x1d0] sm:$0xff]   ;;  %v2364_v23 = vld [vmem:[%s3035_s1 + $0x228] sm:$0xff]  }
  0x2e   : > { %417 = vmatprep.subr.bf16.mxu0 %v2402_v1  ;;  %553 = vmatprep.subr.bf16.mxu1 %v2402_v1 }
  0x31   : > { %418 = vmatpush2.bf16.msra.mxu0 %v2306_v24  ;;  %554 = vmatpush2.bf16.msra.mxu1 %v2307_v25  ;;  %v2365_v24 = vld [vmem:[%s3035_s1 + $0x1c8] sm:$0xff]   ;;  %v2366_v25 = vld [vmem:[%s3035_s1 + $0x220] sm:$0xff]  }
  0x32   : > { %419 = vmatprep.subr.bf16.mxu0 %v2402_v1  ;;  %555 = vmatprep.subr.bf16.mxu1 %v2402_v1 }
  0x35   : > { %420 = vmatpush2.bf16.msra.mxu0 %v2308_v26  ;;  %556 = vmatpush2.bf16.msra.mxu1 %v2309_v27  ;;  %v2367_v26 = vld [vmem:[%s3035_s1 + $0x1c0] sm:$0xff]   ;;  %v2368_v27 = vld [vmem:[%s3035_s1 + $0x2d8] sm:$0xff]  }
  0x36   : > { %421 = vmatprep.subr.bf16.mxu0 %v2402_v1  ;;  %557 = vmatprep.subr.bf16.mxu1 %v2402_v1 }
  0x39   : > { %422 = vmatpush2.bf16.msra.mxu0 %v2310_v28  ;;  %558 = vmatpush2.bf16.msra.mxu1 %v2311_v29  ;;  %v2369_v28 = vld [vmem:[%s3035_s1 + $0x278] sm:$0xff]   ;;  %v2370_v29 = vld [vmem:[%s3035_s1 + $0x2d0] sm:$0xff]  }
  0x3a   : > { %793 = vmatprep.subr.bf16.mxu0 %v2402_v1  ;;  %929 = vmatprep.subr.bf16.mxu1 %v2402_v1 }
  0x3c   : > { %424 = vmatmul.mubr.bf16.vlgmr.msra.gmra.mxu0 %v2549_v31  ;;  %560 = vmatmul.mubr.bf16.vlgmr.msra.gmra.mxu1 %v2552_v33 }
  0x3d   : > { %794 = vmatpush1.bf16.msra.mxu0 %v2316_v30  ;;  %930 = vmatpush1.bf16.msra.mxu1 %v2317_v35  ;;  %v2371_v30 = vld [vmem:[%s3035_s1 + $0x270] sm:$0xff]   ;;  %v2377_v35 = vld [vmem:[%s3035_s1 + $0x260] sm:$0xff]  }
  0x3e   : > { %795 = vmatprep.subr.bf16.mxu0 %v2402_v1  ;;  %931 = vmatprep.subr.bf16.mxu1 %v2402_v1 }
  0x3f   : > { %1960 = vmatprep.mubr.msk.bf16.mxu0 %vm384_vm0, %v2562_v36  ;;  %1978 = vmatprep.mubr.msk.bf16.mxu1 %vm384_vm0, %v2566_v37 }
  0x41   : > { %796 = vmatpush1.bf16.msra.mxu0 %v2318_v38  ;;  %932 = vmatpush1.bf16.msra.mxu1 %v2319_v39  ;;  %v2378_v38 = vld [vmem:[%s3035_s1 + $0x2b8] sm:$0xff]  }
  0x42   : > { %797 = vmatprep.subr.bf16.mxu0 %v2402_v1  ;;  %933 = vmatprep.subr.bf16.mxu1 %v2402_v1  ;;  %v2379_v39 = vld [vmem:[%s3035_s1 + $0x258] sm:$0xff]  }
  0x44   : > { %432 = vmatmul.mubr.bf16.gmra.mxu0 %v2581_v40  ;;  %568 = vmatmul.mubr.bf16.gmra.mxu1 %v2584_v41 }
  0x45   : > { %798 = vmatpush1.bf16.msra.mxu0 %v2324_v42  ;;  %934 = vmatpush1.bf16.msra.mxu1 %v2325_v43  ;;  %v2382_v42 = vld [vmem:[%s3035_s1 + $0x2a8] sm:$0xff]  }
  0x46   : > { %799 = vmatprep.subr.bf16.mxu0 %v2402_v1  ;;  %935 = vmatprep.subr.bf16.mxu1 %v2402_v1  ;;  %v2383_v43 = vld [vmem:[%s3035_s1 + $0x248] sm:$0xff]  }
  0x47   : > { %2047 = vmatprep.mubr.msk.bf16.mxu0 %vm384_vm0, %v2498_v18  ;;  %2065 = vmatprep.mubr.msk.bf16.mxu1 %vm384_vm0, %v2500_v19  ;;  %v2360_v18 = vld [vmem:[%s3035_s1 + $0x238] sm:$0xff]  }
  0x49   : > { %800 = vmatpush1.bf16.msra.mxu0 %v2326_v44  ;;  %936 = vmatpush1.bf16.msra.mxu1 %v2327_v45  ;;  %v2384_v44 = vld [vmem:[%s3035_s1 + $0x2a0] sm:$0xff]  }
  0x4a   : > { %801 = vmatprep.subr.bf16.mxu0 %v2402_v1  ;;  %937 = vmatprep.subr.bf16.mxu1 %v2402_v1  ;;  %v2385_v45 = vld [vmem:[%s3035_s1 + $0x240] sm:$0xff]  }
  0x4d   : > { %802 = vmatpush1.bf16.msra.mxu0 %v2328_v46  ;;  %938 = vmatpush1.bf16.msra.mxu1 %v2329_v47  ;;  %v2386_v46 = vld [vmem:[%s3035_s1 + $0x2f8] sm:$0xff]  }
  0x4e   : > { %803 = vmatprep.subr.bf16.mxu0 %v2402_v1  ;;  %939 = vmatprep.subr.bf16.mxu1 %v2402_v1  ;;  %v2387_v47 = vld [vmem:[%s3035_s1 + $0x298] sm:$0xff]  }
  0x51   : > { %804 = vmatpush1.bf16.msra.mxu0 %v2330_v48  ;;  %940 = vmatpush1.bf16.msra.mxu1 %v2331_v49  ;;  %v2388_v48 = vld [vmem:[%s3035_s1 + $0x2f0] sm:$0xff]  }
  0x52   : > { %805 = vmatprep.subr.bf16.mxu0 %v2402_v1  ;;  %941 = vmatprep.subr.bf16.mxu1 %v2402_v1  ;;  %v2389_v49 = vld [vmem:[%s3035_s1 + $0x290] sm:$0xff]  }
  0x55   : > { %806 = vmatpush1.bf16.msra.mxu0 %v2332_v50  ;;  %942 = vmatpush1.bf16.msra.mxu1 %v2333_v51  ;;  %v2390_v50 = vld [vmem:[%s3035_s1 + $0x2e8] sm:$0xff]  }
  0x56   : > { %807 = vmatprep.subr.bf16.mxu0 %v2402_v1  ;;  %943 = vmatprep.subr.bf16.mxu1 %v2402_v1  ;;  %v2391_v51 = vld [vmem:[%s3035_s1 + $0x288] sm:$0xff]  }
  0x59   : > { %808 = vmatpush1.bf16.msra.mxu0 %v2334_v52  ;;  %944 = vmatpush1.bf16.msra.mxu1 %v2335_v53  ;;  %v2392_v52 = vld [vmem:[%s3035_s1 + $0x2e0] sm:$0xff]  }
  0x5a   : > { %817 = vmatprep.subr.bf16.mxu0 %v2402_v1  ;;  %953 = vmatprep.subr.bf16.mxu1 %v2402_v1  ;;  %v2393_v53 = vld [vmem:[%s3035_s1 + $0x280] sm:$0xff]  }
  0x5d   : > { %818 = vmatpush2.bf16.msra.mxu0 %v2336_v55  ;;  %954 = vmatpush2.bf16.msra.mxu1 %v2337_v58  ;;  %v184_v55 = vshrl.u32 %v183_v54, 7 }
  0x5e   : > { %819 = vmatprep.subr.bf16.mxu0 %v2402_v1  ;;  %955 = vmatprep.subr.bf16.mxu1 %v2402_v1 }
  0x5f   : > { %v192_v58 = vand.u32 7, %v184_v55 }
  0x61   : > { %820 = vmatpush2.bf16.msra.mxu0 %v2338_v59  ;;  %956 = vmatpush2.bf16.msra.mxu1 %v2339_v60  ;;  %v186_v60 = vadd.s32 16, %v184_v55  ;;  %vm2904_vm1 = vcmp.lt.s32.totalorder %v192_v58, 4 }
  0x62   : > { %821 = vmatprep.subr.bf16.mxu0 %v2402_v1  ;;  %957 = vmatprep.subr.bf16.mxu1 %v2402_v1 }
  0x65   : > { %822 = vmatpush2.bf16.msra.mxu0 %v2340_v61  ;;  %958 = vmatpush2.bf16.msra.mxu1 %v2341_v62 }
  0x66   : > { %823 = vmatprep.subr.bf16.mxu0 %v2402_v1  ;;  %959 = vmatprep.subr.bf16.mxu1 %v2402_v1 }
  0x69   : > { %824 = vmatpush2.bf16.msra.mxu0 %v2342_v63  ;;  %960 = vmatpush2.bf16.msra.mxu1 %v2343_v0  ;;  %v206_v0 = vand.u32 7, %v186_v60 }
  0x6a   : > { %1186 = vmatprep.subr.bf16.mxu0 %v2402_v1  ;;  %1322 = vmatprep.subr.bf16.mxu1 %v2402_v1 }
  0x6b   : > { %vm2923_vm5 = vcmp.lt.s32.totalorder %v206_v0, 4 }
  0x6c   : > { %826 = vmatmul.mubr.bf16.vlgmr.msra.gmra.mxu0 %v2549_v31  ;;  %962 = vmatmul.mubr.bf16.vlgmr.msra.gmra.mxu1 %v2552_v33  ;;  %v2374_v31 = vld [vmem:[%s3035_s1 + $0x2c8] sm:$0xff]  }
  0x6d   : > { %1187 = vmatpush1.bf16.msra.mxu0 %v2344_v2  ;;  %1323 = vmatpush1.bf16.msra.mxu1 %v2345_v3 }
  0x6e   : > { %1188 = vmatprep.subr.bf16.mxu0 %v2402_v1  ;;  %1324 = vmatprep.subr.bf16.mxu1 %v2402_v1 }
  0x6f   : > { %2048 = vmatprep.mubr.msk.bf16.mxu0 %vm384_vm0, %v2562_v36  ;;  %2066 = vmatprep.mubr.msk.bf16.mxu1 %vm384_vm0, %v2566_v37 }
  0x71   : > { %1189 = vmatpush1.bf16.msra.mxu0 %v2346_v4  ;;  %1325 = vmatpush1.bf16.msra.mxu1 %v2347_v5  ;;  %v187_v4 = vadd.s32 24, %v184_v55 }
  0x72   : > { %1190 = vmatprep.subr.bf16.mxu0 %v2402_v1  ;;  %1326 = vmatprep.subr.bf16.mxu1 %v2402_v1 }
  0x74   : > { %834 = vmatmul.mubr.bf16.gmra.mxu0 %v2581_v40  ;;  %970 = vmatmul.mubr.bf16.gmra.mxu1 %v2584_v41 }
  0x75   : > { %1191 = vmatpush1.bf16.msra.mxu0 %v2348_v6  ;;  %1327 = vmatpush1.bf16.msra.mxu1 %v2349_v7 }
  0x76   : > { %1192 = vmatprep.subr.bf16.mxu0 %v2402_v1  ;;  %1328 = vmatprep.subr.bf16.mxu1 %v2402_v1 }
  0x77   : > { %2139 = vmatprep.mubr.msk.bf16.mxu0 %vm384_vm0, %v2500_v19  ;;  %2157 = vmatprep.mubr.msk.bf16.mxu1 %vm384_vm0, %v2562_v36 }
  0x79   : > { %1193 = vmatpush1.bf16.msra.mxu0 %v2350_v8  ;;  %1329 = vmatpush1.bf16.msra.mxu1 %v2351_v9 }
  0x7a   : > { %1194 = vmatprep.subr.bf16.mxu0 %v2402_v1  ;;  %1330 = vmatprep.subr.bf16.mxu1 %v2402_v1 }
  0x7d   : > { %1195 = vmatpush1.bf16.msra.mxu0 %v2352_v10  ;;  %1331 = vmatpush1.bf16.msra.mxu1 %v2353_v11 }
  0x7e   : > { %1196 = vmatprep.subr.bf16.mxu0 %v2402_v1  ;;  %1332 = vmatprep.subr.bf16.mxu1 %v2402_v1 }
  0x81   : > { %1197 = vmatpush1.bf16.msra.mxu0 %v2354_v12  ;;  %1333 = vmatpush1.bf16.msra.mxu1 %v2355_v13 }
  0x82   : > { %1198 = vmatprep.subr.bf16.mxu0 %v2402_v1  ;;  %1334 = vmatprep.subr.bf16.mxu1 %v2402_v1 }
  0x85   : > { %1199 = vmatpush1.bf16.msra.mxu0 %v2356_v14  ;;  %1335 = vmatpush1.bf16.msra.mxu1 %v2357_v15 }
  0x86   : > { %1200 = vmatprep.subr.bf16.mxu0 %v2402_v1  ;;  %1336 = vmatprep.subr.bf16.mxu1 %v2402_v1 }
  0x89   : > { %1201 = vmatpush1.bf16.msra.mxu0 %v2358_v16  ;;  %1337 = vmatpush1.bf16.msra.mxu1 %v2359_v17  ;;  %v213_v17 = vand.u32 7, %v187_v4 }
  0x8a   : > { %1210 = vmatprep.subr.bf16.mxu0 %v2402_v1  ;;  %1346 = vmatprep.subr.bf16.mxu1 %v2402_v1 }
  0x8b   : > { %vm2936_vm6 = vcmp.lt.s32.totalorder %v213_v17, 4 }
  0x8d   : > { %1211 = vmatpush2.bf16.msra.mxu0 %v2360_v18  ;;  %1347 = vmatpush2.bf16.msra.mxu1 %v2361_v20 }
  0x8e   : > { %1212 = vmatprep.subr.bf16.mxu0 %v2402_v1  ;;  %1348 = vmatprep.subr.bf16.mxu1 %v2402_v1 }
  0x91   : > { %1213 = vmatpush2.bf16.msra.mxu0 %v2362_v21  ;;  %1349 = vmatpush2.bf16.msra.mxu1 %v2363_v22 }
  0x92   : > { %1214 = vmatprep.subr.bf16.mxu0 %v2402_v1  ;;  %1350 = vmatprep.subr.bf16.mxu1 %v2402_v1 }
  0x95   : > { %1215 = vmatpush2.bf16.msra.mxu0 %v2364_v23  ;;  %1351 = vmatpush2.bf16.msra.mxu1 %v2365_v24 }
  0x96   : > { %1216 = vmatprep.subr.bf16.mxu0 %v2402_v1  ;;  %1352 = vmatprep.subr.bf16.mxu1 %v2402_v1 }
  0x99   : > { %1217 = vmatpush2.bf16.msra.mxu0 %v2366_v25  ;;  %1353 = vmatpush2.bf16.msra.mxu1 %v2367_v26 }
  0x9a   : > { %1579 = vmatprep.subr.bf16.mxu0 %v2402_v1  ;;  %1715 = vmatprep.subr.bf16.mxu1 %v2402_v1 }
  0x9c   : > { %1219 = vmatmul.mubr.bf16.vlgmr.msra.gmra.mxu0 %v2552_v33  ;;  %1355 = vmatmul.mubr.bf16.vlgmr.msra.gmra.mxu1 %v2581_v40 }
  0x9d   : > { %1580 = vmatpush1.bf16.msra.mxu0 %v2368_v27  ;;  %1716 = vmatpush1.bf16.msra.mxu1 %v2369_v28 }
  0x9e   : > { %1581 = vmatprep.subr.bf16.mxu0 %v2402_v1  ;;  %1717 = vmatprep.subr.bf16.mxu1 %v2402_v1 }
  0x9f   : > { %2140 = vmatprep.mubr.msk.bf16.mxu0 %vm384_vm0, %v2566_v37  ;;  %2158 = vmatprep.mubr.msk.bf16.mxu1 %vm384_vm0, %v2645_v56 }
  0xa1   : > { %1582 = vmatpush1.bf16.msra.mxu0 %v2370_v29  ;;  %1718 = vmatpush1.bf16.msra.mxu1 %v2371_v30 }
  0xa2   : > { %1583 = vmatprep.subr.bf16.mxu0 %v2402_v1  ;;  %1719 = vmatprep.subr.bf16.mxu1 %v2402_v1 }
  0xa4   : > { %1227 = vmatmul.mubr.bf16.gmra.mxu0 %v2584_v41  ;;  %1363 = vmatmul.mubr.bf16.gmra.mxu1 %v2648_v57 }
  0xa5   : > { %1584 = vmatpush1.bf16.msra.mxu0 %v2374_v31  ;;  %1720 = vmatpush1.bf16.msra.mxu1 %v2375_v32 }
  0xa6   : > { %1585 = vmatprep.subr.bf16.mxu0 %v2402_v1  ;;  %1721 = vmatprep.subr.bf16.mxu1 %v2402_v1 }
  0xa7   : > { %2231 = vmatprep.mubr.msk.bf16.mxu0 %vm384_vm0, %v2500_v19  ;;  %2249 = vmatprep.mubr.msk.bf16.mxu1 %vm384_vm0, %v2562_v36  ;;  %v2380_v19 = vld [vmem:[%s3035_s1 + $0x2b0] sm:$0xff]  }
  0xa8   : > { %v2381_v36 = vld [vmem:[%s3035_s1 + $0x250] sm:$0xff]  }
  0xa9   : > { %1586 = vmatpush1.bf16.msra.mxu0 %v2376_v34  ;;  %1722 = vmatpush1.bf16.msra.mxu1 %v2377_v35 }
  0xaa   : > { %1587 = vmatprep.subr.bf16.mxu0 %v2402_v1  ;;  %1723 = vmatprep.subr.bf16.mxu1 %v2402_v1 }
  0xad   : > { %1588 = vmatpush1.bf16.msra.mxu0 %v2378_v38  ;;  %1724 = vmatpush1.bf16.msra.mxu1 %v2379_v39 }
  0xae   : > { %1589 = vmatprep.subr.bf16.mxu0 %v2402_v1  ;;  %1725 = vmatprep.subr.bf16.mxu1 %v2402_v1 }
  0xb1   : > { %1590 = vmatpush1.bf16.msra.mxu0 %v2380_v19  ;;  %1726 = vmatpush1.bf16.msra.mxu1 %v2381_v36 }
  0xb2   : > { %1591 = vmatprep.subr.bf16.mxu0 %v2402_v1  ;;  %1727 = vmatprep.subr.bf16.mxu1 %v2402_v1 }
  0xb5   : > { %1592 = vmatpush1.bf16.msra.mxu0 %v2382_v42  ;;  %1728 = vmatpush1.bf16.msra.mxu1 %v2383_v43 }
  0xb6   : > { %1593 = vmatprep.subr.bf16.mxu0 %v2402_v1  ;;  %1729 = vmatprep.subr.bf16.mxu1 %v2402_v1 }
  0xb9   : > { %1594 = vmatpush1.bf16.msra.mxu0 %v2384_v44  ;;  %1730 = vmatpush1.bf16.msra.mxu1 %v2385_v45 }
  0xba   : > { %1603 = vmatprep.subr.bf16.mxu0 %v2402_v1  ;;  %1739 = vmatprep.subr.bf16.mxu1 %v2402_v1 }
  0xbd   : > { %1604 = vmatpush2.bf16.msra.mxu0 %v2386_v46  ;;  %1740 = vmatpush2.bf16.msra.mxu1 %v2387_v47 }
  0xbe   : > { %1605 = vmatprep.subr.bf16.mxu0 %v2402_v1  ;;  %1741 = vmatprep.subr.bf16.mxu1 %v2402_v1 }
  0xc1   : > { %1606 = vmatpush2.bf16.msra.mxu0 %v2388_v48  ;;  %1742 = vmatpush2.bf16.msra.mxu1 %v2389_v49 }
  0xc2   : > { %1607 = vmatprep.subr.bf16.mxu0 %v2402_v1  ;;  %1743 = vmatprep.subr.bf16.mxu1 %v2402_v1 }
  0xc5   : > { %1608 = vmatpush2.bf16.msra.mxu0 %v2390_v50  ;;  %1744 = vmatpush2.bf16.msra.mxu1 %v2391_v51 }
  0xc6   : > { %1609 = vmatprep.subr.bf16.mxu0 %v2402_v1  ;;  %1745 = vmatprep.subr.bf16.mxu1 %v2402_v1  ;;  %v185_v1 = vadd.s32 8, %v184_v55 }
  0xc9   : > { %1610 = vmatpush2.bf16.msra.mxu0 %v2392_v52  ;;  %1746 = vmatpush2.bf16.msra.mxu1 %v2393_v53 }
  0xcc   : > { %1612 = vmatmul.mubr.bf16.vlgmr.msra.gmra.mxu0 %v2552_v33  ;;  %1748 = vmatmul.mubr.bf16.vlgmr.msra.gmra.mxu1 %v2581_v40 }
  0xcd   : > { %2232 = vmatprep.mubr.msk.bf16.mxu0 %vm384_vm0, %v2566_v37  ;;  %2250 = vmatprep.mubr.msk.bf16.mxu1 %vm384_vm0, %v2645_v56  ;;  %v199_v37 = vand.u32 7, %v185_v1 }
  0xcf   : > { %vm2915_vm3 = vcmp.lt.s32.totalorder %v199_v37, 4 }
  0xd4   : > { %1620 = vmatmul.mubr.bf16.gmra.mxu0 %v2584_v41  ;;  %1756 = vmatmul.mubr.bf16.gmra.mxu1 %v2648_v57 }
  0xfc   : > { %v425_v59 = vpop.f32.mrf.mxu0  ;;  %v561_v40 = vpop.f32.mrf.mxu1 }
  0xfd   : > { %v562_v61 = vadd.f32 %v561_v40, %v425_v59 }
  0xfe   : > { %v427_v62 = vpop.f32.mrf.mxu0  ;;  %v563_v41 = vpop.f32.mrf.mxu1 }
  0xff   : > { %v2262_v56 = vpack.c.bf16 %v562_v61, %v562_v61  ;;  %v605_v57 = vsel %vm2904_vm1, %v562_v61, 0.0 }
 0x100   : > { %v428_v63 = vpop.f32.mrf.mxu0  ;;  %v564_v3 = vpop.f32.mrf.mxu1  ;;  %v624_v7 = vmul.f32 %v605_v57, %v605_v57  ;;  %v610_v13 = vsel %vm609_vm4, %v605_v57, 0.0 }
 0x101   : > { %593 = vst.msk [vmem:[%s2911_s14] sm:$0xf] %vm592_vm2, %v2262_v56  ;;  %v565_v5 = vadd.f32 %v564_v3, %v428_v63 }
 0x102   : > { %v430_v6 = vpop.f32.mrf.mxu0  ;;  %v566_v8 = vpop.f32.mrf.mxu1  ;;  %v628_v22 = vsel %vm609_vm4, %v624_v7, 0.0 }
 0x103   : > { %v2263_v9 = vpack.c.bf16 %v565_v5, %v565_v5  ;;  %v606_v10 = vsel %vm2915_vm3, %v565_v5, 0.0 }
 0x104   : > { %v433_v11 = vpop.f32.mrf.mxu0  ;;  %v611_v14 = vsel %vm609_vm4, %v606_v10, 0.0  ;;  %v625_v15 = vmul.f32 %v606_v10, %v606_v10  ;;  %v569_v16 = vpop.f32.mrf.mxu1 }
 0x105   : > { %594 = vst.msk [vmem:[%s2911_s14 + $0x4] sm:$0xf] %vm592_vm2, %v2263_v9  ;;  %v612_v18 = vadd.f32 %v611_v14, %v610_v13  ;;  %v570_v20 = vadd.f32 %v569_v16, %v433_v11 }
 0x106   : > { %v435_v21 = vpop.f32.mrf.mxu0  ;;  %v629_v23 = vsel %vm609_vm4, %v625_v15, 0.0  ;;  %v571_v24 = vpop.f32.mrf.mxu1 }
 0x107   : > { %v630_v25 = vadd.f32 %v629_v23, %v628_v22  ;;  %v2264_v26 = vpack.c.bf16 %v570_v20, %v570_v20  ;;  %v607_v27 = vsel %vm2923_vm5, %v570_v20, 0.0 }
 0x108   : > { %v436_v28 = vpop.f32.mrf.mxu0  ;;  %v613_v29 = vsel %vm609_vm4, %v607_v27, 0.0  ;;  %v626_v30 = vmul.f32 %v607_v27, %v607_v27  ;;  %v572_v32 = vpop.f32.mrf.mxu1 }
 0x109   : > { %595 = vst.msk [vmem:[%s2911_s14 + $0x8] sm:$0xf] %vm592_vm2, %v2264_v26  ;;  %v614_v34 = vadd.f32 %v613_v29, %v612_v18  ;;  %v573_v35 = vadd.f32 %v572_v32, %v436_v28 }
 0x10a   : > { %v438_v38 = vpop.f32.mrf.mxu0  ;;  %v631_v39 = vsel %vm609_vm4, %v626_v30, 0.0  ;;  %v574_v19 = vpop.f32.mrf.mxu1 }
 0x10b   : > { %v632_v36 = vadd.f32 %v631_v39, %v630_v25  ;;  %v2265_v42 = vpack.c.bf16 %v573_v35, %v573_v35  ;;  %v608_v43 = vsel %vm2936_vm6, %v573_v35, 0.0 }
 0x10c   : > { %v615_v44 = vsel %vm609_vm4, %v608_v43, 0.0  ;;  %v627_v45 = vmul.f32 %v608_v43, %v608_v43 }
 0x10d   : > { %596 = vst.msk [vmem:[%s2911_s14 + $0xc] sm:$0xf] %vm592_vm2, %v2265_v42  ;;  %v616_v46 = vadd.f32 %v615_v44, %v614_v34 }
 0x10e   : > { %v633_v47 = vsel %vm609_vm4, %v627_v45, 0.0 }
 0x10f   : > { %v634_v48 = vadd.f32 %v633_v47, %v632_v36  ;;  %v617_v3 = vrot.slane %v616_v46, 4 }
 0x111   : > { %v635_v10 = vrot.slane %v634_v48, 4  ;;  %v618_v20 = vadd.f32 %v617_v3, %v616_v46 }
 0x113   : > { %v636_v26 = vadd.f32 %v635_v10, %v634_v48  ;;  %v619_v34 = vrot.slane %v618_v20, 2 }
 0x115   : > { %v637_v39 = vrot.slane %v636_v26, 2  ;;  %v620_v42 = vadd.f32 %v619_v34, %v618_v20 }
 0x117   : > { %v638_v45 = vadd.f32 %v637_v39, %v636_v26  ;;  %v621_v48 = vrot.slane %v620_v42, 1 }
 0x12c   : > { %v827_v49 = vpop.f32.mrf.mxu0  ;;  %v963_v50 = vpop.f32.mrf.mxu1 }
 0x12d   : > { %v964_v51 = vadd.f32 %v963_v50, %v827_v49 }
 0x12e   : > { %v829_v52 = vpop.f32.mrf.mxu0  ;;  %v965_v53 = vpop.f32.mrf.mxu1 }
 0x12f   : > { %v2266_v54 = vpack.c.bf16 %v964_v51, %v964_v51  ;;  %v999_v55 = vsel %vm2904_vm1, %v964_v51, 0.0  ;;  %v639_v51 = vrot.slane %v638_v45, 1 }
 0x130   : > { %v830_v58 = vpop.f32.mrf.mxu0  ;;  %v966_v1 = vpop.f32.mrf.mxu1  ;;  %v1017_v40 = vmul.f32 %v999_v55, %v999_v55  ;;  %v1003_v56 = vsel %vm609_vm4, %v999_v55, 0.0 }
 0x131   : > { %2071 = vst.msk [vmem:[%s2911_s14 + $0x10] sm:$0xf] %vm592_vm2, %v2266_v54  ;;  %v967_v59 = vadd.f32 %v966_v1, %v830_v58  ;;  %v622_v54 = vadd.f32 %v621_v48, %v620_v42  ;;  %v640_v1 = vadd.f32 %v639_v51, %v638_v45 }
 0x132   : > { %v832_v60 = vpop.f32.mrf.mxu0  ;;  %v968_v37 = vpop.f32.mrf.mxu1  ;;  %v1021_v7 = vsel %vm609_vm4, %v1017_v40, 0.0 }
 0x133   : > { %v2267_v61 = vpack.c.bf16 %v967_v59, %v967_v59  ;;  %v1000_v62 = vsel %vm2915_vm3, %v967_v59, 0.0 }
 0x134   : > { %v835_v41 = vpop.f32.mrf.mxu0  ;;  %v1004_v57 = vsel %vm609_vm4, %v1000_v62, 0.0  ;;  %v1018_v63 = vmul.f32 %v1000_v62, %v1000_v62  ;;  %v971_v0 = vpop.f32.mrf.mxu1 }
 0x135   : > { %2072 = vst.msk [vmem:[%s2911_s14 + $0x14] sm:$0xf] %vm592_vm2, %v2267_v61  ;;  %v1005_v4 = vadd.f32 %v1004_v57, %v1003_v56  ;;  %v972_v5 = vadd.f32 %v971_v0, %v835_v41 }
 0x136   : > { %v837_v6 = vpop.f32.mrf.mxu0  ;;  %v1022_v8 = vsel %vm609_vm4, %v1018_v63, 0.0  ;;  %v973_v9 = vpop.f32.mrf.mxu1 }
 0x137   : > { %v1023_v11 = vadd.f32 %v1022_v8, %v1021_v7  ;;  %v2268_v13 = vpack.c.bf16 %v972_v5, %v972_v5  ;;  %v1001_v14 = vsel %vm2923_vm5, %v972_v5, 0.0 }
 0x138   : > { %v838_v15 = vpop.f32.mrf.mxu0  ;;  %v1006_v16 = vsel %vm609_vm4, %v1001_v14, 0.0  ;;  %v1019_v17 = vmul.f32 %v1001_v14, %v1001_v14  ;;  %v974_v18 = vpop.f32.mrf.mxu1 }
 0x139   : > { %2073 = vst.msk [vmem:[%s2911_s14 + $0x18] sm:$0xf] %vm592_vm2, %v2268_v13  ;;  %v1007_v21 = vadd.f32 %v1006_v16, %v1005_v4  ;;  %v975_v22 = vadd.f32 %v974_v18, %v838_v15 }
 0x13a   : > { %v840_v23 = vpop.f32.mrf.mxu0  ;;  %v1024_v24 = vsel %vm609_vm4, %v1019_v17, 0.0  ;;  %v976_v25 = vpop.f32.mrf.mxu1 }
 0x13b   : > { %v1025_v27 = vadd.f32 %v1024_v24, %v1023_v11  ;;  %v2269_v28 = vpack.c.bf16 %v975_v22, %v975_v22  ;;  %v1002_v29 = vsel %vm2936_vm6, %v975_v22, 0.0 }
 0x13c   : > { %v1008_v30 = vsel %vm609_vm4, %v1002_v29, 0.0  ;;  %v1020_v32 = vmul.f32 %v1002_v29, %v1002_v29 }
 0x13d   : > { %2074 = vst.msk [vmem:[%s2911_s14 + $0x1c] sm:$0xf] %vm592_vm2, %v2269_v28  ;;  %v1009_v35 = vadd.f32 %v1008_v30, %v1007_v21 }
 0x13e   : > { %v1026_v38 = vsel %vm609_vm4, %v1020_v32, 0.0 }
 0x13f   : > { %v1010_v19 = vrot.slane %v1009_v35, 4  ;;  %v1027_v36 = vadd.f32 %v1026_v38, %v1025_v27 }
 0x141   : > { %v1011_v43 = vadd.f32 %v1010_v19, %v1009_v35  ;;  %v1028_v44 = vrot.slane %v1027_v36, 4 }
 0x143   : > { %v1012_v46 = vrot.slane %v1011_v43, 2  ;;  %v1029_v47 = vadd.f32 %v1028_v44, %v1027_v36 }
 0x145   : > { %v1013_v49 = vadd.f32 %v1012_v46, %v1011_v43  ;;  %v1030_v50 = vrot.slane %v1029_v47, 2 }
 0x147   : > { %v1014_v52 = vrot.slane %v1013_v49, 1  ;;  %v1031_v53 = vadd.f32 %v1030_v50, %v1029_v47 }
 0x149   : > { %v1015_v55 = vadd.f32 %v1014_v52, %v1013_v49  ;;  %v1032_v58 = vrot.slane %v1031_v53, 1 }
 0x14b   : > { %v2973_v59 = vadd.f32 %v1015_v55, %v622_v54  ;;  %v1033_v60 = vadd.f32 %v1032_v58, %v1031_v53 }
 0x14d   : > { %v2975_v40 = vadd.f32 %v1033_v60, %v640_v1 }
 0x15c   : > { %v1220_v37 = vpop.f32.mrf.mxu0  ;;  %v1356_v61 = vpop.f32.mrf.mxu1 }
 0x15d   : > { %v1357_v62 = vadd.f32 %v1356_v61, %v1220_v37 }
 0x15e   : > { %v1222_v41 = vpop.f32.mrf.mxu0  ;;  %v1358_v56 = vpop.f32.mrf.mxu1 }
 0x15f   : > { %v2270_v57 = vpack.c.bf16 %v1357_v62, %v1357_v62  ;;  %v1392_v22 = vsel %vm2904_vm1, %v1357_v62, 0.0 }
 0x160   : > { %v1223_v63 = vpop.f32.mrf.mxu0  ;;  %v1359_v0 = vpop.f32.mrf.mxu1  ;;  %v1410_v26 = vmul.f32 %v1392_v22, %v1392_v22  ;;  %v1396_v32 = vsel %vm609_vm4, %v1392_v22, 0.0 }
 0x161   : > { %2163 = vst.msk [vmem:[%s2911_s14 + $0x20] sm:$0xf] %vm592_vm2, %v2270_v57  ;;  %v1360_v3 = vadd.f32 %v1359_v0, %v1223_v63 }
 0x162   : > { %v1225_v4 = vpop.f32.mrf.mxu0  ;;  %v1361_v5 = vpop.f32.mrf.mxu1  ;;  %v1414_v35 = vsel %vm609_vm4, %v1410_v26, 0.0 }
 0x163   : > { %v2271_v6 = vpack.c.bf16 %v1360_v3, %v1360_v3  ;;  %v1393_v21 = vsel %vm2915_vm3, %v1360_v3, 0.0 }
 0x164   : > { %v1228_v7 = vpop.f32.mrf.mxu0  ;;  %v1364_v8 = vpop.f32.mrf.mxu1  ;;  %v1411_v24 = vmul.f32 %v1393_v21, %v1393_v21  ;;  %v1397_v28 = vsel %vm609_vm4, %v1393_v21, 0.0 }
 0x165   : > { %2164 = vst.msk [vmem:[%s2911_s14 + $0x24] sm:$0xf] %vm592_vm2, %v2271_v6  ;;  %v1365_v9 = vadd.f32 %v1364_v8, %v1228_v7  ;;  %v1398_v38 = vadd.f32 %v1397_v28, %v1396_v32 }
 0x166   : > { %v1230_v10 = vpop.f32.mrf.mxu0  ;;  %v1366_v11 = vpop.f32.mrf.mxu1  ;;  %v1415_v29 = vsel %vm609_vm4, %v1411_v24, 0.0 }
 0x167   : > { %v2272_v13 = vpack.c.bf16 %v1365_v9, %v1365_v9  ;;  %v1394_v23 = vsel %vm2923_vm5, %v1365_v9, 0.0  ;;  %v1416_v19 = vadd.f32 %v1415_v29, %v1414_v35 }
 0x168   : > { %v1231_v14 = vpop.f32.mrf.mxu0  ;;  %v1367_v15 = vpop.f32.mrf.mxu1  ;;  %v1412_v27 = vmul.f32 %v1394_v23, %v1394_v23  ;;  %v1399_v34 = vsel %vm609_vm4, %v1394_v23, 0.0 }
 0x169   : > { %2165 = vst.msk [vmem:[%s2911_s14 + $0x28] sm:$0xf] %vm592_vm2, %v2272_v13  ;;  %v1368_v16 = vadd.f32 %v1367_v15, %v1231_v14  ;;  %v1400_v42 = vadd.f32 %v1399_v34, %v1398_v38 }
 0x16a   : > { %v1233_v17 = vpop.f32.mrf.mxu0  ;;  %v1369_v18 = vpop.f32.mrf.mxu1  ;;  %v1417_v39 = vsel %vm609_vm4, %v1412_v27, 0.0 }
 0x16b   : > { %v2273_v20 = vpack.c.bf16 %v1368_v16, %v1368_v16  ;;  %v1395_v25 = vsel %vm2936_vm6, %v1368_v16, 0.0  ;;  %v1418_v45 = vadd.f32 %v1417_v39, %v1416_v19 }
 0x16c   : > { %v1413_v30 = vmul.f32 %v1395_v25, %v1395_v25  ;;  %v1401_v36 = vsel %vm609_vm4, %v1395_v25, 0.0 }
 0x16d   : > { %2166 = vst.msk [vmem:[%s2911_s14 + $0x2c] sm:$0xf] %vm592_vm2, %v2273_v20  ;;  %v1402_v47 = vadd.f32 %v1401_v36, %v1400_v42 }
 0x16e   : > { %v1419_v43 = vsel %vm609_vm4, %v1413_v30, 0.0 }
 0x16f   : > { %v1420_v50 = vadd.f32 %v1419_v43, %v1418_v45  ;;  %v1403_v55 = vrot.slane %v1402_v47, 4 }
 0x171   : > { %v1421_v60 = vrot.slane %v1420_v50, 4  ;;  %v1404_v0 = vadd.f32 %v1403_v55, %v1402_v47 }
 0x173   : > { %v1422_v5 = vadd.f32 %v1421_v60, %v1420_v50  ;;  %v1405_v16 = vrot.slane %v1404_v0, 2 }
 0x175   : > { %v1423_v21 = vrot.slane %v1422_v5, 2  ;;  %v1406_v30 = vadd.f32 %v1405_v16, %v1404_v0 }
 0x177   : > { %v1424_v38 = vadd.f32 %v1423_v21, %v1422_v5  ;;  %v1407_v36 = vrot.slane %v1406_v30, 1 }
 0x18c   : > { %v1613_v44 = vpop.f32.mrf.mxu0  ;;  %v1749_v46 = vpop.f32.mrf.mxu1 }
 0x18d   : > { %v1750_v48 = vadd.f32 %v1749_v46, %v1613_v44  ;;  %v1425_v44 = vrot.slane %v1424_v38, 1  ;;  %v1408_v46 = vadd.f32 %v1407_v36, %v1406_v30 }
 0x18e   : > { %v1615_v49 = vpop.f32.mrf.mxu0  ;;  %v1751_v51 = vpop.f32.mrf.mxu1 }
 0x18f   : > { %v2274_v52 = vpack.c.bf16 %v1750_v48, %v1750_v48  ;;  %v1785_v61 = vsel %vm2904_vm1, %v1750_v48, 0.0  ;;  %v1426_v49 = vadd.f32 %v1425_v44, %v1424_v38 }
 0x190   : > { %v1616_v53 = vpop.f32.mrf.mxu0  ;;  %v1752_v54 = vpop.f32.mrf.mxu1  ;;  %v1803_v6 = vmul.f32 %v1785_v61, %v1785_v61  ;;  %v1789_v10 = vsel %vm609_vm4, %v1785_v61, 0.0 }
 0x191   : > { %2255 = vst.msk [vmem:[%s2911_s14 + $0x30] sm:$0xf] %vm592_vm2, %v2274_v52  ;;  %v1753_v58 = vadd.f32 %v1752_v54, %v1616_v53  ;;  %v1409_v52 = vadd.f32 %v1408_v46, %v2973_v59  ;;  %v1427_v55 = vadd.f32 %v1426_v49, %v2975_v40 }
 0x192   : > { %v1618_v1 = vpop.f32.mrf.mxu0  ;;  %v1754_v37 = vpop.f32.mrf.mxu1  ;;  %v1807_v12 = vsel %vm609_vm4, %v1803_v6, 0.0 }
 0x193   : > { %v2275_v62 = vpack.c.bf16 %v1753_v58, %v1753_v58  ;;  %v1786_v41 = vsel %vm2915_vm3, %v1753_v58, 0.0 }
 0x194   : > { %v1621_v56 = vpop.f32.mrf.mxu0  ;;  %v1804_v57 = vmul.f32 %v1786_v41, %v1786_v41  ;;  %v1757_v63 = vpop.f32.mrf.mxu1  ;;  %v1790_v7 = vsel %vm609_vm4, %v1786_v41, 0.0 }
 0x195   : > { %2256 = vst.msk [vmem:[%s2911_s14 + $0x34] sm:$0xf] %vm592_vm2, %v2275_v62  ;;  %v1758_v3 = vadd.f32 %v1757_v63, %v1621_v56  ;;  %v1791_v17 = vadd.f32 %v1790_v7, %v1789_v10 }
 0x196   : > { %v1623_v4 = vpop.f32.mrf.mxu0  ;;  %v1759_v8 = vpop.f32.mrf.mxu1  ;;  %v1808_v11 = vsel %vm609_vm4, %v1804_v57, 0.0 }
 0x197   : > { %v2276_v33 = vpack.c.bf16 %v1758_v3, %v1758_v3  ;;  %v1787_v9 = vsel %vm2923_vm5, %v1758_v3, 0.0  ;;  %v1809_v24 = vadd.f32 %v1808_v11, %v1807_v12 }
 0x198   : > { %v1624_v2 = vpop.f32.mrf.mxu0  ;;  %v1792_v13 = vsel %vm609_vm4, %v1787_v9, 0.0  ;;  %v1805_v14 = vmul.f32 %v1787_v9, %v1787_v9  ;;  %v1760_v15 = vpop.f32.mrf.mxu1 }
 0x199   : > { %2257 = vst.msk [vmem:[%s2911_s14 + $0x38] sm:$0xf] %vm592_vm2, %v2276_v33  ;;  %v1761_v18 = vadd.f32 %v1760_v15, %v1624_v2  ;;  %v1793_v25 = vadd.f32 %v1792_v13, %v1791_v17 }
 0x19a   : > { %v1626_v20 = vpop.f32.mrf.mxu0  ;;  %v1810_v22 = vsel %vm609_vm4, %v1805_v14, 0.0  ;;  %v1762_v23 = vpop.f32.mrf.mxu1 }
 0x19b   : > { %v2277_v26 = vpack.c.bf16 %v1761_v18, %v1761_v18  ;;  %v1788_v27 = vsel %vm2936_vm6, %v1761_v18, 0.0  ;;  %v1811_v32 = vadd.f32 %v1810_v22, %v1809_v24 }
 0x19c   : > { %v1794_v28 = vsel %vm609_vm4, %v1788_v27, 0.0  ;;  %v1806_v29 = vmul.f32 %v1788_v27, %v1788_v27 }
 0x19d   : > { %2258 = vst.msk [vmem:[%s2911_s14 + $0x3c] sm:$0xf] %vm592_vm2, %v2277_v26  ;;  %v1795_v34 = vadd.f32 %v1794_v28, %v1793_v25 }
 0x19e   : > { %v1812_v35 = vsel %vm609_vm4, %v1806_v29, 0.0 }
 0x19f   : > { %v1796_v39 = vrot.slane %v1795_v34, 4  ;;  %v1813_v19 = vadd.f32 %v1812_v35, %v1811_v32 }
 0x1a1   : > { %v1797_v42 = vadd.f32 %v1796_v39, %v1795_v34  ;;  %v1814_v43 = vrot.slane %v1813_v19, 4 }
 0x1a3   : > { %v1798_v31 = vrot.slane %v1797_v42, 2  ;;  %v1815_v45 = vadd.f32 %v1814_v43, %v1813_v19 }
 0x1a5   : > { %v1799_v47 = vadd.f32 %v1798_v31, %v1797_v42  ;;  %v1816_v48 = vrot.slane %v1815_v45, 2 }
 0x1a7   : > { %v1800_v50 = vrot.slane %v1799_v47, 1  ;;  %v1817_v51 = vadd.f32 %v1816_v48, %v1815_v45 }
 0x1a9   : > { %v1801_v53 = vadd.f32 %v1800_v50, %v1799_v47  ;;  %v1818_v54 = vrot.slane %v1817_v51, 1 }
 0x1ab   : > { %v1802_v58 = vadd.f32 %v1801_v53, %v1409_v52  ;;  %v1819_v1 = vadd.f32 %v1818_v54, %v1817_v51 }
 0x1ad   : > { %v1820_v60 = vadd.f32 %v1819_v1, %v1427_v55  ;;  %1822 = vst.msk [vmem:[%s181_s19] sm:$0x1] %vm1821_vm7, %v1802_v58 }
 0x1af   : > { %1823 = vst.msk [vmem:[%s181_s19 + $0x1] sm:$0x1] %vm1821_vm7, %v1820_v60 }
 0x1b0 PF: > { %s14_s12 = sadd.s32 1, %s2400_s12  }
 0x1b1   : > { %p11_p4 = scmp.ge.s32.totalorder %s14_s12, 4  }
 0x1b3   :  { %13 = sbr.rel (!%p11_p4) target bundleno = 1 (0x1), region = 80 }

// kernel: _lambda_.18
= control target key start
LH: loop header
LB: loop body
LE: loop exit
PB: predicated region body
PF: predicated region fallthrough
CT: control target
= control target key end

     0   :  { %s2446_s12 = smov 0   ;;  %s2858_s0 = inlined_call_operand.vmem [shape: bf16[2,80,96], index: 0, kind: input, shape index: {}]   ;;  %s2859_s1 = inlined_call_operand.vmem [shape: bf16[4,2,96,8], index: 1, kind: input, shape index: {}]   ;;  %s2860_s2 = inlined_call_operand.vmem [shape: bf16[2,4,64,8], index: 2, kind: output, shape index: {0}]   ;;  %s2861_s3 = inlined_call_operand.vmem [shape: f32[2,2,8], index: 3, kind: output, shape index: {1}]  }
   0x1 LB: > { %s1793_s13 = sadd.s32 4294967295, %s2424_s12   ;;  %p1797_p0 = scmp.ge.s32.totalorder %s2424_s12, 1  ;;  %s2424_s12 = sphi %s2446_s12, %s14_s12  }
   0x2   : > { %p140_p1 = scmp.lt.s32.totalorder %s2424_s12, 3 }
   0x4   : > { %p141_p2 = pnand %p1797_p0, %p140_p1 }
   0x5   : > { %p168_p3 = scmp.lt.s32.totalorder (!%p141_p2), %s1793_s13, 1 }
   0x6   : > { %144 = sbr.rel (%p141_p2) target bundleno = 341 (0x155), region = 28 }
   0xb   : > { %v2338_v0 = vld [vmem:[%s2859_s1 + $0x58] sm:$0xff]   ;;  %v2339_v1 = vld [vmem:[%s2859_s1 + $0x28] sm:$0xff]   ;;  %v2340_v2 = vld [vmem:[%s2859_s1 + $0x50] sm:$0xff]   ;;  %s2863_s13 = smov (!%p168_p3, %s1793_s13), 1  ;;  %vm273_vm0 = vcmask 785408   ;;  %vm502_vm1 = vcmask 60416  }
   0xc   : > { %2169 = vmatprep.subr.bf16.mxu0 %v2338_v0  ;;  %2189 = vmatprep.subr.bf16.mxu1 %v2339_v1  ;;  %v2341_v3 = vld [vmem:[%s2859_s1 + $0x20] sm:$0xff]   ;;  %v2342_v4 = vld [vmem:[%s2859_s1 + $0x48] sm:$0xff]   ;;  %v2343_v5 = vld [vmem:[%s2859_s1 + $0x18] sm:$0xff]   ;;  %s2329_s26 = smul.u32 40, %s2863_s13  ;;  %s2056_s17 = sshll.u32 %s2863_s13, 7  ;;  %vm511_vm2 = vcmask 64512  }
   0xd   : > { %2170 = vmatpush3.bf16.msra.mxu0 %v2338_v0  ;;  %2190 = vmatpush3.bf16.msra.mxu1 %v2339_v1  ;;  %v2344_v6 = vld [vmem:[%s2859_s1 + $0x40] sm:$0xff]   ;;  %v2345_v7 = vld [vmem:[%s2859_s1 + $0x10] sm:$0xff]   ;;  %v2346_v8 = vld [vmem:[%s2859_s1 + $0x38] sm:$0xff]   ;;  %s2678_s20 = scalar_lea.vmem %s2860_s2, %s2056_s17  ;;  %vm1704_vm3 = vcmask 57344  }
   0xe   : > { %2171 = vmatprep.subr.bf16.mxu0 %v2340_v2  ;;  %2191 = vmatprep.subr.bf16.mxu1 %v2341_v3  ;;  %s2484_s6 = scalar_lea.vmem %s2858_s0, %s2329_s26  ;;  %v2347_v12 = vld [vmem:[%s2859_s1 + $0x8] sm:$0xff]   ;;  %v2348_v15 = vld [vmem:[%s2859_s1 + $0x30] sm:$0xff]   ;;  %v2349_v16 = vld [vmem:[%s2859_s1] sm:$0xff]  }
   0xf   : > { %v183_v9 = vld [vmem:[%s2484_s6 + $0x4] sm:$0xf]  ;;  %v203_v10 = vld [vmem:[%s2484_s6] sm:$0xf]  ;;  %v184_v11 = vld [vmem:[%s2484_s6 + $0x8] sm:$0xf] }
  0x10   : > { %v1814_v13 = vcombine.low %v203_v10, %v183_v9  ;;  %v1828_v14 = vcombine.low %v183_v9, %v184_v11  ;;  %v185_v17 = vld [vmem:[%s2484_s6 + $0xc] sm:$0xf]  ;;  %v186_v18 = vld [vmem:[%s2484_s6 + $0x10] sm:$0xf]  ;;  %v2354_v19 = vld [vmem:[%s2859_s1 + $0xb8] sm:$0xff]  }
  0x11   : > { %2172 = vmatpush3.bf16.msra.mxu0 %v2340_v2  ;;  %2192 = vmatpush3.bf16.msra.mxu1 %v2341_v3  ;;  %v2355_v20 = vld [vmem:[%s2859_s1 + $0x88] sm:$0xff]   ;;  %v1815_v21 = vcombine.low %v184_v11, %v185_v17  ;;  %v187_v22 = vld [vmem:[%s2484_s6 + $0x14] sm:$0xf]  ;;  %v1829_v23 = vcombine.low %v185_v17, %v186_v18  ;;  %v188_v24 = vld [vmem:[%s2484_s6 + $0x18] sm:$0xf] }
  0x12   : > { %2173 = vmatprep.subr.bf16.mxu0 %v2342_v4  ;;  %2193 = vmatprep.subr.bf16.mxu1 %v2343_v5  ;;  %v2356_v25 = vld [vmem:[%s2859_s1 + $0xb0] sm:$0xff]   ;;  %v2357_v26 = vld [vmem:[%s2859_s1 + $0x80] sm:$0xff]   ;;  %v1816_v27 = vcombine.low %v186_v18, %v187_v22  ;;  %v1830_v28 = vcombine.low %v187_v22, %v188_v24  ;;  %v189_v29 = vld [vmem:[%s2484_s6 + $0x1c] sm:$0xf] }
  0x13   : > { %2181 = vmatprep.mubr.msk.bf16.mxu0 %vm273_vm0, %v1814_v13  ;;  %2201 = vmatprep.mubr.msk.bf16.mxu1 %vm273_vm0, %v1828_v14  ;;  %v190_v30 = vld [vmem:[%s2484_s6 + $0x20] sm:$0xf]  ;;  %v2362_v31 = vld [vmem:[%s2859_s1 + $0xa8] sm:$0xff]   ;;  %v2363_v32 = vld [vmem:[%s2859_s1 + $0x78] sm:$0xff]   ;;  %v1817_v34 = vcombine.low %v188_v24, %v189_v29 }
  0x14   : > { %v564_v33 = vld [vmem:[%s2484_s6 + $0x4] sm:$0xf]  ;;  %v585_v35 = vld [vmem:[%s2484_s6] sm:$0xf]  ;;  %v1831_v36 = vcombine.low %v189_v29, %v190_v30  ;;  %v565_v37 = vld [vmem:[%s2484_s6 + $0x8] sm:$0xf] }
  0x15   : > { %2174 = vmatpush3.bf16.msra.mxu0 %v2342_v4  ;;  %2194 = vmatpush3.bf16.msra.mxu1 %v2343_v5  ;;  %v2364_v38 = vld [vmem:[%s2859_s1 + $0xa0] sm:$0xff]   ;;  %v2365_v39 = vld [vmem:[%s2859_s1 + $0x70] sm:$0xff]   ;;  %v1874_v40 = vcombine.low %v585_v35, %v564_v33  ;;  %v1888_v41 = vcombine.low %v564_v33, %v565_v37  ;;  %v2366_v42 = vld [vmem:[%s2859_s1 + $0x98] sm:$0xff]  }
  0x16   : > { %2175 = vmatprep.subr.bf16.mxu0 %v2344_v6  ;;  %2195 = vmatprep.subr.bf16.mxu1 %v2345_v7  ;;  %v2367_v43 = vld [vmem:[%s2859_s1 + $0x68] sm:$0xff]   ;;  %v2368_v44 = vld [vmem:[%s2859_s1 + $0x90] sm:$0xff]   ;;  %v2369_v45 = vld [vmem:[%s2859_s1 + $0x60] sm:$0xff]  }
  0x17   : > { %v566_v46 = vld [vmem:[%s2484_s6 + $0xc] sm:$0xf]  ;;  %v567_v47 = vld [vmem:[%s2484_s6 + $0x10] sm:$0xf]  ;;  %v2374_v48 = vld [vmem:[%s2859_s1 + $0x118] sm:$0xff]  }
  0x18   : > { %v2375_v49 = vld [vmem:[%s2859_s1 + $0xe8] sm:$0xff]   ;;  %v1875_v50 = vcombine.low %v565_v37, %v566_v46  ;;  %v568_v51 = vld [vmem:[%s2484_s6 + $0x14] sm:$0xf]  ;;  %v1889_v52 = vcombine.low %v566_v46, %v567_v47  ;;  %v569_v53 = vld [vmem:[%s2484_s6 + $0x18] sm:$0xf] }
  0x19   : > { %2176 = vmatpush3.bf16.msra.mxu0 %v2344_v6  ;;  %2196 = vmatpush3.bf16.msra.mxu1 %v2345_v7  ;;  %v2376_v54 = vld [vmem:[%s2859_s1 + $0x110] sm:$0xff]   ;;  %v2377_v55 = vld [vmem:[%s2859_s1 + $0xe0] sm:$0xff]   ;;  %v1876_v56 = vcombine.low %v567_v47, %v568_v51  ;;  %v570_v57 = vld [vmem:[%s2484_s6 + $0x1c] sm:$0xf]  ;;  %v1890_v58 = vcombine.low %v568_v51, %v569_v53 }
  0x1a   : > { %2177 = vmatprep.subr.bf16.mxu0 %v2346_v8  ;;  %2197 = vmatprep.subr.bf16.mxu1 %v2347_v12  ;;  %v571_v59 = vld [vmem:[%s2484_s6 + $0x20] sm:$0xf]  ;;  %v2382_v60 = vld [vmem:[%s2859_s1 + $0x108] sm:$0xff]   ;;  %v2383_v61 = vld [vmem:[%s2859_s1 + $0xd8] sm:$0xff]   ;;  %v1877_v63 = vcombine.low %v569_v53, %v570_v57 }
  0x1b   : > { %v944_v62 = vld [vmem:[%s2484_s6 + $0x8] sm:$0xf]  ;;  %v965_v0 = vld [vmem:[%s2484_s6 + $0x4] sm:$0xf]  ;;  %v1891_v1 = vcombine.low %v570_v57, %v571_v59  ;;  %v945_v2 = vld [vmem:[%s2484_s6 + $0xc] sm:$0xf] }
  0x1c   : > { %v2384_v3 = vld [vmem:[%s2859_s1 + $0x100] sm:$0xff]   ;;  %v2385_v4 = vld [vmem:[%s2859_s1 + $0xd0] sm:$0xff]   ;;  %v1942_v5 = vcombine.low %v965_v0, %v944_v62  ;;  %v1956_v6 = vcombine.low %v944_v62, %v945_v2  ;;  %v2386_v7 = vld [vmem:[%s2859_s1 + $0xf8] sm:$0xff]  }
  0x1d   : > { %2178 = vmatpush3.bf16.msra.mxu0 %v2346_v8  ;;  %2198 = vmatpush3.bf16.msra.mxu1 %v2347_v12  ;;  %v2387_v8 = vld [vmem:[%s2859_s1 + $0xc8] sm:$0xff]   ;;  %v2388_v9 = vld [vmem:[%s2859_s1 + $0xf0] sm:$0xff]   ;;  %v2389_v10 = vld [vmem:[%s2859_s1 + $0xc0] sm:$0xff]  }
  0x1e   : > { %2179 = vmatprep.subr.bf16.mxu0 %v2348_v15  ;;  %2199 = vmatprep.subr.bf16.mxu1 %v2349_v16  ;;  %v946_v11 = vld [vmem:[%s2484_s6 + $0x10] sm:$0xf]  ;;  %v947_v12 = vld [vmem:[%s2484_s6 + $0x14] sm:$0xf]  ;;  %v2394_v13 = vld [vmem:[%s2859_s1 + $0x178] sm:$0xff]  }
  0x1f   : > { %v2395_v14 = vld [vmem:[%s2859_s1 + $0x148] sm:$0xff]   ;;  %v1957_v17 = vcombine.low %v946_v11, %v947_v12  ;;  %v949_v18 = vld [vmem:[%s2484_s6 + $0x1c] sm:$0xf]  ;;  %v951_v24 = vld [vmem:[%s2484_s6 + $0x24] sm:$0xf] }
  0x20   : > { %v1345_v29 = vld [vmem:[%s2484_s6 + $0x4] sm:$0xf]  ;;  %v2405_v33 = vld [vmem:[%s2859_s1 + $0x130] sm:$0xff]   ;;  %v2407_v37 = vld [vmem:[%s2859_s1 + $0x128] sm:$0xff]  }
  0x21   : > { %2180 = vmatpush3.bf16.msra.mxu0 %v2348_v15  ;;  %2200 = vmatpush3.bf16.msra.mxu1 %v2349_v16  ;;  %v1943_v15 = vcombine.low %v945_v2, %v946_v11  ;;  %v948_v16 = vld [vmem:[%s2484_s6 + $0x18] sm:$0xf] }
  0x22   : > { %2209 = vmatprep.subr.bf16.mxu0 %v2354_v19  ;;  %2229 = vmatprep.subr.bf16.mxu1 %v2355_v20  ;;  %v1958_v22 = vcombine.low %v948_v16, %v949_v18 }
  0x24   : > { %2182 = vmatmul.mubr.msk.bf16.vlgmr.msra.gmra.mxu0 %vm273_vm0, %v1815_v21  ;;  %2202 = vmatmul.mubr.msk.bf16.vlgmr.msra.gmra.mxu1 %vm273_vm0, %v1829_v23  ;;  %v1944_v21 = vcombine.low %v947_v12, %v948_v16  ;;  %v950_v23 = vld [vmem:[%s2484_s6 + $0x20] sm:$0xf] }
  0x25   : > { %2210 = vmatpush3.bf16.msra.mxu0 %v2354_v19  ;;  %2230 = vmatpush3.bf16.msra.mxu1 %v2355_v20  ;;  %v2396_v19 = vld [vmem:[%s2859_s1 + $0x170] sm:$0xff]   ;;  %v2397_v20 = vld [vmem:[%s2859_s1 + $0x140] sm:$0xff]   ;;  %v1959_v30 = vcombine.low %v950_v23, %v951_v24 }
  0x26   : > { %2211 = vmatprep.subr.bf16.mxu0 %v2356_v25  ;;  %2231 = vmatprep.subr.bf16.mxu1 %v2357_v26 }
  0x27   : > { %2185 = vmatprep.mubr.msk.bf16.mxu0 %vm273_vm0, %v1816_v27  ;;  %2205 = vmatprep.mubr.msk.bf16.mxu1 %vm273_vm0, %v1830_v28  ;;  %v1945_v27 = vcombine.low %v949_v18, %v950_v23  ;;  %v1324_v28 = vld [vmem:[%s2484_s6 + $0x8] sm:$0xf] }
  0x29   : > { %2212 = vmatpush3.bf16.msra.mxu0 %v2356_v25  ;;  %2232 = vmatpush3.bf16.msra.mxu1 %v2357_v26  ;;  %v2402_v25 = vld [vmem:[%s2859_s1 + $0x168] sm:$0xff]   ;;  %v2403_v26 = vld [vmem:[%s2859_s1 + $0x138] sm:$0xff]  }
  0x2a   : > { %2213 = vmatprep.subr.bf16.mxu0 %v2362_v31  ;;  %2233 = vmatprep.subr.bf16.mxu1 %v2363_v32 }
  0x2c   : > { %2186 = vmatmul.mubr.msk.bf16.gmra.mxu0 %vm273_vm0, %v1817_v34  ;;  %2206 = vmatmul.mubr.msk.bf16.gmra.mxu1 %vm273_vm0, %v1831_v36  ;;  %v2010_v34 = vcombine.low %v1345_v29, %v1324_v28  ;;  %v2406_v36 = vld [vmem:[%s2859_s1 + $0x158] sm:$0xff]  }
  0x2d   : > { %2214 = vmatpush3.bf16.msra.mxu0 %v2362_v31  ;;  %2234 = vmatpush3.bf16.msra.mxu1 %v2363_v32  ;;  %v1325_v31 = vld [vmem:[%s2484_s6 + $0xc] sm:$0xf]  ;;  %v2404_v32 = vld [vmem:[%s2859_s1 + $0x160] sm:$0xff]  }
  0x2e   : > { %2215 = vmatprep.subr.bf16.mxu0 %v2364_v38  ;;  %2235 = vmatprep.subr.bf16.mxu1 %v2365_v39  ;;  %v2024_v35 = vcombine.low %v1324_v28, %v1325_v31 }
  0x2f   : > { %2221 = vmatprep.mubr.msk.bf16.mxu0 %vm273_vm0, %v1874_v40  ;;  %2241 = vmatprep.mubr.msk.bf16.mxu1 %vm273_vm0, %v1888_v41  ;;  %v1326_v40 = vld [vmem:[%s2484_s6 + $0x10] sm:$0xf]  ;;  %v1327_v41 = vld [vmem:[%s2484_s6 + $0x14] sm:$0xf] }
  0x31   : > { %2216 = vmatpush3.bf16.msra.mxu0 %v2364_v38  ;;  %2236 = vmatpush3.bf16.msra.mxu1 %v2365_v39  ;;  %v2408_v38 = vld [vmem:[%s2859_s1 + $0x150] sm:$0xff]   ;;  %v2409_v39 = vld [vmem:[%s2859_s1 + $0x120] sm:$0xff]  }
  0x32   : > { %2217 = vmatprep.subr.bf16.mxu0 %v2366_v42  ;;  %2237 = vmatprep.subr.bf16.mxu1 %v2367_v43 }
  0x35   : > { %2218 = vmatpush3.bf16.msra.mxu0 %v2366_v42  ;;  %2238 = vmatpush3.bf16.msra.mxu1 %v2367_v43  ;;  %v1328_v42 = vld [vmem:[%s2484_s6 + $0x18] sm:$0xf]  ;;  %v1329_v43 = vld [vmem:[%s2484_s6 + $0x1c] sm:$0xf] }
  0x36   : > { %2219 = vmatprep.subr.bf16.mxu0 %v2368_v44  ;;  %2239 = vmatprep.subr.bf16.mxu1 %v2369_v45  ;;  %v2012_v46 = vcombine.low %v1327_v41, %v1328_v42  ;;  %v2026_v47 = vcombine.low %v1328_v42, %v1329_v43 }
  0x39   : > { %2220 = vmatpush3.bf16.msra.mxu0 %v2368_v44  ;;  %2240 = vmatpush3.bf16.msra.mxu1 %v2369_v45  ;;  %v2011_v44 = vcombine.low %v1325_v31, %v1326_v40  ;;  %v2025_v45 = vcombine.low %v1326_v40, %v1327_v41 }
  0x3a   : > { %2249 = vmatprep.subr.bf16.mxu0 %v2374_v48  ;;  %2269 = vmatprep.subr.bf16.mxu1 %v2375_v49 }
  0x3c   : > { %2222 = vmatmul.mubr.msk.bf16.vlgmr.msra.gmra.mxu0 %vm273_vm0, %v1875_v50  ;;  %2242 = vmatmul.mubr.msk.bf16.vlgmr.msra.gmra.mxu1 %vm273_vm0, %v1889_v52 }
  0x3d   : > { %2250 = vmatpush3.bf16.msra.mxu0 %v2374_v48  ;;  %2270 = vmatpush3.bf16.msra.mxu1 %v2375_v49  ;;  %v1330_v48 = vld [vmem:[%s2484_s6 + $0x20] sm:$0xf]  ;;  %v1331_v49 = vld [vmem:[%s2484_s6 + $0x24] sm:$0xf]  ;;  %s1801_s6 = sshll.u32 %s2863_s13, 1 }
  0x3e   : > { %2251 = vmatprep.subr.bf16.mxu0 %v2376_v54  ;;  %2271 = vmatprep.subr.bf16.mxu1 %v2377_v55  ;;  %v2013_v50 = vcombine.low %v1329_v43, %v1330_v48  ;;  %v2027_v51 = vcombine.low %v1330_v48, %v1331_v49  ;;  %s181_s23 = scalar_lea.vmem %s2861_s3, %s1801_s6 }
  0x3f   : > { %2225 = vmatprep.mubr.msk.bf16.mxu0 %vm273_vm0, %v1876_v56  ;;  %2245 = vmatprep.mubr.msk.bf16.mxu1 %vm273_vm0, %v1890_v58 }
  0x41   : > { %2252 = vmatpush3.bf16.msra.mxu0 %v2376_v54  ;;  %2272 = vmatpush3.bf16.msra.mxu1 %v2377_v55 }
  0x42   : > { %2253 = vmatprep.subr.bf16.mxu0 %v2382_v60  ;;  %2273 = vmatprep.subr.bf16.mxu1 %v2383_v61 }
  0x44   : > { %2226 = vmatmul.mubr.msk.bf16.gmra.mxu0 %vm273_vm0, %v1877_v63  ;;  %2246 = vmatmul.mubr.msk.bf16.gmra.mxu1 %vm273_vm0, %v1891_v1 }
  0x45   : > { %2254 = vmatpush3.bf16.msra.mxu0 %v2382_v60  ;;  %2274 = vmatpush3.bf16.msra.mxu1 %v2383_v61 }
  0x46   : > { %2255 = vmatprep.subr.bf16.mxu0 %v2384_v3  ;;  %2275 = vmatprep.subr.bf16.mxu1 %v2385_v4 }
  0x47   : > { %2261 = vmatprep.mubr.msk.bf16.mxu0 %vm273_vm0, %v1942_v5  ;;  %2281 = vmatprep.mubr.msk.bf16.mxu1 %vm273_vm0, %v1956_v6 }
  0x49   : > { %2256 = vmatpush3.bf16.msra.mxu0 %v2384_v3  ;;  %2276 = vmatpush3.bf16.msra.mxu1 %v2385_v4 }
  0x4a   : > { %2257 = vmatprep.subr.bf16.mxu0 %v2386_v7  ;;  %2277 = vmatprep.subr.bf16.mxu1 %v2387_v8 }
  0x4d   : > { %2258 = vmatpush3.bf16.msra.mxu0 %v2386_v7  ;;  %2278 = vmatpush3.bf16.msra.mxu1 %v2387_v8 }
  0x4e   : > { %2259 = vmatprep.subr.bf16.mxu0 %v2388_v9  ;;  %2279 = vmatprep.subr.bf16.mxu1 %v2389_v10 }
  0x51   : > { %2260 = vmatpush3.bf16.msra.mxu0 %v2388_v9  ;;  %2280 = vmatpush3.bf16.msra.mxu1 %v2389_v10 }
  0x52   : > { %2289 = vmatprep.subr.bf16.mxu0 %v2394_v13  ;;  %2309 = vmatprep.subr.bf16.mxu1 %v2395_v14 }
  0x54   : > { %2262 = vmatmul.mubr.msk.bf16.vlgmr.msra.gmra.mxu0 %vm273_vm0, %v1943_v15  ;;  %2282 = vmatmul.mubr.msk.bf16.vlgmr.msra.gmra.mxu1 %vm273_vm0, %v1957_v17 }
  0x55   : > { %2290 = vmatpush3.bf16.msra.mxu0 %v2394_v13  ;;  %2310 = vmatpush3.bf16.msra.mxu1 %v2395_v14 }
  0x56   : > { %2291 = vmatprep.subr.bf16.mxu0 %v2396_v19  ;;  %2311 = vmatprep.subr.bf16.mxu1 %v2397_v20 }
  0x57   : > { %2265 = vmatprep.mubr.msk.bf16.mxu0 %vm273_vm0, %v1944_v21  ;;  %2285 = vmatprep.mubr.msk.bf16.mxu1 %vm273_vm0, %v1958_v22 }
  0x59   : > { %2292 = vmatpush3.bf16.msra.mxu0 %v2396_v19  ;;  %2312 = vmatpush3.bf16.msra.mxu1 %v2397_v20 }
  0x5a   : > { %2293 = vmatprep.subr.bf16.mxu0 %v2402_v25  ;;  %2313 = vmatprep.subr.bf16.mxu1 %v2403_v26 }
  0x5c   : > { %2266 = vmatmul.mubr.msk.bf16.gmra.mxu0 %vm273_vm0, %v1945_v27  ;;  %2286 = vmatmul.mubr.msk.bf16.gmra.mxu1 %vm273_vm0, %v1959_v30 }
  0x5d   : > { %2294 = vmatpush3.bf16.msra.mxu0 %v2402_v25  ;;  %2314 = vmatpush3.bf16.msra.mxu1 %v2403_v26 }
  0x5e   : > { %2295 = vmatprep.subr.bf16.mxu0 %v2404_v32  ;;  %2315 = vmatprep.subr.bf16.mxu1 %v2405_v33 }
  0x5f   : > { %2301 = vmatprep.mubr.msk.bf16.mxu0 %vm273_vm0, %v2010_v34  ;;  %2321 = vmatprep.mubr.msk.bf16.mxu1 %vm273_vm0, %v2024_v35 }
  0x61   : > { %2296 = vmatpush3.bf16.msra.mxu0 %v2404_v32  ;;  %2316 = vmatpush3.bf16.msra.mxu1 %v2405_v33 }
  0x62   : > { %2297 = vmatprep.subr.bf16.mxu0 %v2406_v36  ;;  %2317 = vmatprep.subr.bf16.mxu1 %v2407_v37 }
  0x65   : > { %2298 = vmatpush3.bf16.msra.mxu0 %v2406_v36  ;;  %2318 = vmatpush3.bf16.msra.mxu1 %v2407_v37 }
  0x66   : > { %2299 = vmatprep.subr.bf16.mxu0 %v2408_v38  ;;  %2319 = vmatprep.subr.bf16.mxu1 %v2409_v39 }
  0x69   : > { %2300 = vmatpush3.bf16.msra.mxu0 %v2408_v38  ;;  %2320 = vmatpush3.bf16.msra.mxu1 %v2409_v39 }
  0x6c   : > { %2302 = vmatmul.mubr.msk.bf16.vlgmr.msra.gmra.mxu0 %vm273_vm0, %v2011_v44  ;;  %2322 = vmatmul.mubr.msk.bf16.vlgmr.msra.gmra.mxu1 %vm273_vm0, %v2025_v45 }
  0x6d   : > { %2305 = vmatprep.mubr.msk.bf16.mxu0 %vm273_vm0, %v2012_v46  ;;  %2325 = vmatprep.mubr.msk.bf16.mxu1 %vm273_vm0, %v2026_v47 }
  0x74   : > { %2306 = vmatmul.mubr.msk.bf16.gmra.mxu0 %vm273_vm0, %v2013_v50  ;;  %2326 = vmatmul.mubr.msk.bf16.gmra.mxu1 %vm273_vm0, %v2027_v51 }
  0xe4   : > { %v2183_v52 = vpop.f32.mrf.mxu0  ;;  %v2203_v53 = vpop.f32.mrf.mxu1 }
  0xe5   : > { %v448_v54 = vadd.f32 %v2203_v53, %v2183_v52 }
  0xe6   : > { %v320_v55 = vpop.f32.mrf.mxu0  ;;  %v439_v56 = vpop.f32.mrf.mxu1 }
  0xe7   : > { %v2059_v57 = vpack.c.bf16 %v448_v54, %v448_v54  ;;  %v440_v58 = vadd.f32 %v439_v56, %v320_v55  ;;  %v536_v4 = vmul.f32 %v448_v54, %v448_v54  ;;  %v515_v13 = vsel %vm511_vm2, %v448_v54, 0.0 }
  0xe8   : > { %v2184_v59 = vpop.f32.mrf.mxu0  ;;  %v2204_v60 = vpop.f32.mrf.mxu1 }
  0xe9   : > { %505 = vst.msk [vmem:[%s2678_s20 + $0x8] sm:$0xf] %vm502_vm1, %v2059_v57  ;;  %v2057_v61 = vpack.c.bf16 %v440_v58, %v440_v58  ;;  %v451_v63 = vadd.f32 %v2204_v60, %v2184_v59  ;;  %v534_v1 = vmul.f32 %v440_v58, %v440_v58  ;;  %v512_v5 = vsel %vm511_vm2, %v440_v58, 0.0 }
  0xea   : > { %v323_v62 = vpop.f32.mrf.mxu0  ;;  %v442_v0 = vpop.f32.mrf.mxu1  ;;  %v545_v25 = vsel %vm511_vm2, %v536_v4, 0.0 }
  0xeb   : > { %503 = vst.msk [vmem:[%s2678_s20] sm:$0xf] %vm502_vm1, %v2057_v61  ;;  %v443_v2 = vadd.f32 %v442_v0, %v323_v62  ;;  %v2060_v6 = vpack.c.bf16 %v451_v63, %v451_v63  ;;  %v542_v16 = vsel %vm511_vm2, %v534_v1, 0.0  ;;  %v537_v17 = vmul.f32 %v451_v63, %v451_v63 }
  0xec   : > { %v2187_v3 = vpop.f32.mrf.mxu0  ;;  %v2207_v7 = vpop.f32.mrf.mxu1  ;;  %v517_v26 = vsel %vm511_vm2, %v451_v63, 0.0 }
  0xed   : > { %v2058_v8 = vpack.c.bf16 %v443_v2, %v443_v2  ;;  %v513_v9 = vsel %vm511_vm2, %v443_v2, 0.0  ;;  %v535_v10 = vmul.f32 %v443_v2, %v443_v2  ;;  %v464_v11 = vadd.f32 %v2207_v7, %v2187_v3  ;;  %506 = vst.msk [vmem:[%s2678_s20 + $0xc] sm:$0xf] %vm502_vm1, %v2060_v6 }
  0xee   : > { %v336_v12 = vpop.f32.mrf.mxu0  ;;  %v514_v14 = vadd.f32 %v513_v9, %v512_v5  ;;  %v455_v15 = vpop.f32.mrf.mxu1  ;;  %v547_v34 = vsel %vm511_vm2, %v537_v17, 0.0 }
  0xef   : > { %504 = vst.msk [vmem:[%s2678_s20 + $0x4] sm:$0xf] %vm502_vm1, %v2058_v8  ;;  %v543_v18 = vsel %vm511_vm2, %v535_v10, 0.0  ;;  %v2063_v19 = vpack.c.bf16 %v464_v11, %v464_v11  ;;  %v456_v23 = vadd.f32 %v455_v15, %v336_v12  ;;  %v540_v37 = vmul.f32 %v464_v11, %v464_v11 }
  0xf0   : > { %v2188_v20 = vpop.f32.mrf.mxu0  ;;  %v516_v21 = vadd.f32 %v515_v13, %v514_v14  ;;  %v544_v22 = vadd.f32 %v543_v18, %v542_v16  ;;  %v2208_v24 = vpop.f32.mrf.mxu1  ;;  %v523_v41 = vsel %vm511_vm2, %v464_v11, 0.0 }
  0xf1   : > { %509 = vst.msk [vmem:[%s2678_s20 + $0x18] sm:$0xf] %vm502_vm1, %v2063_v19  ;;  %v467_v27 = vadd.f32 %v2208_v24, %v2188_v20  ;;  %v2061_v30 = vpack.c.bf16 %v456_v23, %v456_v23  ;;  %v519_v32 = vsel %vm511_vm2, %v456_v23, 0.0  ;;  %v538_v35 = vmul.f32 %v456_v23, %v456_v23 }
  0xf2   : > { %v339_v28 = vpop.f32.mrf.mxu0  ;;  %v546_v29 = vadd.f32 %v545_v25, %v544_v22  ;;  %v518_v31 = vadd.f32 %v517_v26, %v516_v21  ;;  %v458_v33 = vpop.f32.mrf.mxu1  ;;  %v553_v49 = vsel %vm511_vm2, %v540_v37, 0.0 }
  0xf3   : > { %v2064_v36 = vpack.c.bf16 %v467_v27, %v467_v27  ;;  %507 = vst.msk [vmem:[%s2678_s20 + $0x10] sm:$0xf] %vm502_vm1, %v2061_v30  ;;  %v459_v40 = vadd.f32 %v458_v33, %v339_v28  ;;  %v549_v42 = vsel %vm511_vm2, %v538_v35, 0.0  ;;  %v541_v43 = vmul.f32 %v467_v27, %v467_v27 }
  0xf4   : > { %v520_v38 = vadd.f32 %v519_v32, %v518_v31  ;;  %v548_v39 = vadd.f32 %v547_v34, %v546_v29  ;;  %v525_v50 = vsel %vm511_vm2, %v467_v27, 0.0 }
  0xf5   : > { %510 = vst.msk [vmem:[%s2678_s20 + $0x1c] sm:$0xf] %vm502_vm1, %v2064_v36  ;;  %v2062_v45 = vpack.c.bf16 %v459_v40, %v459_v40  ;;  %v521_v46 = vsel %vm511_vm2, %v459_v40, 0.0  ;;  %v539_v47 = vmul.f32 %v459_v40, %v459_v40  ;;  %v555_v54 = vsel %vm511_vm2, %v541_v43, 0.0 }
  0xf6   : > { %v550_v44 = vadd.f32 %v549_v42, %v548_v39  ;;  %v522_v48 = vadd.f32 %v521_v46, %v520_v38 }
  0xf7   : > { %508 = vst.msk [vmem:[%s2678_s20 + $0x14] sm:$0xf] %vm502_vm1, %v2062_v45  ;;  %v551_v51 = vsel %vm511_vm2, %v539_v47, 0.0 }
  0xf8   : > { %v524_v52 = vadd.f32 %v523_v41, %v522_v48  ;;  %v552_v53 = vadd.f32 %v551_v51, %v550_v44 }
  0xfa   : > { %v2712_v55 = vadd.f32 %v525_v50, %v524_v52  ;;  %v554_v56 = vadd.f32 %v553_v49, %v552_v53 }
  0xfc   : > { %v2223_v57 = vpop.f32.mrf.mxu0  ;;  %v2243_v58 = vpop.f32.mrf.mxu1  ;;  %v2714_v59 = vadd.f32 %v555_v54, %v554_v56 }
  0xfd   : > { %v829_v60 = vadd.f32 %v2243_v58, %v2223_v57 }
  0xfe   : > { %v701_v61 = vpop.f32.mrf.mxu0  ;;  %v820_v62 = vpop.f32.mrf.mxu1 }
  0xff   : > { %v2067_v63 = vpack.c.bf16 %v829_v60, %v829_v60  ;;  %v821_v1 = vadd.f32 %v820_v62, %v701_v61  ;;  %v895_v33 = vsel %vm511_vm2, %v829_v60, 0.0  ;;  %v916_v34 = vmul.f32 %v829_v60, %v829_v60 }
 0x100   : > { %v2224_v0 = vpop.f32.mrf.mxu0  ;;  %v2244_v2 = vpop.f32.mrf.mxu1 }
 0x101   : > { %1912 = vst.msk [vmem:[%s2678_s20 + $0x28] sm:$0xf] %vm502_vm1, %v2067_v63  ;;  %v832_v3 = vadd.f32 %v2244_v2, %v2224_v0  ;;  %v2065_v5 = vpack.c.bf16 %v821_v1, %v821_v1  ;;  %v892_v28 = vsel %vm511_vm2, %v821_v1, 0.0  ;;  %v914_v29 = vmul.f32 %v821_v1, %v821_v1 }
 0x102   : > { %v704_v4 = vpop.f32.mrf.mxu0  ;;  %v823_v6 = vpop.f32.mrf.mxu1  ;;  %v925_v45 = vsel %vm511_vm2, %v916_v34, 0.0 }
 0x103   : > { %v2068_v7 = vpack.c.bf16 %v832_v3, %v832_v3  ;;  %1910 = vst.msk [vmem:[%s2678_s20 + $0x20] sm:$0xf] %vm502_vm1, %v2065_v5  ;;  %v824_v9 = vadd.f32 %v823_v6, %v704_v4  ;;  %v922_v35 = vsel %vm511_vm2, %v914_v29, 0.0  ;;  %v917_v42 = vmul.f32 %v832_v3, %v832_v3 }
 0x104   : > { %v2227_v8 = vpop.f32.mrf.mxu0  ;;  %v2247_v10 = vpop.f32.mrf.mxu1  ;;  %v897_v46 = vsel %vm511_vm2, %v832_v3, 0.0 }
 0x105   : > { %1913 = vst.msk [vmem:[%s2678_s20 + $0x2c] sm:$0xf] %vm502_vm1, %v2068_v7  ;;  %v2722_v11 = vadd.f32 %v2247_v10, %v2227_v8  ;;  %v2066_v13 = vpack.c.bf16 %v824_v9, %v824_v9  ;;  %v893_v25 = vsel %vm511_vm2, %v824_v9, 0.0  ;;  %v915_v26 = vmul.f32 %v824_v9, %v824_v9 }
 0x106   : > { %v717_v12 = vpop.f32.mrf.mxu0  ;;  %v836_v14 = vpop.f32.mrf.mxu1  ;;  %v894_v30 = vadd.f32 %v893_v25, %v892_v28  ;;  %v927_v58 = vsel %vm511_vm2, %v917_v42, 0.0 }
 0x107   : > { %v2071_v15 = vpack.c.bf16 %v2722_v11, %v2722_v11  ;;  %1911 = vst.msk [vmem:[%s2678_s20 + $0x24] sm:$0xf] %vm502_vm1, %v2066_v13  ;;  %v837_v17 = vadd.f32 %v836_v14, %v717_v12  ;;  %v923_v31 = vsel %vm511_vm2, %v915_v26, 0.0  ;;  %v903_v62 = vsel %vm511_vm2, %v2722_v11, 0.0 }
 0x108   : > { %v2228_v16 = vpop.f32.mrf.mxu0  ;;  %v2248_v18 = vpop.f32.mrf.mxu1  ;;  %v896_v37 = vadd.f32 %v895_v33, %v894_v30  ;;  %v924_v38 = vadd.f32 %v923_v31, %v922_v35 }
 0x109   : > { %1916 = vst.msk [vmem:[%s2678_s20 + $0x38] sm:$0xf] %vm502_vm1, %v2071_v15  ;;  %v2730_v19 = vadd.f32 %v2248_v18, %v2228_v16  ;;  %v2069_v21 = vpack.c.bf16 %v837_v17, %v837_v17  ;;  %v918_v47 = vmul.f32 %v837_v17, %v837_v17  ;;  %v899_v54 = vsel %vm511_vm2, %v837_v17, 0.0 }
 0x10a   : > { %v720_v20 = vpop.f32.mrf.mxu0  ;;  %v839_v22 = vpop.f32.mrf.mxu1  ;;  %v926_v50 = vadd.f32 %v925_v45, %v924_v38  ;;  %v898_v51 = vadd.f32 %v897_v46, %v896_v37 }
 0x10b   : > { %v2072_v23 = vpack.c.bf16 %v2730_v19, %v2730_v19  ;;  %1914 = vst.msk [vmem:[%s2678_s20 + $0x30] sm:$0xf] %vm502_vm1, %v2069_v21  ;;  %v2736_v24 = vadd.f32 %v839_v22, %v720_v20  ;;  %v929_v63 = vsel %vm511_vm2, %v918_v47, 0.0 }
 0x10c   : > { %v900_v3 = vadd.f32 %v899_v54, %v898_v51  ;;  %v928_v4 = vadd.f32 %v927_v58, %v926_v50  ;;  %v905_v54 = vsel %vm511_vm2, %v2730_v19, 0.0 }
 0x10d   : > { %1917 = vst.msk [vmem:[%s2678_s20 + $0x3c] sm:$0xf] %vm502_vm1, %v2072_v23  ;;  %v2070_v27 = vpack.c.bf16 %v2736_v24, %v2736_v24  ;;  %v901_v14 = vsel %vm511_vm2, %v2736_v24, 0.0  ;;  %v919_v26 = vmul.f32 %v2736_v24, %v2736_v24 }
 0x10f   : > { %1915 = vst.msk [vmem:[%s2678_s20 + $0x34] sm:$0xf] %vm502_vm1, %v2070_v27  ;;  %v931_v47 = vsel %vm511_vm2, %v919_v26, 0.0 }
 0x114   : > { %v2263_v32 = vpop.f32.mrf.mxu0  ;;  %v2283_v36 = vpop.f32.mrf.mxu1 }
 0x115   : > { %v1209_v39 = vadd.f32 %v2283_v36, %v2263_v32  ;;  %v920_v36 = vmul.f32 %v2722_v11, %v2722_v11 }
 0x116   : > { %v1081_v40 = vpop.f32.mrf.mxu0  ;;  %v1200_v41 = vpop.f32.mrf.mxu1 }
 0x117   : > { %v2075_v43 = vpack.c.bf16 %v1209_v39, %v1209_v39  ;;  %v1201_v48 = vadd.f32 %v1200_v41, %v1081_v40  ;;  %v1296_v5 = vmul.f32 %v1209_v39, %v1209_v39  ;;  %v1275_v15 = vsel %vm511_vm2, %v1209_v39, 0.0 }
 0x118   : > { %v2264_v44 = vpop.f32.mrf.mxu0  ;;  %v2284_v49 = vpop.f32.mrf.mxu1  ;;  %v902_v39 = vadd.f32 %v901_v14, %v900_v3  ;;  %v933_v58 = vsel %vm511_vm2, %v920_v36, 0.0 }
 0x119   : > { %1980 = vst.msk [vmem:[%s2678_s20 + $0x48] sm:$0xf] %vm502_vm1, %v2075_v43  ;;  %v1212_v52 = vadd.f32 %v2284_v49, %v2264_v44  ;;  %v2073_v56 = vpack.c.bf16 %v1201_v48, %v1201_v48  ;;  %v1294_v0 = vmul.f32 %v1201_v48, %v1201_v48  ;;  %v1272_v8 = vsel %vm511_vm2, %v1201_v48, 0.0 }
 0x11a   : > { %v1084_v53 = vpop.f32.mrf.mxu0  ;;  %v1203_v57 = vpop.f32.mrf.mxu1  ;;  %v1305_v27 = vsel %vm511_vm2, %v1296_v5, 0.0  ;;  %v930_v43 = vadd.f32 %v929_v63, %v928_v4  ;;  %v904_v51 = vadd.f32 %v903_v62, %v902_v39  ;;  %v527_v63 = vrot.slane %v2712_v55, 4 }
 0x11b   : > { %v2076_v60 = vpack.c.bf16 %v1212_v52, %v1212_v52  ;;  %1978 = vst.msk [vmem:[%s2678_s20 + $0x40] sm:$0xf] %vm502_vm1, %v2073_v56  ;;  %v1204_v1 = vadd.f32 %v1203_v57, %v1084_v53  ;;  %v1302_v20 = vsel %vm511_vm2, %v1294_v0, 0.0  ;;  %v1297_v21 = vmul.f32 %v1212_v52, %v1212_v52 }
 0x11c   : > { %v2267_v61 = vpop.f32.mrf.mxu0  ;;  %v2287_v2 = vpop.f32.mrf.mxu1  ;;  %v1277_v31 = vsel %vm511_vm2, %v1212_v52, 0.0  ;;  %v932_v56 = vadd.f32 %v931_v47, %v930_v43 }
 0x11d   : > { %1981 = vst.msk [vmem:[%s2678_s20 + $0x4c] sm:$0xf] %vm502_vm1, %v2076_v60  ;;  %v1225_v6 = vadd.f32 %v2287_v2, %v2267_v61  ;;  %v2074_v9 = vpack.c.bf16 %v1204_v1, %v1204_v1  ;;  %v1273_v10 = vsel %vm511_vm2, %v1204_v1, 0.0  ;;  %v1295_v12 = vmul.f32 %v1204_v1, %v1204_v1 }
 0x11e   : > { %v1097_v7 = vpop.f32.mrf.mxu0  ;;  %v1216_v13 = vpop.f32.mrf.mxu1  ;;  %v1274_v16 = vadd.f32 %v1273_v10, %v1272_v8  ;;  %v1307_v40 = vsel %vm511_vm2, %v1297_v21, 0.0  ;;  %v921_v60 = vmul.f32 %v2730_v19, %v2730_v19  ;;  %v906_v1 = vadd.f32 %v905_v54, %v904_v51 }
 0x11f   : > { %v2079_v17 = vpack.c.bf16 %v1225_v6, %v1225_v6  ;;  %1979 = vst.msk [vmem:[%s2678_s20 + $0x44] sm:$0xf] %vm502_vm1, %v2074_v9  ;;  %v1303_v22 = vsel %vm511_vm2, %v1295_v12, 0.0  ;;  %v1217_v23 = vadd.f32 %v1216_v13, %v1097_v7  ;;  %v1300_v52 = vmul.f32 %v1225_v6, %v1225_v6 }
 0x120   : > { %v2268_v18 = vpop.f32.mrf.mxu0  ;;  %v2288_v25 = vpop.f32.mrf.mxu1  ;;  %v1276_v28 = vadd.f32 %v1275_v15, %v1274_v16  ;;  %v1304_v29 = vadd.f32 %v1303_v22, %v1302_v20  ;;  %v1283_v61 = vsel %vm511_vm2, %v1225_v6, 0.0  ;;  %v934_v4 = vadd.f32 %v933_v58, %v932_v56 }
 0x121   : > { %1984 = vst.msk [vmem:[%s2678_s20 + $0x58] sm:$0xf] %vm502_vm1, %v2079_v17  ;;  %v2077_v32 = vpack.c.bf16 %v1217_v23, %v1217_v23  ;;  %v1279_v33 = vsel %vm511_vm2, %v1217_v23, 0.0  ;;  %v1298_v34 = vmul.f32 %v1217_v23, %v1217_v23  ;;  %v1228_v38 = vadd.f32 %v2288_v25, %v2268_v18 }
 0x122   : > { %v1100_v30 = vpop.f32.mrf.mxu0  ;;  %v1219_v35 = vpop.f32.mrf.mxu1  ;;  %v1306_v37 = vadd.f32 %v1305_v27, %v1304_v29  ;;  %v1278_v24 = vadd.f32 %v1277_v31, %v1276_v28  ;;  %v1313_v2 = vsel %vm511_vm2, %v1300_v52, 0.0  ;;  %v935_v9 = vsel %vm511_vm2, %v921_v60, 0.0 }
 0x123   : > { %1982 = vst.msk [vmem:[%s2678_s20 + $0x50] sm:$0xf] %vm502_vm1, %v2077_v32  ;;  %v1309_v41 = vsel %vm511_vm2, %v1298_v34, 0.0  ;;  %v1220_v42 = vadd.f32 %v1219_v35, %v1100_v30  ;;  %v2080_v46 = vpack.c.bf16 %v1228_v38, %v1228_v38  ;;  %v1301_v10 = vmul.f32 %v1228_v38, %v1228_v38 }
 0x124   : > { %v1280_v44 = vadd.f32 %v1279_v33, %v1278_v24  ;;  %v1308_v45 = vadd.f32 %v1307_v40, %v1306_v37  ;;  %v2801_v19 = vadd.f32 %v527_v63, %v2712_v55  ;;  %v557_v15 = vrot.slane %v2714_v59, 4 }
 0x125   : > { %v2078_v11 = vpack.c.bf16 %v1220_v42, %v1220_v42  ;;  %v1281_v48 = vsel %vm511_vm2, %v1220_v42, 0.0  ;;  %v1299_v49 = vmul.f32 %v1220_v42, %v1220_v42  ;;  %1985 = vst.msk [vmem:[%s2678_s20 + $0x5c] sm:$0xf] %vm502_vm1, %v2080_v46  ;;  %v907_v16 = vrot.slane %v906_v1, 4 }
 0x126   : > { %v1310_v50 = vadd.f32 %v1309_v41, %v1308_v45  ;;  %v1282_v57 = vadd.f32 %v1281_v48, %v1280_v44  ;;  %v1285_v17 = vsel %vm511_vm2, %v1228_v38, 0.0  ;;  %v936_v21 = vadd.f32 %v935_v9, %v934_v4 }
 0x127   : > { %1983 = vst.msk [vmem:[%s2678_s20 + $0x54] sm:$0xf] %vm502_vm1, %v2078_v11  ;;  %v1311_v53 = vsel %vm511_vm2, %v1299_v49, 0.0  ;;  %v1315_v55 = vsel %vm511_vm2, %v1301_v10, 0.0  ;;  %v529_v28 = vrot.slane %v2801_v19, 2  ;;  %v2810_v32 = vadd.f32 %v557_v15, %v2714_v59 }
 0x128   : > { %v1312_v62 = vadd.f32 %v1311_v53, %v1310_v50  ;;  %v1284_v5 = vadd.f32 %v1283_v61, %v1282_v57  ;;  %v2812_v33 = vadd.f32 %v907_v16, %v906_v1  ;;  %v937_v37 = vrot.slane %v936_v21, 4 }
 0x12a   : > { %v1314_v6 = vadd.f32 %v1313_v2, %v1312_v62  ;;  %v1286_v22 = vadd.f32 %v1285_v17, %v1284_v5  ;;  %v909_v54 = vrot.slane %v2812_v33, 2  ;;  %v938_v56 = vadd.f32 %v937_v37, %v936_v21 }
 0x12c   : > { %v2303_v0 = vpop.f32.mrf.mxu0  ;;  %v2323_v3 = vpop.f32.mrf.mxu1  ;;  %v1316_v29 = vadd.f32 %v1315_v55, %v1314_v6  ;;  %v1287_v24 = vrot.slane %v1286_v22, 4 }
 0x12d   : > { %v1589_v7 = vadd.f32 %v2323_v3, %v2303_v0 }
 0x12e   : > { %v1461_v8 = vpop.f32.mrf.mxu0  ;;  %v1580_v12 = vpop.f32.mrf.mxu1  ;;  %v1317_v45 = vrot.slane %v1316_v29, 4  ;;  %v1288_v2 = vadd.f32 %v1287_v24, %v1286_v22 }
 0x12f   : > { %v2083_v13 = vpack.c.bf16 %v1589_v7, %v1589_v7  ;;  %v1581_v18 = vadd.f32 %v1580_v12, %v1461_v8  ;;  %v1676_v38 = vmul.f32 %v1589_v7, %v1589_v7  ;;  %v1655_v46 = vsel %vm511_vm2, %v1589_v7, 0.0 }
 0x130   : > { %v2304_v14 = vpop.f32.mrf.mxu0  ;;  %v2324_v20 = vpop.f32.mrf.mxu1  ;;  %v1318_v7 = vadd.f32 %v1317_v45, %v1316_v29  ;;  %v1289_v21 = vrot.slane %v1288_v2, 2  ;;  %v910_v29 = vadd.f32 %v909_v54, %v2812_v33 }
 0x131   : > { %2048 = vst.msk [vmem:[%s2678_s20 + $0x68] sm:$0xf] %vm502_vm1, %v2083_v13  ;;  %v1592_v23 = vadd.f32 %v2324_v20, %v2304_v14  ;;  %v2081_v26 = vpack.c.bf16 %v1581_v18, %v1581_v18  ;;  %v1674_v34 = vmul.f32 %v1581_v18, %v1581_v18  ;;  %v1652_v41 = vsel %vm511_vm2, %v1581_v18, 0.0 }
 0x132   : > { %v1464_v25 = vpop.f32.mrf.mxu0  ;;  %v1583_v27 = vpop.f32.mrf.mxu1  ;;  %v1685_v61 = vsel %vm511_vm2, %v1676_v38, 0.0  ;;  %v939_v20 = vrot.slane %v938_v56, 2  ;;  %v1290_v38 = vadd.f32 %v1289_v21, %v1288_v2  ;;  %v911_v33 = vrot.slane %v910_v29, 1 }
 0x133   : > { %v2084_v30 = vpack.c.bf16 %v1592_v23, %v1592_v23  ;;  %2046 = vst.msk [vmem:[%s2678_s20 + $0x60] sm:$0xf] %vm502_vm1, %v2081_v26  ;;  %v1584_v35 = vadd.f32 %v1583_v27, %v1464_v25  ;;  %v1682_v49 = vsel %vm511_vm2, %v1674_v34, 0.0  ;;  %v1677_v50 = vmul.f32 %v1592_v23, %v1592_v23 }
 0x134   : > { %v2307_v31 = vpop.f32.mrf.mxu0  ;;  %v2327_v36 = vpop.f32.mrf.mxu1  ;;  %v1657_v63 = vsel %vm511_vm2, %v1592_v23, 0.0  ;;  %v559_v25 = vrot.slane %v2810_v32, 2  ;;  %v940_v24 = vadd.f32 %v939_v20, %v938_v56 }
 0x135   : > { %2049 = vst.msk [vmem:[%s2678_s20 + $0x6c] sm:$0xf] %vm502_vm1, %v2084_v30  ;;  %v1605_v39 = vadd.f32 %v2327_v36, %v2307_v31  ;;  %v2082_v42 = vpack.c.bf16 %v1584_v35, %v1584_v35  ;;  %v1653_v59 = vsel %vm511_vm2, %v1584_v35, 0.0  ;;  %v1675_v43 = vmul.f32 %v1584_v35, %v1584_v35 }
 0x136   : > { %v1477_v40 = vpop.f32.mrf.mxu0  ;;  %v1596_v44 = vpop.f32.mrf.mxu1  ;;  %v1654_v47 = vadd.f32 %v1653_v59, %v1652_v41  ;;  %v1687_v8 = vsel %vm511_vm2, %v1677_v50, 0.0  ;;  %v1319_v30 = vrot.slane %v1318_v7, 2  ;;  %v530_v35 = vadd.f32 %v529_v28, %v2801_v19 }
 0x137   : > { %v2087_v11 = vpack.c.bf16 %v1605_v39, %v1605_v39  ;;  %2047 = vst.msk [vmem:[%s2678_s20 + $0x64] sm:$0xf] %vm502_vm1, %v2082_v42  ;;  %v1683_v51 = vsel %vm511_vm2, %v1675_v43, 0.0  ;;  %v1597_v52 = vadd.f32 %v1596_v44, %v1477_v40  ;;  %v1680_v12 = vmul.f32 %v1605_v39, %v1605_v39 }
 0x138   : > { %v2308_v48 = vpop.f32.mrf.mxu0  ;;  %v2328_v53 = vpop.f32.mrf.mxu1  ;;  %v1656_v57 = vadd.f32 %v1655_v46, %v1654_v47  ;;  %v1684_v58 = vadd.f32 %v1683_v51, %v1682_v49  ;;  %v1663_v55 = vsel %vm511_vm2, %v1605_v39, 0.0  ;;  %v560_v41 = vadd.f32 %v559_v25, %v2810_v32 }
 0x139   : > { %2052 = vst.msk [vmem:[%s2678_s20 + $0x78] sm:$0xf] %vm502_vm1, %v2087_v11  ;;  %v2085_v62 = vpack.c.bf16 %v1597_v52, %v1597_v52  ;;  %v1678_v0 = vmul.f32 %v1597_v52, %v1597_v52  ;;  %v1608_v5 = vadd.f32 %v2328_v53, %v2308_v48  ;;  %v1659_v9 = vsel %vm511_vm2, %v1597_v52, 0.0 }
 0x13a   : > { %v1480_v60 = vpop.f32.mrf.mxu0  ;;  %v1599_v1 = vpop.f32.mrf.mxu1  ;;  %v1686_v3 = vadd.f32 %v1685_v61, %v1684_v58  ;;  %v1658_v4 = vadd.f32 %v1657_v63, %v1656_v57  ;;  %v1693_v36 = vsel %vm511_vm2, %v1680_v12, 0.0  ;;  %v1320_v59 = vadd.f32 %v1319_v30, %v1318_v7 }
 0x13b   : > { %2050 = vst.msk [vmem:[%s2678_s20 + $0x70] sm:$0xf] %vm502_vm1, %v2085_v62  ;;  %v1600_v10 = vadd.f32 %v1599_v1, %v1480_v60  ;;  %v2088_v14 = vpack.c.bf16 %v1608_v5, %v1608_v5  ;;  %v1689_v15 = vsel %vm511_vm2, %v1678_v0, 0.0  ;;  %v1681_v26 = vmul.f32 %v1608_v5, %v1608_v5 }
 0x13c   : > { %v1660_v6 = vadd.f32 %v1659_v9, %v1658_v4  ;;  %v1688_v13 = vadd.f32 %v1687_v8, %v1686_v3  ;;  %v1665_v37 = vsel %vm511_vm2, %v1608_v5, 0.0  ;;  %v531_v45 = vrot.slane %v530_v35, 1 }
 0x13d   : > { %v2086_v16 = vpack.c.bf16 %v1600_v10, %v1600_v10  ;;  %v1661_v17 = vsel %vm511_vm2, %v1600_v10, 0.0  ;;  %v1679_v18 = vmul.f32 %v1600_v10, %v1600_v10  ;;  %2053 = vst.msk [vmem:[%s2678_s20 + $0x7c] sm:$0xf] %vm502_vm1, %v2088_v14  ;;  %v1695_v42 = vsel %vm511_vm2, %v1681_v26, 0.0 }
 0x13e   : > { %v1690_v22 = vadd.f32 %v1689_v15, %v1688_v13  ;;  %v1662_v23 = vadd.f32 %v1661_v17, %v1660_v6  ;;  %v941_v46 = vrot.slane %v940_v24, 1  ;;  %v1291_v47 = vrot.slane %v1290_v38, 1 }
 0x13f   : > { %2051 = vst.msk [vmem:[%s2678_s20 + $0x74] sm:$0xf] %vm502_vm1, %v2086_v16  ;;  %v1691_v27 = vsel %vm511_vm2, %v1679_v18, 0.0  ;;  %v561_v11 = vrot.slane %v560_v41, 1  ;;  %v912_v48 = vadd.f32 %v911_v33, %v910_v29  ;;  %v1321_v49 = vrot.slane %v1320_v59, 1 }
 0x140   : > { %v1664_v31 = vadd.f32 %v1663_v55, %v1662_v23  ;;  %v1692_v34 = vadd.f32 %v1691_v27, %v1690_v22  ;;  %v532_v52 = vadd.f32 %v531_v45, %v530_v35  ;;  %v942_v53 = vadd.f32 %v941_v46, %v940_v24 }
 0x141   : > { %v1292_v32 = vadd.f32 %v1291_v47, %v1290_v38  ;;  %v562_v57 = vadd.f32 %v561_v11, %v560_v41  ;;  %v1322_v60 = vadd.f32 %v1321_v49, %v1320_v59 }
 0x142   : > { %v1666_v39 = vadd.f32 %v1665_v37, %v1664_v31  ;;  %v1694_v40 = vadd.f32 %v1693_v36, %v1692_v34  ;;  %v913_v58 = vadd.f32 %v912_v48, %v532_v52 }
 0x143   : > { %v943_v62 = vadd.f32 %v942_v53, %v562_v57 }
 0x144   : > { %v1667_v43 = vrot.slane %v1666_v39, 4  ;;  %v1696_v44 = vadd.f32 %v1695_v42, %v1694_v40  ;;  %v1293_v0 = vadd.f32 %v1292_v32, %v913_v58 }
 0x145   : > { %v1323_v3 = vadd.f32 %v1322_v60, %v943_v62 }
 0x146   : > { %v1668_v19 = vadd.f32 %v1667_v43, %v1666_v39  ;;  %v1697_v28 = vrot.slane %v1696_v44, 4 }
 0x148   : > { %v1669_v50 = vrot.slane %v1668_v19, 2  ;;  %v1698_v51 = vadd.f32 %v1697_v28, %v1696_v44 }
 0x14a   : > { %v1670_v54 = vadd.f32 %v1669_v50, %v1668_v19  ;;  %v1699_v56 = vrot.slane %v1698_v51, 2 }
 0x14c   : > { %v1671_v61 = vrot.slane %v1670_v54, 1  ;;  %v1700_v63 = vadd.f32 %v1699_v56, %v1698_v51 }
 0x14e   : > { %v1672_v1 = vadd.f32 %v1671_v61, %v1670_v54  ;;  %v1701_v2 = vrot.slane %v1700_v63, 1 }
 0x150   : > { %v1673_v4 = vadd.f32 %v1672_v1, %v1293_v0  ;;  %v1702_v5 = vadd.f32 %v1701_v2, %v1700_v63 }
 0x152   : > { %v1703_v7 = vadd.f32 %v1702_v5, %v1323_v3  ;;  %1705 = vst.msk [vmem:[%s181_s23] sm:$0x1] %vm1704_vm3, %v1673_v4 }
 0x154   : > { %1706 = vst.msk [vmem:[%s181_s23 + $0x1] sm:$0x1] %vm1704_vm3, %v1703_v7 }
 0x155 PF: > { %s14_s12 = sadd.s32 1, %s2424_s12  }
 0x156   : > { %p11_p4 = scmp.ge.s32.totalorder %s14_s12, 4  }
 0x158   :  { %13 = sbr.rel (!%p11_p4) target bundleno = 1 (0x1), region = 80 }

// kernel: _lambda_.19
= control target key start
LH: loop header
LB: loop body
LE: loop exit
PB: predicated region body
PF: predicated region fallthrough
CT: control target
= control target key end

     0   :  { %s4026_s12 = smov 0   ;;  %s4718_s0 = inlined_call_operand.vmem [shape: bf16[2,288,48], index: 0, kind: input, shape index: {}]   ;;  %s4719_s1 = inlined_call_operand.vmem [shape: bf16[4,2,48,2], index: 1, kind: input, shape index: {}]   ;;  %s4720_s2 = inlined_call_operand.vmem [shape: f32[1,2], index: 2, kind: input, shape index: {}]   ;;  %s4721_s3 = inlined_call_operand.vmem [shape: f32[2,4,256,2], index: 3, kind: output, shape index: {}]  }
   0x1 LB: > { %s2811_s13 = sadd.s32 4294967295, %s4004_s12   ;;  %p2815_p0 = scmp.ge.s32.totalorder %s4004_s12, 1  ;;  %s4004_s12 = sphi %s4026_s12, %s13_s12  }
   0x2   : > { %p137_p1 = scmp.lt.s32.totalorder %s4004_s12, 3 }
   0x4   : > { %p138_p2 = pnand %p2815_p0, %p137_p1 }
   0x5   : > { %p161_p3 = scmp.lt.s32.totalorder (!%p138_p2), %s2811_s13, 1 }
   0x6   : > { %141 = sbr.rel (%p138_p2) target bundleno = 491 (0x1eb), region = 32 }
   0xb   : > { %v3649_v0 = vld [vmem:[%s4719_s1 + $0x28] sm:$0xff]   ;;  %v3650_v1 = vld [vmem:[%s4719_s1 + $0x10] sm:$0xff]   ;;  %v3651_v2 = vld [vmem:[%s4719_s1 + $0x20] sm:$0xff]   ;;  %s4723_s13 = smov (!%p161_p3, %s2811_s13), 1  ;;  %vm317_vm0 = vcmask 392192   ;;  %vm785_vm1 = vcmask 15360  }
   0xc   : > { %3336 = vmatprep.subr.bf16.mxu0 %v3649_v0  ;;  %3374 = vmatprep.subr.bf16.mxu1 %v3650_v1  ;;  %v3652_v3 = vld [vmem:[%s4719_s1 + $0x8] sm:$0xff]   ;;  %v3653_v4 = vld [vmem:[%s4719_s1 + $0x18] sm:$0xff]   ;;  %s3640_s24 = smul.u32 144, %s4723_s13  ;;  %v3654_v5 = vld [vmem:[%s4719_s1] sm:$0xff]   ;;  %s3183_s19 = sshll.u32 %s4723_s13, 10 }
   0xd   : > { %3337 = vmatpush3.bf16.msra.mxu0 %v3649_v0  ;;  %3375 = vmatpush3.bf16.msra.mxu1 %v3650_v1  ;;  %v3658_v6 = vld [vmem:[%s4719_s1 + $0x58] sm:$0xff]   ;;  %v3659_v9 = vld [vmem:[%s4719_s1 + $0x40] sm:$0xff]   ;;  %v3664_v12 = vld [vmem:[%s4719_s1 + $0x50] sm:$0xff]   ;;  %s4296_s22 = scalar_lea.vmem %s4721_s3, %s3183_s19 }
   0xe   : > { %3338 = vmatprep.subr.bf16.mxu0 %v3651_v2  ;;  %3376 = vmatprep.subr.bf16.mxu1 %v3652_v3  ;;  %s4058_s29 = scalar_lea.vmem %s4718_s0, %s3640_s24  ;;  %v3665_v13 = vld [vmem:[%s4719_s1 + $0x38] sm:$0xff]   ;;  %v3672_v16 = vld [vmem:[%s4719_s1 + $0x48] sm:$0xff]   ;;  %v3673_v17 = vld [vmem:[%s4719_s1 + $0x30] sm:$0xff]  }
   0xf   : > { %v3655_v7 = vld [vmem:[%s4058_s29] sm:$0xff]   ;;  %v3656_v8 = vld [vmem:[%s4058_s29 + $0x8] sm:$0xff]   ;;  %v3657_v10 = vld [vmem:[%s4058_s29 + $0x10] sm:$0xff]  }
  0x10   : > { %3342 = vmatprep.mubr.msk.bf16.mxu0 %vm317_vm0, %v3655_v7  ;;  %3380 = vmatprep.mubr.msk.bf16.mxu1 %vm317_vm0, %v3656_v8  ;;  %v3660_v11 = vld [vmem:[%s4058_s29 + $0x18] sm:$0xff]   ;;  %v3661_v14 = vld [vmem:[%s4058_s29 + $0x20] sm:$0xff]   ;;  %v3662_v15 = vld [vmem:[%s4058_s29 + $0x28] sm:$0xff]  }
  0x11   : > { %3339 = vmatpush3.bf16.msra.mxu0 %v3651_v2  ;;  %3377 = vmatpush3.bf16.msra.mxu1 %v3652_v3  ;;  %v3663_v18 = vld [vmem:[%s4058_s29 + $0x30] sm:$0xff]   ;;  %v3666_v19 = vld [vmem:[%s4058_s29 + $0x38] sm:$0xff]   ;;  %v3681_v20 = vld [vmem:[%s4719_s1 + $0x88] sm:$0xff]  }
  0x12   : > { %3340 = vmatprep.subr.bf16.mxu0 %v3653_v4  ;;  %3378 = vmatprep.subr.bf16.mxu1 %v3654_v5  ;;  %v3682_v21 = vld [vmem:[%s4719_s1 + $0x70] sm:$0xff]   ;;  %v3667_v22 = vld [vmem:[%s4058_s29 + $0x40] sm:$0xff]   ;;  %v3668_v23 = vld [vmem:[%s4058_s29 + $0x48] sm:$0xff]  }
  0x13   : > { %v3669_v24 = vld [vmem:[%s4058_s29 + $0x50] sm:$0xff]   ;;  %v3670_v25 = vld [vmem:[%s4058_s29 + $0x58] sm:$0xff]   ;;  %v3671_v26 = vld [vmem:[%s4058_s29 + $0x60] sm:$0xff]  }
  0x14   : > { %v3674_v27 = vld [vmem:[%s4058_s29 + $0x68] sm:$0xff]   ;;  %v3675_v28 = vld [vmem:[%s4058_s29 + $0x70] sm:$0xff]   ;;  %v3676_v29 = vld [vmem:[%s4058_s29 + $0x78] sm:$0xff]  }
  0x15   : > { %3341 = vmatpush3.bf16.msra.mxu0 %v3653_v4  ;;  %3379 = vmatpush3.bf16.msra.mxu1 %v3654_v5  ;;  %v3677_v30 = vld [vmem:[%s4058_s29 + $0x80] sm:$0xff]   ;;  %v3679_v32 = vld [vmem:[%s4058_s29 + $0x8] sm:$0xff]   ;;  %v3680_v33 = vld [vmem:[%s4058_s29 + $0x10] sm:$0xff]  }
  0x16   : > { %3412 = vmatprep.subr.bf16.mxu0 %v3658_v6  ;;  %3450 = vmatprep.subr.bf16.mxu1 %v3659_v9  ;;  %v3678_v31 = vld [vmem:[%s4058_s29] sm:$0xff]   ;;  %v3683_v34 = vld [vmem:[%s4058_s29 + $0x18] sm:$0xff]   ;;  %v3688_v36 = vld [vmem:[%s4719_s1 + $0x68] sm:$0xff]  }
  0x17   : > { %v3687_v35 = vld [vmem:[%s4719_s1 + $0x80] sm:$0xff]   ;;  %v3695_v37 = vld [vmem:[%s4719_s1 + $0x78] sm:$0xff]   ;;  %v3685_v40 = vld [vmem:[%s4058_s29 + $0x28] sm:$0xff]  }
  0x18   : > { %3343 = vmatmul.mubr.msk.bf16.vlgmr.msra.gmra.mxu0 %vm317_vm0, %v3656_v8  ;;  %3381 = vmatmul.mubr.msk.bf16.vlgmr.msra.gmra.mxu1 %vm317_vm0, %v3657_v10  ;;  %v3696_v38 = vld [vmem:[%s4719_s1 + $0x60] sm:$0xff]   ;;  %v3704_v41 = vld [vmem:[%s4719_s1 + $0xb8] sm:$0xff]   ;;  %v3686_v43 = vld [vmem:[%s4058_s29 + $0x30] sm:$0xff]  }
  0x19   : > { %3413 = vmatpush3.bf16.msra.mxu0 %v3658_v6  ;;  %3451 = vmatpush3.bf16.msra.mxu1 %v3659_v9  ;;  %v3684_v39 = vld [vmem:[%s4058_s29 + $0x20] sm:$0xff]   ;;  %v3689_v44 = vld [vmem:[%s4058_s29 + $0x38] sm:$0xff]   ;;  %v3691_v46 = vld [vmem:[%s4058_s29 + $0x48] sm:$0xff]  }
  0x1a   : > { %3346 = vmatprep.mubr.msk.bf16.mxu0 %vm317_vm0, %v3657_v10  ;;  %3384 = vmatprep.mubr.msk.bf16.mxu1 %vm317_vm0, %v3660_v11  ;;  %v3705_v42 = vld [vmem:[%s4719_s1 + $0xa0] sm:$0xff]   ;;  %v3692_v47 = vld [vmem:[%s4058_s29 + $0x50] sm:$0xff]   ;;  %v3693_v48 = vld [vmem:[%s4058_s29 + $0x58] sm:$0xff]  }
  0x1b   : > { %3414 = vmatprep.subr.bf16.mxu0 %v3664_v12  ;;  %3452 = vmatprep.subr.bf16.mxu1 %v3665_v13  ;;  %v3690_v45 = vld [vmem:[%s4058_s29 + $0x40] sm:$0xff]   ;;  %v3697_v50 = vld [vmem:[%s4058_s29 + $0x68] sm:$0xff]   ;;  %v3698_v51 = vld [vmem:[%s4058_s29 + $0x70] sm:$0xff]  }
  0x1c   : > { %v3694_v49 = vld [vmem:[%s4058_s29 + $0x60] sm:$0xff]   ;;  %v3699_v52 = vld [vmem:[%s4058_s29 + $0x78] sm:$0xff]   ;;  %v3701_v54 = vld [vmem:[%s4058_s29 + $0x8] sm:$0xff]  }
  0x1d   : > { %3415 = vmatpush3.bf16.msra.mxu0 %v3664_v12  ;;  %3453 = vmatpush3.bf16.msra.mxu1 %v3665_v13  ;;  %v3700_v53 = vld [vmem:[%s4058_s29 + $0x80] sm:$0xff]   ;;  %v3702_v55 = vld [vmem:[%s4058_s29 + $0x10] sm:$0xff]   ;;  %v3703_v56 = vld [vmem:[%s4058_s29 + $0x18] sm:$0xff]  }
  0x1e   : > { %3416 = vmatprep.subr.bf16.mxu0 %v3672_v16  ;;  %3454 = vmatprep.subr.bf16.mxu1 %v3673_v17  ;;  %v3706_v57 = vld [vmem:[%s4058_s29 + $0x20] sm:$0xff]   ;;  %v3710_v58 = vld [vmem:[%s4719_s1 + $0xb0] sm:$0xff]   ;;  %v3711_v59 = vld [vmem:[%s4719_s1 + $0x98] sm:$0xff]  }
  0x1f   : > { %v3718_v60 = vld [vmem:[%s4719_s1 + $0xa8] sm:$0xff]   ;;  %v3719_v61 = vld [vmem:[%s4719_s1 + $0x90] sm:$0xff]   ;;  %v3709_v0 = vld [vmem:[%s4058_s29 + $0x38] sm:$0xff]  }
  0x20   : > { %3347 = vmatmul.mubr.msk.bf16.gmra.mxu0 %vm317_vm0, %v3660_v11  ;;  %3385 = vmatmul.mubr.msk.bf16.gmra.mxu1 %vm317_vm0, %v3661_v14  ;;  %v3707_v62 = vld [vmem:[%s4058_s29 + $0x28] sm:$0xff]   ;;  %v3708_v63 = vld [vmem:[%s4058_s29 + $0x30] sm:$0xff]   ;;  %v3712_v1 = vld [vmem:[%s4058_s29 + $0x40] sm:$0xff]  }
  0x21   : > { %3350 = vmatprep.mubr.msk.bf16.mxu0 %vm317_vm0, %v3661_v14  ;;  %3388 = vmatprep.mubr.msk.bf16.mxu1 %vm317_vm0, %v3662_v15  ;;  %v3713_v2 = vld [vmem:[%s4058_s29 + $0x48] sm:$0xff]   ;;  %v3714_v3 = vld [vmem:[%s4058_s29 + $0x50] sm:$0xff]   ;;  %v3715_v4 = vld [vmem:[%s4058_s29 + $0x58] sm:$0xff]  }
  0x22   : > { %3417 = vmatpush3.bf16.msra.mxu0 %v3672_v16  ;;  %3455 = vmatpush3.bf16.msra.mxu1 %v3673_v17  ;;  %v3716_v5 = vld [vmem:[%s4058_s29 + $0x60] sm:$0xff]   ;;  %v3717_v6 = vld [vmem:[%s4058_s29 + $0x68] sm:$0xff]   ;;  %v3720_v7 = vld [vmem:[%s4058_s29 + $0x70] sm:$0xff]  }
  0x23   : > { %3488 = vmatprep.subr.bf16.mxu0 %v3681_v20  ;;  %3526 = vmatprep.subr.bf16.mxu1 %v3682_v21  ;;  %v3721_v8 = vld [vmem:[%s4058_s29 + $0x78] sm:$0xff]   ;;  %v3722_v9 = vld [vmem:[%s4058_s29 + $0x80] sm:$0xff]   ;;  %v3723_v10 = vld [vmem:[%s4058_s29 + $0x88] sm:$0xff]  }
  0x24   : > { %v3724_v11 = vld [vmem:[%s4058_s29 + $0x8] sm:$0xff]   ;;  %v3725_v12 = vld [vmem:[%s4058_s29 + $0x10] sm:$0xff]   ;;  %v3726_v13 = vld [vmem:[%s4058_s29 + $0x18] sm:$0xff]  }
  0x25   : > { %v3727_v14 = vld [vmem:[%s4058_s29 + $0x20] sm:$0xff]  }
  0x26   : > { %v4271_v17 = vld [vmem:[%s4720_s2] ss:$0 sm:$0xff] }
  0x28   : > { %3351 = vmatmul.mubr.msk.bf16.gmra.mxu0 %vm317_vm0, %v3662_v15  ;;  %3389 = vmatmul.mubr.msk.bf16.gmra.mxu1 %vm317_vm0, %v3663_v18 }
  0x29   : > { %3354 = vmatprep.mubr.msk.bf16.mxu0 %vm317_vm0, %v3663_v18  ;;  %3392 = vmatprep.mubr.msk.bf16.mxu1 %vm317_vm0, %v3666_v19 }
  0x30   : > { %3355 = vmatmul.mubr.msk.bf16.gmra.mxu0 %vm317_vm0, %v3666_v19  ;;  %3393 = vmatmul.mubr.msk.bf16.gmra.mxu1 %vm317_vm0, %v3667_v22 }
  0x31   : > { %3358 = vmatprep.mubr.msk.bf16.mxu0 %vm317_vm0, %v3667_v22  ;;  %3396 = vmatprep.mubr.msk.bf16.mxu1 %vm317_vm0, %v3668_v23 }
  0x38   : > { %3359 = vmatmul.mubr.msk.bf16.gmra.mxu0 %vm317_vm0, %v3668_v23  ;;  %3397 = vmatmul.mubr.msk.bf16.gmra.mxu1 %vm317_vm0, %v3669_v24 }
  0x39   : > { %3362 = vmatprep.mubr.msk.bf16.mxu0 %vm317_vm0, %v3669_v24  ;;  %3400 = vmatprep.mubr.msk.bf16.mxu1 %vm317_vm0, %v3670_v25 }
  0x40   : > { %3363 = vmatmul.mubr.msk.bf16.gmra.mxu0 %vm317_vm0, %v3670_v25  ;;  %3401 = vmatmul.mubr.msk.bf16.gmra.mxu1 %vm317_vm0, %v3671_v26  ;;  %v3728_v25 = vld [vmem:[%s4058_s29 + $0x28] sm:$0xff]  }
  0x41   : > { %3366 = vmatprep.mubr.msk.bf16.mxu0 %vm317_vm0, %v3671_v26  ;;  %3404 = vmatprep.mubr.msk.bf16.mxu1 %vm317_vm0, %v3674_v27 }
  0x48   : > { %3367 = vmatmul.mubr.msk.bf16.gmra.mxu0 %vm317_vm0, %v3674_v27  ;;  %3405 = vmatmul.mubr.msk.bf16.gmra.mxu1 %vm317_vm0, %v3675_v28 }
  0x49   : > { %3370 = vmatprep.mubr.msk.bf16.mxu0 %vm317_vm0, %v3675_v28  ;;  %3408 = vmatprep.mubr.msk.bf16.mxu1 %vm317_vm0, %v3676_v29 }
  0x50   : > { %3371 = vmatmul.mubr.msk.bf16.gmra.mxu0 %vm317_vm0, %v3676_v29  ;;  %3409 = vmatmul.mubr.msk.bf16.gmra.mxu1 %vm317_vm0, %v3677_v30  ;;  %v3729_v29 = vld [vmem:[%s4058_s29 + $0x30] sm:$0xff]  }
  0x51   : > { %3418 = vmatprep.mubr.msk.bf16.mxu0 %vm317_vm0, %v3678_v31  ;;  %3456 = vmatprep.mubr.msk.bf16.mxu1 %vm317_vm0, %v3679_v32 }
  0x58   : > { %3419 = vmatmul.mubr.msk.bf16.vlgmr.msra.gmra.mxu0 %vm317_vm0, %v3679_v32  ;;  %3457 = vmatmul.mubr.msk.bf16.vlgmr.msra.gmra.mxu1 %vm317_vm0, %v3680_v33 }
  0x59   : > { %3489 = vmatpush3.bf16.msra.mxu0 %v3681_v20  ;;  %3527 = vmatpush3.bf16.msra.mxu1 %v3682_v21 }
  0x5a   : > { %3422 = vmatprep.mubr.msk.bf16.mxu0 %vm317_vm0, %v3680_v33  ;;  %3460 = vmatprep.mubr.msk.bf16.mxu1 %vm317_vm0, %v3683_v34 }
  0x5b   : > { %3490 = vmatprep.subr.bf16.mxu0 %v3687_v35  ;;  %3528 = vmatprep.subr.bf16.mxu1 %v3688_v36 }
  0x5d   : > { %3491 = vmatpush3.bf16.msra.mxu0 %v3687_v35  ;;  %3529 = vmatpush3.bf16.msra.mxu1 %v3688_v36 }
  0x5e   : > { %3492 = vmatprep.subr.bf16.mxu0 %v3695_v37  ;;  %3530 = vmatprep.subr.bf16.mxu1 %v3696_v38 }
  0x60   : > { %3423 = vmatmul.mubr.msk.bf16.gmra.mxu0 %vm317_vm0, %v3683_v34  ;;  %3461 = vmatmul.mubr.msk.bf16.gmra.mxu1 %vm317_vm0, %v3684_v39 }
  0x61   : > { %3426 = vmatprep.mubr.msk.bf16.mxu0 %vm317_vm0, %v3684_v39  ;;  %3464 = vmatprep.mubr.msk.bf16.mxu1 %vm317_vm0, %v3685_v40 }
  0x62   : > { %3493 = vmatpush3.bf16.msra.mxu0 %v3695_v37  ;;  %3531 = vmatpush3.bf16.msra.mxu1 %v3696_v38 }
  0x63   : > { %3564 = vmatprep.subr.bf16.mxu0 %v3704_v41  ;;  %3602 = vmatprep.subr.bf16.mxu1 %v3705_v42 }
  0x68   : > { %3427 = vmatmul.mubr.msk.bf16.gmra.mxu0 %vm317_vm0, %v3685_v40  ;;  %3465 = vmatmul.mubr.msk.bf16.gmra.mxu1 %vm317_vm0, %v3686_v43 }
  0x69   : > { %3430 = vmatprep.mubr.msk.bf16.mxu0 %vm317_vm0, %v3686_v43  ;;  %3468 = vmatprep.mubr.msk.bf16.mxu1 %vm317_vm0, %v3689_v44  ;;  %v3730_v43 = vld [vmem:[%s4058_s29 + $0x38] sm:$0xff]  }
  0x70   : > { %3431 = vmatmul.mubr.msk.bf16.gmra.mxu0 %vm317_vm0, %v3689_v44  ;;  %3469 = vmatmul.mubr.msk.bf16.gmra.mxu1 %vm317_vm0, %v3690_v45 }
  0x71   : > { %3434 = vmatprep.mubr.msk.bf16.mxu0 %vm317_vm0, %v3690_v45  ;;  %3472 = vmatprep.mubr.msk.bf16.mxu1 %vm317_vm0, %v3691_v46 }
  0x78   : > { %3435 = vmatmul.mubr.msk.bf16.gmra.mxu0 %vm317_vm0, %v3691_v46  ;;  %3473 = vmatmul.mubr.msk.bf16.gmra.mxu1 %vm317_vm0, %v3692_v47 }
  0x79   : > { %3438 = vmatprep.mubr.msk.bf16.mxu0 %vm317_vm0, %v3692_v47  ;;  %3476 = vmatprep.mubr.msk.bf16.mxu1 %vm317_vm0, %v3693_v48  ;;  %v3731_v47 = vld [vmem:[%s4058_s29 + $0x40] sm:$0xff]  }
  0x80   : > { %3439 = vmatmul.mubr.msk.bf16.gmra.mxu0 %vm317_vm0, %v3693_v48  ;;  %3477 = vmatmul.mubr.msk.bf16.gmra.mxu1 %vm317_vm0, %v3694_v49 }
  0x81   : > { %3442 = vmatprep.mubr.msk.bf16.mxu0 %vm317_vm0, %v3694_v49  ;;  %3480 = vmatprep.mubr.msk.bf16.mxu1 %vm317_vm0, %v3697_v50 }
  0x88   : > { %3443 = vmatmul.mubr.msk.bf16.gmra.mxu0 %vm317_vm0, %v3697_v50  ;;  %3481 = vmatmul.mubr.msk.bf16.gmra.mxu1 %vm317_vm0, %v3698_v51 }
  0x89   : > { %3446 = vmatprep.mubr.msk.bf16.mxu0 %vm317_vm0, %v3698_v51  ;;  %3484 = vmatprep.mubr.msk.bf16.mxu1 %vm317_vm0, %v3699_v52 }
  0x90   : > { %3447 = vmatmul.mubr.msk.bf16.gmra.mxu0 %vm317_vm0, %v3699_v52  ;;  %3485 = vmatmul.mubr.msk.bf16.gmra.mxu1 %vm317_vm0, %v3700_v53 }
  0x91   : > { %3494 = vmatprep.mubr.msk.bf16.mxu0 %vm317_vm0, %v3701_v54  ;;  %3532 = vmatprep.mubr.msk.bf16.mxu1 %vm317_vm0, %v3702_v55 }
  0x98   : > { %3495 = vmatmul.mubr.msk.bf16.vlgmr.msra.gmra.mxu0 %vm317_vm0, %v3702_v55  ;;  %3533 = vmatmul.mubr.msk.bf16.vlgmr.msra.gmra.mxu1 %vm317_vm0, %v3703_v56 }
  0x99   : > { %3565 = vmatpush3.bf16.msra.mxu0 %v3704_v41  ;;  %3603 = vmatpush3.bf16.msra.mxu1 %v3705_v42 }
  0x9a   : > { %3498 = vmatprep.mubr.msk.bf16.mxu0 %vm317_vm0, %v3703_v56  ;;  %3536 = vmatprep.mubr.msk.bf16.mxu1 %vm317_vm0, %v3706_v57 }
  0x9b   : > { %3566 = vmatprep.subr.bf16.mxu0 %v3710_v58  ;;  %3604 = vmatprep.subr.bf16.mxu1 %v3711_v59 }
  0x9d   : > { %3567 = vmatpush3.bf16.msra.mxu0 %v3710_v58  ;;  %3605 = vmatpush3.bf16.msra.mxu1 %v3711_v59 }
  0x9e   : > { %3568 = vmatprep.subr.bf16.mxu0 %v3718_v60  ;;  %3606 = vmatprep.subr.bf16.mxu1 %v3719_v61 }
  0xa0   : > { %3499 = vmatmul.mubr.msk.bf16.gmra.mxu0 %vm317_vm0, %v3706_v57  ;;  %3537 = vmatmul.mubr.msk.bf16.gmra.mxu1 %vm317_vm0, %v3707_v62 }
  0xa1   : > { %3502 = vmatprep.mubr.msk.bf16.mxu0 %vm317_vm0, %v3707_v62  ;;  %3540 = vmatprep.mubr.msk.bf16.mxu1 %vm317_vm0, %v3708_v63 }
  0xa2   : > { %3569 = vmatpush3.bf16.msra.mxu0 %v3718_v60  ;;  %3607 = vmatpush3.bf16.msra.mxu1 %v3719_v61 }
  0xa8   : > { %3503 = vmatmul.mubr.msk.bf16.gmra.mxu0 %vm317_vm0, %v3708_v63  ;;  %3541 = vmatmul.mubr.msk.bf16.gmra.mxu1 %vm317_vm0, %v3709_v0  ;;  %v3732_v63 = vld [vmem:[%s4058_s29 + $0x48] sm:$0xff]  }
  0xa9   : > { %3506 = vmatprep.mubr.msk.bf16.mxu0 %vm317_vm0, %v3709_v0  ;;  %3544 = vmatprep.mubr.msk.bf16.mxu1 %vm317_vm0, %v3712_v1 }
  0xb0   : > { %3507 = vmatmul.mubr.msk.bf16.gmra.mxu0 %vm317_vm0, %v3712_v1  ;;  %3545 = vmatmul.mubr.msk.bf16.gmra.mxu1 %vm317_vm0, %v3713_v2 }
  0xb1   : > { %3510 = vmatprep.mubr.msk.bf16.mxu0 %vm317_vm0, %v3713_v2  ;;  %3548 = vmatprep.mubr.msk.bf16.mxu1 %vm317_vm0, %v3714_v3 }
  0xb8   : > { %3511 = vmatmul.mubr.msk.bf16.gmra.mxu0 %vm317_vm0, %v3714_v3  ;;  %3549 = vmatmul.mubr.msk.bf16.gmra.mxu1 %vm317_vm0, %v3715_v4  ;;  %v3733_v3 = vld [vmem:[%s4058_s29 + $0x50] sm:$0xff]  }
  0xb9   : > { %3514 = vmatprep.mubr.msk.bf16.mxu0 %vm317_vm0, %v3715_v4  ;;  %3552 = vmatprep.mubr.msk.bf16.mxu1 %vm317_vm0, %v3716_v5 }
  0xc0   : > { %3515 = vmatmul.mubr.msk.bf16.gmra.mxu0 %vm317_vm0, %v3716_v5  ;;  %3553 = vmatmul.mubr.msk.bf16.gmra.mxu1 %vm317_vm0, %v3717_v6 }
  0xc1   : > { %3518 = vmatprep.mubr.msk.bf16.mxu0 %vm317_vm0, %v3717_v6  ;;  %3556 = vmatprep.mubr.msk.bf16.mxu1 %vm317_vm0, %v3720_v7 }
  0xc8   : > { %3519 = vmatmul.mubr.msk.bf16.gmra.mxu0 %vm317_vm0, %v3720_v7  ;;  %3557 = vmatmul.mubr.msk.bf16.gmra.mxu1 %vm317_vm0, %v3721_v8 }
  0xc9   : > { %3522 = vmatprep.mubr.msk.bf16.mxu0 %vm317_vm0, %v3721_v8  ;;  %3560 = vmatprep.mubr.msk.bf16.mxu1 %vm317_vm0, %v3722_v9 }
  0xd0   : > { %3523 = vmatmul.mubr.msk.bf16.gmra.mxu0 %vm317_vm0, %v3722_v9  ;;  %3561 = vmatmul.mubr.msk.bf16.gmra.mxu1 %vm317_vm0, %v3723_v10 }
  0xd1   : > { %3570 = vmatprep.mubr.msk.bf16.mxu0 %vm317_vm0, %v3724_v11  ;;  %3608 = vmatprep.mubr.msk.bf16.mxu1 %vm317_vm0, %v3725_v12 }
  0xd8   : > { %v3344_v15 = vpop.f32.mrf.mxu0  ;;  %3571 = vmatmul.mubr.msk.bf16.vlgmr.msra.gmra.mxu0 %vm317_vm0, %v3725_v12  ;;  %v3382_v16 = vpop.f32.mrf.mxu1  ;;  %3609 = vmatmul.mubr.msk.bf16.vlgmr.msra.gmra.mxu1 %vm317_vm0, %v3726_v13 }
  0xd9   : > { %3574 = vmatprep.mubr.msk.bf16.mxu0 %vm317_vm0, %v3726_v13  ;;  %v596_v18 = vadd.f32 %v3382_v16, %v3344_v15  ;;  %3612 = vmatprep.mubr.msk.bf16.mxu1 %vm317_vm0, %v3727_v14 }
  0xda   : > { %v400_v19 = vpop.f32.mrf.mxu0  ;;  %v587_v20 = vpop.f32.mrf.mxu1 }
  0xdb   : > { %v723_v21 = vadd.f32 %v4271_v17, %v596_v18  ;;  %v588_v22 = vadd.f32 %v587_v20, %v400_v19 }
  0xdc   : > { %v3345_v23 = vpop.f32.mrf.mxu0  ;;  %v3383_v24 = vpop.f32.mrf.mxu1 }
  0xdd   : > { %3741 = vtanh.f32 %v723_v21  ;;  %v721_v26 = vadd.f32 %v4271_v17, %v588_v22  ;;  %v599_v27 = vadd.f32 %v3383_v24, %v3345_v23  ;;  %v3734_v22 = vld [vmem:[%s4058_s29 + $0x58] sm:$0xff]  }
  0xde   : > { %v403_v28 = vpop.f32.mrf.mxu0  ;;  %v590_v30 = vpop.f32.mrf.mxu1 }
  0xdf   : > { %3743 = vtanh.f32 %v721_v26  ;;  %v724_v31 = vadd.f32 %v4271_v17, %v599_v27  ;;  %v591_v32 = vadd.f32 %v590_v30, %v403_v28  ;;  %v3735_v26 = vld [vmem:[%s4058_s29 + $0x60] sm:$0xff]  }
  0xe0   : > { %v3348_v33 = vpop.f32.mrf.mxu0  ;;  %3575 = vmatmul.mubr.msk.bf16.gmra.mxu0 %vm317_vm0, %v3727_v14  ;;  %v3386_v34 = vpop.f32.mrf.mxu1  ;;  %3613 = vmatmul.mubr.msk.bf16.gmra.mxu1 %vm317_vm0, %v3728_v25 }
  0xe1   : > { %3578 = vmatprep.mubr.msk.bf16.mxu0 %vm317_vm0, %v3728_v25  ;;  %3745 = vtanh.f32 %v724_v31  ;;  %v722_v35 = vadd.f32 %v4271_v17, %v591_v32  ;;  %v612_v36 = vadd.f32 %v3386_v34, %v3348_v33  ;;  %3616 = vmatprep.mubr.msk.bf16.mxu1 %vm317_vm0, %v3729_v29 }
  0xe2   : > { %v416_v37 = vpop.f32.mrf.mxu0  ;;  %v603_v38 = vpop.f32.mrf.mxu1 }
  0xe3   : > { %3747 = vtanh.f32 %v722_v35  ;;  %v727_v39 = vadd.f32 %v4271_v17, %v612_v36  ;;  %v604_v40 = vadd.f32 %v603_v38, %v416_v37 }
  0xe4   : > { %v3349_v41 = vpop.f32.mrf.mxu0  ;;  %v3387_v42 = vpop.f32.mrf.mxu1 }
  0xe5   : > { %3749 = vtanh.f32 %v727_v39  ;;  %v725_v44 = vadd.f32 %v4271_v17, %v604_v40  ;;  %v615_v45 = vadd.f32 %v3387_v42, %v3349_v41 }
  0xe6   : > { %v419_v46 = vpop.f32.mrf.mxu0  ;;  %v606_v48 = vpop.f32.mrf.mxu1 }
  0xe7   : > { %3751 = vtanh.f32 %v725_v44  ;;  %v728_v49 = vadd.f32 %v4271_v17, %v615_v45  ;;  %v607_v50 = vadd.f32 %v606_v48, %v419_v46  ;;  %v3736_v44 = vld [vmem:[%s4058_s29 + $0x68] sm:$0xff]   ;;  %v3737_v48 = vld [vmem:[%s4058_s29 + $0x70] sm:$0xff]  }
  0xe8   : > { %v3352_v51 = vpop.f32.mrf.mxu0  ;;  %3579 = vmatmul.mubr.msk.bf16.gmra.mxu0 %vm317_vm0, %v3729_v29  ;;  %v3390_v52 = vpop.f32.mrf.mxu1  ;;  %3617 = vmatmul.mubr.msk.bf16.gmra.mxu1 %vm317_vm0, %v3730_v43 }
  0xe9   : > { %3582 = vmatprep.mubr.msk.bf16.mxu0 %vm317_vm0, %v3730_v43  ;;  %3753 = vtanh.f32 %v728_v49  ;;  %v726_v53 = vadd.f32 %v4271_v17, %v607_v50  ;;  %v628_v54 = vadd.f32 %v3390_v52, %v3352_v51  ;;  %3620 = vmatprep.mubr.msk.bf16.mxu1 %vm317_vm0, %v3731_v47 }
  0xea   : > { %v432_v55 = vpop.f32.mrf.mxu0  ;;  %v3742_v56 = vpop.eup %3741 }
  0xeb   : > { %v619_v57 = vpop.f32.mrf.mxu1  ;;  %788 = vst.msk [vmem:[%s4296_s22 + $0x10] sm:$0xff] %vm785_vm1, %v3742_v56  ;;  %3755 = vtanh.f32 %v726_v53  ;;  %v731_v58 = vadd.f32 %v4271_v17, %v628_v54 }
  0xec   : > { %v620_v59 = vadd.f32 %v619_v57, %v432_v55  ;;  %v3353_v60 = vpop.f32.mrf.mxu0  ;;  %v3744_v61 = vpop.eup %3743 }
  0xed   : > { %v3391_v62 = vpop.f32.mrf.mxu1  ;;  %786 = vst.msk [vmem:[%s4296_s22] sm:$0xff] %vm785_vm1, %v3744_v61  ;;  %3757 = vtanh.f32 %v731_v58 }
  0xee   : > { %v729_v0 = vadd.f32 %v4271_v17, %v620_v59  ;;  %v631_v1 = vadd.f32 %v3391_v62, %v3353_v60  ;;  %v435_v2 = vpop.f32.mrf.mxu0  ;;  %v3746_v4 = vpop.eup %3745 }
  0xef   : > { %v622_v5 = vpop.f32.mrf.mxu1  ;;  %789 = vst.msk [vmem:[%s4296_s22 + $0x18] sm:$0xff] %vm785_vm1, %v3746_v4 }
  0xf0   : > { %3759 = vtanh.f32 %v729_v0  ;;  %v732_v6 = vadd.f32 %v4271_v17, %v631_v1  ;;  %v623_v7 = vadd.f32 %v622_v5, %v435_v2  ;;  %v3356_v8 = vpop.f32.mrf.mxu0  ;;  %3583 = vmatmul.mubr.msk.bf16.gmra.mxu0 %vm317_vm0, %v3731_v47  ;;  %v3748_v9 = vpop.eup %3747  ;;  %3621 = vmatmul.mubr.msk.bf16.gmra.mxu1 %vm317_vm0, %v3732_v63  ;;  %v3738_v2 = vld [vmem:[%s4058_s29 + $0x78] sm:$0xff]  }
  0xf1   : > { %v3394_v10 = vpop.f32.mrf.mxu1  ;;  %3586 = vmatprep.mubr.msk.bf16.mxu0 %vm317_vm0, %v3732_v63  ;;  %787 = vst.msk [vmem:[%s4296_s22 + $0x8] sm:$0xff] %vm785_vm1, %v3748_v9  ;;  %3624 = vmatprep.mubr.msk.bf16.mxu1 %vm317_vm0, %v3733_v3 }
  0xf2   : > { %3761 = vtanh.f32 %v732_v6  ;;  %v730_v11 = vadd.f32 %v4271_v17, %v623_v7  ;;  %v644_v12 = vadd.f32 %v3394_v10, %v3356_v8  ;;  %v448_v13 = vpop.f32.mrf.mxu0  ;;  %v3750_v14 = vpop.eup %3749  ;;  %v3739_v6 = vld [vmem:[%s4058_s29 + $0x80] sm:$0xff]  }
  0xf3   : > { %v635_v15 = vpop.f32.mrf.mxu1  ;;  %792 = vst.msk [vmem:[%s4296_s22 + $0x30] sm:$0xff] %vm785_vm1, %v3750_v14 }
  0xf4   : > { %3763 = vtanh.f32 %v730_v11  ;;  %v735_v16 = vadd.f32 %v4271_v17, %v644_v12  ;;  %v636_v18 = vadd.f32 %v635_v15, %v448_v13  ;;  %v3357_v19 = vpop.f32.mrf.mxu0  ;;  %v3752_v20 = vpop.eup %3751 }
  0xf5   : > { %v3395_v21 = vpop.f32.mrf.mxu1  ;;  %790 = vst.msk [vmem:[%s4296_s22 + $0x20] sm:$0xff] %vm785_vm1, %v3752_v20 }
  0xf6   : > { %3765 = vtanh.f32 %v735_v16  ;;  %v733_v23 = vadd.f32 %v4271_v17, %v636_v18  ;;  %v647_v24 = vadd.f32 %v3395_v21, %v3357_v19  ;;  %v451_v25 = vpop.f32.mrf.mxu0  ;;  %v3754_v27 = vpop.eup %3753 }
  0xf7   : > { %v638_v28 = vpop.f32.mrf.mxu1  ;;  %793 = vst.msk [vmem:[%s4296_s22 + $0x38] sm:$0xff] %vm785_vm1, %v3754_v27 }
  0xf8   : > { %3767 = vtanh.f32 %v733_v23  ;;  %v736_v29 = vadd.f32 %v4271_v17, %v647_v24  ;;  %v639_v30 = vadd.f32 %v638_v28, %v451_v25  ;;  %v3360_v31 = vpop.f32.mrf.mxu0  ;;  %3587 = vmatmul.mubr.msk.bf16.gmra.mxu0 %vm317_vm0, %v3733_v3  ;;  %v3756_v32 = vpop.eup %3755  ;;  %3625 = vmatmul.mubr.msk.bf16.gmra.mxu1 %vm317_vm0, %v3734_v22  ;;  %v3740_v25 = vld [vmem:[%s4058_s29 + $0x88] sm:$0xff]  }
  0xf9   : > { %v3398_v33 = vpop.f32.mrf.mxu1  ;;  %3590 = vmatprep.mubr.msk.bf16.mxu0 %vm317_vm0, %v3734_v22  ;;  %791 = vst.msk [vmem:[%s4296_s22 + $0x28] sm:$0xff] %vm785_vm1, %v3756_v32  ;;  %3628 = vmatprep.mubr.msk.bf16.mxu1 %vm317_vm0, %v3735_v26 }
  0xfa   : > { %3769 = vtanh.f32 %v736_v29  ;;  %v734_v34 = vadd.f32 %v4271_v17, %v639_v30  ;;  %v660_v35 = vadd.f32 %v3398_v33, %v3360_v31  ;;  %v464_v36 = vpop.f32.mrf.mxu0  ;;  %v3758_v37 = vpop.eup %3757 }
  0xfb   : > { %v651_v38 = vpop.f32.mrf.mxu1  ;;  %796 = vst.msk [vmem:[%s4296_s22 + $0x50] sm:$0xff] %vm785_vm1, %v3758_v37 }
  0xfc   : > { %3771 = vtanh.f32 %v734_v34  ;;  %v739_v39 = vadd.f32 %v4271_v17, %v660_v35  ;;  %v652_v40 = vadd.f32 %v651_v38, %v464_v36  ;;  %v3361_v41 = vpop.f32.mrf.mxu0 }
  0xfd   : > { %v3760_v42 = vpop.eup %3759  ;;  %v3399_v43 = vpop.f32.mrf.mxu1 }
  0xfe   : > { %794 = vst.msk [vmem:[%s4296_s22 + $0x40] sm:$0xff] %vm785_vm1, %v3760_v42  ;;  %3773 = vtanh.f32 %v739_v39  ;;  %v737_v45 = vadd.f32 %v4271_v17, %v652_v40  ;;  %v663_v46 = vadd.f32 %v3399_v43, %v3361_v41  ;;  %v467_v47 = vpop.f32.mrf.mxu0 }
  0xff   : > { %v3762_v49 = vpop.eup %3761  ;;  %v654_v50 = vpop.f32.mrf.mxu1 }
 0x100   : > { %797 = vst.msk [vmem:[%s4296_s22 + $0x58] sm:$0xff] %vm785_vm1, %v3762_v49  ;;  %3775 = vtanh.f32 %v737_v45  ;;  %v740_v51 = vadd.f32 %v4271_v17, %v663_v46  ;;  %v655_v52 = vadd.f32 %v654_v50, %v467_v47  ;;  %v3364_v53 = vpop.f32.mrf.mxu0  ;;  %3591 = vmatmul.mubr.msk.bf16.gmra.mxu0 %vm317_vm0, %v3735_v26  ;;  %3629 = vmatmul.mubr.msk.bf16.gmra.mxu1 %vm317_vm0, %v3736_v44 }
 0x101   : > { %v3764_v54 = vpop.eup %3763  ;;  %v3402_v55 = vpop.f32.mrf.mxu1  ;;  %3594 = vmatprep.mubr.msk.bf16.mxu0 %vm317_vm0, %v3736_v44  ;;  %3632 = vmatprep.mubr.msk.bf16.mxu1 %vm317_vm0, %v3737_v48 }
 0x102   : > { %795 = vst.msk [vmem:[%s4296_s22 + $0x48] sm:$0xff] %vm785_vm1, %v3764_v54  ;;  %3777 = vtanh.f32 %v740_v51  ;;  %v738_v56 = vadd.f32 %v4271_v17, %v655_v52  ;;  %v676_v57 = vadd.f32 %v3402_v55, %v3364_v53  ;;  %v480_v58 = vpop.f32.mrf.mxu0 }
 0x103   : > { %v3766_v59 = vpop.eup %3765  ;;  %v667_v60 = vpop.f32.mrf.mxu1 }
 0x104   : > { %800 = vst.msk [vmem:[%s4296_s22 + $0x70] sm:$0xff] %vm785_vm1, %v3766_v59  ;;  %3779 = vtanh.f32 %v738_v56  ;;  %v743_v61 = vadd.f32 %v4271_v17, %v676_v57  ;;  %v668_v62 = vadd.f32 %v667_v60, %v480_v58  ;;  %v3365_v63 = vpop.f32.mrf.mxu0 }
 0x105   : > { %v3768_v0 = vpop.eup %3767  ;;  %v3403_v1 = vpop.f32.mrf.mxu1 }
 0x106   : > { %798 = vst.msk [vmem:[%s4296_s22 + $0x60] sm:$0xff] %vm785_vm1, %v3768_v0  ;;  %3781 = vtanh.f32 %v743_v61  ;;  %v741_v3 = vadd.f32 %v4271_v17, %v668_v62  ;;  %v679_v4 = vadd.f32 %v3403_v1, %v3365_v63  ;;  %v483_v5 = vpop.f32.mrf.mxu0 }
 0x107   : > { %v3770_v7 = vpop.eup %3769  ;;  %v670_v8 = vpop.f32.mrf.mxu1 }
 0x108   : > { %801 = vst.msk [vmem:[%s4296_s22 + $0x78] sm:$0xff] %vm785_vm1, %v3770_v7  ;;  %3783 = vtanh.f32 %v741_v3  ;;  %v744_v9 = vadd.f32 %v4271_v17, %v679_v4  ;;  %v671_v10 = vadd.f32 %v670_v8, %v483_v5  ;;  %v3368_v11 = vpop.f32.mrf.mxu0  ;;  %3595 = vmatmul.mubr.msk.bf16.gmra.mxu0 %vm317_vm0, %v3737_v48  ;;  %3633 = vmatmul.mubr.msk.bf16.gmra.mxu1 %vm317_vm0, %v3738_v2 }
 0x109   : > { %v3772_v12 = vpop.eup %3771  ;;  %v3406_v13 = vpop.f32.mrf.mxu1  ;;  %3598 = vmatprep.mubr.msk.bf16.mxu0 %vm317_vm0, %v3738_v2  ;;  %3636 = vmatprep.mubr.msk.bf16.mxu1 %vm317_vm0, %v3739_v6 }
 0x10a   : > { %799 = vst.msk [vmem:[%s4296_s22 + $0x68] sm:$0xff] %vm785_vm1, %v3772_v12  ;;  %3785 = vtanh.f32 %v744_v9  ;;  %v742_v14 = vadd.f32 %v4271_v17, %v671_v10  ;;  %v692_v15 = vadd.f32 %v3406_v13, %v3368_v11  ;;  %v496_v16 = vpop.f32.mrf.mxu0 }
 0x10b   : > { %v3774_v18 = vpop.eup %3773  ;;  %v683_v19 = vpop.f32.mrf.mxu1 }
 0x10c   : > { %804 = vst.msk [vmem:[%s4296_s22 + $0x90] sm:$0xff] %vm785_vm1, %v3774_v18  ;;  %3787 = vtanh.f32 %v742_v14  ;;  %v747_v20 = vadd.f32 %v4271_v17, %v692_v15  ;;  %v684_v21 = vadd.f32 %v683_v19, %v496_v16  ;;  %v3369_v22 = vpop.f32.mrf.mxu0 }
 0x10d   : > { %v3776_v23 = vpop.eup %3775  ;;  %v3407_v24 = vpop.f32.mrf.mxu1 }
 0x10e   : > { %802 = vst.msk [vmem:[%s4296_s22 + $0x80] sm:$0xff] %vm785_vm1, %v3776_v23  ;;  %3789 = vtanh.f32 %v747_v20  ;;  %v745_v26 = vadd.f32 %v4271_v17, %v684_v21  ;;  %v695_v27 = vadd.f32 %v3407_v24, %v3369_v22  ;;  %v499_v28 = vpop.f32.mrf.mxu0 }
 0x10f   : > { %v3778_v29 = vpop.eup %3777  ;;  %v686_v30 = vpop.f32.mrf.mxu1 }
 0x110   : > { %805 = vst.msk [vmem:[%s4296_s22 + $0x98] sm:$0xff] %vm785_vm1, %v3778_v29  ;;  %3791 = vtanh.f32 %v745_v26  ;;  %v748_v31 = vadd.f32 %v4271_v17, %v695_v27  ;;  %v687_v32 = vadd.f32 %v686_v30, %v499_v28  ;;  %v3372_v33 = vpop.f32.mrf.mxu0  ;;  %3599 = vmatmul.mubr.msk.bf16.gmra.mxu0 %vm317_vm0, %v3739_v6  ;;  %3637 = vmatmul.mubr.msk.bf16.gmra.mxu1 %vm317_vm0, %v3740_v25 }
 0x111   : > { %v3780_v34 = vpop.eup %3779  ;;  %v3410_v35 = vpop.f32.mrf.mxu1 }
 0x112   : > { %803 = vst.msk [vmem:[%s4296_s22 + $0x88] sm:$0xff] %vm785_vm1, %v3780_v34  ;;  %3793 = vtanh.f32 %v748_v31  ;;  %v746_v36 = vadd.f32 %v4271_v17, %v687_v32  ;;  %v708_v37 = vadd.f32 %v3410_v35, %v3372_v33  ;;  %v512_v38 = vpop.f32.mrf.mxu0 }
 0x113   : > { %v3782_v39 = vpop.eup %3781  ;;  %v699_v40 = vpop.f32.mrf.mxu1 }
 0x114   : > { %808 = vst.msk [vmem:[%s4296_s22 + $0xb0] sm:$0xff] %vm785_vm1, %v3782_v39  ;;  %3795 = vtanh.f32 %v746_v36  ;;  %v751_v41 = vadd.f32 %v4271_v17, %v708_v37  ;;  %v700_v42 = vadd.f32 %v699_v40, %v512_v38  ;;  %v3373_v43 = vpop.f32.mrf.mxu0 }
 0x115   : > { %v3784_v44 = vpop.eup %3783  ;;  %v3411_v45 = vpop.f32.mrf.mxu1 }
 0x116   : > { %806 = vst.msk [vmem:[%s4296_s22 + $0xa0] sm:$0xff] %vm785_vm1, %v3784_v44  ;;  %3797 = vtanh.f32 %v751_v41  ;;  %v749_v46 = vadd.f32 %v4271_v17, %v700_v42  ;;  %v711_v47 = vadd.f32 %v3411_v45, %v3373_v43  ;;  %v515_v48 = vpop.f32.mrf.mxu0 }
 0x117   : > { %v3786_v49 = vpop.eup %3785  ;;  %v702_v50 = vpop.f32.mrf.mxu1 }
 0x118   : > { %809 = vst.msk [vmem:[%s4296_s22 + $0xb8] sm:$0xff] %vm785_vm1, %v3786_v49  ;;  %3799 = vtanh.f32 %v749_v46  ;;  %v752_v51 = vadd.f32 %v4271_v17, %v711_v47  ;;  %v703_v52 = vadd.f32 %v702_v50, %v515_v48  ;;  %v3420_v53 = vpop.f32.mrf.mxu0 }
 0x119   : > { %v3788_v54 = vpop.eup %3787  ;;  %v3458_v55 = vpop.f32.mrf.mxu1 }
 0x11a   : > { %807 = vst.msk [vmem:[%s4296_s22 + $0xa8] sm:$0xff] %vm785_vm1, %v3788_v54  ;;  %3801 = vtanh.f32 %v752_v51  ;;  %v750_v56 = vadd.f32 %v4271_v17, %v703_v52  ;;  %v1242_v57 = vadd.f32 %v3458_v55, %v3420_v53  ;;  %v1046_v58 = vpop.f32.mrf.mxu0 }
 0x11b   : > { %v3790_v59 = vpop.eup %3789  ;;  %v1233_v60 = vpop.f32.mrf.mxu1 }
 0x11c   : > { %812 = vst.msk [vmem:[%s4296_s22 + $0xd0] sm:$0xff] %vm785_vm1, %v3790_v59  ;;  %3803 = vtanh.f32 %v750_v56  ;;  %v1369_v61 = vadd.f32 %v4271_v17, %v1242_v57  ;;  %v1234_v62 = vadd.f32 %v1233_v60, %v1046_v58  ;;  %v3421_v63 = vpop.f32.mrf.mxu0 }
 0x11d   : > { %v3792_v0 = vpop.eup %3791  ;;  %v3459_v1 = vpop.f32.mrf.mxu1 }
 0x11e   : > { %810 = vst.msk [vmem:[%s4296_s22 + $0xc0] sm:$0xff] %vm785_vm1, %v3792_v0  ;;  %3805 = vtanh.f32 %v1369_v61  ;;  %v1367_v2 = vadd.f32 %v4271_v17, %v1234_v62  ;;  %v1245_v3 = vadd.f32 %v3459_v1, %v3421_v63  ;;  %v1049_v4 = vpop.f32.mrf.mxu0 }
 0x11f   : > { %v3794_v5 = vpop.eup %3793  ;;  %v1236_v6 = vpop.f32.mrf.mxu1 }
 0x120   : > { %813 = vst.msk [vmem:[%s4296_s22 + $0xd8] sm:$0xff] %vm785_vm1, %v3794_v5  ;;  %3807 = vtanh.f32 %v1367_v2  ;;  %v1370_v7 = vadd.f32 %v4271_v17, %v1245_v3  ;;  %v1237_v8 = vadd.f32 %v1236_v6, %v1049_v4  ;;  %v3424_v9 = vpop.f32.mrf.mxu0 }
 0x121   : > { %v3796_v10 = vpop.eup %3795  ;;  %v3462_v11 = vpop.f32.mrf.mxu1 }
 0x122   : > { %811 = vst.msk [vmem:[%s4296_s22 + $0xc8] sm:$0xff] %vm785_vm1, %v3796_v10  ;;  %3809 = vtanh.f32 %v1370_v7  ;;  %v1368_v12 = vadd.f32 %v4271_v17, %v1237_v8  ;;  %v1258_v13 = vadd.f32 %v3462_v11, %v3424_v9  ;;  %v1062_v14 = vpop.f32.mrf.mxu0 }
 0x123   : > { %v3798_v15 = vpop.eup %3797  ;;  %v1249_v16 = vpop.f32.mrf.mxu1 }
 0x124   : > { %816 = vst.msk [vmem:[%s4296_s22 + $0xf0] sm:$0xff] %vm785_vm1, %v3798_v15  ;;  %3811 = vtanh.f32 %v1368_v12  ;;  %v1373_v18 = vadd.f32 %v4271_v17, %v1258_v13  ;;  %v1250_v19 = vadd.f32 %v1249_v16, %v1062_v14  ;;  %v3425_v20 = vpop.f32.mrf.mxu0 }
 0x125   : > { %v3800_v21 = vpop.eup %3799  ;;  %v3463_v22 = vpop.f32.mrf.mxu1 }
 0x126   : > { %814 = vst.msk [vmem:[%s4296_s22 + $0xe0] sm:$0xff] %vm785_vm1, %v3800_v21  ;;  %3813 = vtanh.f32 %v1373_v18  ;;  %v1371_v23 = vadd.f32 %v4271_v17, %v1250_v19  ;;  %v1261_v24 = vadd.f32 %v3463_v22, %v3425_v20  ;;  %v1065_v25 = vpop.f32.mrf.mxu0 }
 0x127   : > { %v3802_v26 = vpop.eup %3801  ;;  %v1252_v27 = vpop.f32.mrf.mxu1 }
 0x128   : > { %817 = vst.msk [vmem:[%s4296_s22 + $0xf8] sm:$0xff] %vm785_vm1, %v3802_v26  ;;  %3815 = vtanh.f32 %v1371_v23  ;;  %v1374_v28 = vadd.f32 %v4271_v17, %v1261_v24  ;;  %v1253_v29 = vadd.f32 %v1252_v27, %v1065_v25  ;;  %v3428_v30 = vpop.f32.mrf.mxu0 }
 0x129   : > { %v3804_v31 = vpop.eup %3803  ;;  %v3466_v32 = vpop.f32.mrf.mxu1 }
 0x12a   : > { %815 = vst.msk [vmem:[%s4296_s22 + $0xe8] sm:$0xff] %vm785_vm1, %v3804_v31  ;;  %3817 = vtanh.f32 %v1374_v28  ;;  %v1372_v33 = vadd.f32 %v4271_v17, %v1253_v29  ;;  %v1274_v34 = vadd.f32 %v3466_v32, %v3428_v30  ;;  %v1078_v35 = vpop.f32.mrf.mxu0 }
 0x12b   : > { %v3806_v36 = vpop.eup %3805  ;;  %v1265_v37 = vpop.f32.mrf.mxu1 }
 0x12c   : > { %2951 = vst.msk [vmem:[%s4296_s22 + $0x110] sm:$0xff] %vm785_vm1, %v3806_v36  ;;  %3819 = vtanh.f32 %v1372_v33  ;;  %v1377_v38 = vadd.f32 %v4271_v17, %v1274_v34  ;;  %v1266_v39 = vadd.f32 %v1265_v37, %v1078_v35  ;;  %v3429_v40 = vpop.f32.mrf.mxu0 }
 0x12d   : > { %v3808_v41 = vpop.eup %3807  ;;  %v3467_v42 = vpop.f32.mrf.mxu1 }
 0x12e   : > { %2949 = vst.msk [vmem:[%s4296_s22 + $0x100] sm:$0xff] %vm785_vm1, %v3808_v41  ;;  %3821 = vtanh.f32 %v1377_v38  ;;  %v1375_v43 = vadd.f32 %v4271_v17, %v1266_v39  ;;  %v1277_v44 = vadd.f32 %v3467_v42, %v3429_v40  ;;  %v1081_v45 = vpop.f32.mrf.mxu0 }
 0x12f   : > { %v3810_v46 = vpop.eup %3809  ;;  %v1268_v47 = vpop.f32.mrf.mxu1 }
 0x130   : > { %2952 = vst.msk [vmem:[%s4296_s22 + $0x118] sm:$0xff] %vm785_vm1, %v3810_v46  ;;  %3823 = vtanh.f32 %v1375_v43  ;;  %v1378_v48 = vadd.f32 %v4271_v17, %v1277_v44  ;;  %v1269_v49 = vadd.f32 %v1268_v47, %v1081_v45  ;;  %v3432_v50 = vpop.f32.mrf.mxu0 }
 0x131   : > { %v3812_v51 = vpop.eup %3811  ;;  %v3470_v52 = vpop.f32.mrf.mxu1 }
 0x132   : > { %2950 = vst.msk [vmem:[%s4296_s22 + $0x108] sm:$0xff] %vm785_vm1, %v3812_v51  ;;  %3825 = vtanh.f32 %v1378_v48  ;;  %v1376_v53 = vadd.f32 %v4271_v17, %v1269_v49  ;;  %v1290_v54 = vadd.f32 %v3470_v52, %v3432_v50  ;;  %v1094_v55 = vpop.f32.mrf.mxu0 }
 0x133   : > { %v3814_v56 = vpop.eup %3813  ;;  %v1281_v57 = vpop.f32.mrf.mxu1 }
 0x134   : > { %2955 = vst.msk [vmem:[%s4296_s22 + $0x130] sm:$0xff] %vm785_vm1, %v3814_v56  ;;  %3827 = vtanh.f32 %v1376_v53  ;;  %v1381_v58 = vadd.f32 %v4271_v17, %v1290_v54  ;;  %v1282_v59 = vadd.f32 %v1281_v57, %v1094_v55  ;;  %v3433_v60 = vpop.f32.mrf.mxu0 }
 0x135   : > { %v3816_v61 = vpop.eup %3815  ;;  %v3471_v62 = vpop.f32.mrf.mxu1 }
 0x136   : > { %2953 = vst.msk [vmem:[%s4296_s22 + $0x120] sm:$0xff] %vm785_vm1, %v3816_v61  ;;  %3829 = vtanh.f32 %v1381_v58  ;;  %v1379_v63 = vadd.f32 %v4271_v17, %v1282_v59  ;;  %v1293_v0 = vadd.f32 %v3471_v62, %v3433_v60  ;;  %v1097_v1 = vpop.f32.mrf.mxu0 }
 0x137   : > { %v3818_v2 = vpop.eup %3817  ;;  %v1284_v3 = vpop.f32.mrf.mxu1 }
 0x138   : > { %2956 = vst.msk [vmem:[%s4296_s22 + $0x138] sm:$0xff] %vm785_vm1, %v3818_v2  ;;  %3831 = vtanh.f32 %v1379_v63  ;;  %v1382_v4 = vadd.f32 %v4271_v17, %v1293_v0  ;;  %v1285_v5 = vadd.f32 %v1284_v3, %v1097_v1  ;;  %v3436_v6 = vpop.f32.mrf.mxu0 }
 0x139   : > { %v3820_v7 = vpop.eup %3819  ;;  %v3474_v8 = vpop.f32.mrf.mxu1 }
 0x13a   : > { %2954 = vst.msk [vmem:[%s4296_s22 + $0x128] sm:$0xff] %vm785_vm1, %v3820_v7  ;;  %3833 = vtanh.f32 %v1382_v4  ;;  %v1380_v9 = vadd.f32 %v4271_v17, %v1285_v5  ;;  %v1306_v10 = vadd.f32 %v3474_v8, %v3436_v6  ;;  %v1110_v11 = vpop.f32.mrf.mxu0 }
 0x13b   : > { %v3822_v12 = vpop.eup %3821  ;;  %v1297_v13 = vpop.f32.mrf.mxu1 }
 0x13c   : > { %2959 = vst.msk [vmem:[%s4296_s22 + $0x150] sm:$0xff] %vm785_vm1, %v3822_v12  ;;  %3835 = vtanh.f32 %v1380_v9  ;;  %v1385_v14 = vadd.f32 %v4271_v17, %v1306_v10  ;;  %v1298_v15 = vadd.f32 %v1297_v13, %v1110_v11  ;;  %v3437_v16 = vpop.f32.mrf.mxu0 }
 0x13d   : > { %v3824_v18 = vpop.eup %3823  ;;  %v3475_v19 = vpop.f32.mrf.mxu1 }
 0x13e   : > { %2957 = vst.msk [vmem:[%s4296_s22 + $0x140] sm:$0xff] %vm785_vm1, %v3824_v18  ;;  %3837 = vtanh.f32 %v1385_v14  ;;  %v1383_v20 = vadd.f32 %v4271_v17, %v1298_v15  ;;  %v1309_v21 = vadd.f32 %v3475_v19, %v3437_v16  ;;  %v1113_v22 = vpop.f32.mrf.mxu0 }
 0x13f   : > { %v3826_v23 = vpop.eup %3825  ;;  %v1300_v24 = vpop.f32.mrf.mxu1 }
 0x140   : > { %2960 = vst.msk [vmem:[%s4296_s22 + $0x158] sm:$0xff] %vm785_vm1, %v3826_v23  ;;  %3839 = vtanh.f32 %v1383_v20  ;;  %v1386_v25 = vadd.f32 %v4271_v17, %v1309_v21  ;;  %v1301_v26 = vadd.f32 %v1300_v24, %v1113_v22  ;;  %v3440_v27 = vpop.f32.mrf.mxu0 }
 0x141   : > { %v3828_v28 = vpop.eup %3827  ;;  %v3478_v29 = vpop.f32.mrf.mxu1 }
 0x142   : > { %2958 = vst.msk [vmem:[%s4296_s22 + $0x148] sm:$0xff] %vm785_vm1, %v3828_v28  ;;  %3841 = vtanh.f32 %v1386_v25  ;;  %v1384_v30 = vadd.f32 %v4271_v17, %v1301_v26  ;;  %v1322_v31 = vadd.f32 %v3478_v29, %v3440_v27  ;;  %v1126_v32 = vpop.f32.mrf.mxu0 }
 0x143   : > { %v3830_v33 = vpop.eup %3829  ;;  %v1313_v34 = vpop.f32.mrf.mxu1 }
 0x144   : > { %2963 = vst.msk [vmem:[%s4296_s22 + $0x170] sm:$0xff] %vm785_vm1, %v3830_v33  ;;  %3843 = vtanh.f32 %v1384_v30  ;;  %v1389_v35 = vadd.f32 %v4271_v17, %v1322_v31  ;;  %v1314_v36 = vadd.f32 %v1313_v34, %v1126_v32  ;;  %v3441_v37 = vpop.f32.mrf.mxu0 }
 0x145   : > { %v3832_v38 = vpop.eup %3831  ;;  %v3479_v39 = vpop.f32.mrf.mxu1 }
 0x146   : > { %2961 = vst.msk [vmem:[%s4296_s22 + $0x160] sm:$0xff] %vm785_vm1, %v3832_v38  ;;  %3845 = vtanh.f32 %v1389_v35  ;;  %v1387_v40 = vadd.f32 %v4271_v17, %v1314_v36  ;;  %v1325_v41 = vadd.f32 %v3479_v39, %v3441_v37  ;;  %v1129_v42 = vpop.f32.mrf.mxu0 }
 0x147   : > { %v3834_v43 = vpop.eup %3833  ;;  %v1316_v44 = vpop.f32.mrf.mxu1 }
 0x148   : > { %2964 = vst.msk [vmem:[%s4296_s22 + $0x178] sm:$0xff] %vm785_vm1, %v3834_v43  ;;  %3847 = vtanh.f32 %v1387_v40  ;;  %v1390_v45 = vadd.f32 %v4271_v17, %v1325_v41  ;;  %v1317_v46 = vadd.f32 %v1316_v44, %v1129_v42  ;;  %v3444_v47 = vpop.f32.mrf.mxu0 }
 0x149   : > { %v3836_v48 = vpop.eup %3835  ;;  %v3482_v49 = vpop.f32.mrf.mxu1 }
 0x14a   : > { %2962 = vst.msk [vmem:[%s4296_s22 + $0x168] sm:$0xff] %vm785_vm1, %v3836_v48  ;;  %3849 = vtanh.f32 %v1390_v45  ;;  %v1388_v50 = vadd.f32 %v4271_v17, %v1317_v46  ;;  %v1338_v51 = vadd.f32 %v3482_v49, %v3444_v47  ;;  %v1142_v52 = vpop.f32.mrf.mxu0 }
 0x14b   : > { %v3838_v53 = vpop.eup %3837  ;;  %v1329_v54 = vpop.f32.mrf.mxu1 }
 0x14c   : > { %2967 = vst.msk [vmem:[%s4296_s22 + $0x190] sm:$0xff] %vm785_vm1, %v3838_v53  ;;  %3851 = vtanh.f32 %v1388_v50  ;;  %v1393_v55 = vadd.f32 %v4271_v17, %v1338_v51  ;;  %v1330_v56 = vadd.f32 %v1329_v54, %v1142_v52  ;;  %v3445_v57 = vpop.f32.mrf.mxu0 }
 0x14d   : > { %v3840_v58 = vpop.eup %3839  ;;  %v3483_v59 = vpop.f32.mrf.mxu1 }
 0x14e   : > { %2965 = vst.msk [vmem:[%s4296_s22 + $0x180] sm:$0xff] %vm785_vm1, %v3840_v58  ;;  %3853 = vtanh.f32 %v1393_v55  ;;  %v1391_v60 = vadd.f32 %v4271_v17, %v1330_v56  ;;  %v1341_v61 = vadd.f32 %v3483_v59, %v3445_v57  ;;  %v1145_v62 = vpop.f32.mrf.mxu0  ;;  %v4517_v57 = vld [vmem:[%s4720_s2] ss:$0 sm:$0xff] }
 0x14f   : > { %v3842_v63 = vpop.eup %3841  ;;  %v1332_v0 = vpop.f32.mrf.mxu1 }
 0x150   : > { %2968 = vst.msk [vmem:[%s4296_s22 + $0x198] sm:$0xff] %vm785_vm1, %v3842_v63  ;;  %3855 = vtanh.f32 %v1391_v60  ;;  %v1394_v1 = vadd.f32 %v4271_v17, %v1341_v61  ;;  %v1333_v2 = vadd.f32 %v1332_v0, %v1145_v62  ;;  %v3448_v3 = vpop.f32.mrf.mxu0 }
 0x151   : > { %v3844_v4 = vpop.eup %3843  ;;  %v3486_v5 = vpop.f32.mrf.mxu1 }
 0x152   : > { %2966 = vst.msk [vmem:[%s4296_s22 + $0x188] sm:$0xff] %vm785_vm1, %v3844_v4  ;;  %3857 = vtanh.f32 %v1394_v1  ;;  %v1392_v6 = vadd.f32 %v4271_v17, %v1333_v2  ;;  %v1354_v7 = vadd.f32 %v3486_v5, %v3448_v3  ;;  %v1158_v8 = vpop.f32.mrf.mxu0 }
 0x153   : > { %v3846_v9 = vpop.eup %3845  ;;  %v1345_v10 = vpop.f32.mrf.mxu1 }
 0x154   : > { %2971 = vst.msk [vmem:[%s4296_s22 + $0x1b0] sm:$0xff] %vm785_vm1, %v3846_v9  ;;  %3859 = vtanh.f32 %v1392_v6  ;;  %v1397_v11 = vadd.f32 %v4271_v17, %v1354_v7  ;;  %v1346_v12 = vadd.f32 %v1345_v10, %v1158_v8  ;;  %v3449_v13 = vpop.f32.mrf.mxu0 }
 0x155   : > { %v3848_v14 = vpop.eup %3847  ;;  %v3487_v15 = vpop.f32.mrf.mxu1 }
 0x156   : > { %2969 = vst.msk [vmem:[%s4296_s22 + $0x1a0] sm:$0xff] %vm785_vm1, %v3848_v14  ;;  %3861 = vtanh.f32 %v1397_v11  ;;  %v1395_v16 = vadd.f32 %v4271_v17, %v1346_v12  ;;  %v1357_v18 = vadd.f32 %v3487_v15, %v3449_v13  ;;  %v1161_v19 = vpop.f32.mrf.mxu0 }
 0x157   : > { %v3850_v20 = vpop.eup %3849  ;;  %v1348_v21 = vpop.f32.mrf.mxu1 }
 0x158   : > { %2972 = vst.msk [vmem:[%s4296_s22 + $0x1b8] sm:$0xff] %vm785_vm1, %v3850_v20  ;;  %3863 = vtanh.f32 %v1395_v16  ;;  %v1398_v22 = vadd.f32 %v4271_v17, %v1357_v18  ;;  %v1349_v23 = vadd.f32 %v1348_v21, %v1161_v19  ;;  %v3496_v24 = vpop.f32.mrf.mxu0 }
 0x159   : > { %v3852_v25 = vpop.eup %3851  ;;  %v3534_v26 = vpop.f32.mrf.mxu1 }
 0x15a   : > { %2970 = vst.msk [vmem:[%s4296_s22 + $0x1a8] sm:$0xff] %vm785_vm1, %v3852_v25  ;;  %3865 = vtanh.f32 %v1398_v22  ;;  %v1396_v27 = vadd.f32 %v4271_v17, %v1349_v23  ;;  %v1888_v28 = vadd.f32 %v3534_v26, %v3496_v24  ;;  %v1692_v29 = vpop.f32.mrf.mxu0 }
 0x15b   : > { %v3854_v30 = vpop.eup %3853  ;;  %v1879_v31 = vpop.f32.mrf.mxu1 }
 0x15c   : > { %2975 = vst.msk [vmem:[%s4296_s22 + $0x1d0] sm:$0xff] %vm785_vm1, %v3854_v30  ;;  %3867 = vtanh.f32 %v1396_v27  ;;  %v2015_v32 = vadd.f32 %v4271_v17, %v1888_v28  ;;  %v1880_v33 = vadd.f32 %v1879_v31, %v1692_v29  ;;  %v3497_v34 = vpop.f32.mrf.mxu0 }
 0x15d   : > { %v3856_v35 = vpop.eup %3855  ;;  %v3535_v36 = vpop.f32.mrf.mxu1 }
 0x15e   : > { %2973 = vst.msk [vmem:[%s4296_s22 + $0x1c0] sm:$0xff] %vm785_vm1, %v3856_v35  ;;  %3869 = vtanh.f32 %v2015_v32  ;;  %v2013_v37 = vadd.f32 %v4271_v17, %v1880_v33  ;;  %v1891_v38 = vadd.f32 %v3535_v36, %v3497_v34  ;;  %v1695_v39 = vpop.f32.mrf.mxu0 }
 0x15f   : > { %v3858_v40 = vpop.eup %3857  ;;  %v1882_v41 = vpop.f32.mrf.mxu1 }
 0x160   : > { %2976 = vst.msk [vmem:[%s4296_s22 + $0x1d8] sm:$0xff] %vm785_vm1, %v3858_v40  ;;  %3871 = vtanh.f32 %v2013_v37  ;;  %v2016_v42 = vadd.f32 %v4271_v17, %v1891_v38  ;;  %v1883_v43 = vadd.f32 %v1882_v41, %v1695_v39  ;;  %v3500_v44 = vpop.f32.mrf.mxu0 }
 0x161   : > { %v3860_v45 = vpop.eup %3859  ;;  %v3538_v46 = vpop.f32.mrf.mxu1 }
 0x162   : > { %2974 = vst.msk [vmem:[%s4296_s22 + $0x1c8] sm:$0xff] %vm785_vm1, %v3860_v45  ;;  %3873 = vtanh.f32 %v2016_v42  ;;  %v2014_v47 = vadd.f32 %v4271_v17, %v1883_v43  ;;  %v1904_v48 = vadd.f32 %v3538_v46, %v3500_v44  ;;  %v1708_v49 = vpop.f32.mrf.mxu0 }
 0x163   : > { %v3862_v50 = vpop.eup %3861  ;;  %v1895_v51 = vpop.f32.mrf.mxu1 }
 0x164   : > { %2979 = vst.msk [vmem:[%s4296_s22 + $0x1f0] sm:$0xff] %vm785_vm1, %v3862_v50  ;;  %3875 = vtanh.f32 %v2014_v47  ;;  %v2019_v52 = vadd.f32 %v4271_v17, %v1904_v48  ;;  %v1896_v53 = vadd.f32 %v1895_v51, %v1708_v49  ;;  %v3501_v54 = vpop.f32.mrf.mxu0 }
 0x165   : > { %v3864_v55 = vpop.eup %3863  ;;  %v3539_v56 = vpop.f32.mrf.mxu1 }
 0x166   : > { %2977 = vst.msk [vmem:[%s4296_s22 + $0x1e0] sm:$0xff] %vm785_vm1, %v3864_v55  ;;  %3877 = vtanh.f32 %v2019_v52  ;;  %v2017_v58 = vadd.f32 %v4517_v57, %v1896_v53  ;;  %v1907_v59 = vadd.f32 %v3539_v56, %v3501_v54  ;;  %v1711_v60 = vpop.f32.mrf.mxu0 }
 0x167   : > { %v3866_v61 = vpop.eup %3865  ;;  %v1898_v17 = vpop.f32.mrf.mxu1 }
 0x168   : > { %2980 = vst.msk [vmem:[%s4296_s22 + $0x1f8] sm:$0xff] %vm785_vm1, %v3866_v61  ;;  %3879 = vtanh.f32 %v2017_v58  ;;  %v2020_v62 = vadd.f32 %v4517_v57, %v1907_v59  ;;  %v1899_v63 = vadd.f32 %v1898_v17, %v1711_v60  ;;  %v3504_v0 = vpop.f32.mrf.mxu0 }
 0x169   : > { %v3868_v1 = vpop.eup %3867  ;;  %v3542_v2 = vpop.f32.mrf.mxu1 }
 0x16a   : > { %2978 = vst.msk [vmem:[%s4296_s22 + $0x1e8] sm:$0xff] %vm785_vm1, %v3868_v1  ;;  %3881 = vtanh.f32 %v2020_v62  ;;  %v2018_v3 = vadd.f32 %v4517_v57, %v1899_v63  ;;  %v1920_v4 = vadd.f32 %v3542_v2, %v3504_v0  ;;  %v1724_v5 = vpop.f32.mrf.mxu0 }
 0x16b   : > { %v3870_v6 = vpop.eup %3869  ;;  %v1911_v7 = vpop.f32.mrf.mxu1 }
 0x16c   : > { %3051 = vst.msk [vmem:[%s4296_s22 + $0x210] sm:$0xff] %vm785_vm1, %v3870_v6  ;;  %3883 = vtanh.f32 %v2018_v3  ;;  %v2023_v8 = vadd.f32 %v4517_v57, %v1920_v4  ;;  %v1912_v9 = vadd.f32 %v1911_v7, %v1724_v5  ;;  %v3505_v10 = vpop.f32.mrf.mxu0 }
 0x16d   : > { %v3872_v11 = vpop.eup %3871  ;;  %v3543_v12 = vpop.f32.mrf.mxu1 }
 0x16e   : > { %3049 = vst.msk [vmem:[%s4296_s22 + $0x200] sm:$0xff] %vm785_vm1, %v3872_v11  ;;  %3885 = vtanh.f32 %v2023_v8  ;;  %v2021_v13 = vadd.f32 %v4517_v57, %v1912_v9  ;;  %v1923_v14 = vadd.f32 %v3543_v12, %v3505_v10  ;;  %v1727_v15 = vpop.f32.mrf.mxu0 }
 0x16f   : > { %v3874_v16 = vpop.eup %3873  ;;  %v1914_v18 = vpop.f32.mrf.mxu1 }
 0x170   : > { %3052 = vst.msk [vmem:[%s4296_s22 + $0x218] sm:$0xff] %vm785_vm1, %v3874_v16  ;;  %3887 = vtanh.f32 %v2021_v13  ;;  %v2024_v19 = vadd.f32 %v4517_v57, %v1923_v14  ;;  %v1915_v20 = vadd.f32 %v1914_v18, %v1727_v15  ;;  %v3508_v21 = vpop.f32.mrf.mxu0 }
 0x171   : > { %v3876_v22 = vpop.eup %3875  ;;  %v3546_v23 = vpop.f32.mrf.mxu1 }
 0x172   : > { %3050 = vst.msk [vmem:[%s4296_s22 + $0x208] sm:$0xff] %vm785_vm1, %v3876_v22  ;;  %3889 = vtanh.f32 %v2024_v19  ;;  %v2022_v24 = vadd.f32 %v4517_v57, %v1915_v20  ;;  %v1936_v25 = vadd.f32 %v3546_v23, %v3508_v21  ;;  %v1740_v26 = vpop.f32.mrf.mxu0 }
 0x173   : > { %v3878_v27 = vpop.eup %3877  ;;  %v1927_v28 = vpop.f32.mrf.mxu1 }
 0x174   : > { %3055 = vst.msk [vmem:[%s4296_s22 + $0x230] sm:$0xff] %vm785_vm1, %v3878_v27  ;;  %3891 = vtanh.f32 %v2022_v24  ;;  %v2027_v29 = vadd.f32 %v4517_v57, %v1936_v25  ;;  %v1928_v30 = vadd.f32 %v1927_v28, %v1740_v26  ;;  %v3509_v31 = vpop.f32.mrf.mxu0 }
 0x175   : > { %v3880_v32 = vpop.eup %3879  ;;  %v3547_v33 = vpop.f32.mrf.mxu1 }
 0x176   : > { %3053 = vst.msk [vmem:[%s4296_s22 + $0x220] sm:$0xff] %vm785_vm1, %v3880_v32  ;;  %3893 = vtanh.f32 %v2027_v29  ;;  %v2025_v34 = vadd.f32 %v4517_v57, %v1928_v30  ;;  %v1939_v35 = vadd.f32 %v3547_v33, %v3509_v31  ;;  %v1743_v36 = vpop.f32.mrf.mxu0 }
 0x177   : > { %v3882_v37 = vpop.eup %3881  ;;  %v1930_v38 = vpop.f32.mrf.mxu1 }
 0x178   : > { %3056 = vst.msk [vmem:[%s4296_s22 + $0x238] sm:$0xff] %vm785_vm1, %v3882_v37  ;;  %3895 = vtanh.f32 %v2025_v34  ;;  %v2028_v39 = vadd.f32 %v4517_v57, %v1939_v35  ;;  %v1931_v40 = vadd.f32 %v1930_v38, %v1743_v36  ;;  %v3512_v41 = vpop.f32.mrf.mxu0 }
 0x179   : > { %v3884_v42 = vpop.eup %3883  ;;  %v3550_v43 = vpop.f32.mrf.mxu1 }
 0x17a   : > { %3054 = vst.msk [vmem:[%s4296_s22 + $0x228] sm:$0xff] %vm785_vm1, %v3884_v42  ;;  %3897 = vtanh.f32 %v2028_v39  ;;  %v2026_v44 = vadd.f32 %v4517_v57, %v1931_v40  ;;  %v1952_v45 = vadd.f32 %v3550_v43, %v3512_v41  ;;  %v1756_v46 = vpop.f32.mrf.mxu0 }
 0x17b   : > { %v3886_v47 = vpop.eup %3885  ;;  %v1943_v48 = vpop.f32.mrf.mxu1 }
 0x17c   : > { %3059 = vst.msk [vmem:[%s4296_s22 + $0x250] sm:$0xff] %vm785_vm1, %v3886_v47  ;;  %3899 = vtanh.f32 %v2026_v44  ;;  %v2031_v49 = vadd.f32 %v4517_v57, %v1952_v45  ;;  %v1944_v50 = vadd.f32 %v1943_v48, %v1756_v46  ;;  %v3513_v51 = vpop.f32.mrf.mxu0 }
 0x17d   : > { %v3888_v52 = vpop.eup %3887  ;;  %v3551_v53 = vpop.f32.mrf.mxu1 }
 0x17e   : > { %3057 = vst.msk [vmem:[%s4296_s22 + $0x240] sm:$0xff] %vm785_vm1, %v3888_v52  ;;  %3901 = vtanh.f32 %v2031_v49  ;;  %v2029_v54 = vadd.f32 %v4517_v57, %v1944_v50  ;;  %v1955_v55 = vadd.f32 %v3551_v53, %v3513_v51  ;;  %v1759_v56 = vpop.f32.mrf.mxu0 }
 0x17f   : > { %v3890_v58 = vpop.eup %3889  ;;  %v1946_v59 = vpop.f32.mrf.mxu1 }
 0x180   : > { %3060 = vst.msk [vmem:[%s4296_s22 + $0x258] sm:$0xff] %vm785_vm1, %v3890_v58  ;;  %3903 = vtanh.f32 %v2029_v54  ;;  %v2032_v60 = vadd.f32 %v4517_v57, %v1955_v55  ;;  %v1947_v61 = vadd.f32 %v1946_v59, %v1759_v56  ;;  %v3516_v17 = vpop.f32.mrf.mxu0 }
 0x181   : > { %v3892_v62 = vpop.eup %3891  ;;  %v3554_v63 = vpop.f32.mrf.mxu1 }
 0x182   : > { %3058 = vst.msk [vmem:[%s4296_s22 + $0x248] sm:$0xff] %vm785_vm1, %v3892_v62  ;;  %3905 = vtanh.f32 %v2032_v60  ;;  %v2030_v0 = vadd.f32 %v4517_v57, %v1947_v61  ;;  %v1968_v1 = vadd.f32 %v3554_v63, %v3516_v17  ;;  %v1772_v2 = vpop.f32.mrf.mxu0  ;;  %v4598_v17 = vld [vmem:[%s4720_s2] ss:$0 sm:$0xff] }
 0x183   : > { %v3894_v3 = vpop.eup %3893  ;;  %v1959_v4 = vpop.f32.mrf.mxu1 }
 0x184   : > { %3063 = vst.msk [vmem:[%s4296_s22 + $0x270] sm:$0xff] %vm785_vm1, %v3894_v3  ;;  %3907 = vtanh.f32 %v2030_v0  ;;  %v2035_v5 = vadd.f32 %v4517_v57, %v1968_v1  ;;  %v1960_v6 = vadd.f32 %v1959_v4, %v1772_v2  ;;  %v3517_v7 = vpop.f32.mrf.mxu0 }
 0x185   : > { %v3896_v8 = vpop.eup %3895  ;;  %v3555_v9 = vpop.f32.mrf.mxu1 }
 0x186   : > { %3061 = vst.msk [vmem:[%s4296_s22 + $0x260] sm:$0xff] %vm785_vm1, %v3896_v8  ;;  %3909 = vtanh.f32 %v2035_v5  ;;  %v2033_v10 = vadd.f32 %v4517_v57, %v1960_v6  ;;  %v1971_v11 = vadd.f32 %v3555_v9, %v3517_v7  ;;  %v1775_v12 = vpop.f32.mrf.mxu0 }
 0x187   : > { %v3898_v13 = vpop.eup %3897  ;;  %v1962_v14 = vpop.f32.mrf.mxu1 }
 0x188   : > { %3064 = vst.msk [vmem:[%s4296_s22 + $0x278] sm:$0xff] %vm785_vm1, %v3898_v13  ;;  %3911 = vtanh.f32 %v2033_v10  ;;  %v2036_v15 = vadd.f32 %v4517_v57, %v1971_v11  ;;  %v1963_v16 = vadd.f32 %v1962_v14, %v1775_v12  ;;  %v3520_v18 = vpop.f32.mrf.mxu0 }
 0x189   : > { %v3900_v19 = vpop.eup %3899  ;;  %v3558_v20 = vpop.f32.mrf.mxu1 }
 0x18a   : > { %3062 = vst.msk [vmem:[%s4296_s22 + $0x268] sm:$0xff] %vm785_vm1, %v3900_v19  ;;  %3913 = vtanh.f32 %v2036_v15  ;;  %v2034_v21 = vadd.f32 %v4517_v57, %v1963_v16  ;;  %v1984_v22 = vadd.f32 %v3558_v20, %v3520_v18  ;;  %v1788_v23 = vpop.f32.mrf.mxu0 }
 0x18b   : > { %v3902_v24 = vpop.eup %3901  ;;  %v1975_v25 = vpop.f32.mrf.mxu1 }
 0x18c   : > { %3067 = vst.msk [vmem:[%s4296_s22 + $0x290] sm:$0xff] %vm785_vm1, %v3902_v24  ;;  %3915 = vtanh.f32 %v2034_v21  ;;  %v2039_v26 = vadd.f32 %v4517_v57, %v1984_v22  ;;  %v1976_v27 = vadd.f32 %v1975_v25, %v1788_v23  ;;  %v3521_v28 = vpop.f32.mrf.mxu0 }
 0x18d   : > { %v3904_v29 = vpop.eup %3903  ;;  %v3559_v30 = vpop.f32.mrf.mxu1 }
 0x18e   : > { %3065 = vst.msk [vmem:[%s4296_s22 + $0x280] sm:$0xff] %vm785_vm1, %v3904_v29  ;;  %3917 = vtanh.f32 %v2039_v26  ;;  %v2037_v31 = vadd.f32 %v4517_v57, %v1976_v27  ;;  %v1987_v32 = vadd.f32 %v3559_v30, %v3521_v28  ;;  %v1791_v33 = vpop.f32.mrf.mxu0 }
 0x18f   : > { %v3906_v34 = vpop.eup %3905  ;;  %v1978_v35 = vpop.f32.mrf.mxu1 }
 0x190   : > { %3068 = vst.msk [vmem:[%s4296_s22 + $0x298] sm:$0xff] %vm785_vm1, %v3906_v34  ;;  %3919 = vtanh.f32 %v2037_v31  ;;  %v2040_v36 = vadd.f32 %v4517_v57, %v1987_v32  ;;  %v1979_v37 = vadd.f32 %v1978_v35, %v1791_v33  ;;  %v3524_v38 = vpop.f32.mrf.mxu0 }
 0x191   : > { %v3908_v39 = vpop.eup %3907  ;;  %v3562_v40 = vpop.f32.mrf.mxu1 }
 0x192   : > { %3066 = vst.msk [vmem:[%s4296_s22 + $0x288] sm:$0xff] %vm785_vm1, %v3908_v39  ;;  %3921 = vtanh.f32 %v2040_v36  ;;  %v2038_v41 = vadd.f32 %v4517_v57, %v1979_v37  ;;  %v2000_v42 = vadd.f32 %v3562_v40, %v3524_v38  ;;  %v1804_v43 = vpop.f32.mrf.mxu0 }
 0x193   : > { %v3910_v44 = vpop.eup %3909  ;;  %v1991_v45 = vpop.f32.mrf.mxu1 }
 0x194   : > { %3071 = vst.msk [vmem:[%s4296_s22 + $0x2b0] sm:$0xff] %vm785_vm1, %v3910_v44  ;;  %3923 = vtanh.f32 %v2038_v41  ;;  %v2043_v46 = vadd.f32 %v4517_v57, %v2000_v42  ;;  %v1992_v47 = vadd.f32 %v1991_v45, %v1804_v43  ;;  %v3525_v48 = vpop.f32.mrf.mxu0 }
 0x195   : > { %v3912_v49 = vpop.eup %3911  ;;  %v3563_v50 = vpop.f32.mrf.mxu1 }
 0x196   : > { %3069 = vst.msk [vmem:[%s4296_s22 + $0x2a0] sm:$0xff] %vm785_vm1, %v3912_v49  ;;  %3925 = vtanh.f32 %v2043_v46  ;;  %v2041_v51 = vadd.f32 %v4517_v57, %v1992_v47  ;;  %v2003_v52 = vadd.f32 %v3563_v50, %v3525_v48  ;;  %v1807_v53 = vpop.f32.mrf.mxu0 }
 0x197   : > { %v3914_v54 = vpop.eup %3913  ;;  %v1994_v55 = vpop.f32.mrf.mxu1 }
 0x198   : > { %3072 = vst.msk [vmem:[%s4296_s22 + $0x2b8] sm:$0xff] %vm785_vm1, %v3914_v54  ;;  %3927 = vtanh.f32 %v2041_v51  ;;  %v2044_v56 = vadd.f32 %v4517_v57, %v2003_v52  ;;  %v1995_v58 = vadd.f32 %v1994_v55, %v1807_v53  ;;  %v3572_v59 = vpop.f32.mrf.mxu0 }
 0x199   : > { %v3916_v60 = vpop.eup %3915  ;;  %v3610_v61 = vpop.f32.mrf.mxu1 }
 0x19a   : > { %3070 = vst.msk [vmem:[%s4296_s22 + $0x2a8] sm:$0xff] %vm785_vm1, %v3916_v60  ;;  %3929 = vtanh.f32 %v2044_v56  ;;  %v2042_v62 = vadd.f32 %v4517_v57, %v1995_v58  ;;  %v2534_v63 = vadd.f32 %v3610_v61, %v3572_v59  ;;  %v2338_v0 = vpop.f32.mrf.mxu0 }
 0x19b   : > { %v3918_v1 = vpop.eup %3917  ;;  %v2525_v2 = vpop.f32.mrf.mxu1 }
 0x19c   : > { %3075 = vst.msk [vmem:[%s4296_s22 + $0x2d0] sm:$0xff] %vm785_vm1, %v3918_v1  ;;  %3931 = vtanh.f32 %v2042_v62  ;;  %v2661_v3 = vadd.f32 %v4598_v17, %v2534_v63  ;;  %v2526_v4 = vadd.f32 %v2525_v2, %v2338_v0  ;;  %v3573_v5 = vpop.f32.mrf.mxu0 }
 0x19d   : > { %v3920_v6 = vpop.eup %3919  ;;  %v3611_v7 = vpop.f32.mrf.mxu1 }
 0x19e   : > { %3073 = vst.msk [vmem:[%s4296_s22 + $0x2c0] sm:$0xff] %vm785_vm1, %v3920_v6  ;;  %3933 = vtanh.f32 %v2661_v3  ;;  %v2659_v57 = vadd.f32 %v4598_v17, %v2526_v4  ;;  %v2537_v8 = vadd.f32 %v3611_v7, %v3573_v5  ;;  %v2341_v9 = vpop.f32.mrf.mxu0 }
 0x19f   : > { %v3922_v10 = vpop.eup %3921  ;;  %v2528_v11 = vpop.f32.mrf.mxu1 }
 0x1a0   : > { %3076 = vst.msk [vmem:[%s4296_s22 + $0x2d8] sm:$0xff] %vm785_vm1, %v3922_v10  ;;  %3935 = vtanh.f32 %v2659_v57  ;;  %v2662_v12 = vadd.f32 %v4598_v17, %v2537_v8  ;;  %v2529_v13 = vadd.f32 %v2528_v11, %v2341_v9  ;;  %v3576_v14 = vpop.f32.mrf.mxu0 }
 0x1a1   : > { %v3924_v15 = vpop.eup %3923  ;;  %v3614_v16 = vpop.f32.mrf.mxu1 }
 0x1a2   : > { %3074 = vst.msk [vmem:[%s4296_s22 + $0x2c8] sm:$0xff] %vm785_vm1, %v3924_v15  ;;  %3937 = vtanh.f32 %v2662_v12  ;;  %v2660_v18 = vadd.f32 %v4598_v17, %v2529_v13  ;;  %v2550_v19 = vadd.f32 %v3614_v16, %v3576_v14  ;;  %v2354_v20 = vpop.f32.mrf.mxu0 }
 0x1a3   : > { %v3926_v21 = vpop.eup %3925  ;;  %v2541_v22 = vpop.f32.mrf.mxu1 }
 0x1a4   : > { %3079 = vst.msk [vmem:[%s4296_s22 + $0x2f0] sm:$0xff] %vm785_vm1, %v3926_v21  ;;  %3939 = vtanh.f32 %v2660_v18  ;;  %v2665_v23 = vadd.f32 %v4598_v17, %v2550_v19  ;;  %v2542_v24 = vadd.f32 %v2541_v22, %v2354_v20  ;;  %v3577_v25 = vpop.f32.mrf.mxu0 }
 0x1a5   : > { %v3928_v26 = vpop.eup %3927  ;;  %v3615_v27 = vpop.f32.mrf.mxu1 }
 0x1a6   : > { %3077 = vst.msk [vmem:[%s4296_s22 + $0x2e0] sm:$0xff] %vm785_vm1, %v3928_v26  ;;  %3941 = vtanh.f32 %v2665_v23  ;;  %v2663_v28 = vadd.f32 %v4598_v17, %v2542_v24  ;;  %v2553_v29 = vadd.f32 %v3615_v27, %v3577_v25  ;;  %v2357_v30 = vpop.f32.mrf.mxu0 }
 0x1a7   : > { %v3930_v31 = vpop.eup %3929  ;;  %v2544_v32 = vpop.f32.mrf.mxu1 }
 0x1a8   : > { %3080 = vst.msk [vmem:[%s4296_s22 + $0x2f8] sm:$0xff] %vm785_vm1, %v3930_v31  ;;  %3943 = vtanh.f32 %v2663_v28  ;;  %v2666_v33 = vadd.f32 %v4598_v17, %v2553_v29  ;;  %v2545_v34 = vadd.f32 %v2544_v32, %v2357_v30  ;;  %v3580_v35 = vpop.f32.mrf.mxu0 }
 0x1a9   : > { %v3932_v36 = vpop.eup %3931  ;;  %v3618_v37 = vpop.f32.mrf.mxu1 }
 0x1aa   : > { %3078 = vst.msk [vmem:[%s4296_s22 + $0x2e8] sm:$0xff] %vm785_vm1, %v3932_v36  ;;  %3945 = vtanh.f32 %v2666_v33  ;;  %v2664_v38 = vadd.f32 %v4598_v17, %v2545_v34  ;;  %v2566_v39 = vadd.f32 %v3618_v37, %v3580_v35  ;;  %v2370_v40 = vpop.f32.mrf.mxu0 }
 0x1ab   : > { %v3934_v41 = vpop.eup %3933  ;;  %v2557_v42 = vpop.f32.mrf.mxu1 }
 0x1ac   : > { %3151 = vst.msk [vmem:[%s4296_s22 + $0x310] sm:$0xff] %vm785_vm1, %v3934_v41  ;;  %3947 = vtanh.f32 %v2664_v38  ;;  %v2669_v43 = vadd.f32 %v4598_v17, %v2566_v39  ;;  %v2558_v44 = vadd.f32 %v2557_v42, %v2370_v40  ;;  %v3581_v45 = vpop.f32.mrf.mxu0 }
 0x1ad   : > { %v3936_v46 = vpop.eup %3935  ;;  %v3619_v47 = vpop.f32.mrf.mxu1 }
 0x1ae   : > { %3149 = vst.msk [vmem:[%s4296_s22 + $0x300] sm:$0xff] %vm785_vm1, %v3936_v46  ;;  %3949 = vtanh.f32 %v2669_v43  ;;  %v2667_v48 = vadd.f32 %v4598_v17, %v2558_v44  ;;  %v2569_v49 = vadd.f32 %v3619_v47, %v3581_v45  ;;  %v2373_v50 = vpop.f32.mrf.mxu0 }
 0x1af   : > { %v3938_v51 = vpop.eup %3937  ;;  %v2560_v52 = vpop.f32.mrf.mxu1 }
 0x1b0   : > { %3152 = vst.msk [vmem:[%s4296_s22 + $0x318] sm:$0xff] %vm785_vm1, %v3938_v51  ;;  %3951 = vtanh.f32 %v2667_v48  ;;  %v2670_v53 = vadd.f32 %v4598_v17, %v2569_v49  ;;  %v2561_v54 = vadd.f32 %v2560_v52, %v2373_v50  ;;  %v3584_v55 = vpop.f32.mrf.mxu0 }
 0x1b1   : > { %v3940_v56 = vpop.eup %3939  ;;  %v3622_v58 = vpop.f32.mrf.mxu1 }
 0x1b2   : > { %3150 = vst.msk [vmem:[%s4296_s22 + $0x308] sm:$0xff] %vm785_vm1, %v3940_v56  ;;  %3953 = vtanh.f32 %v2670_v53  ;;  %v2668_v59 = vadd.f32 %v4598_v17, %v2561_v54  ;;  %v2582_v60 = vadd.f32 %v3622_v58, %v3584_v55  ;;  %v2386_v61 = vpop.f32.mrf.mxu0 }
 0x1b3   : > { %v3942_v62 = vpop.eup %3941  ;;  %v2573_v63 = vpop.f32.mrf.mxu1 }
 0x1b4   : > { %3155 = vst.msk [vmem:[%s4296_s22 + $0x330] sm:$0xff] %vm785_vm1, %v3942_v62  ;;  %3955 = vtanh.f32 %v2668_v59  ;;  %v2673_v0 = vadd.f32 %v4598_v17, %v2582_v60  ;;  %v2574_v1 = vadd.f32 %v2573_v63, %v2386_v61  ;;  %v3585_v2 = vpop.f32.mrf.mxu0 }
 0x1b5   : > { %v3944_v3 = vpop.eup %3943  ;;  %v3623_v4 = vpop.f32.mrf.mxu1 }
 0x1b6   : > { %3153 = vst.msk [vmem:[%s4296_s22 + $0x320] sm:$0xff] %vm785_vm1, %v3944_v3  ;;  %3957 = vtanh.f32 %v2673_v0  ;;  %v2671_v5 = vadd.f32 %v4598_v17, %v2574_v1  ;;  %v2585_v6 = vadd.f32 %v3623_v4, %v3585_v2  ;;  %v2389_v7 = vpop.f32.mrf.mxu0 }
 0x1b7   : > { %v3946_v57 = vpop.eup %3945  ;;  %v2576_v8 = vpop.f32.mrf.mxu1 }
 0x1b8   : > { %3156 = vst.msk [vmem:[%s4296_s22 + $0x338] sm:$0xff] %vm785_vm1, %v3946_v57  ;;  %3959 = vtanh.f32 %v2671_v5  ;;  %v2674_v9 = vadd.f32 %v4598_v17, %v2585_v6  ;;  %v2577_v10 = vadd.f32 %v2576_v8, %v2389_v7  ;;  %v3588_v11 = vpop.f32.mrf.mxu0 }
 0x1b9   : > { %v3948_v12 = vpop.eup %3947  ;;  %v3626_v13 = vpop.f32.mrf.mxu1 }
 0x1ba   : > { %3154 = vst.msk [vmem:[%s4296_s22 + $0x328] sm:$0xff] %vm785_vm1, %v3948_v12  ;;  %3961 = vtanh.f32 %v2674_v9  ;;  %v2672_v14 = vadd.f32 %v4598_v17, %v2577_v10  ;;  %v2598_v15 = vadd.f32 %v3626_v13, %v3588_v11  ;;  %v2402_v16 = vpop.f32.mrf.mxu0 }
 0x1bb   : > { %v3950_v18 = vpop.eup %3949  ;;  %v2589_v19 = vpop.f32.mrf.mxu1 }
 0x1bc   : > { %3159 = vst.msk [vmem:[%s4296_s22 + $0x350] sm:$0xff] %vm785_vm1, %v3950_v18  ;;  %3963 = vtanh.f32 %v2672_v14  ;;  %v2677_v20 = vadd.f32 %v4598_v17, %v2598_v15  ;;  %v2590_v21 = vadd.f32 %v2589_v19, %v2402_v16  ;;  %v3589_v22 = vpop.f32.mrf.mxu0 }
 0x1bd   : > { %v3952_v23 = vpop.eup %3951  ;;  %v3627_v24 = vpop.f32.mrf.mxu1 }
 0x1be   : > { %3157 = vst.msk [vmem:[%s4296_s22 + $0x340] sm:$0xff] %vm785_vm1, %v3952_v23  ;;  %3965 = vtanh.f32 %v2677_v20  ;;  %v2675_v25 = vadd.f32 %v4598_v17, %v2590_v21  ;;  %v2601_v26 = vadd.f32 %v3627_v24, %v3589_v22  ;;  %v2405_v27 = vpop.f32.mrf.mxu0 }
 0x1bf   : > { %v3954_v28 = vpop.eup %3953  ;;  %v2592_v29 = vpop.f32.mrf.mxu1 }
 0x1c0   : > { %3160 = vst.msk [vmem:[%s4296_s22 + $0x358] sm:$0xff] %vm785_vm1, %v3954_v28  ;;  %3967 = vtanh.f32 %v2675_v25  ;;  %v2678_v30 = vadd.f32 %v4598_v17, %v2601_v26  ;;  %v2593_v31 = vadd.f32 %v2592_v29, %v2405_v27  ;;  %v3592_v32 = vpop.f32.mrf.mxu0 }
 0x1c1   : > { %v3956_v33 = vpop.eup %3955  ;;  %v3630_v34 = vpop.f32.mrf.mxu1 }
 0x1c2   : > { %3158 = vst.msk [vmem:[%s4296_s22 + $0x348] sm:$0xff] %vm785_vm1, %v3956_v33  ;;  %3969 = vtanh.f32 %v2678_v30  ;;  %v2676_v35 = vadd.f32 %v4598_v17, %v2593_v31  ;;  %v2614_v36 = vadd.f32 %v3630_v34, %v3592_v32  ;;  %v2418_v37 = vpop.f32.mrf.mxu0 }
 0x1c3   : > { %v3958_v38 = vpop.eup %3957  ;;  %v2605_v39 = vpop.f32.mrf.mxu1 }
 0x1c4   : > { %3163 = vst.msk [vmem:[%s4296_s22 + $0x370] sm:$0xff] %vm785_vm1, %v3958_v38  ;;  %3971 = vtanh.f32 %v2676_v35  ;;  %v2681_v40 = vadd.f32 %v4598_v17, %v2614_v36  ;;  %v2606_v41 = vadd.f32 %v2605_v39, %v2418_v37  ;;  %v3593_v42 = vpop.f32.mrf.mxu0 }
 0x1c5   : > { %v3960_v43 = vpop.eup %3959  ;;  %v3631_v44 = vpop.f32.mrf.mxu1 }
 0x1c6   : > { %3161 = vst.msk [vmem:[%s4296_s22 + $0x360] sm:$0xff] %vm785_vm1, %v3960_v43  ;;  %3973 = vtanh.f32 %v2681_v40  ;;  %v2679_v45 = vadd.f32 %v4598_v17, %v2606_v41  ;;  %v2617_v46 = vadd.f32 %v3631_v44, %v3593_v42  ;;  %v2421_v47 = vpop.f32.mrf.mxu0 }
 0x1c7   : > { %v3962_v48 = vpop.eup %3961  ;;  %v2608_v49 = vpop.f32.mrf.mxu1 }
 0x1c8   : > { %3164 = vst.msk [vmem:[%s4296_s22 + $0x378] sm:$0xff] %vm785_vm1, %v3962_v48  ;;  %3975 = vtanh.f32 %v2679_v45  ;;  %v2682_v50 = vadd.f32 %v4598_v17, %v2617_v46  ;;  %v2609_v51 = vadd.f32 %v2608_v49, %v2421_v47  ;;  %v3596_v52 = vpop.f32.mrf.mxu0 }
 0x1c9   : > { %v3964_v53 = vpop.eup %3963  ;;  %v3634_v54 = vpop.f32.mrf.mxu1 }
 0x1ca   : > { %3162 = vst.msk [vmem:[%s4296_s22 + $0x368] sm:$0xff] %vm785_vm1, %v3964_v53  ;;  %3977 = vtanh.f32 %v2682_v50  ;;  %v2680_v55 = vadd.f32 %v4598_v17, %v2609_v51  ;;  %v2630_v56 = vadd.f32 %v3634_v54, %v3596_v52  ;;  %v2434_v58 = vpop.f32.mrf.mxu0 }
 0x1cb   : > { %v3966_v59 = vpop.eup %3965  ;;  %v2621_v60 = vpop.f32.mrf.mxu1 }
 0x1cc   : > { %3167 = vst.msk [vmem:[%s4296_s22 + $0x390] sm:$0xff] %vm785_vm1, %v3966_v59  ;;  %3979 = vtanh.f32 %v2680_v55  ;;  %v2685_v61 = vadd.f32 %v4598_v17, %v2630_v56  ;;  %v2622_v62 = vadd.f32 %v2621_v60, %v2434_v58  ;;  %v3597_v63 = vpop.f32.mrf.mxu0 }
 0x1cd   : > { %v3968_v0 = vpop.eup %3967  ;;  %v3635_v1 = vpop.f32.mrf.mxu1 }
 0x1ce   : > { %3165 = vst.msk [vmem:[%s4296_s22 + $0x380] sm:$0xff] %vm785_vm1, %v3968_v0  ;;  %3981 = vtanh.f32 %v2685_v61  ;;  %v2683_v2 = vadd.f32 %v4598_v17, %v2622_v62  ;;  %v2633_v3 = vadd.f32 %v3635_v1, %v3597_v63  ;;  %v2437_v4 = vpop.f32.mrf.mxu0 }
 0x1cf   : > { %v3970_v5 = vpop.eup %3969  ;;  %v2624_v6 = vpop.f32.mrf.mxu1 }
 0x1d0   : > { %3168 = vst.msk [vmem:[%s4296_s22 + $0x398] sm:$0xff] %vm785_vm1, %v3970_v5  ;;  %3983 = vtanh.f32 %v2683_v2  ;;  %v2686_v7 = vadd.f32 %v4598_v17, %v2633_v3  ;;  %v2625_v57 = vadd.f32 %v2624_v6, %v2437_v4  ;;  %v3600_v8 = vpop.f32.mrf.mxu0 }
 0x1d1   : > { %v3972_v9 = vpop.eup %3971  ;;  %v3638_v10 = vpop.f32.mrf.mxu1 }
 0x1d2   : > { %3166 = vst.msk [vmem:[%s4296_s22 + $0x388] sm:$0xff] %vm785_vm1, %v3972_v9  ;;  %3985 = vtanh.f32 %v2686_v7  ;;  %v2684_v11 = vadd.f32 %v4598_v17, %v2625_v57  ;;  %v2646_v12 = vadd.f32 %v3638_v10, %v3600_v8  ;;  %v2450_v13 = vpop.f32.mrf.mxu0 }
 0x1d3   : > { %v3974_v14 = vpop.eup %3973  ;;  %v2637_v15 = vpop.f32.mrf.mxu1 }
 0x1d4   : > { %3171 = vst.msk [vmem:[%s4296_s22 + $0x3b0] sm:$0xff] %vm785_vm1, %v3974_v14  ;;  %3987 = vtanh.f32 %v2684_v11  ;;  %v2689_v16 = vadd.f32 %v4598_v17, %v2646_v12  ;;  %v2638_v18 = vadd.f32 %v2637_v15, %v2450_v13  ;;  %v3601_v19 = vpop.f32.mrf.mxu0 }
 0x1d5   : > { %v3976_v20 = vpop.eup %3975  ;;  %v3639_v21 = vpop.f32.mrf.mxu1 }
 0x1d6   : > { %3169 = vst.msk [vmem:[%s4296_s22 + $0x3a0] sm:$0xff] %vm785_vm1, %v3976_v20  ;;  %3989 = vtanh.f32 %v2689_v16  ;;  %v2687_v22 = vadd.f32 %v4598_v17, %v2638_v18  ;;  %v2649_v23 = vadd.f32 %v3639_v21, %v3601_v19  ;;  %v2453_v24 = vpop.f32.mrf.mxu0 }
 0x1d7   : > { %v3978_v25 = vpop.eup %3977  ;;  %v2640_v26 = vpop.f32.mrf.mxu1 }
 0x1d8   : > { %3172 = vst.msk [vmem:[%s4296_s22 + $0x3b8] sm:$0xff] %vm785_vm1, %v3978_v25  ;;  %3991 = vtanh.f32 %v2687_v22  ;;  %v2690_v27 = vadd.f32 %v4598_v17, %v2649_v23  ;;  %v2641_v28 = vadd.f32 %v2640_v26, %v2453_v24 }
 0x1d9   : > { %v3980_v29 = vpop.eup %3979 }
 0x1da   : > { %3170 = vst.msk [vmem:[%s4296_s22 + $0x3a8] sm:$0xff] %vm785_vm1, %v3980_v29  ;;  %3993 = vtanh.f32 %v2690_v27  ;;  %v2688_v30 = vadd.f32 %v4598_v17, %v2641_v28 }
 0x1db   : > { %v3982_v31 = vpop.eup %3981 }
 0x1dc   : > { %3175 = vst.msk [vmem:[%s4296_s22 + $0x3d0] sm:$0xff] %vm785_vm1, %v3982_v31  ;;  %3995 = vtanh.f32 %v2688_v30 }
 0x1dd   : > { %v3984_v32 = vpop.eup %3983 }
 0x1de   : > { %3173 = vst.msk [vmem:[%s4296_s22 + $0x3c0] sm:$0xff] %vm785_vm1, %v3984_v32 }
 0x1df   : > { %v3986_v33 = vpop.eup %3985 }
 0x1e0   : > { %3176 = vst.msk [vmem:[%s4296_s22 + $0x3d8] sm:$0xff] %vm785_vm1, %v3986_v33 }
 0x1e1   : > { %v3988_v34 = vpop.eup %3987 }
 0x1e2   : > { %3174 = vst.msk [vmem:[%s4296_s22 + $0x3c8] sm:$0xff] %vm785_vm1, %v3988_v34 }
 0x1e3   : > { %v3990_v35 = vpop.eup %3989 }
 0x1e4   : > { %3179 = vst.msk [vmem:[%s4296_s22 + $0x3f0] sm:$0xff] %vm785_vm1, %v3990_v35 }
 0x1e5   : > { %v3992_v36 = vpop.eup %3991 }
 0x1e6   : > { %3177 = vst.msk [vmem:[%s4296_s22 + $0x3e0] sm:$0xff] %vm785_vm1, %v3992_v36 }
 0x1e7   : > { %v3994_v17 = vpop.eup %3993 }
 0x1e8   : > { %3180 = vst.msk [vmem:[%s4296_s22 + $0x3f8] sm:$0xff] %vm785_vm1, %v3994_v17 }
 0x1e9   : > { %v3996_v37 = vpop.eup %3995 }
 0x1ea   : > { %3178 = vst.msk [vmem:[%s4296_s22 + $0x3e8] sm:$0xff] %vm785_vm1, %v3996_v37 }
 0x1eb PF: > { %s13_s12 = sadd.s32 1, %s4004_s12  }
 0x1ec   : > { %p10_p4 = scmp.ge.s32.totalorder %s13_s12, 4  }
 0x1ee   :  { %12 = sbr.rel (!%p10_p4) target bundleno = 1 (0x1), region = 72 }

</bundles_post_ra>
